<compile_context>
chip_gen: v5e
topology: v5e:2x2
jax: 0.10.0
libtpu: 0.0.40
codegen_flags: <defaults>
</compile_context>

<pallas_src>
import functools
import math

import jax
import jax.numpy as jnp
from jax.experimental import pallas as pl
from jax.experimental.pallas import tpu as pltpu


def _round_up(x, m):
    return (x + m - 1) // m * m


# ---------------------------------------------------------------------------
# in-kernel helpers
# ---------------------------------------------------------------------------

def _interior_mask(n_rows, h, w, wp):
    """(n_rows, 1) f32 mask: 1.0 at real-pixel rows of the per-image padded
    flat frame, 0.0 on the zero-pad ring and the row-alignment tail.

    Built in-kernel from an iota on the flat row index (replaces the old HBM
    mask input).  Row/col indices are recovered with a reciprocal multiply +
    floor instead of a vector integer divide: exact, because true quotients
    are >= 0.5/wp away from the floor boundary while the f32 product error is
    ~1e-6.
    """
    r = jax.lax.broadcasted_iota(jnp.int32, (n_rows, 1), 0).astype(jnp.float32)
    i = jnp.floor((r + 0.5) * (1.0 / wp))
    j = r - i * wp
    m = (i >= 1.0) & (i <= float(h)) & (j >= 1.0) & (j <= float(w))
    return m.astype(jnp.float32)


def _conv3x3_acc(act_bf16, w_ref, offsets):
    """3x3 'same' conv as 9 accumulating (N,Cp)x(Cp,Cp) bf16 MXU matmuls.

    Taps are uniform row-rolls of the flat frame; roll wrap-around only ever
    lands on pad-ring rows (masked downstream), never on interior rows.  No
    (N, 9*Cp) patch slab is materialized.
    """
    # TODO(synk): if the bundle dump shows the vector-extended slot saturating,
    # switch the 8 odd-shift bf16 rolls to static shifted loads of an
    # over-padded slab (moves the cost from the XLU to the load slots).
    acc = None
    for t, off in enumerate(offsets):
        tap = act_bf16 if off == 0 else jnp.roll(act_bf16, -off, axis=0)
        part = jnp.dot(tap, w_ref[t], preferred_element_type=jnp.float32)
        acc = part if acc is None else acc + part
    return acc


def _masked_partial_stats(acc_f32, mask):
    """(8, Cp) slab: row 0 = sum(x), row 1 = sum(x^2) over valid rows."""
    sm = acc_f32 * mask
    s1 = jnp.sum(sm, axis=0, keepdims=True)
    s2 = jnp.sum(sm * acc_f32, axis=0, keepdims=True)
    pad = jnp.zeros((6, acc_f32.shape[1]), jnp.float32)
    return jnp.concatenate([s1, s2, pad], axis=0)


# ---------------------------------------------------------------------------
# pass 1: conv1 + partial BN1 stats
# ---------------------------------------------------------------------------

def _conv1_stats_kernel(x_ref, w_ref, h1_ref, st_ref, *, offsets, h, w, wp):
    x = x_ref[0]                                       # (Np, Cp) bf16
    acc = _conv3x3_acc(x, w_ref, offsets)              # (Np, Cp) f32
    m = _interior_mask(x.shape[0], h, w, wp)
    h1_ref[0] = acc.astype(h1_ref.dtype)               # raw conv1 output
    st_ref[0] = _masked_partial_stats(acc, m)


# ---------------------------------------------------------------------------
# pass 2: BN1 affine + PReLU1 + re-mask + conv2 + partial BN2 stats
# ---------------------------------------------------------------------------

def _conv2_stats_kernel(h1_ref, w_ref, sc_ref, sh_ref, a_ref, h2_ref, st_ref,
                        *, offsets, h, w, wp):
    h1 = h1_ref[0].astype(jnp.float32)
    m = _interior_mask(h1.shape[0], h, w, wp)
    t = h1 * sc_ref[...] + sh_ref[...]                 # folded BN1 affine
    t = jnp.where(t > 0, t, a_ref[...] * t)            # PReLU1
    t = (t * m).astype(jnp.bfloat16)                   # re-zero the pad ring
    acc = _conv3x3_acc(t, w_ref, offsets)
    h2_ref[0] = acc.astype(h2_ref.dtype)               # raw conv2 output
    st_ref[0] = _masked_partial_stats(acc, m)


# ---------------------------------------------------------------------------
# pass 3: BN2 affine + residual + PReLU2
# ---------------------------------------------------------------------------

def _bn2_residual_kernel(h2_ref, x_ref, sc_ref, sh_ref, a_ref, out_ref):
    y = (h2_ref[0].astype(jnp.float32) * sc_ref[...] + sh_ref[...]
         + x_ref[0].astype(jnp.float32))
    out_ref[0] = jnp.where(y > 0, y, a_ref[...] * y)


# ---------------------------------------------------------------------------
# wrapper
# ---------------------------------------------------------------------------

def _vmem_limit_bytes():
    phys = 128 << 20
    try:
        phys = int(getattr(pltpu.get_tpu_info(), "vmem_capacity_bytes", phys))
    except Exception:
        pass
    # generation-aware cap with headroom: ~48 MiB on v7x (64 MiB physical),
    # 64 MiB on v5e/v6e (128 MiB physical).
    return int(min(64 << 20, (phys * 3) // 4))


def _bn_affine(st, gamma, beta, n_valid, c, cp, eps=1e-5):
    """Merge per-image partial sums; fold BN into per-channel (scale, shift)."""
    # TODO(synk): switch to Welford/Chan merging of per-tile centered stats if
    # one-pass E[x^2]-E[x]^2 cancellation ever matters at scale.
    s1 = jnp.sum(st[:, 0, :], axis=0)
    s2 = jnp.sum(st[:, 1, :], axis=0)
    mean = s1 / n_valid
    var = jnp.maximum(s2 / n_valid - mean * mean, 0.0)
    g = jnp.pad(gamma.astype(jnp.float32).reshape(c), (0, cp - c))
    b = jnp.pad(beta.astype(jnp.float32).reshape(c), (0, cp - c))
    scale = g * jax.lax.rsqrt(var + eps)
    shift = b - mean * scale
    return scale.reshape(1, cp), shift.reshape(1, cp)


def basic_block_face(x_nchw, params):
    """Pallas implementation of BasicBlockFace.forward (training-mode BN)."""
    w1, g1, b1, a1, w2, g2, b2, a2 = params
    B, C, H, W = x_nchw.shape
    Hp, Wp = H + 2, W + 2
    Cp = _round_up(C, 128)              # lane-dense channel width
    # TODO(synk): for C >= 128 on v6e/v7x round Cp to a multiple of 256, and
    # for tiny C fold the 9 taps x C channels into a single 128-lane K group.
    Npp = Hp * Wp
    Npp_pad = _round_up(Npp, 16)        # bf16 sublane alignment
    n_valid = B * H * W

    # NCHW -> NHWC, zero-pad spatial ring + channels, flatten rows per image.
    # TODO(synk): when chaining blocks in a trunk, keep activations in this
    # padded flat bf16 frame between blocks instead of repeating the
    # transpose/pad/slice round trip per block.
    x = jnp.transpose(x_nchw, (0, 2, 3, 1)).astype(jnp.float32)
    xp = jnp.pad(x, ((0, 0), (1, 1), (1, 1), (0, Cp - C)))
    x_flat = jnp.pad(xp.reshape(B, Npp, Cp),
                     ((0, 0), (0, Npp_pad - Npp), (0, 0))).astype(jnp.bfloat16)

    def pack_w(wt):
        # torch (Cout, Cin, 3, 3) -> (9, Cp, Cp) bf16, [t]=(Cin,Cout), t=kh*3+kw
        wk = jnp.transpose(wt, (2, 3, 1, 0)).astype(jnp.float32).reshape(9, C, C)
        wk = jnp.pad(wk, ((0, 0), (0, Cp - C), (0, Cp - C)))
        return wk.astype(jnp.bfloat16)

    def prelu_vec(a):
        a0 = a.astype(jnp.float32).reshape(-1)[0]
        return jnp.ones((1, Cp), jnp.float32) * a0

    # flat-frame row offset of tap (kh, kw) relative to the output position
    offsets = tuple((kh - 1) * Wp + (kw - 1)
                    for kh in range(3) for kw in range(3))

    act_spec = pl.BlockSpec((1, Npp_pad, Cp), lambda b: (b, 0, 0))
    w_spec = pl.BlockSpec((9, Cp, Cp), lambda b: (0, 0, 0))
    vec_spec = pl.BlockSpec((1, Cp), lambda b: (0, 0))
    st_spec = pl.BlockSpec((1, 8, Cp), lambda b: (b, 0, 0))

    cparams = pltpu.CompilerParams(
        dimension_semantics=("parallel",),       # shard batch across TCs (v7x)
        vmem_limit_bytes=_vmem_limit_bytes())

    # ---- pass 1: conv1 + partial BN1 stats --------------------------------
    h1, st1 = pl.pallas_call(
        functools.partial(_conv1_stats_kernel, offsets=offsets, h=H, w=W, wp=Wp),
        grid=(B,),
        in_specs=[act_spec, w_spec],
        out_specs=(act_spec, st_spec),
        out_shape=(jax.ShapeDtypeStruct((B, Npp_pad, Cp), jnp.bfloat16),
                   jax.ShapeDtypeStruct((B, 8, Cp), jnp.float32)),
        compiler_params=cparams,
    )(x_flat, pack_w(w1))
    scale1, shift1 = _bn_affine(st1, g1, b1, n_valid, C, Cp)

    # ---- pass 2: BN1 affine + PReLU1 + conv2 + partial BN2 stats ----------
    h2, st2 = pl.pallas_call(
        functools.partial(_conv2_stats_kernel, offsets=offsets, h=H, w=W, wp=Wp),
        grid=(B,),
        in_specs=[act_spec, w_spec, vec_spec, vec_spec, vec_spec],
        out_specs=(act_spec, st_spec),
        out_shape=(jax.ShapeDtypeStruct((B, Npp_pad, Cp), jnp.bfloat16),
                   jax.ShapeDtypeStruct((B, 8, Cp), jnp.float32)),
        compiler_params=cparams,
    )(h1, pack_w(w2), scale1, shift1, prelu_vec(a1))
    scale2, shift2 = _bn_affine(st2, g2, b2, n_valid, C, Cp)

    # ---- pass 3: BN2 affine + residual + PReLU2 ---------------------------
    out_flat = pl.pallas_call(
        _bn2_residual_kernel,
        grid=(B,),
        in_specs=[act_spec, act_spec, vec_spec, vec_spec, vec_spec],
        out_specs=act_spec,
        out_shape=jax.ShapeDtypeStruct((B, Npp_pad, Cp), jnp.float32),
        compiler_params=cparams,
    )(h2, x_flat, scale2, shift2, prelu_vec(a2))

    out = out_flat[:, :Npp, :].reshape(B, Hp, Wp, Cp)[:, 1:H + 1, 1:W + 1, :C]
    return jnp.transpose(out, (0, 3, 1, 2))            # back to NCHW


# ---------------------------------------------------------------------------
# pure-JAX reference (mirrors the PyTorch forward) + synthetic params
# ---------------------------------------------------------------------------

def basic_block_face_ref(x_nchw, params):
    w1, g1, b1, a1, w2, g2, b2, a2 = params
    x = jnp.transpose(x_nchw, (0, 2, 3, 1)).astype(jnp.float32)

    def conv(h, w):
        return jax.lax.conv_general_dilated(
            h, jnp.transpose(w, (2, 3, 1, 0)).astype(jnp.float32),
            window_strides=(1, 1), padding=((1, 1), (1, 1)),
            dimension_numbers=('NHWC', 'HWIO', 'NHWC'),
            precision=jax.lax.Precision.HIGHEST)

    def bn(h, g, b):
        m = jnp.mean(h, axis=(0, 1, 2), keepdims=True)
        v = jnp.mean((h - m) ** 2, axis=(0, 1, 2), keepdims=True)
        return (h - m) * jax.lax.rsqrt(v + 1e-5) * g + b

    def prelu(h, a):
        return jnp.where(h > 0, h, a * h)

    h = prelu(bn(conv(x, w1), g1, b1), a1)
    h = bn(conv(h, w2), g2, b2)
    h = prelu(h + x, a2)
    return jnp.transpose(h, (0, 3, 1, 2))


def init_params(key, planes):
    ks = jax.random.split(key, 6)
    std = 1.0 / math.sqrt(planes * 9)
    w1 = jax.random.normal(ks[0], (planes, planes, 3, 3), jnp.float32) * std
    w2 = jax.random.normal(ks[1], (planes, planes, 3, 3), jnp.float32) * std
    g1 = 1.0 + 0.1 * jax.random.normal(ks[2], (planes,), jnp.float32)
    b1 = 0.1 * jax.random.normal(ks[3], (planes,), jnp.float32)
    g2 = 1.0 + 0.1 * jax.random.normal(ks[4], (planes,), jnp.float32)
    b2 = 0.1 * jax.random.normal(ks[5], (planes,), jnp.float32)
    a1 = jnp.array(0.25, jnp.float32)   # nn.PReLU() default
    a2 = jnp.array(0.25, jnp.float32)
    return (w1, g1, b1, a1, w2, g2, b2, a2)


if __name__ == "__main__":
    key = jax.random.PRNGKey(0)
    kx, kp = jax.random.split(key)

    B, C, H, W = 2, 4, 16, 16            # inplanes == planes (residual add)
    x = jax.random.normal(kx, (B, C, H, W), jnp.float32)
    params = init_params(kp, C)

    out = jax.block_until_ready(jax.jit(basic_block_face)(x, params))

    ref = basic_block_face_ref(x, params)
    assert out.shape == (B, C, H, W)
    # bf16 activation I/O + bf16 MXU matmuls + bf16 intermediates -> compare
    # at a loose (but still bug-catching) tolerance.
    max_err = float(jnp.max(jnp.abs(out - ref)))
    assert jnp.allclose(out, ref, atol=5e-2, rtol=5e-2), max_err

    print("KERNEL_OK")
</pallas_src>

<mosaic_0001>
module attributes {stable_mosaic.version = 11 : i64} {
  func.func @_conv1_stats_kernel(%arg0: i32, %arg1: memref<1x336x128xbf16, #tpu.memory_space<vmem>>, %arg2: memref<9x128x128xbf16, #tpu.memory_space<vmem>>, %arg3: memref<1x336x128xbf16, #tpu.memory_space<vmem>>, %arg4: memref<1x8x128xf32, #tpu.memory_space<vmem>>) attributes {dimension_semantics = [#tpu.dimension_semantics<parallel>], iteration_bounds = array<i64: 2>, scalar_prefetch = 0 : i64, scratch_operands = 0 : i64, tpu.core_type = #tpu.core_type<tc>, window_params = [{transform_indices = @transform_0, window_bounds = array<i64: 1, 336, 128>}, {pipeline_mode = #tpu.pipeline_mode<synchronous>, transform_indices = @transform_1, window_bounds = array<i64: 9, 128, 128>}, {transform_indices = @transform_2, window_bounds = array<i64: 1, 336, 128>}, {transform_indices = @transform_3, window_bounds = array<i64: 1, 8, 128>}]} {
    %c0 = arith.constant 0 : index
    %c0_0 = arith.constant 0 : index
    %c0_1 = arith.constant 0 : index
    %0 = vector.load %arg1[%c0, %c0_0, %c0_1] : memref<1x336x128xbf16, #tpu.memory_space<vmem>>, vector<1x336x128xbf16>
    %1 = vector.shape_cast %0 : vector<1x336x128xbf16> to vector<336x128xbf16>
    %2 = vector.extract_strided_slice %1 {offsets = [317, 0], sizes = [19, 128], strides = [1, 1]} : vector<336x128xbf16> to vector<19x128xbf16>
    %3 = vector.extract_strided_slice %1 {offsets = [0, 0], sizes = [317, 128], strides = [1, 1]} : vector<336x128xbf16> to vector<317x128xbf16>
    %4 = tpu.concatenate %2, %3 in 0 : vector<19x128xbf16>, vector<317x128xbf16> -> vector<336x128xbf16>
    %c0_2 = arith.constant 0 : index
    %c0_3 = arith.constant 0 : index
    %c0_4 = arith.constant 0 : index
    %5 = vector.load %arg2[%c0_2, %c0_3, %c0_4] : memref<9x128x128xbf16, #tpu.memory_space<vmem>>, vector<1x128x128xbf16>
    %6 = vector.shape_cast %5 : vector<1x128x128xbf16> to vector<128x128xbf16>
    %cst = arith.constant dense<0.000000e+00> : vector<336x128xf32>
    %7 = tpu.matmul %4, %6, %cst {dimension_numbers = #tpu.dot_dimension_numbers<[1], [0], [0], [1], [0, 0, 1, 1], [], []>} : vector<336x128xbf16>, vector<128x128xbf16>, vector<336x128xf32> -> vector<336x128xf32>
    %8 = vector.extract_strided_slice %1 {offsets = [318, 0], sizes = [18, 128], strides = [1, 1]} : vector<336x128xbf16> to vector<18x128xbf16>
    %9 = vector.extract_strided_slice %1 {offsets = [0, 0], sizes = [318, 128], strides = [1, 1]} : vector<336x128xbf16> to vector<318x128xbf16>
    %10 = tpu.concatenate %8, %9 in 0 : vector<18x128xbf16>, vector<318x128xbf16> -> vector<336x128xbf16>
    %c1 = arith.constant 1 : index
    %c0_5 = arith.constant 0 : index
    %c0_6 = arith.constant 0 : index
    %11 = vector.load %arg2[%c1, %c0_5, %c0_6] : memref<9x128x128xbf16, #tpu.memory_space<vmem>>, vector<1x128x128xbf16>
    %12 = vector.shape_cast %11 : vector<1x128x128xbf16> to vector<128x128xbf16>
    %cst_7 = arith.constant dense<0.000000e+00> : vector<336x128xf32>
    %13 = tpu.matmul %10, %12, %cst_7 {dimension_numbers = #tpu.dot_dimension_numbers<[1], [0], [0], [1], [0, 0, 1, 1], [], []>} : vector<336x128xbf16>, vector<128x128xbf16>, vector<336x128xf32> -> vector<336x128xf32>
    %14 = arith.addf %7, %13 : vector<336x128xf32>
    %15 = vector.extract_strided_slice %1 {offsets = [319, 0], sizes = [17, 128], strides = [1, 1]} : vector<336x128xbf16> to vector<17x128xbf16>
    %16 = vector.extract_strided_slice %1 {offsets = [0, 0], sizes = [319, 128], strides = [1, 1]} : vector<336x128xbf16> to vector<319x128xbf16>
    %17 = tpu.concatenate %15, %16 in 0 : vector<17x128xbf16>, vector<319x128xbf16> -> vector<336x128xbf16>
    %c2 = arith.constant 2 : index
    %c0_8 = arith.constant 0 : index
    %c0_9 = arith.constant 0 : index
    %18 = vector.load %arg2[%c2, %c0_8, %c0_9] : memref<9x128x128xbf16, #tpu.memory_space<vmem>>, vector<1x128x128xbf16>
    %19 = vector.shape_cast %18 : vector<1x128x128xbf16> to vector<128x128xbf16>
    %cst_10 = arith.constant dense<0.000000e+00> : vector<336x128xf32>
    %20 = tpu.matmul %17, %19, %cst_10 {dimension_numbers = #tpu.dot_dimension_numbers<[1], [0], [0], [1], [0, 0, 1, 1], [], []>} : vector<336x128xbf16>, vector<128x128xbf16>, vector<336x128xf32> -> vector<336x128xf32>
    %21 = arith.addf %14, %20 : vector<336x128xf32>
    %22 = vector.extract_strided_slice %1 {offsets = [335, 0], sizes = [1, 128], strides = [1, 1]} : vector<336x128xbf16> to vector<1x128xbf16>
    %23 = vector.extract_strided_slice %1 {offsets = [0, 0], sizes = [335, 128], strides = [1, 1]} : vector<336x128xbf16> to vector<335x128xbf16>
    %24 = tpu.concatenate %22, %23 in 0 : vector<1x128xbf16>, vector<335x128xbf16> -> vector<336x128xbf16>
    %c3 = arith.constant 3 : index
    %c0_11 = arith.constant 0 : index
    %c0_12 = arith.constant 0 : index
    %25 = vector.load %arg2[%c3, %c0_11, %c0_12] : memref<9x128x128xbf16, #tpu.memory_space<vmem>>, vector<1x128x128xbf16>
    %26 = vector.shape_cast %25 : vector<1x128x128xbf16> to vector<128x128xbf16>
    %cst_13 = arith.constant dense<0.000000e+00> : vector<336x128xf32>
    %27 = tpu.matmul %24, %26, %cst_13 {dimension_numbers = #tpu.dot_dimension_numbers<[1], [0], [0], [1], [0, 0, 1, 1], [], []>} : vector<336x128xbf16>, vector<128x128xbf16>, vector<336x128xf32> -> vector<336x128xf32>
    %28 = arith.addf %21, %27 : vector<336x128xf32>
    %c4 = arith.constant 4 : index
    %c0_14 = arith.constant 0 : index
    %c0_15 = arith.constant 0 : index
    %29 = vector.load %arg2[%c4, %c0_14, %c0_15] : memref<9x128x128xbf16, #tpu.memory_space<vmem>>, vector<1x128x128xbf16>
    %30 = vector.shape_cast %29 : vector<1x128x128xbf16> to vector<128x128xbf16>
    %cst_16 = arith.constant dense<0.000000e+00> : vector<336x128xf32>
    %31 = tpu.matmul %1, %30, %cst_16 {dimension_numbers = #tpu.dot_dimension_numbers<[1], [0], [0], [1], [0, 0, 1, 1], [], []>} : vector<336x128xbf16>, vector<128x128xbf16>, vector<336x128xf32> -> vector<336x128xf32>
    %32 = arith.addf %28, %31 : vector<336x128xf32>
    %33 = vector.extract_strided_slice %1 {offsets = [1, 0], sizes = [335, 128], strides = [1, 1]} : vector<336x128xbf16> to vector<335x128xbf16>
    %34 = vector.extract_strided_slice %1 {offsets = [0, 0], sizes = [1, 128], strides = [1, 1]} : vector<336x128xbf16> to vector<1x128xbf16>
    %35 = tpu.concatenate %33, %34 in 0 : vector<335x128xbf16>, vector<1x128xbf16> -> vector<336x128xbf16>
    %c5 = arith.constant 5 : index
    %c0_17 = arith.constant 0 : index
    %c0_18 = arith.constant 0 : index
    %36 = vector.load %arg2[%c5, %c0_17, %c0_18] : memref<9x128x128xbf16, #tpu.memory_space<vmem>>, vector<1x128x128xbf16>
    %37 = vector.shape_cast %36 : vector<1x128x128xbf16> to vector<128x128xbf16>
    %cst_19 = arith.constant dense<0.000000e+00> : vector<336x128xf32>
    %38 = tpu.matmul %35, %37, %cst_19 {dimension_numbers = #tpu.dot_dimension_numbers<[1], [0], [0], [1], [0, 0, 1, 1], [], []>} : vector<336x128xbf16>, vector<128x128xbf16>, vector<336x128xf32> -> vector<336x128xf32>
    %39 = arith.addf %32, %38 : vector<336x128xf32>
    %40 = vector.extract_strided_slice %1 {offsets = [17, 0], sizes = [319, 128], strides = [1, 1]} : vector<336x128xbf16> to vector<319x128xbf16>
    %41 = vector.extract_strided_slice %1 {offsets = [0, 0], sizes = [17, 128], strides = [1, 1]} : vector<336x128xbf16> to vector<17x128xbf16>
    %42 = tpu.concatenate %40, %41 in 0 : vector<319x128xbf16>, vector<17x128xbf16> -> vector<336x128xbf16>
    %c6 = arith.constant 6 : index
    %c0_20 = arith.constant 0 : index
    %c0_21 = arith.constant 0 : index
    %43 = vector.load %arg2[%c6, %c0_20, %c0_21] : memref<9x128x128xbf16, #tpu.memory_space<vmem>>, vector<1x128x128xbf16>
    %44 = vector.shape_cast %43 : vector<1x128x128xbf16> to vector<128x128xbf16>
    %cst_22 = arith.constant dense<0.000000e+00> : vector<336x128xf32>
    %45 = tpu.matmul %42, %44, %cst_22 {dimension_numbers = #tpu.dot_dimension_numbers<[1], [0], [0], [1], [0, 0, 1, 1], [], []>} : vector<336x128xbf16>, vector<128x128xbf16>, vector<336x128xf32> -> vector<336x128xf32>
    %46 = arith.addf %39, %45 : vector<336x128xf32>
    %47 = vector.extract_strided_slice %1 {offsets = [18, 0], sizes = [318, 128], strides = [1, 1]} : vector<336x128xbf16> to vector<318x128xbf16>
    %48 = vector.extract_strided_slice %1 {offsets = [0, 0], sizes = [18, 128], strides = [1, 1]} : vector<336x128xbf16> to vector<18x128xbf16>
    %49 = tpu.concatenate %47, %48 in 0 : vector<318x128xbf16>, vector<18x128xbf16> -> vector<336x128xbf16>
    %c7 = arith.constant 7 : index
    %c0_23 = arith.constant 0 : index
    %c0_24 = arith.constant 0 : index
    %50 = vector.load %arg2[%c7, %c0_23, %c0_24] : memref<9x128x128xbf16, #tpu.memory_space<vmem>>, vector<1x128x128xbf16>
    %51 = vector.shape_cast %50 : vector<1x128x128xbf16> to vector<128x128xbf16>
    %cst_25 = arith.constant dense<0.000000e+00> : vector<336x128xf32>
    %52 = tpu.matmul %49, %51, %cst_25 {dimension_numbers = #tpu.dot_dimension_numbers<[1], [0], [0], [1], [0, 0, 1, 1], [], []>} : vector<336x128xbf16>, vector<128x128xbf16>, vector<336x128xf32> -> vector<336x128xf32>
    %53 = arith.addf %46, %52 : vector<336x128xf32>
    %54 = vector.extract_strided_slice %1 {offsets = [19, 0], sizes = [317, 128], strides = [1, 1]} : vector<336x128xbf16> to vector<317x128xbf16>
    %55 = vector.extract_strided_slice %1 {offsets = [0, 0], sizes = [19, 128], strides = [1, 1]} : vector<336x128xbf16> to vector<19x128xbf16>
    %56 = tpu.concatenate %54, %55 in 0 : vector<317x128xbf16>, vector<19x128xbf16> -> vector<336x128xbf16>
    %c8 = arith.constant 8 : index
    %c0_26 = arith.constant 0 : index
    %c0_27 = arith.constant 0 : index
    %57 = vector.load %arg2[%c8, %c0_26, %c0_27] : memref<9x128x128xbf16, #tpu.memory_space<vmem>>, vector<1x128x128xbf16>
    %58 = vector.shape_cast %57 : vector<1x128x128xbf16> to vector<128x128xbf16>
    %cst_28 = arith.constant dense<0.000000e+00> : vector<336x128xf32>
    %59 = tpu.matmul %56, %58, %cst_28 {dimension_numbers = #tpu.dot_dimension_numbers<[1], [0], [0], [1], [0, 0, 1, 1], [], []>} : vector<336x128xbf16>, vector<128x128xbf16>, vector<336x128xf32> -> vector<336x128xf32>
    %60 = arith.addf %53, %59 : vector<336x128xf32>
    %61 = tpu.iota {dimensions = array<i32: 0>} : vector<336x1xi32>
    %62 = arith.sitofp %61 : vector<336x1xi32> to vector<336x1xf32>
    %cst_29 = arith.constant 5.000000e-01 : f32
    %63 = vector.broadcast %cst_29 : f32 to vector<336x1xf32>
    %64 = arith.addf %62, %63 : vector<336x1xf32>
    %cst_30 = arith.constant 0.055555556 : f32
    %65 = vector.broadcast %cst_30 : f32 to vector<336x1xf32>
    %66 = arith.mulf %64, %65 : vector<336x1xf32>
    %67 = math.floor %66 : vector<336x1xf32>
    %cst_31 = arith.constant 1.800000e+01 : f32
    %68 = vector.broadcast %cst_31 : f32 to vector<336x1xf32>
    %69 = arith.mulf %67, %68 : vector<336x1xf32>
    %70 = arith.subf %62, %69 : vector<336x1xf32>
    %cst_32 = arith.constant 1.000000e+00 : f32
    %71 = vector.broadcast %cst_32 : f32 to vector<336x1xf32>
    %72 = arith.cmpf oge, %67, %71 : vector<336x1xf32>
    %cst_33 = arith.constant 1.600000e+01 : f32
    %73 = vector.broadcast %cst_33 : f32 to vector<336x1xf32>
    %74 = arith.cmpf ole, %67, %73 : vector<336x1xf32>
    %75 = arith.andi %72, %74 : vector<336x1xi1>
    %cst_34 = arith.constant 1.000000e+00 : f32
    %76 = vector.broadcast %cst_34 : f32 to vector<336x1xf32>
    %77 = arith.cmpf oge, %70, %76 : vector<336x1xf32>
    %78 = arith.andi %75, %77 : vector<336x1xi1>
    %cst_35 = arith.constant 1.600000e+01 : f32
    %79 = vector.broadcast %cst_35 : f32 to vector<336x1xf32>
    %80 = arith.cmpf ole, %70, %79 : vector<336x1xf32>
    %81 = arith.andi %78, %80 : vector<336x1xi1>
    %82 = arith.extui %81 : vector<336x1xi1> to vector<336x1xi32>
    %83 = arith.sitofp %82 : vector<336x1xi32> to vector<336x1xf32>
    %84 = arith.truncf %60 : vector<336x128xf32> to vector<336x128xbf16>
    %c0_36 = arith.constant 0 : index
    %c0_37 = arith.constant 0 : index
    %c0_38 = arith.constant 0 : index
    %85 = vector.load %arg3[%c0_36, %c0_37, %c0_38] : memref<1x336x128xbf16, #tpu.memory_space<vmem>>, vector<1x336x128xbf16>
    %86 = vector.shape_cast %85 : vector<1x336x128xbf16> to vector<336x128xbf16>
    %87 = vector.shape_cast %84 : vector<336x128xbf16> to vector<1x336x128xbf16>
    tpu.vector_store %arg3[%c0_36, %c0_37, %c0_38], %87 {strides = array<i32>} : memref<1x336x128xbf16, #tpu.memory_space<vmem>>, vector<1x336x128xbf16>,
    %88 = vector.broadcast %83 : vector<336x1xf32> to vector<336x128xf32>
    %89 = arith.mulf %60, %88 : vector<336x128xf32>
    %cst_39 = arith.constant dense<0.000000e+00> : vector<128xf32>
    %90 = vector.multi_reduction <add>, %89, %cst_39 [0] : vector<336x128xf32> to vector<128xf32>
    %91 = vector.shape_cast %90 : vector<128xf32> to vector<1x128xf32>
    %92 = arith.mulf %89, %60 : vector<336x128xf32>
    %cst_40 = arith.constant dense<0.000000e+00> : vector<128xf32>
    %93 = vector.multi_reduction <add>, %92, %cst_40 [0] : vector<336x128xf32> to vector<128xf32>
    %94 = vector.shape_cast %93 : vector<128xf32> to vector<1x128xf32>
    %cst_41 = arith.constant 0.000000e+00 : f32
    %95 = vector.broadcast %cst_41 : f32 to vector<6x128xf32>
    %96 = tpu.concatenate %91, %94, %95 in 0 : vector<1x128xf32>, vector<1x128xf32>, vector<6x128xf32> -> vector<8x128xf32>
    %c0_42 = arith.constant 0 : index
    %c0_43 = arith.constant 0 : index
    %c0_44 = arith.constant 0 : index
    %97 = vector.load %arg4[%c0_42, %c0_43, %c0_44] : memref<1x8x128xf32, #tpu.memory_space<vmem>>, vector<1x8x128xf32>
    %98 = vector.shape_cast %97 : vector<1x8x128xf32> to vector<8x128xf32>
    %99 = vector.shape_cast %96 : vector<8x128xf32> to vector<1x8x128xf32>
    tpu.vector_store %arg4[%c0_42, %c0_43, %c0_44], %99 {strides = array<i32>} : memref<1x8x128xf32, #tpu.memory_space<vmem>>, vector<1x8x128xf32>,
    return
  }
  func.func @transform_0(%arg0: i32) -> (i32, i32, i32) {
    %c0_i32 = arith.constant 0 : i32
    %c0_i32_0 = arith.constant 0 : i32
    %c0_i32_1 = arith.constant 0 : i32
    return %arg0, %c0_i32, %c0_i32_0 : i32, i32, i32
  }
  func.func @transform_1(%arg0: i32) -> (i32, i32, i32) {
    %c0_i32 = arith.constant 0 : i32
    %c0_i32_0 = arith.constant 0 : i32
    %c0_i32_1 = arith.constant 0 : i32
    %c0_i32_2 = arith.constant 0 : i32
    return %c0_i32, %c0_i32_0, %c0_i32_1 : i32, i32, i32
  }
  func.func @transform_2(%arg0: i32) -> (i32, i32, i32) {
    %c0_i32 = arith.constant 0 : i32
    %c0_i32_0 = arith.constant 0 : i32
    %c0_i32_1 = arith.constant 0 : i32
    return %arg0, %c0_i32, %c0_i32_0 : i32, i32, i32
  }
  func.func @transform_3(%arg0: i32) -> (i32, i32, i32) {
    %c0_i32 = arith.constant 0 : i32
    %c0_i32_0 = arith.constant 0 : i32
    %c0_i32_1 = arith.constant 0 : i32
    return %arg0, %c0_i32, %c0_i32_0 : i32, i32, i32
  }
}

module attributes {stable_mosaic.version = 11 : i64} {
  func.func @_conv2_stats_kernel(%arg0: i32, %arg1: memref<1x336x128xbf16, #tpu.memory_space<vmem>>, %arg2: memref<9x128x128xbf16, #tpu.memory_space<vmem>>, %arg3: memref<1x128xf32, #tpu.memory_space<vmem>>, %arg4: memref<1x128xf32, #tpu.memory_space<vmem>>, %arg5: memref<1x128xf32, #tpu.memory_space<vmem>>, %arg6: memref<1x336x128xbf16, #tpu.memory_space<vmem>>, %arg7: memref<1x8x128xf32, #tpu.memory_space<vmem>>) attributes {dimension_semantics = [#tpu.dimension_semantics<parallel>], iteration_bounds = array<i64: 2>, scalar_prefetch = 0 : i64, scratch_operands = 0 : i64, tpu.core_type = #tpu.core_type<tc>, window_params = [{transform_indices = @transform_0, window_bounds = array<i64: 1, 336, 128>}, {pipeline_mode = #tpu.pipeline_mode<synchronous>, transform_indices = @transform_1, window_bounds = array<i64: 9, 128, 128>}, {pipeline_mode = #tpu.pipeline_mode<synchronous>, transform_indices = @transform_2, window_bounds = array<i64: 1, 128>}, {pipeline_mode = #tpu.pipeline_mode<synchronous>, transform_indices = @transform_3, window_bounds = array<i64: 1, 128>}, {pipeline_mode = #tpu.pipeline_mode<synchronous>, transform_indices = @transform_4, window_bounds = array<i64: 1, 128>}, {transform_indices = @transform_5, window_bounds = array<i64: 1, 336, 128>}, {transform_indices = @transform_6, window_bounds = array<i64: 1, 8, 128>}]} {
    %c0 = arith.constant 0 : index
    %c0_0 = arith.constant 0 : index
    %c0_1 = arith.constant 0 : index
    %0 = vector.load %arg1[%c0, %c0_0, %c0_1] : memref<1x336x128xbf16, #tpu.memory_space<vmem>>, vector<1x336x128xbf16>
    %1 = vector.shape_cast %0 : vector<1x336x128xbf16> to vector<336x128xbf16>
    %2 = arith.extf %1 : vector<336x128xbf16> to vector<336x128xf32>
    %3 = tpu.iota {dimensions = array<i32: 0>} : vector<336x1xi32>
    %4 = arith.sitofp %3 : vector<336x1xi32> to vector<336x1xf32>
    %cst = arith.constant 5.000000e-01 : f32
    %5 = vector.broadcast %cst : f32 to vector<336x1xf32>
    %6 = arith.addf %4, %5 : vector<336x1xf32>
    %cst_2 = arith.constant 0.055555556 : f32
    %7 = vector.broadcast %cst_2 : f32 to vector<336x1xf32>
    %8 = arith.mulf %6, %7 : vector<336x1xf32>
    %9 = math.floor %8 : vector<336x1xf32>
    %cst_3 = arith.constant 1.800000e+01 : f32
    %10 = vector.broadcast %cst_3 : f32 to vector<336x1xf32>
    %11 = arith.mulf %9, %10 : vector<336x1xf32>
    %12 = arith.subf %4, %11 : vector<336x1xf32>
    %cst_4 = arith.constant 1.000000e+00 : f32
    %13 = vector.broadcast %cst_4 : f32 to vector<336x1xf32>
    %14 = arith.cmpf oge, %9, %13 : vector<336x1xf32>
    %cst_5 = arith.constant 1.600000e+01 : f32
    %15 = vector.broadcast %cst_5 : f32 to vector<336x1xf32>
    %16 = arith.cmpf ole, %9, %15 : vector<336x1xf32>
    %17 = arith.andi %14, %16 : vector<336x1xi1>
    %cst_6 = arith.constant 1.000000e+00 : f32
    %18 = vector.broadcast %cst_6 : f32 to vector<336x1xf32>
    %19 = arith.cmpf oge, %12, %18 : vector<336x1xf32>
    %20 = arith.andi %17, %19 : vector<336x1xi1>
    %cst_7 = arith.constant 1.600000e+01 : f32
    %21 = vector.broadcast %cst_7 : f32 to vector<336x1xf32>
    %22 = arith.cmpf ole, %12, %21 : vector<336x1xf32>
    %23 = arith.andi %20, %22 : vector<336x1xi1>
    %24 = arith.extui %23 : vector<336x1xi1> to vector<336x1xi32>
    %25 = arith.sitofp %24 : vector<336x1xi32> to vector<336x1xf32>
    %c0_8 = arith.constant 0 : index
    %c0_9 = arith.constant 0 : index
    %26 = vector.load %arg3[%c0_8, %c0_9] : memref<1x128xf32, #tpu.memory_space<vmem>>, vector<1x128xf32>
    %27 = vector.broadcast %26 : vector<1x128xf32> to vector<336x128xf32>
    %28 = arith.mulf %2, %27 : vector<336x128xf32>
    %c0_10 = arith.constant 0 : index
    %c0_11 = arith.constant 0 : index
    %29 = vector.load %arg4[%c0_10, %c0_11] : memref<1x128xf32, #tpu.memory_space<vmem>>, vector<1x128xf32>
    %30 = vector.broadcast %29 : vector<1x128xf32> to vector<336x128xf32>
    %31 = arith.addf %28, %30 : vector<336x128xf32>
    %cst_12 = arith.constant 0.000000e+00 : f32
    %32 = vector.broadcast %cst_12 : f32 to vector<336x128xf32>
    %33 = arith.cmpf ogt, %31, %32 : vector<336x128xf32>
    %c0_13 = arith.constant 0 : index
    %c0_14 = arith.constant 0 : index
    %34 = vector.load %arg5[%c0_13, %c0_14] : memref<1x128xf32, #tpu.memory_space<vmem>>, vector<1x128xf32>
    %35 = vector.broadcast %34 : vector<1x128xf32> to vector<336x128xf32>
    %36 = arith.mulf %35, %31 : vector<336x128xf32>
    %37 = arith.select %33, %31, %36 : vector<336x128xi1>, vector<336x128xf32>
    %38 = vector.broadcast %25 : vector<336x1xf32> to vector<336x128xf32>
    %39 = arith.mulf %37, %38 : vector<336x128xf32>
    %40 = arith.truncf %39 : vector<336x128xf32> to vector<336x128xbf16>
    %41 = vector.extract_strided_slice %40 {offsets = [317, 0], sizes = [19, 128], strides = [1, 1]} : vector<336x128xbf16> to vector<19x128xbf16>
    %42 = vector.extract_strided_slice %40 {offsets = [0, 0], sizes = [317, 128], strides = [1, 1]} : vector<336x128xbf16> to vector<317x128xbf16>
    %43 = tpu.concatenate %41, %42 in 0 : vector<19x128xbf16>, vector<317x128xbf16> -> vector<336x128xbf16>
    %c0_15 = arith.constant 0 : index
    %c0_16 = arith.constant 0 : index
    %c0_17 = arith.constant 0 : index
    %44 = vector.load %arg2[%c0_15, %c0_16, %c0_17] : memref<9x128x128xbf16, #tpu.memory_space<vmem>>, vector<1x128x128xbf16>
    %45 = vector.shape_cast %44 : vector<1x128x128xbf16> to vector<128x128xbf16>
    %cst_18 = arith.constant dense<0.000000e+00> : vector<336x128xf32>
    %46 = tpu.matmul %43, %45, %cst_18 {dimension_numbers = #tpu.dot_dimension_numbers<[1], [0], [0], [1], [0, 0, 1, 1], [], []>} : vector<336x128xbf16>, vector<128x128xbf16>, vector<336x128xf32> -> vector<336x128xf32>
    %47 = vector.extract_strided_slice %40 {offsets = [318, 0], sizes = [18, 128], strides = [1, 1]} : vector<336x128xbf16> to vector<18x128xbf16>
    %48 = vector.extract_strided_slice %40 {offsets = [0, 0], sizes = [318, 128], strides = [1, 1]} : vector<336x128xbf16> to vector<318x128xbf16>
    %49 = tpu.concatenate %47, %48 in 0 : vector<18x128xbf16>, vector<318x128xbf16> -> vector<336x128xbf16>
    %c1 = arith.constant 1 : index
    %c0_19 = arith.constant 0 : index
    %c0_20 = arith.constant 0 : index
    %50 = vector.load %arg2[%c1, %c0_19, %c0_20] : memref<9x128x128xbf16, #tpu.memory_space<vmem>>, vector<1x128x128xbf16>
    %51 = vector.shape_cast %50 : vector<1x128x128xbf16> to vector<128x128xbf16>
    %cst_21 = arith.constant dense<0.000000e+00> : vector<336x128xf32>
    %52 = tpu.matmul %49, %51, %cst_21 {dimension_numbers = #tpu.dot_dimension_numbers<[1], [0], [0], [1], [0, 0, 1, 1], [], []>} : vector<336x128xbf16>, vector<128x128xbf16>, vector<336x128xf32> -> vector<336x128xf32>
    %53 = arith.addf %46, %52 : vector<336x128xf32>
    %54 = vector.extract_strided_slice %40 {offsets = [319, 0], sizes = [17, 128], strides = [1, 1]} : vector<336x128xbf16> to vector<17x128xbf16>
    %55 = vector.extract_strided_slice %40 {offsets = [0, 0], sizes = [319, 128], strides = [1, 1]} : vector<336x128xbf16> to vector<319x128xbf16>
    %56 = tpu.concatenate %54, %55 in 0 : vector<17x128xbf16>, vector<319x128xbf16> -> vector<336x128xbf16>
    %c2 = arith.constant 2 : index
    %c0_22 = arith.constant 0 : index
    %c0_23 = arith.constant 0 : index
    %57 = vector.load %arg2[%c2, %c0_22, %c0_23] : memref<9x128x128xbf16, #tpu.memory_space<vmem>>, vector<1x128x128xbf16>
    %58 = vector.shape_cast %57 : vector<1x128x128xbf16> to vector<128x128xbf16>
    %cst_24 = arith.constant dense<0.000000e+00> : vector<336x128xf32>
    %59 = tpu.matmul %56, %58, %cst_24 {dimension_numbers = #tpu.dot_dimension_numbers<[1], [0], [0], [1], [0, 0, 1, 1], [], []>} : vector<336x128xbf16>, vector<128x128xbf16>, vector<336x128xf32> -> vector<336x128xf32>
    %60 = arith.addf %53, %59 : vector<336x128xf32>
    %61 = vector.extract_strided_slice %40 {offsets = [335, 0], sizes = [1, 128], strides = [1, 1]} : vector<336x128xbf16> to vector<1x128xbf16>
    %62 = vector.extract_strided_slice %40 {offsets = [0, 0], sizes = [335, 128], strides = [1, 1]} : vector<336x128xbf16> to vector<335x128xbf16>
    %63 = tpu.concatenate %61, %62 in 0 : vector<1x128xbf16>, vector<335x128xbf16> -> vector<336x128xbf16>
    %c3 = arith.constant 3 : index
    %c0_25 = arith.constant 0 : index
    %c0_26 = arith.constant 0 : index
    %64 = vector.load %arg2[%c3, %c0_25, %c0_26] : memref<9x128x128xbf16, #tpu.memory_space<vmem>>, vector<1x128x128xbf16>
    %65 = vector.shape_cast %64 : vector<1x128x128xbf16> to vector<128x128xbf16>
    %cst_27 = arith.constant dense<0.000000e+00> : vector<336x128xf32>
    %66 = tpu.matmul %63, %65, %cst_27 {dimension_numbers = #tpu.dot_dimension_numbers<[1], [0], [0], [1], [0, 0, 1, 1], [], []>} : vector<336x128xbf16>, vector<128x128xbf16>, vector<336x128xf32> -> vector<336x128xf32>
    %67 = arith.addf %60, %66 : vector<336x128xf32>
    %c4 = arith.constant 4 : index
    %c0_28 = arith.constant 0 : index
    %c0_29 = arith.constant 0 : index
    %68 = vector.load %arg2[%c4, %c0_28, %c0_29] : memref<9x128x128xbf16, #tpu.memory_space<vmem>>, vector<1x128x128xbf16>
    %69 = vector.shape_cast %68 : vector<1x128x128xbf16> to vector<128x128xbf16>
    %cst_30 = arith.constant dense<0.000000e+00> : vector<336x128xf32>
    %70 = tpu.matmul %40, %69, %cst_30 {dimension_numbers = #tpu.dot_dimension_numbers<[1], [0], [0], [1], [0, 0, 1, 1], [], []>} : vector<336x128xbf16>, vector<128x128xbf16>, vector<336x128xf32> -> vector<336x128xf32>
    %71 = arith.addf %67, %70 : vector<336x128xf32>
    %72 = vector.extract_strided_slice %40 {offsets = [1, 0], sizes = [335, 128], strides = [1, 1]} : vector<336x128xbf16> to vector<335x128xbf16>
    %73 = vector.extract_strided_slice %40 {offsets = [0, 0], sizes = [1, 128], strides = [1, 1]} : vector<336x128xbf16> to vector<1x128xbf16>
    %74 = tpu.concatenate %72, %73 in 0 : vector<335x128xbf16>, vector<1x128xbf16> -> vector<336x128xbf16>
    %c5 = arith.constant 5 : index
    %c0_31 = arith.constant 0 : index
    %c0_32 = arith.constant 0 : index
    %75 = vector.load %arg2[%c5, %c0_31, %c0_32] : memref<9x128x128xbf16, #tpu.memory_space<vmem>>, vector<1x128x128xbf16>
    %76 = vector.shape_cast %75 : vector<1x128x128xbf16> to vector<128x128xbf16>
    %cst_33 = arith.constant dense<0.000000e+00> : vector<336x128xf32>
    %77 = tpu.matmul %74, %76, %cst_33 {dimension_numbers = #tpu.dot_dimension_numbers<[1], [0], [0], [1], [0, 0, 1, 1], [], []>} : vector<336x128xbf16>, vector<128x128xbf16>, vector<336x128xf32> -> vector<336x128xf32>
    %78 = arith.addf %71, %77 : vector<336x128xf32>
    %79 = vector.extract_strided_slice %40 {offsets = [17, 0], sizes = [319, 128], strides = [1, 1]} : vector<336x128xbf16> to vector<319x128xbf16>
    %80 = vector.extract_strided_slice %40 {offsets = [0, 0], sizes = [17, 128], strides = [1, 1]} : vector<336x128xbf16> to vector<17x128xbf16>
    %81 = tpu.concatenate %79, %80 in 0 : vector<319x128xbf16>, vector<17x128xbf16> -> vector<336x128xbf16>
    %c6 = arith.constant 6 : index
    %c0_34 = arith.constant 0 : index
    %c0_35 = arith.constant 0 : index
    %82 = vector.load %arg2[%c6, %c0_34, %c0_35] : memref<9x128x128xbf16, #tpu.memory_space<vmem>>, vector<1x128x128xbf16>
    %83 = vector.shape_cast %82 : vector<1x128x128xbf16> to vector<128x128xbf16>
    %cst_36 = arith.constant dense<0.000000e+00> : vector<336x128xf32>
    %84 = tpu.matmul %81, %83, %cst_36 {dimension_numbers = #tpu.dot_dimension_numbers<[1], [0], [0], [1], [0, 0, 1, 1], [], []>} : vector<336x128xbf16>, vector<128x128xbf16>, vector<336x128xf32> -> vector<336x128xf32>
    %85 = arith.addf %78, %84 : vector<336x128xf32>
    %86 = vector.extract_strided_slice %40 {offsets = [18, 0], sizes = [318, 128], strides = [1, 1]} : vector<336x128xbf16> to vector<318x128xbf16>
    %87 = vector.extract_strided_slice %40 {offsets = [0, 0], sizes = [18, 128], strides = [1, 1]} : vector<336x128xbf16> to vector<18x128xbf16>
    %88 = tpu.concatenate %86, %87 in 0 : vector<318x128xbf16>, vector<18x128xbf16> -> vector<336x128xbf16>
    %c7 = arith.constant 7 : index
    %c0_37 = arith.constant 0 : index
    %c0_38 = arith.constant 0 : index
    %89 = vector.load %arg2[%c7, %c0_37, %c0_38] : memref<9x128x128xbf16, #tpu.memory_space<vmem>>, vector<1x128x128xbf16>
    %90 = vector.shape_cast %89 : vector<1x128x128xbf16> to vector<128x128xbf16>
    %cst_39 = arith.constant dense<0.000000e+00> : vector<336x128xf32>
    %91 = tpu.matmul %88, %90, %cst_39 {dimension_numbers = #tpu.dot_dimension_numbers<[1], [0], [0], [1], [0, 0, 1, 1], [], []>} : vector<336x128xbf16>, vector<128x128xbf16>, vector<336x128xf32> -> vector<336x128xf32>
    %92 = arith.addf %85, %91 : vector<336x128xf32>
    %93 = vector.extract_strided_slice %40 {offsets = [19, 0], sizes = [317, 128], strides = [1, 1]} : vector<336x128xbf16> to vector<317x128xbf16>
    %94 = vector.extract_strided_slice %40 {offsets = [0, 0], sizes = [19, 128], strides = [1, 1]} : vector<336x128xbf16> to vector<19x128xbf16>
    %95 = tpu.concatenate %93, %94 in 0 : vector<317x128xbf16>, vector<19x128xbf16> -> vector<336x128xbf16>
    %c8 = arith.constant 8 : index
    %c0_40 = arith.constant 0 : index
    %c0_41 = arith.constant 0 : index
    %96 = vector.load %arg2[%c8, %c0_40, %c0_41] : memref<9x128x128xbf16, #tpu.memory_space<vmem>>, vector<1x128x128xbf16>
    %97 = vector.shape_cast %96 : vector<1x128x128xbf16> to vector<128x128xbf16>
    %cst_42 = arith.constant dense<0.000000e+00> : vector<336x128xf32>
    %98 = tpu.matmul %95, %97, %cst_42 {dimension_numbers = #tpu.dot_dimension_numbers<[1], [0], [0], [1], [0, 0, 1, 1], [], []>} : vector<336x128xbf16>, vector<128x128xbf16>, vector<336x128xf32> -> vector<336x128xf32>
    %99 = arith.addf %92, %98 : vector<336x128xf32>
    %100 = arith.truncf %99 : vector<336x128xf32> to vector<336x128xbf16>
    %c0_43 = arith.constant 0 : index
    %c0_44 = arith.constant 0 : index
    %c0_45 = arith.constant 0 : index
    %101 = vector.load %arg6[%c0_43, %c0_44, %c0_45] : memref<1x336x128xbf16, #tpu.memory_space<vmem>>, vector<1x336x128xbf16>
    %102 = vector.shape_cast %101 : vector<1x336x128xbf16> to vector<336x128xbf16>
    %103 = vector.shape_cast %100 : vector<336x128xbf16> to vector<1x336x128xbf16>
    tpu.vector_store %arg6[%c0_43, %c0_44, %c0_45], %103 {strides = array<i32>} : memref<1x336x128xbf16, #tpu.memory_space<vmem>>, vector<1x336x128xbf16>,
    %104 = vector.broadcast %25 : vector<336x1xf32> to vector<336x128xf32>
    %105 = arith.mulf %99, %104 : vector<336x128xf32>
    %cst_46 = arith.constant dense<0.000000e+00> : vector<128xf32>
    %106 = vector.multi_reduction <add>, %105, %cst_46 [0] : vector<336x128xf32> to vector<128xf32>
    %107 = vector.shape_cast %106 : vector<128xf32> to vector<1x128xf32>
    %108 = arith.mulf %105, %99 : vector<336x128xf32>
    %cst_47 = arith.constant dense<0.000000e+00> : vector<128xf32>
    %109 = vector.multi_reduction <add>, %108, %cst_47 [0] : vector<336x128xf32> to vector<128xf32>
    %110 = vector.shape_cast %109 : vector<128xf32> to vector<1x128xf32>
    %cst_48 = arith.constant 0.000000e+00 : f32
    %111 = vector.broadcast %cst_48 : f32 to vector<6x128xf32>
    %112 = tpu.concatenate %107, %110, %111 in 0 : vector<1x128xf32>, vector<1x128xf32>, vector<6x128xf32> -> vector<8x128xf32>
    %c0_49 = arith.constant 0 : index
    %c0_50 = arith.constant 0 : index
    %c0_51 = arith.constant 0 : index
    %113 = vector.load %arg7[%c0_49, %c0_50, %c0_51] : memref<1x8x128xf32, #tpu.memory_space<vmem>>, vector<1x8x128xf32>
    %114 = vector.shape_cast %113 : vector<1x8x128xf32> to vector<8x128xf32>
    %115 = vector.shape_cast %112 : vector<8x128xf32> to vector<1x8x128xf32>
    tpu.vector_store %arg7[%c0_49, %c0_50, %c0_51], %115 {strides = array<i32>} : memref<1x8x128xf32, #tpu.memory_space<vmem>>, vector<1x8x128xf32>,
    return
  }
  func.func @transform_0(%arg0: i32) -> (i32, i32, i32) {
    %c0_i32 = arith.constant 0 : i32
    %c0_i32_0 = arith.constant 0 : i32
    %c0_i32_1 = arith.constant 0 : i32
    return %arg0, %c0_i32, %c0_i32_0 : i32, i32, i32
  }
  func.func @transform_1(%arg0: i32) -> (i32, i32, i32) {
    %c0_i32 = arith.constant 0 : i32
    %c0_i32_0 = arith.constant 0 : i32
    %c0_i32_1 = arith.constant 0 : i32
    %c0_i32_2 = arith.constant 0 : i32
    return %c0_i32, %c0_i32_0, %c0_i32_1 : i32, i32, i32
  }
  func.func @transform_2(%arg0: i32) -> (i32, i32) {
    %c0_i32 = arith.constant 0 : i32
    %c0_i32_0 = arith.constant 0 : i32
    %c0_i32_1 = arith.constant 0 : i32
    return %c0_i32, %c0_i32_0 : i32, i32
  }
  func.func @transform_3(%arg0: i32) -> (i32, i32) {
    %c0_i32 = arith.constant 0 : i32
    %c0_i32_0 = arith.constant 0 : i32
    %c0_i32_1 = arith.constant 0 : i32
    return %c0_i32, %c0_i32_0 : i32, i32
  }
  func.func @transform_4(%arg0: i32) -> (i32, i32) {
    %c0_i32 = arith.constant 0 : i32
    %c0_i32_0 = arith.constant 0 : i32
    %c0_i32_1 = arith.constant 0 : i32
    return %c0_i32, %c0_i32_0 : i32, i32
  }
  func.func @transform_5(%arg0: i32) -> (i32, i32, i32) {
    %c0_i32 = arith.constant 0 : i32
    %c0_i32_0 = arith.constant 0 : i32
    %c0_i32_1 = arith.constant 0 : i32
    return %arg0, %c0_i32, %c0_i32_0 : i32, i32, i32
  }
  func.func @transform_6(%arg0: i32) -> (i32, i32, i32) {
    %c0_i32 = arith.constant 0 : i32
    %c0_i32_0 = arith.constant 0 : i32
    %c0_i32_1 = arith.constant 0 : i32
    return %arg0, %c0_i32, %c0_i32_0 : i32, i32, i32
  }
}

module attributes {stable_mosaic.version = 11 : i64} {
  func.func @_bn2_residual_kernel(%arg0: i32, %arg1: memref<1x336x128xbf16, #tpu.memory_space<vmem>>, %arg2: memref<1x336x128xbf16, #tpu.memory_space<vmem>>, %arg3: memref<1x128xf32, #tpu.memory_space<vmem>>, %arg4: memref<1x128xf32, #tpu.memory_space<vmem>>, %arg5: memref<1x128xf32, #tpu.memory_space<vmem>>, %arg6: memref<1x336x128xf32, #tpu.memory_space<vmem>>) attributes {dimension_semantics = [#tpu.dimension_semantics<parallel>], iteration_bounds = array<i64: 2>, scalar_prefetch = 0 : i64, scratch_operands = 0 : i64, tpu.core_type = #tpu.core_type<tc>, window_params = [{transform_indices = @transform_0, window_bounds = array<i64: 1, 336, 128>}, {transform_indices = @transform_1, window_bounds = array<i64: 1, 336, 128>}, {pipeline_mode = #tpu.pipeline_mode<synchronous>, transform_indices = @transform_2, window_bounds = array<i64: 1, 128>}, {pipeline_mode = #tpu.pipeline_mode<synchronous>, transform_indices = @transform_3, window_bounds = array<i64: 1, 128>}, {pipeline_mode = #tpu.pipeline_mode<synchronous>, transform_indices = @transform_4, window_bounds = array<i64: 1, 128>}, {transform_indices = @transform_5, window_bounds = array<i64: 1, 336, 128>}]} {
    %c0 = arith.constant 0 : index
    %c0_0 = arith.constant 0 : index
    %c0_1 = arith.constant 0 : index
    %0 = vector.load %arg1[%c0, %c0_0, %c0_1] : memref<1x336x128xbf16, #tpu.memory_space<vmem>>, vector<1x336x128xbf16>
    %1 = vector.shape_cast %0 : vector<1x336x128xbf16> to vector<336x128xbf16>
    %2 = arith.extf %1 : vector<336x128xbf16> to vector<336x128xf32>
    %c0_2 = arith.constant 0 : index
    %c0_3 = arith.constant 0 : index
    %3 = vector.load %arg3[%c0_2, %c0_3] : memref<1x128xf32, #tpu.memory_space<vmem>>, vector<1x128xf32>
    %4 = vector.broadcast %3 : vector<1x128xf32> to vector<336x128xf32>
    %5 = arith.mulf %2, %4 : vector<336x128xf32>
    %c0_4 = arith.constant 0 : index
    %c0_5 = arith.constant 0 : index
    %6 = vector.load %arg4[%c0_4, %c0_5] : memref<1x128xf32, #tpu.memory_space<vmem>>, vector<1x128xf32>
    %7 = vector.broadcast %6 : vector<1x128xf32> to vector<336x128xf32>
    %8 = arith.addf %5, %7 : vector<336x128xf32>
    %c0_6 = arith.constant 0 : index
    %c0_7 = arith.constant 0 : index
    %c0_8 = arith.constant 0 : index
    %9 = vector.load %arg2[%c0_6, %c0_7, %c0_8] : memref<1x336x128xbf16, #tpu.memory_space<vmem>>, vector<1x336x128xbf16>
    %10 = vector.shape_cast %9 : vector<1x336x128xbf16> to vector<336x128xbf16>
    %11 = arith.extf %10 : vector<336x128xbf16> to vector<336x128xf32>
    %12 = arith.addf %8, %11 : vector<336x128xf32>
    %cst = arith.constant 0.000000e+00 : f32
    %13 = vector.broadcast %cst : f32 to vector<336x128xf32>
    %14 = arith.cmpf ogt, %12, %13 : vector<336x128xf32>
    %c0_9 = arith.constant 0 : index
    %c0_10 = arith.constant 0 : index
    %15 = vector.load %arg5[%c0_9, %c0_10] : memref<1x128xf32, #tpu.memory_space<vmem>>, vector<1x128xf32>
    %16 = vector.broadcast %15 : vector<1x128xf32> to vector<336x128xf32>
    %17 = arith.mulf %16, %12 : vector<336x128xf32>
    %18 = arith.select %14, %12, %17 : vector<336x128xi1>, vector<336x128xf32>
    %c0_11 = arith.constant 0 : index
    %c0_12 = arith.constant 0 : index
    %c0_13 = arith.constant 0 : index
    %19 = vector.load %arg6[%c0_11, %c0_12, %c0_13] : memref<1x336x128xf32, #tpu.memory_space<vmem>>, vector<1x336x128xf32>
    %20 = vector.shape_cast %19 : vector<1x336x128xf32> to vector<336x128xf32>
    %21 = vector.shape_cast %18 : vector<336x128xf32> to vector<1x336x128xf32>
    tpu.vector_store %arg6[%c0_11, %c0_12, %c0_13], %21 {strides = array<i32>} : memref<1x336x128xf32, #tpu.memory_space<vmem>>, vector<1x336x128xf32>,
    return
  }
  func.func @transform_0(%arg0: i32) -> (i32, i32, i32) {
    %c0_i32 = arith.constant 0 : i32
    %c0_i32_0 = arith.constant 0 : i32
    %c0_i32_1 = arith.constant 0 : i32
    return %arg0, %c0_i32, %c0_i32_0 : i32, i32, i32
  }
  func.func @transform_1(%arg0: i32) -> (i32, i32, i32) {
    %c0_i32 = arith.constant 0 : i32
    %c0_i32_0 = arith.constant 0 : i32
    %c0_i32_1 = arith.constant 0 : i32
    return %arg0, %c0_i32, %c0_i32_0 : i32, i32, i32
  }
  func.func @transform_2(%arg0: i32) -> (i32, i32) {
    %c0_i32 = arith.constant 0 : i32
    %c0_i32_0 = arith.constant 0 : i32
    %c0_i32_1 = arith.constant 0 : i32
    return %c0_i32, %c0_i32_0 : i32, i32
  }
  func.func @transform_3(%arg0: i32) -> (i32, i32) {
    %c0_i32 = arith.constant 0 : i32
    %c0_i32_0 = arith.constant 0 : i32
    %c0_i32_1 = arith.constant 0 : i32
    return %c0_i32, %c0_i32_0 : i32, i32
  }
  func.func @transform_4(%arg0: i32) -> (i32, i32) {
    %c0_i32 = arith.constant 0 : i32
    %c0_i32_0 = arith.constant 0 : i32
    %c0_i32_1 = arith.constant 0 : i32
    return %c0_i32, %c0_i32_0 : i32, i32
  }
  func.func @transform_5(%arg0: i32) -> (i32, i32, i32) {
    %c0_i32 = arith.constant 0 : i32
    %c0_i32_0 = arith.constant 0 : i32
    %c0_i32_1 = arith.constant 0 : i32
    return %arg0, %c0_i32, %c0_i32_0 : i32, i32, i32
  }
}

</mosaic_0001>

<bundles_post_ra>
// kernel: mul.11
= control target key start
LH: loop header
LB: loop body
LE: loop exit
PB: predicated region body
PF: predicated region fallthrough
CT: control target
= control target key end

     0   :  { %s20_s0 = inlined_call_operand.<no memory space> [shape: f32[], index: 0, kind: input, shape index: {}]   ;;  %s21_s1 = inlined_call_operand.vmem [shape: f32[1,128], index: 1, kind: output, shape index: {}]  }
   0x1   :  { %v2_v0 = vstv %s20_s0 }
   0x2   :  { %3 = vst [vmem:[%s21_s1] sm:$0x1] %v2_v0 }

// kernel: basic_block_face.5
= control target key start
LH: loop header
LB: loop body
LE: loop exit
PB: predicated region body
PF: predicated region fallthrough
CT: control target
= control target key end

     0   :  { %s1055_s18 = smov 0   ;;  %s1314_s0 = inlined_call_operand.vmem [shape: bf16[2,336,128], index: 0, kind: input, shape index: {}]   ;;  %s1315_s1 = inlined_call_operand.vmem [shape: bf16[2,336,128], index: 1, kind: input, shape index: {}]   ;;  %s1316_s2 = inlined_call_operand.vmem [shape: f32[1,128], index: 2, kind: input, shape index: {}]   ;;  %s1317_s3 = inlined_call_operand.vmem [shape: f32[1,128], index: 3, kind: input, shape index: {}]   ;;  %s1318_s4 = inlined_call_operand.vmem [shape: f32[1,128], index: 4, kind: input, shape index: {}]   ;;  %s1319_s5 = inlined_call_operand.vmem [shape: f32[2,336,128], index: 5, kind: output, shape index: {}]  }
   0x1 LB: > { %s786_s19 = sadd.s32 4294967295, %s1023_s18   ;;  %p790_p0 = scmp.ge.s32.totalorder %s1023_s18, 1  ;;  %s1023_s18 = sphi %s1055_s18, %s15_s18  }
   0x2   : > { %p197_p1 = scmp.lt.s32.totalorder %s1023_s18, 3 }
   0x4   : > { %p198_p2 = pnand %p790_p0, %p197_p1 }
   0x5   : > { %p230_p3 = scmp.lt.s32.totalorder (!%p198_p2), %s786_s19, 1 }
   0x6   : > { %201 = sbr.rel (%p198_p2) target bundleno = 106 (0x6a), region = 40 }
   0xb   : > { %s1321_s19 = smov (!%p230_p3, %s786_s19), 1  ;;  %v1079_v0 = vld [vmem:[%s1316_s2] ss:$0 sm:$0xff] }
   0xc   : > { %s1004_s20 = smul.u32 168, %s1321_s19  ;;  %v1084_v1 = vld [vmem:[%s1317_s3] ss:$0 sm:$0xff] }
   0xd   : > { %s1005_s6 = smul.u32 336, %s1321_s19  ;;  %v1105_v27 = vld [vmem:[%s1318_s4] ss:$0 sm:$0xff] }
   0xe   : > { %s1069_s23 = scalar_lea.vmem %s1314_s0, %s1004_s20  ;;  %s1074_s26 = scalar_lea.vmem %s1315_s1, %s1004_s20 }
   0xf   : > { %v797_v2 = vld [vmem:[%s1069_s23] sm:$0xff]   ;;  %v964_v4 = vld [vmem:[%s1069_s23 + $0x8] sm:$0xff]   ;;  %v965_v10 = vld [vmem:[%s1069_s23 + $0x10] sm:$0xff]   ;;  %s1119_s11 = scalar_lea.vmem %s1319_s5, %s1005_s6 }
  0x10   : > { %v881_v3 = vld [vmem:[%s1074_s26] sm:$0xff]   ;;  %v798_v5 = vunpack.c.l.bf16 %v797_v2  ;;  %v799_v7 = vunpack.c.h.bf16 %v797_v2  ;;  %v984_v9 = vld [vmem:[%s1074_s26 + $0x8] sm:$0xff]   ;;  %v985_v11 = vld [vmem:[%s1074_s26 + $0x10] sm:$0xff]   ;;  %v802_v12 = vunpack.c.l.bf16 %v964_v4  ;;  %v803_v14 = vunpack.c.h.bf16 %v964_v4 }
  0x11   : > { %v882_v6 = vunpack.c.l.bf16 %v881_v3  ;;  %v883_v8 = vunpack.c.h.bf16 %v881_v3  ;;  %v886_v13 = vunpack.c.l.bf16 %v984_v9  ;;  %v887_v15 = vunpack.c.h.bf16 %v984_v9  ;;  %v966_v16 = vld [vmem:[%s1069_s23 + $0x18] sm:$0xff]   ;;  %v967_v51 = vld [vmem:[%s1069_s23 + $0x20] sm:$0xff]   ;;  %v968_v63 = vld [vmem:[%s1069_s23 + $0x28] sm:$0xff]  }
  0x12   : > { %v333_v17 = vmul.f32 %v1079_v0, %v798_v5  ;;  %v334_v18 = vmul.f32 %v1079_v0, %v799_v7  ;;  %v806_v19 = vunpack.c.l.bf16 %v965_v10  ;;  %v890_v20 = vunpack.c.l.bf16 %v985_v11  ;;  %v1096_v21 = vld [vmem:[%s1074_s26 + $0x18] sm:$0xff]   ;;  %v987_v56 = vld [vmem:[%s1074_s26 + $0x20] sm:$0xff]   ;;  %v988_v2 = vld [vmem:[%s1074_s26 + $0x28] sm:$0xff]  }
  0x13   : > { %v335_v22 = vmul.f32 %v1079_v0, %v802_v12  ;;  %v336_v23 = vmul.f32 %v1079_v0, %v803_v14  ;;  %v807_v24 = vunpack.c.h.bf16 %v965_v10  ;;  %v891_v25 = vunpack.c.h.bf16 %v985_v11  ;;  %v969_v14 = vld [vmem:[%s1069_s23 + $0x30] sm:$0xff]  }
  0x14   : > { %v379_v26 = vadd.f32 %v1084_v1, %v333_v17  ;;  %v380_v28 = vadd.f32 %v1084_v1, %v334_v18  ;;  %v337_v29 = vmul.f32 %v1079_v0, %v806_v19  ;;  %v810_v30 = vunpack.c.l.bf16 %v966_v16 }
  0x15   : > { %v381_v31 = vadd.f32 %v1084_v1, %v335_v22  ;;  %v382_v32 = vadd.f32 %v1084_v1, %v336_v23  ;;  %v338_v33 = vmul.f32 %v1079_v0, %v807_v24  ;;  %v894_v34 = vunpack.c.l.bf16 %v1096_v21 }
  0x16   : > { %v505_v35 = vadd.f32 %v882_v6, %v379_v26  ;;  %v506_v36 = vadd.f32 %v883_v8, %v380_v28  ;;  %v383_v37 = vadd.f32 %v1084_v1, %v337_v29  ;;  %v339_v38 = vmul.f32 %v1079_v0, %v810_v30 }
  0x17   : > { %v507_v39 = vadd.f32 %v886_v13, %v381_v31  ;;  %v508_v40 = vadd.f32 %v887_v15, %v382_v32  ;;  %v384_v41 = vadd.f32 %v1084_v1, %v338_v33  ;;  %v811_v42 = vunpack.c.h.bf16 %v966_v16  ;;  %v989_v15 = vld [vmem:[%s1074_s26 + $0x30] sm:$0xff]   ;;  %v970_v32 = vld [vmem:[%s1069_s23 + $0x38] sm:$0xff]  }
  0x18   : > { %vm547_vm0 = vcmp.gt.f32.partialorder %v505_v35, 0.0  ;;  %v593_v43 = vmul.f32 %v1105_v27, %v505_v35  ;;  %vm548_vm1 = vcmp.gt.f32.partialorder %v506_v36, 0.0  ;;  %v594_v44 = vmul.f32 %v1105_v27, %v506_v36 }
  0x19   : > { %vm549_vm2 = vcmp.gt.f32.partialorder %v507_v39, 0.0  ;;  %v595_v45 = vmul.f32 %v1105_v27, %v507_v39  ;;  %vm550_vm3 = vcmp.gt.f32.partialorder %v508_v40, 0.0  ;;  %v596_v46 = vmul.f32 %v1105_v27, %v508_v40 }
  0x1a   : > { %v635_v47 = vsel %vm547_vm0, %v505_v35, %v593_v43  ;;  %v636_v48 = vsel %vm548_vm1, %v506_v36, %v594_v44  ;;  %v509_v49 = vadd.f32 %v890_v20, %v383_v37  ;;  %v510_v50 = vadd.f32 %v891_v25, %v384_v41 }
  0x1b   : > { %677 = vst [vmem:[%s1119_s11] sm:$0xff] %v635_v47  ;;  %v637_v52 = vsel %vm549_vm2, %v507_v39, %v595_v45  ;;  %v638_v53 = vsel %vm550_vm3, %v508_v40, %v596_v46  ;;  %v385_v54 = vadd.f32 %v1084_v1, %v339_v38  ;;  %v340_v55 = vmul.f32 %v1079_v0, %v811_v42  ;;  %v990_v39 = vld [vmem:[%s1074_s26 + $0x38] sm:$0xff]  }
  0x1c   : > { %678 = vst [vmem:[%s1119_s11 + $0x8] sm:$0xff] %v636_v48  ;;  %vm551_vm4 = vcmp.gt.f32.partialorder %v509_v49, 0.0  ;;  %v597_v57 = vmul.f32 %v1105_v27, %v509_v49  ;;  %vm552_vm5 = vcmp.gt.f32.partialorder %v510_v50, 0.0  ;;  %v598_v58 = vmul.f32 %v1105_v27, %v510_v50 }
  0x1d   : > { %679 = vst [vmem:[%s1119_s11 + $0x10] sm:$0xff] %v637_v52  ;;  %v511_v59 = vadd.f32 %v894_v34, %v385_v54  ;;  %v386_v60 = vadd.f32 %v1084_v1, %v340_v55  ;;  %v895_v61 = vunpack.c.h.bf16 %v1096_v21  ;;  %v814_v62 = vunpack.c.l.bf16 %v967_v51 }
  0x1e   : > { %680 = vst [vmem:[%s1119_s11 + $0x18] sm:$0xff] %v638_v53  ;;  %v639_v3 = vsel %vm551_vm4, %v509_v49, %v597_v57  ;;  %v640_v4 = vsel %vm552_vm5, %v510_v50, %v598_v58  ;;  %v898_v5 = vunpack.c.l.bf16 %v987_v56  ;;  %v815_v6 = vunpack.c.h.bf16 %v967_v51  ;;  %v971_v51 = vld [vmem:[%s1069_s23 + $0x40] sm:$0xff]  }
  0x1f   : > { %681 = vst [vmem:[%s1119_s11 + $0x20] sm:$0xff] %v639_v3  ;;  %vm553_vm6 = vcmp.gt.f32.partialorder %v511_v59, 0.0  ;;  %v599_v7 = vmul.f32 %v1105_v27, %v511_v59  ;;  %v512_v8 = vadd.f32 %v895_v61, %v386_v60  ;;  %v341_v9 = vmul.f32 %v1079_v0, %v814_v62  ;;  %v991_v58 = vld [vmem:[%s1074_s26 + $0x40] sm:$0xff]  }
  0x20   : > { %682 = vst [vmem:[%s1119_s11 + $0x28] sm:$0xff] %v640_v4  ;;  %v342_v10 = vmul.f32 %v1079_v0, %v815_v6  ;;  %v899_v11 = vunpack.c.h.bf16 %v987_v56  ;;  %v818_v12 = vunpack.c.l.bf16 %v968_v63  ;;  %v902_v13 = vunpack.c.l.bf16 %v988_v2  ;;  %v972_v4 = vld [vmem:[%s1069_s23 + $0x48] sm:$0xff]  }
  0x21   : > { %v641_v16 = vsel %vm553_vm6, %v511_v59, %v599_v7  ;;  %vm554_vm7 = vcmp.gt.f32.partialorder %v512_v8, 0.0  ;;  %v600_v17 = vmul.f32 %v1105_v27, %v512_v8  ;;  %v387_v18 = vadd.f32 %v1084_v1, %v341_v9  ;;  %v992_v9 = vld [vmem:[%s1074_s26 + $0x48] sm:$0xff]  }
  0x22   : > { %683 = vst [vmem:[%s1119_s11 + $0x30] sm:$0xff] %v641_v16  ;;  %v388_v19 = vadd.f32 %v1084_v1, %v342_v10  ;;  %v343_v20 = vmul.f32 %v1079_v0, %v818_v12  ;;  %v819_v21 = vunpack.c.h.bf16 %v968_v63  ;;  %v903_v22 = vunpack.c.h.bf16 %v988_v2 }
  0x23   : > { %v642_v23 = vsel %vm554_vm7, %v512_v8, %v600_v17  ;;  %v513_v24 = vadd.f32 %v898_v5, %v387_v18  ;;  %v822_v25 = vunpack.c.l.bf16 %v969_v14  ;;  %v906_v26 = vunpack.c.l.bf16 %v989_v15  ;;  %v973_v17 = vld [vmem:[%s1069_s23 + $0x50] sm:$0xff]  }
  0x24   : > { %684 = vst [vmem:[%s1119_s11 + $0x38] sm:$0xff] %v642_v23  ;;  %v514_v28 = vadd.f32 %v899_v11, %v388_v19  ;;  %v389_v29 = vadd.f32 %v1084_v1, %v343_v20  ;;  %v344_v30 = vmul.f32 %v1079_v0, %v819_v21  ;;  %v823_v31 = vunpack.c.h.bf16 %v969_v14  ;;  %v993_v18 = vld [vmem:[%s1074_s26 + $0x50] sm:$0xff]  }
  0x25   : > { %vm555_vm8 = vcmp.gt.f32.partialorder %v513_v24, 0.0  ;;  %v601_v33 = vmul.f32 %v1105_v27, %v513_v24  ;;  %v345_v34 = vmul.f32 %v1079_v0, %v822_v25  ;;  %v907_v35 = vunpack.c.h.bf16 %v989_v15 }
  0x26   : > { %vm556_vm9 = vcmp.gt.f32.partialorder %v514_v28, 0.0  ;;  %v602_v36 = vmul.f32 %v1105_v27, %v514_v28  ;;  %v515_v37 = vadd.f32 %v902_v13, %v389_v29  ;;  %v390_v38 = vadd.f32 %v1084_v1, %v344_v30 }
  0x27   : > { %v643_v40 = vsel %vm555_vm8, %v513_v24, %v601_v33  ;;  %v391_v41 = vadd.f32 %v1084_v1, %v345_v34  ;;  %v346_v42 = vmul.f32 %v1079_v0, %v823_v31  ;;  %v826_v43 = vunpack.c.l.bf16 %v970_v32 }
  0x28   : > { %685 = vst [vmem:[%s1119_s11 + $0x40] sm:$0xff] %v643_v40  ;;  %v644_v44 = vsel %vm556_vm9, %v514_v28, %v602_v36  ;;  %vm557_vm10 = vcmp.gt.f32.partialorder %v515_v37, 0.0  ;;  %v603_v45 = vmul.f32 %v1105_v27, %v515_v37  ;;  %v516_v46 = vadd.f32 %v903_v22, %v390_v38  ;;  %v974_v38 = vld [vmem:[%s1069_s23 + $0x58] sm:$0xff]  }
  0x29   : > { %686 = vst [vmem:[%s1119_s11 + $0x48] sm:$0xff] %v644_v44  ;;  %v517_v47 = vadd.f32 %v906_v26, %v391_v41  ;;  %v392_v48 = vadd.f32 %v1084_v1, %v346_v42  ;;  %v347_v49 = vmul.f32 %v1079_v0, %v826_v43  ;;  %v910_v50 = vunpack.c.l.bf16 %v990_v39 }
  0x2a   : > { %v645_v52 = vsel %vm557_vm10, %v515_v37, %v603_v45  ;;  %vm558_vm11 = vcmp.gt.f32.partialorder %v516_v46, 0.0  ;;  %v604_v53 = vmul.f32 %v1105_v27, %v516_v46  ;;  %v827_v54 = vunpack.c.h.bf16 %v970_v32 }
  0x2b   : > { %687 = vst [vmem:[%s1119_s11 + $0x50] sm:$0xff] %v645_v52  ;;  %vm559_vm12 = vcmp.gt.f32.partialorder %v517_v47, 0.0  ;;  %v605_v55 = vmul.f32 %v1105_v27, %v517_v47  ;;  %v518_v56 = vadd.f32 %v907_v35, %v392_v48  ;;  %v393_v57 = vadd.f32 %v1084_v1, %v347_v49 }
  0x2c   : > { %v646_v59 = vsel %vm558_vm11, %v516_v46, %v604_v53  ;;  %v348_v60 = vmul.f32 %v1079_v0, %v827_v54  ;;  %v911_v61 = vunpack.c.h.bf16 %v990_v39  ;;  %v830_v62 = vunpack.c.l.bf16 %v971_v51  ;;  %v994_v39 = vld [vmem:[%s1074_s26 + $0x58] sm:$0xff]  }
  0x2d   : > { %688 = vst [vmem:[%s1119_s11 + $0x58] sm:$0xff] %v646_v59  ;;  %v647_v63 = vsel %vm559_vm12, %v517_v47, %v605_v55  ;;  %vm560_vm13 = vcmp.gt.f32.partialorder %v518_v56, 0.0  ;;  %v606_v2 = vmul.f32 %v1105_v27, %v518_v56  ;;  %v519_v3 = vadd.f32 %v910_v50, %v393_v57 }
  0x2e   : > { %689 = vst [vmem:[%s1119_s11 + $0x60] sm:$0xff] %v647_v63  ;;  %v394_v5 = vadd.f32 %v1084_v1, %v348_v60  ;;  %v349_v6 = vmul.f32 %v1079_v0, %v830_v62  ;;  %v914_v7 = vunpack.c.l.bf16 %v991_v58  ;;  %v831_v8 = vunpack.c.h.bf16 %v971_v51  ;;  %v975_v51 = vld [vmem:[%s1069_s23 + $0x60] sm:$0xff]  }
  0x2f   : > { %v648_v10 = vsel %vm560_vm13, %v518_v56, %v606_v2  ;;  %vm561_vm14 = vcmp.gt.f32.partialorder %v519_v3, 0.0  ;;  %v607_v11 = vmul.f32 %v1105_v27, %v519_v3  ;;  %v915_v12 = vunpack.c.h.bf16 %v991_v58  ;;  %v995_v58 = vld [vmem:[%s1074_s26 + $0x60] sm:$0xff]  }
  0x30   : > { %690 = vst [vmem:[%s1119_s11 + $0x68] sm:$0xff] %v648_v10  ;;  %v520_v13 = vadd.f32 %v911_v61, %v394_v5  ;;  %v395_v14 = vadd.f32 %v1084_v1, %v349_v6  ;;  %v350_v15 = vmul.f32 %v1079_v0, %v831_v8  ;;  %v834_v16 = vunpack.c.l.bf16 %v972_v4  ;;  %v976_v8 = vld [vmem:[%s1069_s23 + $0x68] sm:$0xff]  }
  0x31   : > { %v649_v19 = vsel %vm561_vm14, %v519_v3, %v607_v11  ;;  %v918_v20 = vunpack.c.l.bf16 %v992_v9  ;;  %v835_v21 = vunpack.c.h.bf16 %v972_v4  ;;  %v919_v22 = vunpack.c.h.bf16 %v992_v9 }
  0x32   : > { %691 = vst [vmem:[%s1119_s11 + $0x70] sm:$0xff] %v649_v19  ;;  %vm562_vm15 = vcmp.gt.f32.partialorder %v520_v13, 0.0  ;;  %v608_v23 = vmul.f32 %v1105_v27, %v520_v13  ;;  %v521_v24 = vadd.f32 %v914_v7, %v395_v14  ;;  %v396_v25 = vadd.f32 %v1084_v1, %v350_v15 }
  0x33   : > { %v351_v26 = vmul.f32 %v1079_v0, %v834_v16  ;;  %v352_v28 = vmul.f32 %v1079_v0, %v835_v21  ;;  %v838_v29 = vunpack.c.l.bf16 %v973_v17  ;;  %v922_v30 = vunpack.c.l.bf16 %v993_v18  ;;  %v996_v16 = vld [vmem:[%s1074_s26 + $0x68] sm:$0xff]  }
  0x34   : > { %v650_v31 = vsel %vm562_vm15, %v520_v13, %v608_v23  ;;  %vm563_vm0 = vcmp.gt.f32.partialorder %v521_v24, 0.0  ;;  %v609_v32 = vmul.f32 %v1105_v27, %v521_v24  ;;  %v522_v33 = vadd.f32 %v915_v12, %v396_v25  ;;  %v977_v23 = vld [vmem:[%s1069_s23 + $0x70] sm:$0xff]  }
  0x35   : > { %692 = vst [vmem:[%s1119_s11 + $0x78] sm:$0xff] %v650_v31  ;;  %v397_v34 = vadd.f32 %v1084_v1, %v351_v26  ;;  %v398_v35 = vadd.f32 %v1084_v1, %v352_v28  ;;  %v353_v36 = vmul.f32 %v1079_v0, %v838_v29  ;;  %v839_v37 = vunpack.c.h.bf16 %v973_v17  ;;  %v997_v29 = vld [vmem:[%s1074_s26 + $0x70] sm:$0xff]  }
  0x36   : > { %v651_v40 = vsel %vm563_vm0, %v521_v24, %v609_v32  ;;  %vm564_vm1 = vcmp.gt.f32.partialorder %v522_v33, 0.0  ;;  %v610_v41 = vmul.f32 %v1105_v27, %v522_v33  ;;  %v923_v42 = vunpack.c.h.bf16 %v993_v18 }
  0x37   : > { %693 = vst [vmem:[%s1119_s11 + $0x80] sm:$0xff] %v651_v40  ;;  %v523_v43 = vadd.f32 %v918_v20, %v397_v34  ;;  %v524_v44 = vadd.f32 %v919_v22, %v398_v35  ;;  %v399_v45 = vadd.f32 %v1084_v1, %v353_v36  ;;  %v354_v46 = vmul.f32 %v1079_v0, %v839_v37  ;;  %v978_v37 = vld [vmem:[%s1069_s23 + $0x78] sm:$0xff]  }
  0x38   : > { %v652_v47 = vsel %vm564_vm1, %v522_v33, %v610_v41  ;;  %v842_v48 = vunpack.c.l.bf16 %v974_v38  ;;  %v926_v49 = vunpack.c.l.bf16 %v994_v39  ;;  %v843_v50 = vunpack.c.h.bf16 %v974_v38  ;;  %v998_v38 = vld [vmem:[%s1074_s26 + $0x78] sm:$0xff]  }
  0x39   : > { %694 = vst [vmem:[%s1119_s11 + $0x88] sm:$0xff] %v652_v47  ;;  %vm565_vm2 = vcmp.gt.f32.partialorder %v523_v43, 0.0  ;;  %v611_v52 = vmul.f32 %v1105_v27, %v523_v43  ;;  %vm566_vm3 = vcmp.gt.f32.partialorder %v524_v44, 0.0  ;;  %v612_v53 = vmul.f32 %v1105_v27, %v524_v44 }
  0x3a   : > { %v525_v54 = vadd.f32 %v922_v30, %v399_v45  ;;  %v400_v55 = vadd.f32 %v1084_v1, %v354_v46  ;;  %v355_v56 = vmul.f32 %v1079_v0, %v842_v48  ;;  %v356_v57 = vmul.f32 %v1079_v0, %v843_v50 }
  0x3b   : > { %v653_v59 = vsel %vm565_vm2, %v523_v43, %v611_v52  ;;  %v654_v60 = vsel %vm566_vm3, %v524_v44, %v612_v53  ;;  %v927_v61 = vunpack.c.h.bf16 %v994_v39  ;;  %v846_v62 = vunpack.c.l.bf16 %v975_v51  ;;  %v979_v53 = vld [vmem:[%s1069_s23 + $0x80] sm:$0xff]  }
  0x3c   : > { %695 = vst [vmem:[%s1119_s11 + $0x90] sm:$0xff] %v653_v59  ;;  %vm567_vm4 = vcmp.gt.f32.partialorder %v525_v54, 0.0  ;;  %v613_v63 = vmul.f32 %v1105_v27, %v525_v54  ;;  %v526_v2 = vadd.f32 %v923_v42, %v400_v55  ;;  %v401_v3 = vadd.f32 %v1084_v1, %v355_v56 }
  0x3d   : > { %696 = vst [vmem:[%s1119_s11 + $0x98] sm:$0xff] %v654_v60  ;;  %v402_v4 = vadd.f32 %v1084_v1, %v356_v57  ;;  %v357_v5 = vmul.f32 %v1079_v0, %v846_v62  ;;  %v930_v6 = vunpack.c.l.bf16 %v995_v58  ;;  %v847_v7 = vunpack.c.h.bf16 %v975_v51 }
  0x3e   : > { %v655_v9 = vsel %vm567_vm4, %v525_v54, %v613_v63  ;;  %vm568_vm5 = vcmp.gt.f32.partialorder %v526_v2, 0.0  ;;  %v614_v10 = vmul.f32 %v1105_v27, %v526_v2  ;;  %v527_v11 = vadd.f32 %v926_v49, %v401_v3 }
  0x3f   : > { %697 = vst [vmem:[%s1119_s11 + $0xa0] sm:$0xff] %v655_v9  ;;  %v528_v12 = vadd.f32 %v927_v61, %v402_v4  ;;  %v403_v13 = vadd.f32 %v1084_v1, %v357_v5  ;;  %v358_v14 = vmul.f32 %v1079_v0, %v847_v7  ;;  %v931_v15 = vunpack.c.h.bf16 %v995_v58  ;;  %v999_v58 = vld [vmem:[%s1074_s26 + $0x80] sm:$0xff]   ;;  %v980_v4 = vld [vmem:[%s1069_s23 + $0x88] sm:$0xff]  }
  0x40   : > { %v656_v17 = vsel %vm568_vm5, %v526_v2, %v614_v10  ;;  %vm569_vm6 = vcmp.gt.f32.partialorder %v527_v11, 0.0  ;;  %v615_v18 = vmul.f32 %v1105_v27, %v527_v11  ;;  %v850_v19 = vunpack.c.l.bf16 %v976_v8 }
  0x41   : > { %698 = vst [vmem:[%s1119_s11 + $0xa8] sm:$0xff] %v656_v17  ;;  %vm570_vm7 = vcmp.gt.f32.partialorder %v528_v12, 0.0  ;;  %v616_v20 = vmul.f32 %v1105_v27, %v528_v12  ;;  %v529_v21 = vadd.f32 %v930_v6, %v403_v13  ;;  %v404_v22 = vadd.f32 %v1084_v1, %v358_v14 }
  0x42   : > { %v657_v24 = vsel %vm569_vm6, %v527_v11, %v615_v18  ;;  %v359_v25 = vmul.f32 %v1079_v0, %v850_v19  ;;  %v934_v26 = vunpack.c.l.bf16 %v996_v16  ;;  %v851_v28 = vunpack.c.h.bf16 %v976_v8 }
  0x43   : > { %699 = vst [vmem:[%s1119_s11 + $0xb0] sm:$0xff] %v657_v24  ;;  %v658_v30 = vsel %vm570_vm7, %v528_v12, %v616_v20  ;;  %vm571_vm8 = vcmp.gt.f32.partialorder %v529_v21, 0.0  ;;  %v617_v31 = vmul.f32 %v1105_v27, %v529_v21  ;;  %v530_v32 = vadd.f32 %v931_v15, %v404_v22 }
  0x44   : > { %700 = vst [vmem:[%s1119_s11 + $0xb8] sm:$0xff] %v658_v30  ;;  %v405_v33 = vadd.f32 %v1084_v1, %v359_v25  ;;  %v360_v34 = vmul.f32 %v1079_v0, %v851_v28  ;;  %v935_v35 = vunpack.c.h.bf16 %v996_v16  ;;  %v854_v36 = vunpack.c.l.bf16 %v977_v23  ;;  %v1000_v16 = vld [vmem:[%s1074_s26 + $0x88] sm:$0xff]  }
  0x45   : > { %v659_v39 = vsel %vm571_vm8, %v529_v21, %v617_v31  ;;  %vm572_vm9 = vcmp.gt.f32.partialorder %v530_v32, 0.0  ;;  %v618_v40 = vmul.f32 %v1105_v27, %v530_v32  ;;  %v938_v41 = vunpack.c.l.bf16 %v997_v29 }
  0x46   : > { %701 = vst [vmem:[%s1119_s11 + $0xc0] sm:$0xff] %v659_v39  ;;  %v531_v42 = vadd.f32 %v934_v26, %v405_v33  ;;  %v406_v43 = vadd.f32 %v1084_v1, %v360_v34  ;;  %v361_v44 = vmul.f32 %v1079_v0, %v854_v36  ;;  %v855_v45 = vunpack.c.h.bf16 %v977_v23  ;;  %v981_v23 = vld [vmem:[%s1069_s23 + $0x90] sm:$0xff]  }
  0x47   : > { %v660_v46 = vsel %vm572_vm9, %v530_v32, %v618_v40  ;;  %v939_v47 = vunpack.c.h.bf16 %v997_v29  ;;  %v858_v48 = vunpack.c.l.bf16 %v978_v37  ;;  %v942_v49 = vunpack.c.l.bf16 %v998_v38  ;;  %v1001_v32 = vld [vmem:[%s1074_s26 + $0x90] sm:$0xff]  }
  0x48   : > { %702 = vst [vmem:[%s1119_s11 + $0xc8] sm:$0xff] %v660_v46  ;;  %vm573_vm10 = vcmp.gt.f32.partialorder %v531_v42, 0.0  ;;  %v619_v50 = vmul.f32 %v1105_v27, %v531_v42  ;;  %v532_v51 = vadd.f32 %v935_v35, %v406_v43  ;;  %v407_v52 = vadd.f32 %v1084_v1, %v361_v44  ;;  %v982_v44 = vld [vmem:[%s1069_s23 + $0x98] sm:$0xff]  }
  0x49   : > { %v362_v54 = vmul.f32 %v1079_v0, %v855_v45  ;;  %v363_v55 = vmul.f32 %v1079_v0, %v858_v48  ;;  %v859_v56 = vunpack.c.h.bf16 %v978_v37  ;;  %v943_v57 = vunpack.c.h.bf16 %v998_v38 }
  0x4a   : > { %v661_v59 = vsel %vm573_vm10, %v531_v42, %v619_v50  ;;  %vm574_vm11 = vcmp.gt.f32.partialorder %v532_v51, 0.0  ;;  %v620_v60 = vmul.f32 %v1105_v27, %v532_v51  ;;  %v533_v61 = vadd.f32 %v938_v41, %v407_v52 }
  0x4b   : > { %703 = vst [vmem:[%s1119_s11 + $0xd0] sm:$0xff] %v661_v59  ;;  %v408_v62 = vadd.f32 %v1084_v1, %v362_v54  ;;  %v409_v63 = vadd.f32 %v1084_v1, %v363_v55  ;;  %v364_v2 = vmul.f32 %v1079_v0, %v859_v56  ;;  %v862_v3 = vunpack.c.l.bf16 %v979_v53  ;;  %v983_v59 = vld [vmem:[%s1069_s23 + $0xa0] sm:$0xff]  }
  0x4c   : > { %v662_v5 = vsel %vm574_vm11, %v532_v51, %v620_v60  ;;  %vm575_vm12 = vcmp.gt.f32.partialorder %v533_v61, 0.0  ;;  %v621_v6 = vmul.f32 %v1105_v27, %v533_v61  ;;  %v946_v7 = vunpack.c.l.bf16 %v999_v58  ;;  %v1002_v51 = vld [vmem:[%s1074_s26 + $0x98] sm:$0xff]  }
  0x4d   : > { %704 = vst [vmem:[%s1119_s11 + $0xd8] sm:$0xff] %v662_v5  ;;  %v534_v8 = vadd.f32 %v939_v47, %v408_v62  ;;  %v535_v9 = vadd.f32 %v942_v49, %v409_v63  ;;  %v410_v10 = vadd.f32 %v1084_v1, %v364_v2  ;;  %v365_v11 = vmul.f32 %v1079_v0, %v862_v3 }
  0x4e   : > { %v663_v12 = vsel %vm575_vm12, %v533_v61, %v621_v6  ;;  %v863_v13 = vunpack.c.h.bf16 %v979_v53  ;;  %v947_v14 = vunpack.c.h.bf16 %v999_v58  ;;  %v866_v15 = vunpack.c.l.bf16 %v980_v4 }
  0x4f   : > { %705 = vst [vmem:[%s1119_s11 + $0xe0] sm:$0xff] %v663_v12  ;;  %vm576_vm13 = vcmp.gt.f32.partialorder %v534_v8, 0.0  ;;  %v622_v17 = vmul.f32 %v1105_v27, %v534_v8  ;;  %vm577_vm14 = vcmp.gt.f32.partialorder %v535_v9, 0.0  ;;  %v623_v18 = vmul.f32 %v1105_v27, %v535_v9 }
  0x50   : > { %v536_v19 = vadd.f32 %v943_v57, %v410_v10  ;;  %v411_v20 = vadd.f32 %v1084_v1, %v365_v11  ;;  %v366_v21 = vmul.f32 %v1079_v0, %v863_v13  ;;  %v367_v22 = vmul.f32 %v1079_v0, %v866_v15 }
  0x51   : > { %v664_v24 = vsel %vm576_vm13, %v534_v8, %v622_v17  ;;  %v665_v25 = vsel %vm577_vm14, %v535_v9, %v623_v18  ;;  %v950_v26 = vunpack.c.l.bf16 %v1000_v16  ;;  %v867_v28 = vunpack.c.h.bf16 %v980_v4  ;;  %v1003_v9 = vld [vmem:[%s1074_s26 + $0xa0] sm:$0xff]  }
  0x52   : > { %706 = vst [vmem:[%s1119_s11 + $0xe8] sm:$0xff] %v664_v24  ;;  %vm578_vm15 = vcmp.gt.f32.partialorder %v536_v19, 0.0  ;;  %v624_v29 = vmul.f32 %v1105_v27, %v536_v19  ;;  %v537_v30 = vadd.f32 %v946_v7, %v411_v20  ;;  %v412_v31 = vadd.f32 %v1084_v1, %v366_v21 }
  0x53   : > { %707 = vst [vmem:[%s1119_s11 + $0xf0] sm:$0xff] %v665_v25  ;;  %v413_v33 = vadd.f32 %v1084_v1, %v367_v22  ;;  %v368_v34 = vmul.f32 %v1079_v0, %v867_v28  ;;  %v951_v35 = vunpack.c.h.bf16 %v1000_v16  ;;  %v870_v36 = vunpack.c.l.bf16 %v981_v23 }
  0x54   : > { %v666_v37 = vsel %vm578_vm15, %v536_v19, %v624_v29  ;;  %vm579_vm0 = vcmp.gt.f32.partialorder %v537_v30, 0.0  ;;  %v625_v38 = vmul.f32 %v1105_v27, %v537_v30  ;;  %v538_v39 = vadd.f32 %v947_v14, %v412_v31 }
  0x55   : > { %708 = vst [vmem:[%s1119_s11 + $0xf8] sm:$0xff] %v666_v37  ;;  %v539_v40 = vadd.f32 %v950_v26, %v413_v33  ;;  %v414_v41 = vadd.f32 %v1084_v1, %v368_v34  ;;  %v369_v42 = vmul.f32 %v1079_v0, %v870_v36  ;;  %v954_v43 = vunpack.c.l.bf16 %v1001_v32 }
  0x56   : > { %v667_v45 = vsel %vm579_vm0, %v537_v30, %v625_v38  ;;  %vm580_vm1 = vcmp.gt.f32.partialorder %v538_v39, 0.0  ;;  %v626_v46 = vmul.f32 %v1105_v27, %v538_v39  ;;  %v871_v47 = vunpack.c.h.bf16 %v981_v23 }
  0x57   : > { %709 = vst [vmem:[%s1119_s11 + $0x100] sm:$0xff] %v667_v45  ;;  %vm581_vm2 = vcmp.gt.f32.partialorder %v539_v40, 0.0  ;;  %v627_v48 = vmul.f32 %v1105_v27, %v539_v40  ;;  %v540_v49 = vadd.f32 %v951_v35, %v414_v41  ;;  %v415_v50 = vadd.f32 %v1084_v1, %v369_v42 }
  0x58   : > { %v668_v52 = vsel %vm580_vm1, %v538_v39, %v626_v46  ;;  %v370_v53 = vmul.f32 %v1079_v0, %v871_v47  ;;  %v955_v54 = vunpack.c.h.bf16 %v1001_v32  ;;  %v874_v55 = vunpack.c.l.bf16 %v982_v44 }
  0x59   : > { %710 = vst [vmem:[%s1119_s11 + $0x108] sm:$0xff] %v668_v52  ;;  %v669_v56 = vsel %vm581_vm2, %v539_v40, %v627_v48  ;;  %vm582_vm3 = vcmp.gt.f32.partialorder %v540_v49, 0.0  ;;  %v628_v57 = vmul.f32 %v1105_v27, %v540_v49  ;;  %v541_v58 = vadd.f32 %v954_v43, %v415_v50 }
  0x5a   : > { %711 = vst [vmem:[%s1119_s11 + $0x110] sm:$0xff] %v669_v56  ;;  %v416_v60 = vadd.f32 %v1084_v1, %v370_v53  ;;  %v371_v61 = vmul.f32 %v1079_v0, %v874_v55  ;;  %v958_v62 = vunpack.c.l.bf16 %v1002_v51  ;;  %v875_v63 = vunpack.c.h.bf16 %v982_v44 }
  0x5b   : > { %v670_v2 = vsel %vm582_vm3, %v540_v49, %v628_v57  ;;  %vm583_vm4 = vcmp.gt.f32.partialorder %v541_v58, 0.0  ;;  %v629_v3 = vmul.f32 %v1105_v27, %v541_v58  ;;  %v959_v4 = vunpack.c.h.bf16 %v1002_v51 }
  0x5c   : > { %712 = vst [vmem:[%s1119_s11 + $0x118] sm:$0xff] %v670_v2  ;;  %v542_v5 = vadd.f32 %v955_v54, %v416_v60  ;;  %v417_v6 = vadd.f32 %v1084_v1, %v371_v61  ;;  %v372_v7 = vmul.f32 %v1079_v0, %v875_v63  ;;  %v878_v8 = vunpack.c.l.bf16 %v983_v59 }
  0x5d   : > { %v671_v10 = vsel %vm583_vm4, %v541_v58, %v629_v3  ;;  %v879_v11 = vunpack.c.h.bf16 %v983_v59  ;;  %v962_v16 = vunpack.c.l.bf16 %v1003_v9  ;;  %v963_v18 = vunpack.c.h.bf16 %v1003_v9 }
  0x5e   : > { %713 = vst [vmem:[%s1119_s11 + $0x120] sm:$0xff] %v671_v10  ;;  %vm584_vm5 = vcmp.gt.f32.partialorder %v542_v5, 0.0  ;;  %v630_v12 = vmul.f32 %v1105_v27, %v542_v5  ;;  %v543_v13 = vadd.f32 %v958_v62, %v417_v6  ;;  %v418_v14 = vadd.f32 %v1084_v1, %v372_v7 }
  0x5f   : > { %v373_v15 = vmul.f32 %v1079_v0, %v878_v8  ;;  %v374_v17 = vmul.f32 %v1079_v0, %v879_v11 }
  0x60   : > { %v672_v19 = vsel %vm584_vm5, %v542_v5, %v630_v12  ;;  %vm585_vm6 = vcmp.gt.f32.partialorder %v543_v13, 0.0  ;;  %v631_v20 = vmul.f32 %v1105_v27, %v543_v13  ;;  %v544_v21 = vadd.f32 %v959_v4, %v418_v14 }
  0x61   : > { %714 = vst [vmem:[%s1119_s11 + $0x128] sm:$0xff] %v672_v19  ;;  %v419_v22 = vadd.f32 %v1084_v1, %v373_v15  ;;  %v420_v23 = vadd.f32 %v1084_v1, %v374_v17 }
  0x62   : > { %v673_v24 = vsel %vm585_vm6, %v543_v13, %v631_v20  ;;  %vm586_vm7 = vcmp.gt.f32.partialorder %v544_v21, 0.0  ;;  %v632_v25 = vmul.f32 %v1105_v27, %v544_v21 }
  0x63   : > { %715 = vst [vmem:[%s1119_s11 + $0x130] sm:$0xff] %v673_v24  ;;  %v545_v0 = vadd.f32 %v962_v16, %v419_v22  ;;  %v546_v26 = vadd.f32 %v963_v18, %v420_v23 }
  0x64   : > { %v674_v28 = vsel %vm586_vm7, %v544_v21, %v632_v25 }
  0x65   : > { %716 = vst [vmem:[%s1119_s11 + $0x138] sm:$0xff] %v674_v28  ;;  %vm587_vm8 = vcmp.gt.f32.partialorder %v545_v0, 0.0  ;;  %v633_v29 = vmul.f32 %v1105_v27, %v545_v0  ;;  %vm588_vm9 = vcmp.gt.f32.partialorder %v546_v26, 0.0  ;;  %v634_v30 = vmul.f32 %v1105_v27, %v546_v26 }
  0x67   : > { %v675_v31 = vsel %vm587_vm8, %v545_v0, %v633_v29  ;;  %v676_v32 = vsel %vm588_vm9, %v546_v26, %v634_v30 }
  0x68   : > { %717 = vst [vmem:[%s1119_s11 + $0x140] sm:$0xff] %v675_v31 }
  0x69   : > { %718 = vst [vmem:[%s1119_s11 + $0x148] sm:$0xff] %v676_v32 }
  0x6a PF: > { %s15_s18 = sadd.s32 1, %s1023_s18  }
  0x6b   : > { %p12_p4 = scmp.ge.s32.totalorder %s15_s18, 4  }
  0x6d   :  { %14 = sbr.rel (!%p12_p4) target bundleno = 1 (0x1), region = 73 }

// kernel: basic_block_face.3
= control target key start
LH: loop header
LB: loop body
LE: loop exit
PB: predicated region body
PF: predicated region fallthrough
CT: control target
= control target key end

     0   :  { %s4823_s12 = smov 0   ;;  %s7133_s0 = inlined_call_operand.vmem [shape: bf16[2,336,128], index: 0, kind: input, shape index: {}]   ;;  %s7134_s1 = inlined_call_operand.vmem [shape: bf16[9,128,128], index: 1, kind: input, shape index: {}]   ;;  %s7135_s2 = inlined_call_operand.vmem [shape: bf16[2,336,128], index: 2, kind: output, shape index: {0}]   ;;  %s7136_s3 = inlined_call_operand.vmem [shape: f32[2,8,128], index: 3, kind: output, shape index: {1}]  }
   0x1 LB: > { %s3957_s13 = sadd.s32 4294967295, %s4800_s12   ;;  %p3961_p0 = scmp.ge.s32.totalorder %s4800_s12, 1  ;;  %s4800_s12 = sphi %s4823_s12, %s14_s12  }
   0x2   : > { %p140_p1 = scmp.lt.s32.totalorder %s4800_s12, 3 }
   0x4   : > { %p141_p2 = pnand %p3961_p0, %p140_p1 }
   0x6   : > { %144 = sbr.rel (%p141_p2) target bundleno = 962 (0x3c2), region = 28 }
   0xb   : > { %v4525_v0 = vld [vmem:[%s7134_s1 + $0x78] sm:$0xff]  ;;  %p168_p3 = scmp.lt.s32.totalorder %s3957_s13, 1  ;;  %v4524_v1 = vld [vmem:[%s7134_s1 + $0x70] sm:$0xff]  ;;  %v4523_v2 = vld [vmem:[%s7134_s1 + $0x68] sm:$0xff]  ;;  %vm574_vm0 = vcmask 1040384   ;;  %vm569_vm1 = vcmask 1044480  }
   0xc   : > { %4731 = vmatpush.bf16.msra.mxu1 %v4525_v0  ;;  %4732 = vmatpush.bf16.msra.mxu2 %v4525_v0  ;;  %v4522_v3 = vld [vmem:[%s7134_s1 + $0x60] sm:$0xff]  ;;  %v4521_v4 = vld [vmem:[%s7134_s1 + $0x58] sm:$0xff]  ;;  %v4520_v6 = vld [vmem:[%s7134_s1 + $0x50] sm:$0xff]  ;;  %vm989_vm2 = vsmask.f32 256  ;;  %vm550_vm7 = vcmask 1041408  }
   0xd   : > { %703 = vmatpush.bf16.msra.mxu0 %v4525_v0  ;;  %4733 = vmatpush.bf16.msra.mxu3 %v4525_v0  ;;  %s7422_s13 = smov (!%p168_p3, %s3957_s13), 1  ;;  %v4519_v8 = vld [vmem:[%s7134_s1 + $0x48] sm:$0xff]  ;;  %v4518_v15 = vld [vmem:[%s7134_s1 + $0x40] sm:$0xff]  ;;  %v4533_v20 = vld [vmem:[%s7134_s1 + $0xb8] sm:$0xff]  ;;  %vm232_vm4 = vsmask.f32 5376 }
   0xe   : > { %s4757_s20 = smul.u32 168, %s7422_s13  ;;  %v4517_v23 = vld [vmem:[%s7134_s1 + $0x38] sm:$0xff]  ;;  %v4532_v28 = vld [vmem:[%s7134_s1 + $0xb0] sm:$0xff]  ;;  %v4531_v31 = vld [vmem:[%s7134_s1 + $0xa8] sm:$0xff]  ;;  %vm979_vm5 = vsmask.f32 4352 }
   0xf   : > { %v4549_v24 = vld [vmem:[%s7134_s1 + $0x138] sm:$0xff]  ;;  %v4516_v29 = vld [vmem:[%s7134_s1 + $0x30] sm:$0xff]  ;;  %v4515_v34 = vld [vmem:[%s7134_s1 + $0x28] sm:$0xff]  ;;  %vm350_vm6 = vsmask.f32 1280  ;;  %vm2309_vm9 = vcmask 1046528  }
  0x10   : > { %4734 = vmatpush.bf16.msra.mxu1 %v4524_v1  ;;  %4735 = vmatpush.bf16.msra.mxu2 %v4524_v1  ;;  %s4851_s25 = scalar_lea.vmem %s7133_s0, %s4757_s20  ;;  %v4548_v30 = vld [vmem:[%s7134_s1 + $0x130] sm:$0xff]  ;;  %v4547_v35 = vld [vmem:[%s7134_s1 + $0x128] sm:$0xff]  ;;  %v4530_v40 = vld [vmem:[%s7134_s1 + $0xa0] sm:$0xff]  ;;  %vm1765_vm10 = vsmask.f32 7424  ;;  %s6080_s26 = scalar_lea.vmem %s7135_s2, %s4757_s20 }
  0x11   : > { %704 = vmatpush.bf16.msra.mxu0 %v4524_v1  ;;  %4736 = vmatpush.bf16.msra.mxu3 %v4524_v1  ;;  %v4705_v5 = vld [vmem:[%s4851_s25 + $0xa0] sm:$0xff]   ;;  %v4867_v10 = vld [vmem:[%s4851_s25 + $0x28] sm:$0xff]  ;;  %v4870_v11 = vld [vmem:[%s4851_s25 + $0x50] sm:$0xff]  ;;  %vm2598_vm11 = vsmask.f32 6400  ;;  %s3964_s20 = sshll.u32 %s7422_s13, 3 }
  0x12   : > { %v4597_v7 = vunpack.c.h.b16 %v4705_v5  ;;  %v4864_v9 = vld [vmem:[%s4851_s25 + $0x20] sm:$0xff]  ;;  %v4873_v12 = vld [vmem:[%s4851_s25 + $0x58] sm:$0xff]  ;;  %v584_v17 = vrot.slane %v4867_v10, 7  ;;  %v594_v18 = vrot.slane %v4870_v11, 7  ;;  %v4508_v33 = vld [vmem:[%s4851_s25 + $0x88] sm:$0xff]  ;;  %s181_s28 = scalar_lea.vmem %s7136_s3, %s3964_s20 }
  0x13   : > { %v4876_v13 = vld [vmem:[%s4851_s25 + $0x9c] sm:$0xff]   ;;  %v582_v16 = vrot.slane %v4864_v9, 7  ;;  %v596_v19 = vrot.slane %v4873_v12, 7  ;;  %v608_v37 = vrot.slane %v4508_v33, 7  ;;  %v4928_v38 = vld [vmem:[%s4851_s25 + $0x30] sm:$0xff]  ;;  %v4977_v60 = vld [vmem:[%s4851_s25 + $0x68] sm:$0xff] }
  0x14   : > { %4737 = vmatpush.bf16.msra.mxu1 %v4523_v2  ;;  %4738 = vmatpush.bf16.msra.mxu2 %v4523_v2  ;;  %v4878_v14 = vpack.c.b16 %v4597_v7, %v4597_v7  ;;  %v570_v21 = vrot.slane %v4876_v13, 3  ;;  %v4917_v32 = vld [vmem:[%s4851_s25 + $0x80] sm:$0xff]  ;;  %v586_v45 = vrot.slane %v4928_v38, 7  ;;  %v4529_v51 = vld [vmem:[%s7134_s1 + $0x98] sm:$0xff]  ;;  %v4509_v54 = vld [vmem:[%s4851_s25 + $0x90] sm:$0xff]  ;;  %v600_v1 = vrot.slane %v4977_v60, 7 }
  0x15   : > { %705 = vmatpush.bf16.msra.mxu0 %v4523_v2  ;;  %4739 = vmatpush.bf16.msra.mxu3 %v4523_v2  ;;  %v585_v25 = vsel %vm574_vm0, %v582_v16, %v584_v17  ;;  %v597_v26 = vsel %vm574_vm0, %v594_v18, %v596_v19  ;;  %v606_v36 = vrot.slane %v4917_v32, 7  ;;  %v4931_v39 = vld [vmem:[%s4851_s25 + $0x60] sm:$0xff]  ;;  %v4541_v52 = vld [vmem:[%s7134_s1 + $0xf8] sm:$0xff]  ;;  %v4528_v56 = vld [vmem:[%s7134_s1 + $0x90] sm:$0xff]  ;;  %v610_v58 = vrot.slane %v4509_v54, 7 }
  0x16   : > { %v571_v22 = vrot.slane %v4878_v14, 3  ;;  %v4940_v42 = vld [vmem:[%s4851_s25] sm:$0xff]   ;;  %v598_v46 = vrot.slane %v4931_v39, 7  ;;  %v587_v48 = vsel %vm574_vm0, %v584_v17, %v586_v45  ;;  %v4513_v53 = vld [vmem:[%s7134_s1 + $0x18] sm:$0xff]  ;;  %v4540_v57 = vld [vmem:[%s7134_s1 + $0xf0] sm:$0xff] }
  0x17   : > { %v609_v41 = vsel %vm574_vm0, %v606_v36, %v608_v37  ;;  %v4514_v43 = vld [vmem:[%s7134_s1 + $0x20] sm:$0xff]  ;;  %v575_v47 = vrot.slane %v4940_v42, 7  ;;  %v4545_v55 = vld [vmem:[%s7134_s1 + $0x118] sm:$0xff]  ;;  %v611_v61 = vsel %vm574_vm0, %v608_v37, %v610_v58  ;;  %v4981_v62 = vld [vmem:[%s4851_s25 + $0x8] sm:$0xff]  }
  0x18   : > { %4740 = vmatpush.bf16.msra.mxu1 %v4522_v3  ;;  %4741 = vmatpush.bf16.msra.mxu2 %v4522_v3  ;;  %v572_v27 = vsel %vm569_vm1, %v570_v21, %v571_v22  ;;  %v4546_v44 = vld [vmem:[%s7134_s1 + $0x120] sm:$0xff]  ;;  %v599_v49 = vsel %vm574_vm0, %v596_v19, %v598_v46  ;;  %v4974_v59 = vld [vmem:[%s4851_s25 + $0x38] sm:$0xff]  ;;  %v4539_v63 = vld [vmem:[%s7134_s1 + $0xe8] sm:$0xff]  ;;  %v576_v2 = vrot.slane %v4981_v62, 7 }
  0x19   : > { %706 = vmatpush.bf16.msra.mxu0 %v4522_v3  ;;  %4742 = vmatpush.bf16.msra.mxu3 %v4522_v3  ;;  %v636_v50 = vsel %vm574_vm0, %v571_v22, %v575_v47  ;;  %v588_v0 = vrot.slane %v4974_v59, 7  ;;  %v4538_v7 = vld [vmem:[%s7134_s1 + $0xe0] sm:$0xff]  ;;  %v4704_v17 = vld [vmem:[%s4851_s25 + $0x98] sm:$0xff]   ;;  %v4511_v19 = vld [vmem:[%s7134_s1 + $0x8] sm:$0xff] }
  0x1a   : > { %v577_v5 = vsel %vm574_vm0, %v575_v47, %v576_v2  ;;  %v4537_v21 = vld [vmem:[%s7134_s1 + $0xd8] sm:$0xff]  ;;  %v5012_v22 = vld [vmem:[%s4851_s25 + $0x40] sm:$0xff]  ;;  %vm1069_vm3 = vmand %vm574_vm0, %vm989_vm2 }
  0x1b   : > { %v589_v3 = vsel %vm574_vm0, %v586_v45, %v588_v0  ;;  %v4526_v37 = vld [vmem:[%s7134_s1 + $0x80] sm:$0xff]  ;;  %vm551_vm8 = vmand %vm550_vm7, %vm350_vm6 }
  0x1c   : > { %4743 = vmatpush.bf16.msra.mxu1 %v4521_v4  ;;  %4744 = vmatpush.bf16.msra.mxu2 %v4521_v4  ;;  %v4534_v45 = vld [vmem:[%s7134_s1 + $0xc0] sm:$0xff] }
  0x1d   : > { %707 = vmatpush.bf16.msra.mxu0 %v4521_v4  ;;  %4745 = vmatpush.bf16.msra.mxu3 %v4521_v4  ;;  %v601_v4 = vsel %vm574_vm0, %v598_v46, %v600_v1 }
  0x20   : > { %4746 = vmatpush.bf16.msra.mxu1 %v4520_v6  ;;  %4747 = vmatpush.bf16.msra.mxu2 %v4520_v6 }
  0x21   : > { %708 = vmatpush.bf16.msra.mxu0 %v4520_v6  ;;  %4748 = vmatpush.bf16.msra.mxu3 %v4520_v6  ;;  %v4512_v6 = vld [vmem:[%s7134_s1 + $0x10] sm:$0xff] }
  0x24   : > { %4749 = vmatpush.bf16.msra.mxu1 %v4519_v8  ;;  %4750 = vmatpush.bf16.msra.mxu2 %v4519_v8 }
  0x25   : > { %709 = vmatpush.bf16.msra.mxu0 %v4519_v8  ;;  %4751 = vmatpush.bf16.msra.mxu3 %v4519_v8  ;;  %v4544_v8 = vld [vmem:[%s7134_s1 + $0x110] sm:$0xff] }
  0x28   : > { %4752 = vmatpush.bf16.msra.mxu1 %v4518_v15  ;;  %4753 = vmatpush.bf16.msra.mxu2 %v4518_v15 }
  0x29   : > { %710 = vmatpush.bf16.msra.mxu0 %v4518_v15  ;;  %4754 = vmatpush.bf16.msra.mxu3 %v4518_v15  ;;  %v4527_v15 = vld [vmem:[%s7134_s1 + $0x88] sm:$0xff] }
  0x2b   : > { %741 = vmatmul.bf16.vlgmr.msra.gmra.mxu1 %v585_v25  ;;  %771 = vmatmul.bf16.vlgmr.msra.gmra.mxu2 %v597_v26  ;;  %v5019_v25 = vld [vmem:[%s4851_s25 + $0x10] sm:$0xff] }
  0x2c   : > { %1136 = vmatpush.bf16.msrb.mxu2 %v4533_v20  ;;  %865 = vmatpush.bf16.msrb.mxu1 %v4517_v23  ;;  %v612_v20 = vrot.slane %v4704_v17, 7  ;;  %v5015_v23 = vld [vmem:[%s4851_s25 + $0x70] sm:$0xff] }
  0x2d   : > { %1609 = vmatpush.bf16.msrb.mxu0 %v4549_v24  ;;  %801 = vmatmul.bf16.vlgmr.msra.gmra.mxu3 %v609_v41  ;;  %v4536_v26 = vld [vmem:[%s7134_s1 + $0xd0] sm:$0xff]  ;;  %v5041_v41 = vshrl.u32 %v4940_v42, 16 }
  0x2e   : > { %711 = vmatmul.bf16.vlgmr.msra.gmra.mxu0 %v572_v27  ;;  %1367 = vmatpush.bf16.msrb.mxu3 %v4541_v52  ;;  %v613_v24 = vsel %vm574_vm0, %v610_v58, %v612_v20  ;;  %v590_v27 = vrot.slane %v5012_v22, 7  ;;  %v5068_v52 = vld [vmem:[%s4851_s25 + $0x18] sm:$0xff]  ;;  %v237_v20 = vshll.u32 %v4876_v13, 16 }
  0x2f   : > { %7186 = vst [vmem:[#allocation2_spill] sm:$0xff] %v5041_v41  ;;  %v990_v47 = vrot.slane %v5041_v41, 7 }
  0x30   : > { %1137 = vmatpush.bf16.msrb.mxu2 %v4532_v28  ;;  %866 = vmatpush.bf16.msrb.mxu1 %v4516_v29  ;;  %v602_v28 = vrot.slane %v5015_v23, 7  ;;  %v578_v29 = vrot.slane %v5019_v25, 7 }
  0x31   : > { %1610 = vmatpush.bf16.msrb.mxu0 %v4548_v30  ;;  %v591_v30 = vsel %vm574_vm0, %v588_v0, %v590_v27  ;;  %v4573_v0 = vld [vmem:[%s7134_s1 + $0x1f8] sm:$0xff] }
  0x32   : > { %1368 = vmatpush.bf16.msrb.mxu3 %v4540_v57  ;;  %v579_v33 = vsel %vm574_vm0, %v576_v2, %v578_v29  ;;  %v5090_v2 = vshrl.u32 %v4981_v62, 16 }
  0x34   : > { %1138 = vmatpush.bf16.msrb.mxu2 %v4531_v31  ;;  %867 = vmatpush.bf16.msrb.mxu1 %v4515_v34  ;;  %v603_v31 = vsel %vm574_vm0, %v600_v1, %v602_v28  ;;  %v4543_v34 = vld [vmem:[%s7134_s1 + $0x108] sm:$0xff]  ;;  %v4557_v1 = vld [vmem:[%s7134_s1 + $0x178] sm:$0xff]  ;;  %7188 = vst [vmem:[#allocation4_spill] sm:$0xff] %v5090_v2 }
  0x35   : > { %1611 = vmatpush.bf16.msrb.mxu0 %v4547_v35  ;;  %v4535_v35 = vld [vmem:[%s7134_s1 + $0xc8] sm:$0xff] }
  0x36   : > { %1369 = vmatpush.bf16.msrb.mxu3 %v4539_v63  ;;  %v4565_v63 = vld [vmem:[%s7134_s1 + $0x1b8] sm:$0xff] }
  0x38   : > { %1139 = vmatpush.bf16.msrb.mxu2 %v4530_v40  ;;  %868 = vmatpush.bf16.msrb.mxu1 %v4514_v43  ;;  %v242_v40 = vshrl.u32 %v4878_v14, 16  ;;  %v5044_v43 = vshll.u32 %v4940_v42, 16 }
  0x39   : > { %1612 = vmatpush.bf16.msrb.mxu0 %v4546_v44  ;;  %v4510_v44 = vld [vmem:[%s7134_s1] sm:$0xff] }
  0x3a   : > { %1370 = vmatpush.bf16.msrb.mxu3 %v4538_v7  ;;  %7187 = vst [vmem:[#allocation3_spill] sm:$0xff] %v5044_v43  ;;  %v5052_v46 = vrot.slane %v242_v40, 3 }
  0x3b   : > { %746 = vmatmul.bf16.gmra.mxu1 %v587_v48  ;;  %776 = vmatmul.bf16.gmra.mxu2 %v599_v49  ;;  %v4542_v48 = vld [vmem:[%s7134_s1 + $0x100] sm:$0xff]  ;;  %v5061_v49 = vld [vmem:[%s4851_s25 + $0x48] sm:$0xff] }
  0x3c   : > { %1140 = vmatpush.bf16.msrb.mxu2 %v4529_v51  ;;  %869 = vmatpush.bf16.msrb.mxu1 %v4513_v53  ;;  %v991_v51 = vor.u32 %v990_v47, %v5044_v43  ;;  %v592_v54 = vrot.slane %v5061_v49, 7 }
  0x3d   : > { %1613 = vmatpush.bf16.msrb.mxu0 %v4545_v55  ;;  %806 = vmatmul.bf16.gmra.mxu3 %v611_v61 }
  0x3e   : > { %716 = vmatmul.bf16.gmra.mxu0 %v636_v50  ;;  %1371 = vmatpush.bf16.msrb.mxu3 %v4537_v21  ;;  %v5064_v50 = vld [vmem:[%s4851_s25 + $0x78] sm:$0xff]  ;;  %v5071_v53 = vsel %vm1069_vm3, %v5052_v46, %v991_v51  ;;  %v593_v57 = vsel %vm574_vm0, %v590_v27, %v592_v54  ;;  %v245_v21 = vshll.u32 %v4878_v14, 16  ;;  %v4564_v51 = vld [vmem:[%s7134_s1 + $0x1b0] sm:$0xff] }
  0x3f   : > { %v604_v55 = vrot.slane %v5064_v50, 7 }
  0x40   : > { %1141 = vmatpush.bf16.msrb.mxu2 %v4528_v56  ;;  %870 = vmatpush.bf16.msrb.mxu1 %v4512_v6  ;;  %v580_v56 = vrot.slane %v5068_v52, 7  ;;  %v247_v27 = vrot.slane %v245_v21, 3 }
  0x41   : > { %1614 = vmatpush.bf16.msrb.mxu0 %v4544_v8  ;;  %v605_v58 = vsel %vm574_vm0, %v602_v28, %v604_v55  ;;  %v595_v8 = vsel %vm574_vm0, %v592_v54, %v594_v18  ;;  %v5120_v18 = vshll.u32 %v5019_v25, 16 }
  0x42   : > { %1372 = vmatpush.bf16.msrb.mxu3 %v4536_v26  ;;  %v581_v61 = vsel %vm574_vm0, %v578_v29, %v580_v56  ;;  %v583_v17 = vsel %vm574_vm0, %v580_v56, %v582_v16  ;;  %v239_v26 = vrot.slane %v237_v20, 3  ;;  %v244_v16 = vrot.slane %v242_v40, 2  ;;  %v4572_v56 = vld [vmem:[%s7134_s1 + $0x1f0] sm:$0xff] }
  0x43   : > { %7191 = vst [vmem:[#allocation7_spill] sm:$0xff] %v5120_v18  ;;  %v981_v29 = vrot.slane %v237_v20, 4  ;;  %v5184_v20 = vshrl.u32 %v4867_v10, 16 }
  0x44   : > { %1142 = vmatpush.bf16.msrb.mxu2 %v4527_v15  ;;  %871 = vmatpush.bf16.msrb.mxu1 %v4511_v19  ;;  %v607_v15 = vsel %vm574_vm0, %v604_v55, %v606_v36  ;;  %v234_v19 = vshrl.u32 %v4876_v13, 16 }
  0x45   : > { %1615 = vmatpush.bf16.msrb.mxu0 %v4543_v34  ;;  %7197 = vst [vmem:[#allocation13_spill] sm:$0xff] %v5184_v20 }
  0x46   : > { %1373 = vmatpush.bf16.msrb.mxu3 %v4535_v35  ;;  %v236_v36 = vrot.slane %v234_v19, 2  ;;  %v980_v28 = vrot.slane %v234_v19, 3 }
  0x48   : > { %1143 = vmatpush.bf16.msrb.mxu2 %v4526_v37  ;;  %872 = vmatpush.bf16.msrb.mxu1 %v4510_v44  ;;  %v982_v34 = vor.u32 %v981_v29, %v980_v28  ;;  %v5131_v44 = vshrl.u32 %v5068_v52, 16 }
  0x49   : > { %1616 = vmatpush.bf16.msrb.mxu0 %v4542_v48  ;;  %v5136_v48 = vshll.u32 %v5068_v52, 16 }
  0x4a   : > { %1374 = vmatpush.bf16.msrb.mxu3 %v4534_v45  ;;  %7192 = vst [vmem:[#allocation8_spill] sm:$0xff] %v5131_v44  ;;  %v354_v45 = vrot.slane %v5041_v41, 6 }
  0x4b   : > { %751 = vmatmul.bf16.gmra.mxu1 %v589_v3  ;;  %781 = vmatmul.bf16.gmra.mxu2 %v601_v4  ;;  %v5093_v3 = vshll.u32 %v4981_v62, 16  ;;  %v4581_v4 = vld [vmem:[%s7134_s1 + $0x238] sm:$0xff]  ;;  %7193 = vst [vmem:[#allocation9_spill] sm:$0xff] %v5136_v48 }
  0x4c   : > { %2153 = vmatpush.bf16.msra.mxu2 %v4565_v63  ;;  %1923 = vmatpush.bf16.msra.mxu1 %v4557_v1  ;;  %v5161_v63 = vshrl.u32 %v4864_v9, 16 }
  0x4d   : > { %811 = vmatmul.bf16.gmra.mxu3 %v613_v24  ;;  %7189 = vst [vmem:[#allocation5_spill] sm:$0xff] %v5093_v3  ;;  %2776 = vmatpush.bf16.msra.mxu0 %v4581_v4  ;;  %v5117_v24 = vshrl.u32 %v5019_v25, 16  ;;  %v365_v1 = vrot.slane %v5093_v3, 7  ;;  %v5166_v4 = vshll.u32 %v4864_v9, 16 }
  0x4e   : > { %721 = vmatmul.bf16.gmra.mxu0 %v577_v5  ;;  %2442 = vmatpush.bf16.msra.mxu3 %v4573_v0  ;;  %v992_v5 = vrot.slane %v5090_v2, 7  ;;  %7194 = vst [vmem:[#allocation10_spill] sm:$0xff] %v5161_v63  ;;  %v362_v0 = vrot.slane %v5090_v2, 6 }
  0x4f   : > { %7190 = vst [vmem:[#allocation6_spill] sm:$0xff] %v5117_v24  ;;  %v995_v32 = vrot.slane %v5117_v24, 7 }
  0x50   : > { %v993_v6 = vor.u32 %v992_v5, %v5093_v3  ;;  %2154 = vmatpush.bf16.msra.mxu2 %v4564_v51  ;;  %7195 = vst [vmem:[#allocation11_spill] sm:$0xff] %v5166_v4 }
  0x51   : > { %v996_v13 = vor.u32 %v995_v32, %v5120_v18 }
  0x52   : > { %v5101_v7 = vsel %vm989_vm2, %v990_v47, %v993_v6  ;;  %v357_v47 = vrot.slane %v5044_v43, 7  ;;  %2443 = vmatpush.bf16.msra.mxu3 %v4572_v56 }
  0x53   : > { %v5125_v14 = vsel %vm989_vm2, %v992_v5, %v996_v13  ;;  %v1001_v5 = vrot.slane %v5161_v63, 7 }
  0x54   : > { %v358_v54 = vor.u32 %v357_v47, %v354_v45  ;;  %v380_v45 = vrot.slane %v5131_v44, 6  ;;  %v383_v47 = vrot.slane %v5136_v48, 7 }
  0x5b   : > { %756 = vmatmul.bf16.gmra.mxu1 %v591_v30  ;;  %786 = vmatmul.bf16.gmra.mxu2 %v603_v31  ;;  %v984_v30 = vrot.slane %v245_v21, 4  ;;  %v240_v31 = vor.u32 %v239_v26, %v236_v36  ;;  %v374_v36 = vrot.slane %v5120_v18, 7  ;;  %v5191_v26 = vshll.u32 %v4867_v10, 16 }
  0x5d   : > { %1375 = vmatmul.bf16.vlgmr.msrb.gmra.mxu3 %v5071_v53  ;;  %v985_v35 = vor.u32 %v984_v30, %v5052_v46  ;;  %v998_v46 = vrot.slane %v5131_v44, 7  ;;  %7198 = vst [vmem:[#allocation14_spill] sm:$0xff] %v5191_v26 }
  0x5e   : > { %726 = vmatmul.bf16.gmra.mxu0 %v579_v33  ;;  %v248_v33 = vor.u32 %v247_v27, %v244_v16  ;;  %v1004_v16 = vrot.slane %v5184_v20, 7 }
  0x5f   : > { %v986_v40 = vsel %vm979_vm5, %v982_v34, %v985_v35  ;;  %v4563_v35 = vld [vmem:[%s7134_s1 + $0x1a8] sm:$0xff] }
  0x60   : > { %v249_v37 = vsel %vm232_vm4, %v240_v31, %v248_v33  ;;  %2155 = vmatpush.bf16.msra.mxu2 %v4563_v35 }
  0x6b   : > { %761 = vmatmul.bf16.gmra.mxu1 %v593_v57  ;;  %791 = vmatmul.bf16.gmra.mxu2 %v605_v58  ;;  %v552_v57 = vsel %vm551_vm8, %v248_v33, %v358_v54  ;;  %v4556_v58 = vld [vmem:[%s7134_s1 + $0x170] sm:$0xff] }
  0x6c   : > { %1924 = vmatpush.bf16.msra.mxu1 %v4556_v58 }
  0x6d   : > { %1380 = vmatmul.bf16.gmra.mxu3 %v5101_v7 }
  0x6e   : > { %731 = vmatmul.bf16.gmra.mxu0 %v581_v61  ;;  %v4580_v61 = vld [vmem:[%s7134_s1 + $0x230] sm:$0xff] }
  0x6f   : > { %2777 = vmatpush.bf16.msra.mxu0 %v4580_v61 }
  0x7b   : > { %766 = vmatmul.bf16.gmra.mxu1 %v595_v8  ;;  %796 = vmatmul.bf16.gmra.mxu2 %v607_v15 }
  0x7d   : > { %1385 = vmatmul.bf16.gmra.mxu3 %v5125_v14 }
  0x7e   : > { %736 = vmatmul.bf16.gmra.mxu0 %v583_v17 }
  0x8b   : > { %873 = vmatmul.bf16.vlgmr.msrb.gmra.mxu1 %v249_v37  ;;  %1144 = vmatmul.bf16.vlgmr.msrb.gmra.mxu2 %v986_v40  ;;  %v5218_v37 = vshrl.u32 %v4928_v38, 16 }
  0x8d   : > { %7202 = vst [vmem:[#allocation18_spill] sm:$0xff] %v5218_v37  ;;  %v1007_v51 = vrot.slane %v5218_v37, 7 }
  0x8e   : > { %1617 = vmatmul.bf16.vlgmr.msrb.gmra.mxu0 %v4940_v42  ;;  %v999_v42 = vor.u32 %v998_v46, %v5136_v48 }
  0x90   : > { %v5144_v55 = vsel %vm989_vm2, %v995_v32, %v999_v42  ;;  %v371_v32 = vrot.slane %v5117_v24, 6 }
  0x91   : > { %1390 = vmatmul.bf16.gmra.mxu3 %v5144_v55 }
  0x9b   : > { %878 = vmatmul.bf16.gmra.mxu1 %v552_v57  ;;  %1149 = vmatmul.bf16.gmra.mxu2 %v5071_v53  ;;  %v1002_v53 = vor.u32 %v1001_v5, %v5166_v4  ;;  %v384_v57 = vor.u32 %v383_v47, %v380_v45 }
  0x9d   : > { %v5171_v6 = vsel %vm989_vm2, %v998_v46, %v1002_v53  ;;  %v4579_v53 = vld [vmem:[%s7134_s1 + $0x228] sm:$0xff] }
  0x9e   : > { %1622 = vmatmul.bf16.gmra.mxu0 %v4981_v62  ;;  %v366_v62 = vor.u32 %v365_v1, %v362_v0 }
  0x9f   : > { %2778 = vmatpush.bf16.msra.mxu0 %v4579_v53 }
  0xa0   : > { %v367_v15 = vsel %vm350_vm6, %v358_v54, %v366_v62  ;;  %v4555_v54 = vld [vmem:[%s7134_s1 + $0x168] sm:$0xff] }
  0xa1   : > { %1395 = vmatmul.bf16.gmra.mxu3 %v5171_v6  ;;  %1925 = vmatpush.bf16.msra.mxu1 %v4555_v54 }
  0xa8   : > { %v5174_v8 = vpop.f32.mrf.mxu1 }
  0xab   : > { %v5177_v17 = vpop.f32.mrf.mxu0  ;;  %883 = vmatmul.bf16.gmra.mxu1 %v367_v15  ;;  %1154 = vmatmul.bf16.gmra.mxu2 %v5101_v7  ;;  %v375_v7 = vor.u32 %v374_v36, %v371_v32  ;;  %v5260_v32 = vshrl.u32 %v4974_v59, 16 }
  0xad   : > { %v376_v13 = vsel %vm350_vm6, %v366_v62, %v375_v7  ;;  %v385_v1 = vsel %vm350_vm6, %v375_v7, %v384_v57  ;;  %7208 = vst [vmem:[#allocation24_spill] sm:$0xff] %v5260_v32 }
  0xae   : > { %1627 = vmatmul.bf16.gmra.mxu0 %v5019_v25  ;;  %v5181_v19 = vpop.f32.mrf.mxu2  ;;  %v1005_v25 = vor.u32 %v1004_v16, %v5191_v26 }
  0xaf   : > { %7196 = vst [vmem:[#allocation12_spill] sm:$0xff] %v5181_v19 }
  0xb0   : > { %v5186_v21 = vpop.f32.mrf.mxu1  ;;  %v5198_v28 = vsel %vm989_vm2, %v1001_v5, %v1005_v25  ;;  %v5206_v31 = vpop.f32.mrf.mxu3  ;;  %v392_v25 = vrot.slane %v5166_v4, 7 }
  0xb1   : > { %1400 = vmatmul.bf16.gmra.mxu3 %v5198_v28  ;;  %7200 = vst [vmem:[#allocation16_spill] sm:$0xff] %v5206_v31 }
  0xb3   : > { %v5194_v27 = vpop.f32.mrf.mxu0 }
  0xb6   : > { %v5201_v29 = vpop.f32.mrf.mxu2 }
  0xb7   : > { %7199 = vst [vmem:[#allocation15_spill] sm:$0xff] %v5201_v29 }
  0xb8   : > { %v5203_v30 = vpop.f32.mrf.mxu1  ;;  %v5224_v46 = vpop.f32.mrf.mxu3 }
  0xb9   : > { %7203 = vst [vmem:[#allocation19_spill] sm:$0xff] %v5224_v46 }
  0xbb   : > { %v5208_v33 = vpop.f32.mrf.mxu0  ;;  %888 = vmatmul.bf16.gmra.mxu1 %v376_v13  ;;  %1159 = vmatmul.bf16.gmra.mxu2 %v5125_v14  ;;  %v5230_v14 = vshll.u32 %v4928_v38, 16  ;;  %v5269_v13 = vshll.u32 %v4974_v59, 16 }
  0xbd   : > { %7204 = vst [vmem:[#allocation20_spill] sm:$0xff] %v5230_v14  ;;  %v1008_v56 = vor.u32 %v1007_v51, %v5230_v14 }
  0xbe   : > { %1632 = vmatmul.bf16.gmra.mxu0 %v5068_v52  ;;  %v5212_v34 = vpop.f32.mrf.mxu2  ;;  %v4571_v52 = vld [vmem:[%s7134_s1 + $0x1e8] sm:$0xff]  ;;  %7210 = vst [vmem:[#allocation26_spill] sm:$0xff] %v5269_v13 }
  0xbf   : > { %7201 = vst [vmem:[#allocation17_spill] sm:$0xff] %v5212_v34  ;;  %2444 = vmatpush.bf16.msra.mxu3 %v4571_v52  ;;  %v5240_v58 = vsel %vm989_vm2, %v1004_v16, %v1008_v56  ;;  %v389_v16 = vrot.slane %v5161_v63, 6 }
  0xc0   : > { %v5220_v40 = vpop.f32.mrf.mxu1  ;;  %v5248_v5 = vpop.f32.mrf.mxu3 }
  0xc1   : > { %1405 = vmatmul.bf16.gmra.mxu3 %v5240_v58  ;;  %7206 = vst [vmem:[#allocation22_spill] sm:$0xff] %v5248_v5  ;;  %v393_v45 = vor.u32 %v392_v25, %v389_v16 }
  0xc3   : > { %v5233_v42 = vpop.f32.mrf.mxu0  ;;  %v394_v56 = vsel %vm350_vm6, %v384_v57, %v393_v45  ;;  %v401_v57 = vrot.slane %v5191_v26, 7 }
  0xc6   : > { %v5243_v61 = vpop.f32.mrf.mxu2 }
  0xc7   : > { %7205 = vst [vmem:[#allocation21_spill] sm:$0xff] %v5243_v61 }
  0xc8   : > { %v5245_v0 = vpop.f32.mrf.mxu1  ;;  %v5266_v7 = vpop.f32.mrf.mxu3 }
  0xc9   : > { %7209 = vst [vmem:[#allocation25_spill] sm:$0xff] %v5266_v7 }
  0xcb   : > { %v5253_v62 = vpop.f32.mrf.mxu0  ;;  %893 = vmatmul.bf16.gmra.mxu1 %v385_v1  ;;  %1164 = vmatmul.bf16.gmra.mxu2 %v5144_v55  ;;  %v1010_v55 = vrot.slane %v5260_v32, 7 }
  0xce   : > { %1637 = vmatmul.bf16.gmra.mxu0 %v4864_v9  ;;  %v5257_v15 = vpop.f32.mrf.mxu2  ;;  %v1011_v9 = vor.u32 %v1010_v55, %v5269_v13 }
  0xcf   : > { %7207 = vst [vmem:[#allocation23_spill] sm:$0xff] %v5257_v15 }
  0xd0   : > { %v5262_v36 = vpop.f32.mrf.mxu1  ;;  %v5276_v47 = vsel %vm989_vm2, %v1007_v51, %v1011_v9  ;;  %v5284_v1 = vpop.f32.mrf.mxu3  ;;  %v5293_v51 = vshrl.u32 %v5012_v22, 16  ;;  %v398_v9 = vrot.slane %v5184_v20, 6 }
  0xd1   : > { %1410 = vmatmul.bf16.gmra.mxu3 %v5276_v47  ;;  %7212 = vst [vmem:[#allocation28_spill] sm:$0xff] %v5284_v1  ;;  %v5302_v1 = vshll.u32 %v5012_v22, 16 }
  0xd2   : > { %7214 = vst [vmem:[#allocation30_spill] sm:$0xff] %v5293_v51  ;;  %v402_v5 = vor.u32 %v401_v57, %v398_v9  ;;  %v5335_v57 = vshrl.u32 %v5061_v49, 16 }
  0xd3   : > { %v5272_v35 = vpop.f32.mrf.mxu0  ;;  %7216 = vst [vmem:[#allocation32_spill] sm:$0xff] %v5302_v1 }
  0xd6   : > { %v5279_v52 = vpop.f32.mrf.mxu2 }
  0xd7   : > { %7211 = vst [vmem:[#allocation27_spill] sm:$0xff] %v5279_v52  ;;  %v4562_v52 = vld [vmem:[%s7134_s1 + $0x1a0] sm:$0xff] }
  0xd8   : > { %v5281_v54 = vpop.f32.mrf.mxu1  ;;  %v5299_v7 = vpop.f32.mrf.mxu3  ;;  %2156 = vmatpush.bf16.msra.mxu2 %v4562_v52  ;;  %v1016_v52 = vrot.slane %v5335_v57, 7 }
  0xd9   : > { %7215 = vst [vmem:[#allocation31_spill] sm:$0xff] %v5299_v7  ;;  %v403_v7 = vsel %vm350_vm6, %v393_v45, %v402_v5  ;;  %v4554_v45 = vld [vmem:[%s7134_s1 + $0x160] sm:$0xff] }
  0xda   : > { %1926 = vmatpush.bf16.msra.mxu1 %v4554_v45  ;;  %v4578_v45 = vld [vmem:[%s7134_s1 + $0x220] sm:$0xff] }
  0xdb   : > { %v5286_v53 = vpop.f32.mrf.mxu0  ;;  %898 = vmatmul.bf16.gmra.mxu1 %v394_v56  ;;  %1169 = vmatmul.bf16.gmra.mxu2 %v5171_v6  ;;  %v1013_v6 = vrot.slane %v5293_v51, 7 }
  0xdc   : > { %2779 = vmatpush.bf16.msra.mxu0 %v4578_v45 }
  0xde   : > { %1642 = vmatmul.bf16.gmra.mxu0 %v4867_v10  ;;  %v5290_v16 = vpop.f32.mrf.mxu2  ;;  %v1014_v10 = vor.u32 %v1013_v6, %v5302_v1 }
  0xdf   : > { %7213 = vst [vmem:[#allocation29_spill] sm:$0xff] %v5290_v16 }
  0xe0   : > { %v5295_v25 = vpop.f32.mrf.mxu1  ;;  %v5309_v46 = vsel %vm989_vm2, %v1010_v55, %v1014_v10  ;;  %v5317_v20 = vpop.f32.mrf.mxu3  ;;  %v4570_v55 = vld [vmem:[%s7134_s1 + $0x1e0] sm:$0xff]  ;;  %v410_v10 = vrot.slane %v5230_v14, 7 }
  0xe1   : > { %1415 = vmatmul.bf16.gmra.mxu3 %v5309_v46 }
  0xe2   : > { %2445 = vmatpush.bf16.msra.mxu3 %v4570_v55 }
  0xe3   : > { %v5305_v56 = vpop.f32.mrf.mxu0 }
  0xe6   : > { %v5312_v31 = vpop.f32.mrf.mxu2 }
  0xe7   : > { %7217 = vst [vmem:[#allocation33_spill] sm:$0xff] %v5312_v31 }
  0xe8   : > { %v5314_v26 = vpop.f32.mrf.mxu1  ;;  %v5341_v31 = vpop.f32.mrf.mxu3 }
  0xeb   : > { %v5319_v16 = vpop.f32.mrf.mxu0  ;;  %903 = vmatmul.bf16.gmra.mxu1 %v403_v7  ;;  %1174 = vmatmul.bf16.gmra.mxu2 %v5198_v28  ;;  %v407_v28 = vrot.slane %v5218_v37, 6 }
  0xed   : > { %v411_v4 = vor.u32 %v410_v10, %v407_v28  ;;  %v416_v10 = vrot.slane %v5260_v32, 6 }
  0xee   : > { %1647 = vmatmul.bf16.gmra.mxu0 %v4928_v38  ;;  %v5332_v9 = vpop.f32.mrf.mxu2  ;;  %v5344_v38 = vshll.u32 %v5061_v49, 16 }
  0xef   : > { %7218 = vst [vmem:[#allocation34_spill] sm:$0xff] %v5332_v9  ;;  %v412_v15 = vsel %vm350_vm6, %v402_v5, %v411_v4  ;;  %v419_v5 = vrot.slane %v5269_v13, 7 }
  0xf0   : > { %v5337_v7 = vpop.f32.mrf.mxu1  ;;  %v1017_v9 = vor.u32 %v1016_v52, %v5344_v38  ;;  %v5362_v61 = vpop.f32.mrf.mxu3 }
  0xf2   : > { %v5354_v37 = vsel %vm989_vm2, %v1013_v6, %v1017_v9  ;;  %v5371_v6 = vshrl.u32 %v4870_v11, 16 }
  0xf3   : > { %v5347_v55 = vpop.f32.mrf.mxu0  ;;  %1420 = vmatmul.bf16.gmra.mxu3 %v5354_v37 }
  0xf6   : > { %v5357_v14 = vpop.f32.mrf.mxu2 }
  0xf7   : > { %7219 = vst [vmem:[#allocation35_spill] sm:$0xff] %v5357_v14  ;;  %v5380_v14 = vshll.u32 %v4870_v11, 16 }
  0xf8   : > { %v5359_v63 = vpop.f32.mrf.mxu1  ;;  %v5377_v45 = vpop.f32.mrf.mxu3 }
  0xfb   : > { %v5364_v48 = vpop.f32.mrf.mxu0  ;;  %908 = vmatmul.bf16.gmra.mxu1 %v412_v15  ;;  %1179 = vmatmul.bf16.gmra.mxu2 %v5240_v58  ;;  %v1019_v58 = vrot.slane %v5371_v6, 7 }
  0xfe   : > { %1652 = vmatmul.bf16.gmra.mxu0 %v4974_v59  ;;  %v5368_v28 = vpop.f32.mrf.mxu2  ;;  %v1020_v59 = vor.u32 %v1019_v58, %v5380_v14 }
  0xff   : > { %7220 = vst [vmem:[#allocation36_spill] sm:$0xff] %v5368_v28  ;;  %v420_v28 = vor.u32 %v419_v5, %v416_v10 }
 0x100   : > { %v5373_v9 = vpop.f32.mrf.mxu1  ;;  %v5387_v44 = vsel %vm989_vm2, %v1016_v52, %v1020_v59  ;;  %v5393_v29 = vpop.f32.mrf.mxu3  ;;  %v5399_v52 = vshrl.u32 %v4873_v12, 16 }
 0x101   : > { %7221 = vst [vmem:[#allocation37_spill] sm:$0xff] %v5373_v9  ;;  %v421_v34 = vsel %vm350_vm6, %v411_v4, %v420_v28  ;;  %v428_v4 = vrot.slane %v5302_v1, 7 }
 0x103   : > { %v5383_v15 = vpop.f32.mrf.mxu0  ;;  %1425 = vmatmul.bf16.gmra.mxu3 %v5387_v44 }
 0x106   : > { %v5390_v32 = vpop.f32.mrf.mxu2 }
 0x107   : > { %7222 = vst [vmem:[#allocation38_spill] sm:$0xff] %v5390_v32  ;;  %v425_v32 = vrot.slane %v5293_v51, 6 }
 0x108   : > { %v874_v13 = vpop.f32.mrf.mxu1  ;;  %v5403_v24 = vpop.f32.mrf.mxu3 }
 0x109   : > { %v875_v10 = vadd.f32 %v874_v13, %v5177_v17  ;;  %v4561_v13 = vld [vmem:[%s7134_s1 + $0x198] sm:$0xff]  ;;  %v429_v51 = vor.u32 %v428_v4, %v425_v32 }
 0x10a   : > { %2157 = vmatpush.bf16.msra.mxu2 %v4561_v13 }
 0x10b   : > { %v1618_v41 = vpop.f32.mrf.mxu0  ;;  %913 = vmatmul.bf16.gmra.mxu1 %v421_v34  ;;  %1184 = vmatmul.bf16.gmra.mxu2 %v5276_v47  ;;  %v5406_v34 = vshll.u32 %v4873_v12, 16  ;;  %v1022_v47 = vrot.slane %v5399_v52, 7  ;;  %v430_v19 = vsel %vm350_vm6, %v420_v28, %v429_v51 }
 0x10e   : > { %1657 = vmatmul.bf16.gmra.mxu0 %v5012_v22  ;;  %v1145_v5 = vpop.f32.mrf.mxu2 }
 0x10f   : > { %v1250_v59 = vadd.f32 %v1145_v5, %v875_v10  ;;  %v4569_v10 = vld [vmem:[%s7134_s1 + $0x1d8] sm:$0xff]  ;;  %v1023_v5 = vor.u32 %v1022_v47, %v5406_v34 }
 0x110   : > { %v876_v18 = vpop.f32.mrf.mxu1  ;;  %2446 = vmatpush.bf16.msra.mxu3 %v4569_v10 }
 0x111   : > { %v1481_v22 = vadd.f32 %v5317_v20, %v1250_v59  ;;  %v5420_v2 = vsel %vm989_vm2, %v1019_v58, %v1023_v5  ;;  %v877_v20 = vadd.f32 %v876_v18, %v5194_v27  ;;  %v4577_v27 = vld [vmem:[%s7134_s1 + $0x218] sm:$0xff]  ;;  %v437_v58 = vrot.slane %v5344_v38, 7 }
 0x112   : > { %2780 = vmatpush.bf16.msra.mxu0 %v4577_v27 }
 0x113   : > { %v1620_v17 = vpop.f32.mrf.mxu0  ;;  %v5417_v1 = vadd.f32 %v1618_v41, %v1481_v22  ;;  %1430 = vmatmul.bf16.gmra.mxu3 %v5420_v2  ;;  %v4553_v41 = vld [vmem:[%s7134_s1 + $0x158] sm:$0xff] }
 0x114   : > { %v5425_v9 = vpop.f32.mrf.mxu3  ;;  %1927 = vmatpush.bf16.msra.mxu1 %v4553_v41 }
 0x116   : > { %v1147_v59 = vpop.f32.mrf.mxu2 }
 0x117   : > { %v1251_v3 = vadd.f32 %v1147_v59, %v877_v20 }
 0x118   : > { %v879_v43 = vpop.f32.mrf.mxu1 }
 0x119   : > { %v1482_v13 = vadd.f32 %v5341_v31, %v1251_v3  ;;  %v880_v32 = vadd.f32 %v879_v43, %v5208_v33  ;;  %v5440_v31 = vshrl.u32 %v4931_v39, 16 }
 0x11b   : > { %v1623_v10 = vpop.f32.mrf.mxu0  ;;  %918 = vmatmul.bf16.gmra.mxu1 %v430_v19  ;;  %1189 = vmatmul.bf16.gmra.mxu2 %v5309_v46  ;;  %v5432_v18 = vadd.f32 %v1620_v17, %v1482_v13  ;;  %v434_v46 = vrot.slane %v5335_v57, 6  ;;  %v1025_v22 = vrot.slane %v5440_v31, 7 }
 0x11c   : > { %v5444_v4 = vpop.f32.mrf.mxu3 }
 0x11d   : > { %7223 = vst [vmem:[#allocation39_spill] sm:$0xff] %v5432_v18  ;;  %v438_v20 = vor.u32 %v437_v58, %v434_v46  ;;  %v443_v58 = vrot.slane %v5371_v6, 6 }
 0x11e   : > { %1662 = vmatmul.bf16.gmra.mxu0 %v5061_v49  ;;  %v1150_v3 = vpop.f32.mrf.mxu2  ;;  %v5447_v49 = vshll.u32 %v4931_v39, 16 }
 0x11f   : > { %v1252_v28 = vadd.f32 %v1150_v3, %v880_v32  ;;  %v439_v3 = vsel %vm350_vm6, %v429_v51, %v438_v20 }
 0x120   : > { %v881_v19 = vpop.f32.mrf.mxu1  ;;  %v1026_v17 = vor.u32 %v1025_v22, %v5447_v49 }
 0x121   : > { %v1483_v43 = vadd.f32 %v5362_v61, %v1252_v28  ;;  %v882_v13 = vadd.f32 %v881_v19, %v5233_v42  ;;  %v5469_v19 = vshrl.u32 %v4977_v60, 16 }
 0x122   : > { %v5455_v59 = vsel %vm989_vm2, %v1022_v47, %v1026_v17 }
 0x123   : > { %v1625_v33 = vpop.f32.mrf.mxu0  ;;  %v5452_v5 = vadd.f32 %v1623_v10, %v1483_v43  ;;  %1435 = vmatmul.bf16.gmra.mxu3 %v5455_v59 }
 0x124   : > { %v5460_v18 = vpop.f32.mrf.mxu3 }
 0x126   : > { %v1152_v41 = vpop.f32.mrf.mxu2 }
 0x127   : > { %v1253_v27 = vadd.f32 %v1152_v41, %v882_v13 }
 0x128   : > { %v884_v32 = vpop.f32.mrf.mxu1 }
 0x129   : > { %v1484_v61 = vadd.f32 %v5377_v45, %v1253_v27  ;;  %v885_v42 = vadd.f32 %v884_v32, %v5253_v62  ;;  %v446_v45 = vrot.slane %v5380_v14, 7 }
 0x12b   : > { %v1628_v28 = vpop.f32.mrf.mxu0  ;;  %923 = vmatmul.bf16.gmra.mxu1 %v439_v3  ;;  %1194 = vmatmul.bf16.gmra.mxu2 %v5354_v37  ;;  %v5464_v10 = vadd.f32 %v1625_v33, %v1484_v61  ;;  %v5476_v37 = vshll.u32 %v4977_v60, 16  ;;  %v1028_v33 = vrot.slane %v5469_v19, 7  ;;  %v447_v41 = vor.u32 %v446_v45, %v443_v58 }
 0x12c   : > { %v5473_v43 = vpop.f32.mrf.mxu3  ;;  %v452_v45 = vrot.slane %v5399_v52, 6 }
 0x12d   : > { %7224 = vst [vmem:[#allocation40_spill] sm:$0xff] %v5464_v10  ;;  %v1029_v17 = vor.u32 %v1028_v33, %v5476_v37 }
 0x12e   : > { %1667 = vmatmul.bf16.gmra.mxu0 %v4870_v11  ;;  %v1155_v47 = vpop.f32.mrf.mxu2 }
 0x12f   : > { %v1254_v46 = vadd.f32 %v1155_v47, %v885_v42  ;;  %v5484_v27 = vsel %vm989_vm2, %v1025_v22, %v1029_v17  ;;  %v448_v47 = vsel %vm350_vm6, %v438_v20, %v447_v41  ;;  %v5501_v20 = vshrl.u32 %v5015_v23, 16 }
 0x130   : > { %v886_v51 = vpop.f32.mrf.mxu1 }
 0x131   : > { %v1485_v11 = vadd.f32 %v5393_v29, %v1254_v46  ;;  %v887_v32 = vadd.f32 %v886_v51, %v5272_v35  ;;  %v4560_v35 = vld [vmem:[%s7134_s1 + $0x190] sm:$0xff] }
 0x132   : > { %2158 = vmatpush.bf16.msra.mxu2 %v4560_v35 }
 0x133   : > { %v1630_v62 = vpop.f32.mrf.mxu0  ;;  %v5481_v13 = vadd.f32 %v1628_v28, %v1485_v11  ;;  %1440 = vmatmul.bf16.gmra.mxu3 %v5484_v27 }
 0x134   : > { %v5489_v10 = vpop.f32.mrf.mxu3 }
 0x136   : > { %v1157_v3 = vpop.f32.mrf.mxu2 }
 0x137   : > { %v1255_v61 = vadd.f32 %v1157_v3, %v887_v32  ;;  %v4568_v32 = vld [vmem:[%s7134_s1 + $0x1d0] sm:$0xff] }
 0x138   : > { %v889_v42 = vpop.f32.mrf.mxu1  ;;  %v4552_v3 = vld [vmem:[%s7134_s1 + $0x150] sm:$0xff]  ;;  %2447 = vmatpush.bf16.msra.mxu3 %v4568_v32 }
 0x139   : > { %v1486_v29 = vadd.f32 %v5403_v24, %v1255_v61  ;;  %v890_v22 = vadd.f32 %v889_v42, %v5286_v53  ;;  %1928 = vmatpush.bf16.msra.mxu1 %v4552_v3 }
 0x13b   : > { %v1633_v46 = vpop.f32.mrf.mxu0  ;;  %928 = vmatmul.bf16.gmra.mxu1 %v448_v47  ;;  %1199 = vmatmul.bf16.gmra.mxu2 %v5387_v44  ;;  %v5493_v28 = vadd.f32 %v1630_v62, %v1486_v29  ;;  %v455_v44 = vrot.slane %v5406_v34, 7  ;;  %v1031_v62 = vrot.slane %v5501_v20, 7 }
 0x13c   : > { %v5505_v11 = vpop.f32.mrf.mxu3 }
 0x13d   : > { %7225 = vst [vmem:[#allocation41_spill] sm:$0xff] %v5493_v28  ;;  %v456_v47 = vor.u32 %v455_v44, %v452_v45  ;;  %v461_v44 = vrot.slane %v5440_v31, 6 }
 0x13e   : > { %1672 = vmatmul.bf16.gmra.mxu0 %v4873_v12  ;;  %v1160_v51 = vpop.f32.mrf.mxu2  ;;  %v5508_v12 = vshll.u32 %v5015_v23, 16 }
 0x13f   : > { %v1256_v24 = vadd.f32 %v1160_v51, %v890_v22 }
 0x140   : > { %v891_v58 = vpop.f32.mrf.mxu1  ;;  %v1032_v61 = vor.u32 %v1031_v62, %v5508_v12 }
 0x141   : > { %v1487_v53 = vadd.f32 %v5425_v9, %v1256_v24  ;;  %v892_v9 = vadd.f32 %v891_v58, %v5305_v56  ;;  %v457_v24 = vsel %vm350_vm6, %v447_v41, %v456_v47  ;;  %v5539_v58 = vshrl.u32 %v5064_v50, 16 }
 0x142   : > { %v5522_v29 = vsel %vm989_vm2, %v1028_v33, %v1032_v61 }
 0x143   : > { %v1635_v17 = vpop.f32.mrf.mxu0  ;;  %v5519_v42 = vadd.f32 %v1633_v46, %v1487_v53  ;;  %1445 = vmatmul.bf16.gmra.mxu3 %v5522_v29  ;;  %v4576_v46 = vld [vmem:[%s7134_s1 + $0x210] sm:$0xff]  ;;  %v464_v53 = vrot.slane %v5447_v49, 7 }
 0x144   : > { %v5527_v28 = vpop.f32.mrf.mxu3  ;;  %2781 = vmatpush.bf16.msra.mxu0 %v4576_v46 }
 0x146   : > { %v1162_v35 = vpop.f32.mrf.mxu2 }
 0x147   : > { %v1257_v22 = vadd.f32 %v1162_v35, %v892_v9 }
 0x148   : > { %v894_v51 = vpop.f32.mrf.mxu1 }
 0x149   : > { %v1488_v32 = vadd.f32 %v5444_v4, %v1257_v22  ;;  %v895_v33 = vadd.f32 %v894_v51, %v5319_v16  ;;  %v465_v22 = vor.u32 %v464_v53, %v461_v44  ;;  %v5568_v44 = vld [vmem:[%s4851_s25 + $0x80] sm:$0xff] }
 0x14a   : > { %v5571_v53 = vshrl.u32 %v5568_v44, 16 }
 0x14b   : > { %v1638_v3 = vpop.f32.mrf.mxu0  ;;  %933 = vmatmul.bf16.gmra.mxu1 %v457_v24  ;;  %1204 = vmatmul.bf16.gmra.mxu2 %v5420_v2  ;;  %v5534_v56 = vadd.f32 %v1635_v17, %v1488_v32  ;;  %v5546_v2 = vshll.u32 %v5064_v50, 16 }
 0x14c   : > { %v5543_v61 = vpop.f32.mrf.mxu3  ;;  %7228 = vst [vmem:[#allocation44_spill] sm:$0xff] %v5571_v53 }
 0x14e   : > { %1677 = vmatmul.bf16.gmra.mxu0 %v4931_v39  ;;  %v1165_v41 = vpop.f32.mrf.mxu2  ;;  %v1034_v39 = vrot.slane %v5539_v58, 7 }
 0x14f   : > { %v1258_v4 = vadd.f32 %v1165_v41, %v895_v33  ;;  %v466_v41 = vsel %vm350_vm6, %v456_v47, %v465_v22 }
 0x150   : > { %v896_v45 = vpop.f32.mrf.mxu1  ;;  %v1035_v9 = vor.u32 %v1034_v39, %v5546_v2 }
 0x151   : > { %v1489_v16 = vadd.f32 %v5460_v18, %v1258_v4  ;;  %v897_v24 = vadd.f32 %v896_v45, %v5347_v55 }
 0x152   : > { %v5554_v51 = vsel %vm989_vm2, %v1031_v62, %v1035_v9  ;;  %v473_v9 = vrot.slane %v5476_v37, 7 }
 0x153   : > { %v1640_v17 = vpop.f32.mrf.mxu0  ;;  %v5551_v35 = vadd.f32 %v1638_v3, %v1489_v16  ;;  %1450 = vmatmul.bf16.gmra.mxu3 %v5554_v51 }
 0x154   : > { %v5559_v18 = vpop.f32.mrf.mxu3 }
 0x155   : > { %7226 = vst [vmem:[#allocation42_spill] sm:$0xff] %v5551_v35 }
 0x156   : > { %v1167_v32 = vpop.f32.mrf.mxu2 }
 0x157   : > { %v1259_v46 = vadd.f32 %v1167_v32, %v897_v24 }
 0x158   : > { %v899_v33 = vpop.f32.mrf.mxu1 }
 0x159   : > { %v1490_v4 = vadd.f32 %v5473_v43, %v1259_v46  ;;  %v900_v55 = vadd.f32 %v899_v33, %v5364_v48  ;;  %v470_v43 = vrot.slane %v5469_v19, 6 }
 0x15b   : > { %v1643_v3 = vpop.f32.mrf.mxu0  ;;  %938 = vmatmul.bf16.gmra.mxu1 %v466_v41  ;;  %1209 = vmatmul.bf16.gmra.mxu2 %v5455_v59  ;;  %v5563_v62 = vadd.f32 %v1640_v17, %v1490_v4  ;;  %v5578_v59 = vshll.u32 %v5568_v44, 16  ;;  %v474_v33 = vor.u32 %v473_v9, %v470_v43  ;;  %v5609_v9 = vld [vmem:[%s4851_s25 + $0x88] sm:$0xff] }
 0x15c   : > { %v5575_v24 = vpop.f32.mrf.mxu3 }
 0x15d   : > { %7227 = vst [vmem:[#allocation43_spill] sm:$0xff] %v5563_v62  ;;  %v475_v35 = vsel %vm350_vm6, %v465_v22, %v474_v33  ;;  %v4551_v22 = vld [vmem:[%s7134_s1 + $0x148] sm:$0xff] }
 0x15e   : > { %1682 = vmatmul.bf16.gmra.mxu0 %v4977_v60  ;;  %v1170_v45 = vpop.f32.mrf.mxu2  ;;  %7229 = vst [vmem:[#allocation45_spill] sm:$0xff] %v5578_v59  ;;  %v1037_v60 = vrot.slane %v5571_v53, 7  ;;  %1929 = vmatpush.bf16.msra.mxu1 %v4551_v22 }
 0x15f   : > { %v1260_v47 = vadd.f32 %v1170_v45, %v900_v55 }
 0x160   : > { %v901_v16 = vpop.f32.mrf.mxu1  ;;  %v1038_v32 = vor.u32 %v1037_v60, %v5578_v59 }
 0x161   : > { %v1491_v48 = vadd.f32 %v5489_v10, %v1260_v47  ;;  %v902_v4 = vadd.f32 %v901_v16, %v5383_v15  ;;  %v4567_v15 = vld [vmem:[%s7134_s1 + $0x1c8] sm:$0xff] }
 0x162   : > { %v5586_v41 = vsel %vm989_vm2, %v1034_v39, %v1038_v32  ;;  %v4559_v39 = vld [vmem:[%s7134_s1 + $0x188] sm:$0xff]  ;;  %2448 = vmatpush.bf16.msra.mxu3 %v4567_v15  ;;  %v479_v32 = vrot.slane %v5501_v20, 6 }
 0x163   : > { %v1645_v17 = vpop.f32.mrf.mxu0  ;;  %v5583_v46 = vadd.f32 %v1643_v3, %v1491_v48  ;;  %1455 = vmatmul.bf16.gmra.mxu3 %v5586_v41  ;;  %2159 = vmatpush.bf16.msra.mxu2 %v4559_v39 }
 0x164   : > { %v5591_v10 = vpop.f32.mrf.mxu3 }
 0x165   : > { %7230 = vst [vmem:[#allocation46_spill] sm:$0xff] %v5583_v46 }
 0x166   : > { %v1172_v55 = vpop.f32.mrf.mxu2 }
 0x167   : > { %v1261_v45 = vadd.f32 %v1172_v55, %v902_v4 }
 0x168   : > { %v904_v62 = vpop.f32.mrf.mxu1 }
 0x169   : > { %v1492_v47 = vadd.f32 %v5505_v11, %v1261_v45  ;;  %v905_v11 = vadd.f32 %v904_v62, %v5174_v8  ;;  %v4575_v45 = vld [vmem:[%s7134_s1 + $0x208] sm:$0xff] }
 0x16a   : > { %2782 = vmatpush.bf16.msra.mxu0 %v4575_v45 }
 0x16b   : > { %v1648_v3 = vpop.f32.mrf.mxu0  ;;  %943 = vmatmul.bf16.gmra.mxu1 %v475_v35  ;;  %1214 = vmatmul.bf16.gmra.mxu2 %v5484_v27  ;;  %v5604_v16 = vadd.f32 %v1645_v17, %v1492_v47  ;;  %v5612_v35 = vshrl.u32 %v5609_v9, 16  ;;  %v482_v17 = vrot.slane %v5508_v12, 7 }
 0x16c   : > { %v5616_v4 = vpop.f32.mrf.mxu3 }
 0x16d   : > { %7231 = vst [vmem:[#allocation47_spill] sm:$0xff] %v5604_v16  ;;  %v1040_v8 = vrot.slane %v5612_v35, 7  ;;  %v483_v15 = vor.u32 %v482_v17, %v479_v32  ;;  %v5644_v32 = vld [vmem:[%s4851_s25 + $0x90] sm:$0xff] }
 0x16e   : > { %1687 = vmatmul.bf16.gmra.mxu0 %v5015_v23  ;;  %v1175_v43 = vpop.f32.mrf.mxu2  ;;  %v5619_v23 = vshll.u32 %v5609_v9, 16  ;;  %v5647_v17 = vshrl.u32 %v5644_v32, 16 }
 0x16f   : > { %v1262_v27 = vadd.f32 %v1175_v43, %v905_v11  ;;  %v484_v16 = vsel %vm350_vm6, %v474_v33, %v483_v15 }
 0x170   : > { %v906_v48 = vpop.f32.mrf.mxu1  ;;  %v1041_v47 = vor.u32 %v1040_v8, %v5619_v23 }
 0x171   : > { %v1493_v62 = vadd.f32 %v5527_v28, %v1262_v27  ;;  %v907_v11 = vadd.f32 %v906_v48, %v5186_v21 }
 0x172   : > { %v5630_v22 = vsel %vm989_vm2, %v1037_v60, %v1041_v47 }
 0x173   : > { %v1650_v55 = vpop.f32.mrf.mxu0  ;;  %v5627_v39 = vadd.f32 %v1648_v3, %v1493_v62  ;;  %1460 = vmatmul.bf16.gmra.mxu3 %v5630_v22 }
 0x175   : > { %7232 = vst [vmem:[#allocation48_spill] sm:$0xff] %v5627_v39 }
 0x176   : > { %v1177_v28 = vpop.f32.mrf.mxu2  ;;  %v5635_v46 = vpop.f32.mrf.mxu3 }
 0x177   : > { %v1263_v43 = vadd.f32 %v1177_v28, %v907_v11 }
 0x178   : > { %v909_v27 = vpop.f32.mrf.mxu1 }
 0x179   : > { %v1494_v45 = vadd.f32 %v5543_v61, %v1263_v43  ;;  %v910_v21 = vadd.f32 %v909_v27, %v5203_v30  ;;  %v488_v61 = vrot.slane %v5539_v58, 6 }
 0x17b   : > { %v1653_v3 = vpop.f32.mrf.mxu0  ;;  %948 = vmatmul.bf16.gmra.mxu1 %v484_v16  ;;  %1219 = vmatmul.bf16.gmra.mxu2 %v5522_v29  ;;  %v5639_v60 = vadd.f32 %v1650_v55, %v1494_v45  ;;  %v491_v16 = vrot.slane %v5546_v2, 7  ;;  %v5654_v29 = vshll.u32 %v5644_v32, 16 }
 0x17d   : > { %7233 = vst [vmem:[#allocation49_spill] sm:$0xff] %v5639_v60  ;;  %v492_v43 = vor.u32 %v491_v16, %v488_v61  ;;  %v5676_v61 = vld [vmem:[%s4851_s25 + $0x98] sm:$0xff]  }
 0x17e   : > { %1692 = vmatmul.bf16.gmra.mxu0 %v5064_v50  ;;  %v1180_v48 = vpop.f32.mrf.mxu2  ;;  %v5651_v47 = vpop.f32.mrf.mxu3  ;;  %v1043_v50 = vrot.slane %v5647_v17, 7  ;;  %v5679_v16 = vshrl.u32 %v5676_v61, 16 }
 0x17f   : > { %v1264_v33 = vadd.f32 %v1180_v48, %v910_v21  ;;  %v493_v39 = vsel %vm350_vm6, %v483_v15, %v492_v43 }
 0x180   : > { %v911_v62 = vpop.f32.mrf.mxu1  ;;  %v1044_v11 = vor.u32 %v1043_v50, %v5654_v29 }
 0x181   : > { %v1495_v30 = vadd.f32 %v5559_v18, %v1264_v33  ;;  %v912_v45 = vadd.f32 %v911_v62, %v5220_v40 }
 0x182   : > { %v5662_v27 = vsel %vm989_vm2, %v1040_v8, %v1044_v11 }
 0x183   : > { %v1655_v55 = vpop.f32.mrf.mxu0  ;;  %v5659_v28 = vadd.f32 %v1653_v3, %v1495_v30  ;;  %1465 = vmatmul.bf16.gmra.mxu3 %v5662_v27 }
 0x185   : > { %7234 = vst [vmem:[#allocation50_spill] sm:$0xff] %v5659_v28 }
 0x186   : > { %v1182_v21 = vpop.f32.mrf.mxu2  ;;  %v5667_v18 = vpop.f32.mrf.mxu3 }
 0x187   : > { %v1265_v48 = vadd.f32 %v1182_v21, %v912_v45  ;;  %v4566_v45 = vld [vmem:[%s7134_s1 + $0x1c0] sm:$0xff] }
 0x188   : > { %v914_v60 = vpop.f32.mrf.mxu1  ;;  %v4550_v21 = vld [vmem:[%s7134_s1 + $0x140] sm:$0xff]  ;;  %2449 = vmatpush.bf16.msra.mxu3 %v4566_v45 }
 0x189   : > { %v1496_v33 = vadd.f32 %v5575_v24, %v1265_v48  ;;  %v915_v40 = vadd.f32 %v914_v60, %v5245_v0  ;;  %v497_v24 = vrot.slane %v5571_v53, 6  ;;  %1930 = vmatpush.bf16.msra.mxu1 %v4550_v21 }
 0x18b   : > { %v1658_v3 = vpop.f32.mrf.mxu0  ;;  %953 = vmatmul.bf16.gmra.mxu1 %v493_v39  ;;  %1224 = vmatmul.bf16.gmra.mxu2 %v5554_v51  ;;  %v5671_v8 = vadd.f32 %v1655_v55, %v1496_v33  ;;  %v500_v39 = vrot.slane %v5578_v59, 7  ;;  %v5686_v51 = vshll.u32 %v5676_v61, 16  ;;  %v4558_v55 = vld [vmem:[%s7134_s1 + $0x180] sm:$0xff] }
 0x18c   : > { %2160 = vmatpush.bf16.msra.mxu2 %v4558_v55 }
 0x18d   : > { %7235 = vst [vmem:[#allocation51_spill] sm:$0xff] %v5671_v8 }
 0x18e   : > { %1697 = vmatmul.bf16.gmra.mxu0 %v5568_v44  ;;  %v1185_v62 = vpop.f32.mrf.mxu2  ;;  %v5683_v11 = vpop.f32.mrf.mxu3  ;;  %v1046_v44 = vrot.slane %v5679_v16, 7 }
 0x18f   : > { %v1266_v15 = vadd.f32 %v1185_v62, %v915_v40 }
 0x190   : > { %v916_v30 = vpop.f32.mrf.mxu1  ;;  %v1047_v48 = vor.u32 %v1046_v44, %v5686_v51 }
 0x191   : > { %v1497_v0 = vadd.f32 %v5591_v10, %v1266_v15  ;;  %v501_v10 = vor.u32 %v500_v39, %v497_v24  ;;  %v917_v62 = vadd.f32 %v916_v30, %v5262_v36  ;;  %v4574_v36 = vld [vmem:[%s7134_s1 + $0x200] sm:$0xff]  ;;  %v509_v39 = vrot.slane %v5619_v23, 7 }
 0x192   : > { %v5703_v40 = vsel %vm989_vm2, %v1043_v50, %v1047_v48  ;;  %2783 = vmatpush.bf16.msra.mxu0 %v4574_v36  ;;  %v5720_v24 = vld [vmem:[%s4851_s25 + $0xa0] sm:$0xff]  }
 0x193   : > { %v1660_v60 = vpop.f32.mrf.mxu0  ;;  %v5700_v33 = vadd.f32 %v1658_v3, %v1497_v0  ;;  %1470 = vmatmul.bf16.gmra.mxu3 %v5703_v40  ;;  %v502_v59 = vsel %vm350_vm6, %v492_v43, %v501_v10 }
 0x196   : > { %v1187_v15 = vpop.f32.mrf.mxu2  ;;  %v5708_v53 = vpop.f32.mrf.mxu3 }
 0x197   : > { %v1267_v8 = vadd.f32 %v1187_v15, %v917_v62 }
 0x198   : > { %v919_v28 = vpop.f32.mrf.mxu1 }
 0x199   : > { %v1498_v3 = vadd.f32 %v5616_v4, %v1267_v8  ;;  %v920_v30 = vadd.f32 %v919_v28, %v5281_v54  ;;  %v5723_v4 = vshrl.u32 %v5720_v24, 16 }
 0x19b   : > { %v1663_v0 = vpop.f32.mrf.mxu0  ;;  %958 = vmatmul.bf16.gmra.mxu1 %v502_v59  ;;  %1229 = vmatmul.bf16.gmra.mxu2 %v5586_v41  ;;  %v5715_v50 = vadd.f32 %v1660_v60, %v1498_v3  ;;  %7236 = vst [vmem:[#allocation52_spill] sm:$0xff] %v5723_v4  ;;  %v506_v41 = vrot.slane %v5612_v35, 6  ;;  %v1296_v60 = vrot.slane %v5723_v4, 7 }
 0x19d   : > { %v510_v48 = vor.u32 %v509_v39, %v506_v41  ;;  %v518_v39 = vrot.slane %v5654_v29, 7 }
 0x19e   : > { %1702 = vmatmul.bf16.gmra.mxu0 %v5609_v9  ;;  %v1190_v43 = vpop.f32.mrf.mxu2  ;;  %v5727_v55 = vpop.f32.mrf.mxu3  ;;  %v5731_v9 = vshll.u32 %v5720_v24, 16 }
 0x19f   : > { %v1268_v59 = vadd.f32 %v1190_v43, %v920_v30  ;;  %v511_v43 = vsel %vm350_vm6, %v501_v10, %v510_v48  ;;  %v515_v10 = vrot.slane %v5647_v17, 6 }
 0x1a0   : > { %v921_v8 = vpop.f32.mrf.mxu1  ;;  %v1299_v45 = vor.u32 %v5731_v9, %v1296_v60 }
 0x1a1   : > { %v1499_v54 = vadd.f32 %v5635_v46, %v1268_v59  ;;  %v922_v15 = vadd.f32 %v921_v8, %v5295_v25 }
 0x1a2   : > { %v1300_v62 = vsel %vm989_vm2, %v1046_v44, %v1299_v45  ;;  %v4773_v45 = vld [vmem:[%s4851_s25 + $0x10] sm:$0xff] }
 0x1a3   : > { %v1665_v28 = vpop.f32.mrf.mxu0  ;;  %v5735_v21 = vadd.f32 %v1663_v0, %v1499_v54  ;;  %1475 = vmatmul.bf16.gmra.mxu3 %v1300_v62  ;;  %v2311_v62 = vrot.slane %v4773_v45, 1 }
 0x1a6   : > { %v1192_v3 = vpop.f32.mrf.mxu2  ;;  %v5740_v4 = vpop.f32.mrf.mxu3 }
 0x1a7   : > { %v1269_v36 = vadd.f32 %v1192_v3, %v922_v15 }
 0x1a8   : > { %v924_v30 = vpop.f32.mrf.mxu1 }
 0x1a9   : > { %v1500_v46 = vadd.f32 %v5651_v47, %v1269_v36  ;;  %v925_v25 = vadd.f32 %v924_v30, %v5314_v26  ;;  %v519_v26 = vor.u32 %v518_v39, %v515_v10  ;;  %v527_v39 = vrot.slane %v5686_v51, 7 }
 0x1ab   : > { %v1668_v59 = vpop.f32.mrf.mxu0  ;;  %963 = vmatmul.bf16.gmra.mxu1 %v511_v43  ;;  %1234 = vmatmul.bf16.gmra.mxu2 %v5630_v22  ;;  %v5744_v0 = vadd.f32 %v1665_v28, %v1500_v46  ;;  %v4772_v22 = vld [vmem:[%s4851_s25 + $0x8] sm:$0xff]   ;;  %v520_v46 = vsel %vm350_vm6, %v510_v48, %v519_v26  ;;  %v524_v48 = vrot.slane %v5679_v16, 6 }
 0x1ac   : > { %v2310_v28 = vrot.slane %v4772_v22, 1 }
 0x1ae   : > { %1707 = vmatmul.bf16.gmra.mxu0 %v5644_v32  ;;  %v1195_v44 = vpop.f32.mrf.mxu2  ;;  %v5750_v47 = vpop.f32.mrf.mxu3  ;;  %v2312_v15 = vsel %vm2309_vm9, %v2310_v28, %v2311_v62  ;;  %v4774_v28 = vld [vmem:[%s4851_s25 + $0x18] sm:$0xff] }
 0x1af   : > { %v1270_v8 = vadd.f32 %v1195_v44, %v925_v25 }
 0x1b0   : > { %v926_v41 = vpop.f32.mrf.mxu1 }
 0x1b1   : > { %v1501_v60 = vadd.f32 %v5667_v18, %v1270_v8  ;;  %v927_v3 = vadd.f32 %v926_v41, %v5337_v7 }
 0x1b3   : > { %v1670_v54 = vpop.f32.mrf.mxu0  ;;  %v5755_v32 = vadd.f32 %v1668_v59, %v1501_v60  ;;  %2450 = vmatmul.bf16.vlgmr.msra.gmra.mxu3 %v2312_v15 }
 0x1b5   : > { %7237 = vst [vmem:[#allocation53_spill] sm:$0xff] %v5755_v32  ;;  %v4802_v32 = vmov 0.0  }
 0x1b6   : > { %v1197_v36 = vpop.f32.mrf.mxu2  ;;  %v5760_v18 = vpop.f32.mrf.mxu3 }
 0x1b7   : > { %v1271_v30 = vadd.f32 %v1197_v36, %v927_v3 }
 0x1b8   : > { %v929_v43 = vpop.f32.mrf.mxu1 }
 0x1b9   : > { %v1502_v25 = vadd.f32 %v5683_v11, %v1271_v30  ;;  %v930_v7 = vadd.f32 %v929_v43, %v5359_v63  ;;  %v7240_v63 = vld [vmem:[#allocation37_spill] sm:$0xff] }
 0x1bb   : > { %v1673_v44 = vpop.f32.mrf.mxu0  ;;  %968 = vmatmul.bf16.gmra.mxu1 %v520_v46  ;;  %1239 = vmatmul.bf16.gmra.mxu2 %v5662_v27  ;;  %v5764_v59 = vadd.f32 %v1670_v54, %v1502_v25  ;;  %v2313_v27 = vrot.slane %v4774_v28, 1  ;;  %v7245_v28 = vld [vmem:[#allocation4_spill] sm:$0xff] }
 0x1bd   : > { %7238 = vst [vmem:[#allocation54_spill] sm:$0xff] %v5764_v59  ;;  %v2314_v54 = vsel %vm2309_vm9, %v2311_v62, %v2313_v27 }
 0x1be   : > { %1712 = vmatmul.bf16.gmra.mxu0 %v5676_v61  ;;  %v1200_v8 = vpop.f32.mrf.mxu2  ;;  %v5770_v60 = vpop.f32.mrf.mxu3  ;;  %v528_v61 = vor.u32 %v527_v39, %v524_v48  ;;  %v7243_v48 = vld [vmem:[#allocation3_spill] sm:$0xff]  ;;  %v7244_v39 = vld [vmem:[#allocation5_spill] sm:$0xff] }
 0x1bf   : > { %v1272_v41 = vadd.f32 %v1200_v8, %v930_v7 }
 0x1c0   : > { %v931_v10 = vpop.f32.mrf.mxu1  ;;  %v529_v43 = vsel %vm350_vm6, %v519_v26, %v528_v61  ;;  %v7179_v26 = vrot.slane %v7243_v48, 1 }
 0x1c1   : > { %v1503_v11 = vadd.f32 %v5708_v53, %v1272_v41  ;;  %v932_v15 = vadd.f32 %v931_v10, %v7240_v63  ;;  %v7246_v63 = vld [vmem:[#allocation6_spill] sm:$0xff] }
 0x1c3   : > { %v1675_v22 = vpop.f32.mrf.mxu0  ;;  %v5775_v45 = vadd.f32 %v1673_v44, %v1503_v11  ;;  %2455 = vmatmul.bf16.gmra.mxu3 %v2314_v54  ;;  %v7242_v44 = vld [vmem:[#allocation12_spill] sm:$0xff]  ;;  %v1768_v11 = vrot.slane %v7244_v39, 1  ;;  %v2600_v54 = vrot.slane %v7244_v39, 2 }
 0x1c5   : > { %7239 = vst [vmem:[#allocation55_spill] sm:$0xff] %v5775_v45 }
 0x1c6   : > { %v1202_v3 = vpop.f32.mrf.mxu2  ;;  %v5779_v46 = vpop.f32.mrf.mxu3 }
 0x1c7   : > { %v1273_v36 = vadd.f32 %v1202_v3, %v932_v15  ;;  %v7247_v15 = vld [vmem:[#allocation7_spill] sm:$0xff] }
 0x1c8   : > { %v934_v30 = vpop.f32.mrf.mxu1  ;;  %v2603_v3 = vrot.slane %v7247_v15, 2 }
 0x1c9   : > { %v1504_v53 = vadd.f32 %v5727_v55, %v1273_v36  ;;  %v935_v7 = vadd.f32 %v934_v30, %v7242_v44  ;;  %v2599_v55 = vrot.slane %v7245_v28, 1  ;;  %v4775_v36 = vld [vmem:[%s4851_s25 + $0x20] sm:$0xff] }
 0x1ca   : > { %v2315_v30 = vrot.slane %v4775_v36, 1  ;;  %v7249_v44 = vld [vmem:[#allocation2_spill] sm:$0xff] }
 0x1cb   : > { %v1678_v25 = vpop.f32.mrf.mxu0  ;;  %973 = vmatmul.bf16.gmra.mxu1 %v529_v43  ;;  %1244 = vmatmul.bf16.gmra.mxu2 %v5703_v40  ;;  %v5783_v62 = vadd.f32 %v1675_v22, %v1504_v53 }
 0x1cc   : > { %v2316_v43 = vsel %vm2309_vm9, %v2313_v27, %v2315_v30 }
 0x1cd   : > { %7241 = vst [vmem:[#allocation37_spill] sm:$0xff] %v5783_v62  ;;  %v2601_v62 = vor.u32 %v2600_v54, %v2599_v55  ;;  %v7253_v54 = vld [vmem:[#allocation17_spill] sm:$0xff] }
 0x1ce   : > { %1717 = vmatmul.bf16.gmra.mxu0 %v5720_v24  ;;  %v1205_v8 = vpop.f32.mrf.mxu2  ;;  %v5791_v61 = vpop.f32.mrf.mxu3  ;;  %v2602_v24 = vrot.slane %v7246_v63, 1 }
 0x1cf   : > { %v1274_v41 = vadd.f32 %v1205_v8, %v935_v7  ;;  %v5803_v7 = vor.u32 %v7179_v26, %v7249_v44  ;;  %v1770_v8 = vor.u32 %v1768_v11, %v7245_v28 }
 0x1d0   : > { %v936_v10 = vpop.f32.mrf.mxu1  ;;  %v2604_v45 = vor.u32 %v2603_v3, %v2602_v24 }
 0x1d1   : > { %v1505_v40 = vadd.f32 %v5740_v4, %v1274_v41  ;;  %7250 = vst [vmem:[#allocation5_spill] sm:$0xff] %v5803_v7  ;;  %v1771_v4 = vrot.slane %v7247_v15, 1  ;;  %v7251_v41 = vld [vmem:[#allocation15_spill] sm:$0xff] }
 0x1d2   : > { %v937_v39 = vadd.f32 %v936_v10, %v7251_v41  ;;  %v2605_v10 = vsel %vm2598_vm11, %v2601_v62, %v2604_v45  ;;  %v4776_v62 = vld [vmem:[%s4851_s25 + $0x28] sm:$0xff] }
 0x1d3   : > { %v1680_v22 = vpop.f32.mrf.mxu0  ;;  %v5798_v53 = vadd.f32 %v1678_v25, %v1505_v40  ;;  %2460 = vmatmul.bf16.gmra.mxu3 %v2316_v43  ;;  %v1769_v40 = vsel %vm1765_vm10, %v5803_v7, %v1768_v11  ;;  %v1772_v26 = vsel %vm1765_vm10, %v1770_v8, %v1771_v4 }
 0x1d5   : > { %7248 = vst [vmem:[#allocation12_spill] sm:$0xff] %v5798_v53 }
 0x1d6   : > { %v1207_v36 = vpop.f32.mrf.mxu2  ;;  %v5811_v53 = vpop.f32.mrf.mxu3 }
 0x1d7   : > { %v1275_v27 = vadd.f32 %v1207_v36, %v937_v39 }
 0x1d8   : > { %v939_v25 = vpop.f32.mrf.mxu1 }
 0x1d9   : > { %v1506_v28 = vadd.f32 %v5750_v47, %v1275_v27  ;;  %v940_v24 = vadd.f32 %v939_v25, %v7253_v54  ;;  %v7254_v47 = vld [vmem:[#allocation8_spill] sm:$0xff]  ;;  %v7255_v27 = vld [vmem:[#allocation9_spill] sm:$0xff]  ;;  %v1773_v25 = vor.u32 %v1771_v4, %v7246_v63 }
 0x1da   : > { %v2606_v36 = vrot.slane %v7254_v47, 1  ;;  %v2607_v7 = vrot.slane %v7255_v27, 2  ;;  %v7257_v54 = vld [vmem:[#allocation21_spill] sm:$0xff] }
 0x1db   : > { %v1683_v15 = vpop.f32.mrf.mxu0  ;;  %1931 = vmatmul.bf16.vlgmr.msra.gmra.mxu1 %v1769_v40  ;;  %2161 = vmatmul.bf16.vlgmr.msra.gmra.mxu2 %v1772_v26  ;;  %v5815_v55 = vadd.f32 %v1680_v22, %v1506_v28  ;;  %v2317_v40 = vrot.slane %v4776_v62, 1 }
 0x1dd   : > { %7252 = vst [vmem:[#allocation4_spill] sm:$0xff] %v5815_v55  ;;  %v2318_v22 = vsel %vm2309_vm9, %v2315_v30, %v2317_v40 }
 0x1de   : > { %2784 = vmatmul.bf16.vlgmr.msra.gmra.mxu0 %v2605_v10  ;;  %v1210_v3 = vpop.f32.mrf.mxu2  ;;  %v5818_v41 = vpop.f32.mrf.mxu3  ;;  %v1774_v10 = vrot.slane %v7255_v27, 1 }
 0x1df   : > { %v1276_v43 = vadd.f32 %v1210_v3, %v940_v24  ;;  %v2608_v3 = vor.u32 %v2607_v7, %v2606_v36  ;;  %v7259_v7 = vld [vmem:[#allocation23_spill] sm:$0xff] }
 0x1e0   : > { %v941_v11 = vpop.f32.mrf.mxu1  ;;  %v1775_v59 = vsel %vm1765_vm10, %v1773_v25, %v1774_v10 }
 0x1e1   : > { %v1507_v8 = vadd.f32 %v5760_v18, %v1276_v43  ;;  %v942_v24 = vadd.f32 %v941_v11, %v7257_v54 }
 0x1e3   : > { %v1685_v39 = vpop.f32.mrf.mxu0  ;;  %v5825_v28 = vadd.f32 %v1683_v15, %v1507_v8  ;;  %2465 = vmatmul.bf16.gmra.mxu3 %v2318_v22  ;;  %v2609_v15 = vsel %vm2598_vm11, %v2604_v45, %v2608_v3  ;;  %v4777_v45 = vld [vmem:[%s4851_s25 + $0x30] sm:$0xff] }
 0x1e5   : > { %7256 = vst [vmem:[#allocation6_spill] sm:$0xff] %v5825_v28 }
 0x1e6   : > { %v1212_v18 = vpop.f32.mrf.mxu2  ;;  %v5831_v48 = vpop.f32.mrf.mxu3 }
 0x1e7   : > { %v1277_v43 = vadd.f32 %v1212_v18, %v942_v24  ;;  %v7261_v24 = vld [vmem:[#allocation11_spill] sm:$0xff] }
 0x1e8   : > { %v944_v55 = vpop.f32.mrf.mxu1  ;;  %v2611_v18 = vrot.slane %v7261_v24, 2 }
 0x1e9   : > { %v1508_v62 = vadd.f32 %v5770_v60, %v1277_v43  ;;  %v945_v4 = vadd.f32 %v944_v55, %v7259_v7  ;;  %v7260_v60 = vld [vmem:[#allocation10_spill] sm:$0xff]  ;;  %v1776_v55 = vor.u32 %v1774_v10, %v7254_v47  ;;  %v7265_v10 = vld [vmem:[#allocation29_spill] sm:$0xff] }
 0x1ea   : > { %v2610_v54 = vrot.slane %v7260_v60, 1 }
 0x1eb   : > { %v1688_v30 = vpop.f32.mrf.mxu0  ;;  %1936 = vmatmul.bf16.gmra.mxu1 %v1772_v26  ;;  %2166 = vmatmul.bf16.gmra.mxu2 %v1775_v59  ;;  %v5835_v63 = vadd.f32 %v1685_v39, %v1508_v62  ;;  %v2319_v26 = vrot.slane %v4777_v45, 1  ;;  %v1777_v62 = vrot.slane %v7261_v24, 1 }
 0x1ed   : > { %7258 = vst [vmem:[#allocation7_spill] sm:$0xff] %v5835_v63  ;;  %v2320_v39 = vsel %vm2309_vm9, %v2317_v40, %v2319_v26  ;;  %v1778_v63 = vsel %vm1765_vm10, %v1776_v55, %v1777_v62 }
 0x1ee   : > { %2789 = vmatmul.bf16.gmra.mxu0 %v2609_v15  ;;  %v1215_v11 = vpop.f32.mrf.mxu2  ;;  %v5838_v27 = vpop.f32.mrf.mxu3  ;;  %v7263_v15 = vld [vmem:[#allocation27_spill] sm:$0xff] }
 0x1ef   : > { %v1278_v8 = vadd.f32 %v1215_v11, %v945_v4  ;;  %v2612_v4 = vor.u32 %v2611_v18, %v2610_v54 }
 0x1f0   : > { %v946_v36 = vpop.f32.mrf.mxu1 }
 0x1f1   : > { %v1509_v22 = vadd.f32 %v5779_v46, %v1278_v8  ;;  %v947_v7 = vadd.f32 %v946_v36, %v7263_v15 }
 0x1f3   : > { %v1690_v25 = vpop.f32.mrf.mxu0  ;;  %v5845_v43 = vadd.f32 %v1688_v30, %v1509_v22  ;;  %2470 = vmatmul.bf16.gmra.mxu3 %v2320_v39  ;;  %v2613_v30 = vsel %vm2598_vm11, %v2608_v3, %v2612_v4  ;;  %v4778_v3 = vld [vmem:[%s4851_s25 + $0x38] sm:$0xff] }
 0x1f5   : > { %7262 = vst [vmem:[#allocation15_spill] sm:$0xff] %v5845_v43 }
 0x1f6   : > { %v1217_v46 = vpop.f32.mrf.mxu2  ;;  %v5851_v28 = vpop.f32.mrf.mxu3 }
 0x1f7   : > { %v1279_v11 = vadd.f32 %v1217_v46, %v947_v7  ;;  %v7267_v7 = vld [vmem:[#allocation14_spill] sm:$0xff] }
 0x1f8   : > { %v949_v8 = vpop.f32.mrf.mxu1  ;;  %v2615_v46 = vrot.slane %v7267_v7, 2 }
 0x1f9   : > { %v1510_v45 = vadd.f32 %v5791_v61, %v1279_v11  ;;  %v950_v36 = vadd.f32 %v949_v8, %v7265_v10  ;;  %v7266_v61 = vld [vmem:[#allocation13_spill] sm:$0xff]  ;;  %v1779_v8 = vor.u32 %v1777_v62, %v7260_v60  ;;  %v7271_v62 = vld [vmem:[#allocation34_spill] sm:$0xff] }
 0x1fa   : > { %v2614_v15 = vrot.slane %v7266_v61, 1 }
 0x1fb   : > { %v1693_v40 = vpop.f32.mrf.mxu0  ;;  %1941 = vmatmul.bf16.gmra.mxu1 %v1775_v59  ;;  %2171 = vmatmul.bf16.gmra.mxu2 %v1778_v63  ;;  %v5855_v47 = vadd.f32 %v1690_v25, %v1510_v45  ;;  %v2321_v59 = vrot.slane %v4778_v3, 1  ;;  %v1780_v45 = vrot.slane %v7267_v7, 1 }
 0x1fd   : > { %7264 = vst [vmem:[#allocation17_spill] sm:$0xff] %v5855_v47  ;;  %v2322_v25 = vsel %vm2309_vm9, %v2319_v26, %v2321_v59  ;;  %v1781_v47 = vsel %vm1765_vm10, %v1779_v8, %v1780_v45 }
 0x1fe   : > { %2794 = vmatmul.bf16.gmra.mxu0 %v2613_v30  ;;  %v1220_v22 = vpop.f32.mrf.mxu2  ;;  %v5858_v18 = vpop.f32.mrf.mxu3  ;;  %v7269_v30 = vld [vmem:[#allocation33_spill] sm:$0xff] }
 0x1ff   : > { %v1280_v54 = vadd.f32 %v1220_v22, %v950_v36  ;;  %v2616_v36 = vor.u32 %v2615_v46, %v2614_v15 }
 0x200   : > { %v951_v24 = vpop.f32.mrf.mxu1 }
 0x201   : > { %v1511_v39 = vadd.f32 %v5811_v53, %v1280_v54  ;;  %v952_v10 = vadd.f32 %v951_v24, %v7269_v30 }
 0x203   : > { %v1695_v55 = vpop.f32.mrf.mxu0  ;;  %v5865_v11 = vadd.f32 %v1693_v40, %v1511_v39  ;;  %2475 = vmatmul.bf16.gmra.mxu3 %v2322_v25  ;;  %v2617_v40 = vsel %vm2598_vm11, %v2612_v4, %v2616_v36  ;;  %v4779_v4 = vld [vmem:[%s4851_s25 + $0x40] sm:$0xff] }
 0x205   : > { %7268 = vst [vmem:[#allocation8_spill] sm:$0xff] %v5865_v11 }
 0x206   : > { %v1222_v53 = vpop.f32.mrf.mxu2  ;;  %v5871_v43 = vpop.f32.mrf.mxu3 }
 0x207   : > { %v1281_v22 = vadd.f32 %v1222_v53, %v952_v10  ;;  %v7273_v10 = vld [vmem:[#allocation20_spill] sm:$0xff] }
 0x208   : > { %v954_v54 = vpop.f32.mrf.mxu1  ;;  %v2619_v53 = vrot.slane %v7273_v10, 2 }
 0x209   : > { %v1512_v3 = vadd.f32 %v5818_v41, %v1281_v22  ;;  %v955_v24 = vadd.f32 %v954_v54, %v7271_v62  ;;  %v7272_v41 = vld [vmem:[#allocation18_spill] sm:$0xff]  ;;  %v1782_v54 = vor.u32 %v1780_v45, %v7266_v61  ;;  %v7277_v45 = vld [vmem:[#allocation36_spill] sm:$0xff] }
 0x20a   : > { %v2618_v30 = vrot.slane %v7272_v41, 1 }
 0x20b   : > { %v1698_v26 = vpop.f32.mrf.mxu0  ;;  %1946 = vmatmul.bf16.gmra.mxu1 %v1778_v63  ;;  %2176 = vmatmul.bf16.gmra.mxu2 %v1781_v47  ;;  %v5875_v60 = vadd.f32 %v1695_v55, %v1512_v3  ;;  %v2323_v63 = vrot.slane %v4779_v4, 1  ;;  %v1783_v3 = vrot.slane %v7273_v10, 1 }
 0x20d   : > { %7270 = vst [vmem:[#allocation9_spill] sm:$0xff] %v5875_v60  ;;  %v2324_v55 = vsel %vm2309_vm9, %v2321_v59, %v2323_v63  ;;  %v1784_v60 = vsel %vm1765_vm10, %v1782_v54, %v1783_v3 }
 0x20e   : > { %2799 = vmatmul.bf16.gmra.mxu0 %v2617_v40  ;;  %v1225_v39 = vpop.f32.mrf.mxu2  ;;  %v5878_v46 = vpop.f32.mrf.mxu3  ;;  %v7275_v40 = vld [vmem:[#allocation35_spill] sm:$0xff] }
 0x20f   : > { %v1282_v15 = vadd.f32 %v1225_v39, %v955_v24  ;;  %v2620_v24 = vor.u32 %v2619_v53, %v2618_v30 }
 0x210   : > { %v956_v7 = vpop.f32.mrf.mxu1 }
 0x211   : > { %v1513_v25 = vadd.f32 %v5831_v48, %v1282_v15  ;;  %v957_v62 = vadd.f32 %v956_v7, %v7275_v40 }
 0x213   : > { %v1700_v8 = vpop.f32.mrf.mxu0  ;;  %v5885_v22 = vadd.f32 %v1698_v26, %v1513_v25  ;;  %2480 = vmatmul.bf16.gmra.mxu3 %v2324_v55  ;;  %v2621_v26 = vsel %vm2598_vm11, %v2616_v36, %v2620_v24  ;;  %v4780_v36 = vld [vmem:[%s4851_s25 + $0x48] sm:$0xff] }
 0x215   : > { %7274 = vst [vmem:[#allocation21_spill] sm:$0xff] %v5885_v22 }
 0x216   : > { %v1227_v48 = vpop.f32.mrf.mxu2  ;;  %v5891_v11 = vpop.f32.mrf.mxu3 }
 0x217   : > { %v1283_v39 = vadd.f32 %v1227_v48, %v957_v62  ;;  %v7279_v62 = vld [vmem:[#allocation26_spill] sm:$0xff] }
 0x218   : > { %v959_v15 = vpop.f32.mrf.mxu1  ;;  %v2623_v48 = vrot.slane %v7279_v62, 2 }
 0x219   : > { %v1514_v4 = vadd.f32 %v5838_v27, %v1283_v39  ;;  %v960_v7 = vadd.f32 %v959_v15, %v7277_v45  ;;  %v7278_v27 = vld [vmem:[#allocation24_spill] sm:$0xff]  ;;  %v1785_v15 = vor.u32 %v1783_v3, %v7272_v41 }
 0x21a   : > { %v2622_v40 = vrot.slane %v7278_v27, 1  ;;  %v7283_v3 = vld [vmem:[#allocation16_spill] sm:$0xff] }
 0x21b   : > { %v1703_v59 = vpop.f32.mrf.mxu0  ;;  %1951 = vmatmul.bf16.gmra.mxu1 %v1781_v47  ;;  %2181 = vmatmul.bf16.gmra.mxu2 %v1784_v60  ;;  %v5895_v61 = vadd.f32 %v1700_v8, %v1514_v4  ;;  %v2325_v47 = vrot.slane %v4780_v36, 1  ;;  %v1786_v4 = vrot.slane %v7279_v62, 1 }
 0x21d   : > { %7276 = vst [vmem:[#allocation23_spill] sm:$0xff] %v5895_v61  ;;  %v2326_v8 = vsel %vm2309_vm9, %v2323_v63, %v2325_v47  ;;  %v1787_v61 = vsel %vm1765_vm10, %v1785_v15, %v1786_v4 }
 0x21e   : > { %2804 = vmatmul.bf16.gmra.mxu0 %v2621_v26  ;;  %v1230_v25 = vpop.f32.mrf.mxu2  ;;  %v5898_v53 = vpop.f32.mrf.mxu3  ;;  %v7281_v26 = vld [vmem:[#allocation38_spill] sm:$0xff] }
 0x21f   : > { %v1284_v30 = vadd.f32 %v1230_v25, %v960_v7  ;;  %v2624_v7 = vor.u32 %v2623_v48, %v2622_v40 }
 0x220   : > { %v961_v10 = vpop.f32.mrf.mxu1 }
 0x221   : > { %v1515_v55 = vadd.f32 %v5851_v28, %v1284_v30  ;;  %v962_v45 = vadd.f32 %v961_v10, %v7281_v26 }
 0x223   : > { %v1705_v54 = vpop.f32.mrf.mxu0  ;;  %v5905_v39 = vadd.f32 %v1703_v59, %v1515_v55  ;;  %2485 = vmatmul.bf16.gmra.mxu3 %v2326_v8  ;;  %v2625_v59 = vsel %vm2598_vm11, %v2620_v24, %v2624_v7  ;;  %v4781_v24 = vld [vmem:[%s4851_s25 + $0x50] sm:$0xff] }
 0x225   : > { %7280 = vst [vmem:[#allocation10_spill] sm:$0xff] %v5905_v39 }
 0x226   : > { %v1232_v28 = vpop.f32.mrf.mxu2  ;;  %v5911_v22 = vpop.f32.mrf.mxu3 }
 0x227   : > { %v1285_v25 = vadd.f32 %v1232_v28, %v962_v45  ;;  %v7285_v45 = vld [vmem:[#allocation32_spill] sm:$0xff] }
 0x228   : > { %v964_v30 = vpop.f32.mrf.mxu1  ;;  %v2627_v28 = vrot.slane %v7285_v45, 2 }
 0x229   : > { %v1516_v36 = vadd.f32 %v5858_v18, %v1285_v25  ;;  %v965_v10 = vadd.f32 %v964_v30, %v7283_v3  ;;  %v7284_v18 = vld [vmem:[#allocation30_spill] sm:$0xff]  ;;  %v1788_v30 = vor.u32 %v1786_v4, %v7278_v27 }
 0x22a   : > { %v2626_v26 = vrot.slane %v7284_v18, 1  ;;  %v7289_v4 = vld [vmem:[#allocation22_spill] sm:$0xff] }
 0x22b   : > { %v1708_v63 = vpop.f32.mrf.mxu0  ;;  %1956 = vmatmul.bf16.gmra.mxu1 %v1784_v60  ;;  %2186 = vmatmul.bf16.gmra.mxu2 %v1787_v61  ;;  %v5915_v41 = vadd.f32 %v1705_v54, %v1516_v36  ;;  %v2327_v60 = vrot.slane %v4781_v24, 1  ;;  %v1789_v36 = vrot.slane %v7285_v45, 1 }
 0x22d   : > { %7282 = vst [vmem:[#allocation11_spill] sm:$0xff] %v5915_v41  ;;  %v2328_v54 = vsel %vm2309_vm9, %v2325_v47, %v2327_v60  ;;  %v1790_v41 = vsel %vm1765_vm10, %v1788_v30, %v1789_v36 }
 0x22e   : > { %2809 = vmatmul.bf16.gmra.mxu0 %v2625_v59  ;;  %v1235_v55 = vpop.f32.mrf.mxu2  ;;  %v5918_v48 = vpop.f32.mrf.mxu3  ;;  %v7287_v59 = vld [vmem:[#allocation19_spill] sm:$0xff] }
 0x22f   : > { %v1286_v40 = vadd.f32 %v1235_v55, %v965_v10  ;;  %v2628_v10 = vor.u32 %v2627_v28, %v2626_v26 }
 0x230   : > { %v966_v62 = vpop.f32.mrf.mxu1 }
 0x231   : > { %v1517_v8 = vadd.f32 %v5871_v43, %v1286_v40  ;;  %v967_v3 = vadd.f32 %v966_v62, %v7287_v59  ;;  %v2630_v59 = vrot.slane %v5335_v57, 1 }
 0x233   : > { %v1710_v15 = vpop.f32.mrf.mxu0  ;;  %v5925_v25 = vadd.f32 %v1708_v63, %v1517_v8  ;;  %2490 = vmatmul.bf16.gmra.mxu3 %v2328_v54  ;;  %v2629_v63 = vsel %vm2598_vm11, %v2624_v7, %v2628_v10  ;;  %v2932_v8 = vlaneseq  ;;  %v2631_v7 = vrot.slane %v5344_v38, 2 }
 0x235   : > { %7286 = vst [vmem:[#allocation27_spill] sm:$0xff] %v5925_v25 }
 0x236   : > { %v1237_v43 = vpop.f32.mrf.mxu2  ;;  %v5931_v39 = vpop.f32.mrf.mxu3 }
 0x237   : > { %v1287_v55 = vadd.f32 %v1237_v43, %v967_v3 }
 0x238   : > { %v969_v40 = vpop.f32.mrf.mxu1 }
 0x239   : > { %v1518_v24 = vadd.f32 %v5878_v46, %v1287_v55  ;;  %v970_v62 = vadd.f32 %v969_v40, %v7289_v4  ;;  %v1791_v55 = vor.u32 %v1789_v36, %v7284_v18  ;;  %v1792_v40 = vrot.slane %v5344_v38, 1 }
 0x23b   : > { %v1713_v47 = vpop.f32.mrf.mxu0  ;;  %1961 = vmatmul.bf16.gmra.mxu1 %v1787_v61  ;;  %2191 = vmatmul.bf16.gmra.mxu2 %v1790_v41  ;;  %v5935_v27 = vadd.f32 %v1710_v15, %v1518_v24  ;;  %v5943_v61 = vshrl.u32 %v2932_v8, 7  ;;  %v4782_v15 = vld [vmem:[%s4851_s25 + $0x58] sm:$0xff] }
 0x23c   : > { %v2329_v3 = vrot.slane %v4782_v15, 1 }
 0x23d   : > { %7288 = vst [vmem:[#allocation29_spill] sm:$0xff] %v5935_v27 }
 0x23e   : > { %2814 = vmatmul.bf16.gmra.mxu0 %v2629_v63  ;;  %v1240_v26 = vpop.f32.mrf.mxu2  ;;  %v5938_v54 = vpop.f32.mrf.mxu3  ;;  %v2330_v24 = vsel %vm2309_vm9, %v2327_v60, %v2329_v3  ;;  %v7291_v63 = vld [vmem:[#allocation25_spill] sm:$0xff] }
 0x23f   : > { %v1288_v45 = vadd.f32 %v1240_v26, %v970_v62  ;;  %v2975_v62 = vcvt.s32.f32 %v5943_v61  ;;  %v5954_v26 = vadd.s32 8, %v5943_v61 }
 0x240   : > { %v971_v28 = vpop.f32.mrf.mxu1 }
 0x241   : > { %v1519_v30 = vadd.f32 %v5891_v11, %v1288_v45  ;;  %v972_v4 = vadd.f32 %v971_v28, %v7291_v63  ;;  %v2632_v11 = vor.u32 %v2631_v7, %v2630_v59  ;;  %v3017_v36 = vadd.f32 0.5, %v2975_v62  ;;  %v7293_v7 = vld [vmem:[#allocation28_spill] sm:$0xff] }
 0x242   : > { %v2976_v28 = vcvt.s32.f32 %v5954_v26  ;;  %v2635_v26 = vrot.slane %v5380_v14, 2 }
 0x243   : > { %v1715_v46 = vpop.f32.mrf.mxu0  ;;  %v5946_v43 = vadd.f32 %v1713_v47, %v1519_v30  ;;  %2495 = vmatmul.bf16.gmra.mxu3 %v2330_v24  ;;  %v1793_v47 = vsel %vm1765_vm10, %v1791_v55, %v1792_v40  ;;  %v2633_v60 = vsel %vm2598_vm11, %v2628_v10, %v2632_v11  ;;  %v3059_v63 = vmul.f32 0.055555556, %v3017_v36  ;;  %v5975_v36 = vld [vmem:[%s4851_s25 + $0x60] sm:$0xff] }
 0x244   : > { %v3018_v55 = vadd.f32 0.5, %v2976_v28  ;;  %v2634_v10 = vrot.slane %v5371_v6, 1 }
 0x245   : > { %7290 = vst [vmem:[#allocation13_spill] sm:$0xff] %v5946_v43  ;;  %v1795_v43 = vrot.slane %v5380_v14, 1 }
 0x246   : > { %v1242_v8 = vpop.f32.mrf.mxu2  ;;  %v5957_v30 = vpop.f32.mrf.mxu3  ;;  %v5982_v27 = vor.u32 %v2635_v26, %v2634_v10 }
 0x247   : > { %v1289_v45 = vadd.f32 %v1242_v8, %v972_v4  ;;  %v5966_v4 = vadd.s32 16, %v5943_v61 }
 0x248   : > { %v974_v15 = vpop.f32.mrf.mxu1 }
 0x249   : > { %v1520_v38 = vadd.f32 %v5898_v53, %v1289_v45  ;;  %v975_v24 = vadd.f32 %v974_v15, %v7293_v7  ;;  %v7182_v7 = vrot.slane %v5975_v36, 1  ;;  %v7296_v44 = vcvt.s32.f32 %v5966_v4 }
 0x24b   : > { %v1718_v18 = vpop.f32.mrf.mxu0  ;;  %1966 = vmatmul.bf16.gmra.mxu1 %v1790_v41  ;;  %2196 = vmatmul.bf16.gmra.mxu2 %v1793_v47  ;;  %v5962_v59 = vadd.f32 %v1715_v46, %v1520_v38 }
 0x24d   : > { %7292 = vst [vmem:[#allocation14_spill] sm:$0xff] %v5962_v59  ;;  %v3060_v59 = vmul.f32 0.055555556, %v3018_v55  ;;  %v7295_v55 = vld [vmem:[#allocation31_spill] sm:$0xff] }
 0x24e   : > { %2819 = vmatmul.bf16.gmra.mxu0 %v2633_v60  ;;  %v1245_v53 = vpop.f32.mrf.mxu2  ;;  %v5970_v41 = vpop.f32.mrf.mxu3  ;;  %v3101_v60 = vfloor.f32 %v3059_v63  ;;  %v5988_v63 = vadd.s32 24, %v5943_v61 }
 0x24f   : > { %v1290_v8 = vadd.f32 %v1245_v53, %v975_v24  ;;  %v1794_v24 = vor.u32 %v1792_v40, %v5335_v57  ;;  %v3102_v25 = vfloor.f32 %v3060_v59  ;;  %v3019_v57 = vadd.f32 0.5, %v7296_v44 }
 0x250   : > { %v976_v45 = vpop.f32.mrf.mxu1  ;;  %v3143_v15 = vmul.f32 18.0, %v3101_v60  ;;  %v7183_v26 = vcvt.s32.f32 %v5988_v63  ;;  %vm3227_vm12 = vcmp.ge.f32.partialorder %v3101_v60, 1.0  ;;  %vm3269_vm13 = vcmp.le.f32.partialorder %v3101_v60, 16.0 }
 0x251   : > { %v1521_v46 = vadd.f32 %v5911_v22, %v1290_v8  ;;  %v2332_v22 = vsel %vm2309_vm9, %v2329_v3, %v7182_v7  ;;  %v977_v8 = vadd.f32 %v976_v45, %v7295_v55  ;;  %v5994_v10 = vsel %vm1765_vm10, %v1794_v24, %v1795_v43  ;;  %vm3311_vm14 = vmand %vm3227_vm12, %vm3269_vm13 }
 0x252   : > { %v2637_v3 = vsel %vm2598_vm11, %v2632_v11, %v5982_v27  ;;  %v3185_v55 = vsub.f32 %v2975_v62, %v3143_v15  ;;  %v3144_v7 = vmul.f32 18.0, %v3102_v25  ;;  %v3061_v44 = vmul.f32 0.055555556, %v3019_v57 }
 0x253   : > { %v1720_v38 = vpop.f32.mrf.mxu0  ;;  %v5979_v53 = vadd.f32 %v1718_v18, %v1521_v46  ;;  %2500 = vmatmul.bf16.gmra.mxu3 %v2332_v22  ;;  %v3020_v11 = vadd.f32 0.5, %v7183_v26  ;;  %v6008_v22 = vadd.s32 32, %v5943_v61  ;;  %vm3228_vm1 = vcmp.ge.f32.partialorder %v3102_v25, 1.0 }
 0x254   : > { %vm3353_vm15 = vcmp.ge.f32.partialorder %v3185_v55, 1.0  ;;  %v3186_v62 = vsub.f32 %v2976_v28, %v3144_v7  ;;  %v3103_v15 = vfloor.f32 %v3061_v44  ;;  %vm3270_vm2 = vcmp.le.f32.partialorder %v3102_v25, 16.0 }
 0x255   : > { %7294 = vst [vmem:[#allocation33_spill] sm:$0xff] %v5979_v53  ;;  %vm6011_vm3 = vmand %vm3311_vm14, %vm3353_vm15  ;;  %vm3437_vm4 = vcmp.le.f32.partialorder %v3185_v55, 16.0  ;;  %v3062_v57 = vmul.f32 0.055555556, %v3020_v11  ;;  %v2638_v28 = vrot.slane %v5399_v52, 1  ;;  %v2639_v7 = vrot.slane %v5406_v34, 2 }
 0x256   : > { %v1247_v40 = vpop.f32.mrf.mxu2  ;;  %v5999_v46 = vpop.f32.mrf.mxu3  ;;  %vm3312_vm5 = vmand %vm3228_vm1, %vm3270_vm2  ;;  %vm3354_vm6 = vcmp.ge.f32.partialorder %v3186_v62, 1.0  ;;  %v3145_v25 = vmul.f32 18.0, %v3103_v15  ;;  %vm3438_vm12 = vcmp.le.f32.partialorder %v3186_v62, 16.0  ;;  %v1797_v44 = vor.u32 %v1795_v43, %v5371_v6  ;;  %v7305_v6 = vld [vmem:[#allocation39_spill] sm:$0xff] }
 0x257   : > { %v1291_v18 = vadd.f32 %v1247_v40, %v977_v8  ;;  %v7184_v40 = vcvt.s32.f32 %v6008_v22  ;;  %vm6027_vm8 = vmand %vm6011_vm3, %vm3437_vm4  ;;  %v6048_v11 = vor.u32 %v2639_v7, %v2638_v28  ;;  %vm3229_vm14 = vcmp.ge.f32.partialorder %v3103_v15, 1.0 }
 0x258   : > { %v1932_v14 = vpop.f32.mrf.mxu1  ;;  %vm6033_vm13 = vmand %vm3312_vm5, %vm3354_vm6  ;;  %vm3271_vm15 = vcmp.le.f32.partialorder %v3103_v15, 16.0  ;;  %v7307_v28 = vrot.slane %v5406_v34, 1 }
 0x259   : > { %v1522_v45 = vadd.f32 %v5918_v48, %v1291_v18  ;;  %v2037_v48 = vadd.f32 %v1932_v14, %v5417_v1  ;;  %v6021_v14 = vld [vmem:[%s4851_s25 + $0x68] sm:$0xff]  ;;  %v3021_v26 = vadd.f32 0.5, %v7184_v40  ;;  %vm3480_vm1 = vmand %vm6033_vm13, %vm3438_vm12  ;;  %v2641_v62 = vsel %vm2598_vm11, %v5982_v27, %v6048_v11 }
 0x25a   : > { %vm3313_vm2 = vmand %vm3229_vm14, %vm3271_vm15 }
 0x25b   : > { %v2785_v59 = vpop.f32.mrf.mxu0  ;;  %1971 = vmatmul.bf16.gmra.mxu1 %v1793_v47  ;;  %2201 = vmatmul.bf16.gmra.mxu2 %v5994_v10  ;;  %v6003_v24 = vadd.f32 %v1720_v38, %v1522_v45  ;;  %v6045_v38 = vadd.s32 40, %v5943_v61  ;;  %v3063_v7 = vmul.f32 0.055555556, %v3021_v26 }
 0x25d   : > { %7297 = vst [vmem:[#allocation34_spill] sm:$0xff] %v6003_v24  ;;  %v7306_v24 = vcvt.s32.f32 %v5966_v4  ;;  %v6061_v4 = vsel %vm1765_vm10, %v1797_v44, %v7307_v28  ;;  %v4450_v44 = vsel %vm3480_vm1, 1.0, %v4802_v32  ;;  %v3105_v15 = vfloor.f32 %v3063_v7 }
 0x25e   : > { %2824 = vmatmul.bf16.gmra.mxu0 %v2637_v3  ;;  %v2162_v8 = vpop.f32.mrf.mxu2  ;;  %v6016_v18 = vpop.f32.mrf.mxu3  ;;  %v2333_v3 = vrot.slane %v6021_v14, 1 }
 0x25f   : > { %v2267_v47 = vadd.f32 %v2162_v8, %v2037_v48  ;;  %v3104_v8 = vfloor.f32 %v3062_v57  ;;  %v3187_v53 = vsub.f32 %v7306_v24, %v3145_v25 }
 0x260   : > { %v1934_v60 = vpop.f32.mrf.mxu1 }
 0x261   : > { %v2556_v45 = vadd.f32 %v5931_v39, %v2267_v47  ;;  %v7304_v39 = vrot.slane %v5975_v36, 1  ;;  %v2038_v43 = vadd.f32 %v1934_v60, %v7305_v6  ;;  %v4449_v36 = vsel %vm6027_vm8, 1.0, %v4802_v32 }
 0x262   : > { %v3146_v24 = vmul.f32 18.0, %v3104_v8  ;;  %vm3355_vm3 = vcmp.ge.f32.partialorder %v3187_v53, 1.0  ;;  %vm3439_vm5 = vcmp.le.f32.partialorder %v3187_v53, 16.0  ;;  %vm3230_vm6 = vcmp.ge.f32.partialorder %v3104_v8, 1.0 }
 0x263   : > { %v2787_v1 = vpop.f32.mrf.mxu0  ;;  %v2334_v47 = vsel %vm2309_vm9, %v7304_v39, %v2333_v3  ;;  %v2890_v40 = vadd.f32 %v2785_v59, %v2556_v45  ;;  %v7185_v59 = vcvt.s32.f32 %v6045_v38  ;;  %vm6082_vm4 = vmand %vm3313_vm2, %vm3355_vm3  ;;  %vm3272_vm8 = vcmp.le.f32.partialorder %v3104_v8, 16.0 }
 0x264   : > { %2505 = vmatmul.bf16.gmra.mxu3 %v2334_v47  ;;  %vm3481_vm12 = vmand %vm6082_vm4, %vm3439_vm5  ;;  %v3147_v53 = vmul.f32 18.0, %v3105_v15  ;;  %vm3231_vm2 = vcmp.ge.f32.partialorder %v3105_v15, 1.0  ;;  %vm3273_vm3 = vcmp.le.f32.partialorder %v3105_v15, 16.0 }
 0x265   : > { %v3689_v48 = vmul.f32 %v4449_v36, %v2890_v40  ;;  %vm3314_vm14 = vmand %vm3230_vm6, %vm3272_vm8  ;;  %v4451_v27 = vsel %vm3481_vm12, 1.0, %v4802_v32 }
 0x266   : > { %v2164_v57 = vpop.f32.mrf.mxu2  ;;  %v6064_v25 = vpop.f32.mrf.mxu3  ;;  %vm3315_vm5 = vmand %vm3231_vm2, %vm3273_vm3 }
 0x267   : > { %v2268_v39 = vadd.f32 %v2164_v57, %v2038_v43  ;;  %v6092_v57 = vadd.s32 48, %v5943_v61 }
 0x268   : > { %v1937_v60 = vpop.f32.mrf.mxu1 }
 0x269   : > { %v2557_v45 = vadd.f32 %v5938_v54, %v2268_v39  ;;  %v7310_v54 = vcvt.s32.f32 %v5988_v63  ;;  %v2039_v43 = vadd.f32 %v1937_v60, %v5452_v5  ;;  %v3778_v39 = vmul.f32 %v3689_v48, %v2890_v40 }
 0x26a   : > { %v2642_v5 = vrot.slane %v5440_v31, 1  ;;  %v2643_v60 = vrot.slane %v5447_v49, 2 }
 0x26b   : > { %v2790_v55 = vpop.f32.mrf.mxu0  ;;  %v2891_v47 = vadd.f32 %v2787_v1, %v2557_v45  ;;  %1976 = vmatmul.bf16.gmra.mxu1 %v5994_v10  ;;  %2206 = vmatmul.bf16.gmra.mxu2 %v6061_v4  ;;  %v3188_v26 = vsub.f32 %v7310_v54, %v3146_v24  ;;  %v3022_v10 = vadd.f32 0.5, %v7185_v59  ;;  %v6108_v54 = vld [vmem:[%s4851_s25 + $0x70] sm:$0xff] }
 0x26d   : > { %v4601_v1 = vpack.c.bf16 %v2891_v47, %v2890_v40  ;;  %v3690_v6 = vmul.f32 %v4450_v44, %v2891_v47  ;;  %vm3356_vm13 = vcmp.ge.f32.partialorder %v3188_v26, 1.0  ;;  %v3064_v7 = vmul.f32 0.055555556, %v3022_v10 }
 0x26e   : > { %2829 = vmatmul.bf16.gmra.mxu0 %v2641_v62  ;;  %v2167_v36 = vpop.f32.mrf.mxu2  ;;  %v6100_v62 = vpop.f32.mrf.mxu3  ;;  %vm3440_vm15 = vcmp.le.f32.partialorder %v3188_v26, 16.0  ;;  %v7311_v10 = vrot.slane %v5406_v34, 1  ;;  %vm6116_vm1 = vmand %vm3314_vm14, %vm3356_vm13  ;;  %v7314_v34 = vld [vmem:[#allocation40_spill] sm:$0xff] }
 0x26f   : > { %4602 = vst [vmem:[%s6080_s26] sm:$0xff] %v4601_v1   ;;  %v3731_v28 = vadd.f32 %v3690_v6, %v3689_v48  ;;  %v3779_v45 = vmul.f32 %v3690_v6, %v2891_v47  ;;  %v2269_v63 = vadd.f32 %v2167_v36, %v2039_v43  ;;  %v2981_v47 = vcvt.s32.f32 %v6092_v57  ;;  %vm3482_vm4 = vmand %vm6116_vm1, %vm3440_vm15 }
 0x270   : > { %v1939_v24 = vpop.f32.mrf.mxu1  ;;  %v2335_v1 = vrot.slane %v6108_v54, 1  ;;  %v1800_v43 = vor.u32 %v7311_v10, %v5399_v52  ;;  %v6120_v36 = vor.u32 %v2643_v60, %v2642_v5 }
 0x271   : > { %v3820_v44 = vadd.f32 %v3779_v45, %v3778_v39  ;;  %v2558_v40 = vadd.f32 %v5957_v30, %v2269_v63  ;;  %v1801_v30 = vrot.slane %v5447_v49, 1  ;;  %v3106_v39 = vfloor.f32 %v3064_v7 }
 0x272   : > { %v6128_v45 = vadd.s32 56, %v5943_v61  ;;  %v2040_v63 = vadd.f32 %v1939_v24, %v7314_v34  ;;  %v3023_v5 = vadd.f32 0.5, %v2981_v47  ;;  %v2645_v24 = vsel %vm2598_vm11, %v6048_v11, %v6120_v36  ;;  %v6180_v11 = vld [vmem:[%s4851_s25 + $0x78] sm:$0xff] }
 0x273   : > { %v2792_v48 = vpop.f32.mrf.mxu0  ;;  %v2892_v6 = vadd.f32 %v2790_v55, %v2558_v40  ;;  %v2336_v55 = vsel %vm2309_vm9, %v2333_v3, %v2335_v1  ;;  %v7315_v40 = vcvt.s32.f32 %v6008_v22  ;;  %v6141_v22 = vsel %vm1765_vm10, %v1800_v43, %v1801_v30 }
 0x274   : > { %2510 = vmatmul.bf16.gmra.mxu3 %v2336_v55  ;;  %v4452_v43 = vsel %vm3482_vm4, 1.0, %v4802_v32  ;;  %vm3232_vm13 = vcmp.ge.f32.partialorder %v3106_v39, 1.0  ;;  %vm3274_vm14 = vcmp.le.f32.partialorder %v3106_v39, 16.0  ;;  %v6200_v49 = vadd.s32 72, %v5943_v61 }
 0x275   : > { %v3691_v52 = vmul.f32 %v4451_v27, %v2892_v6  ;;  %v3189_v10 = vsub.f32 %v7315_v40, %v3147_v53  ;;  %v3148_v53 = vmul.f32 18.0, %v3106_v39  ;;  %v2982_v27 = vcvt.s32.f32 %v6128_v45  ;;  %vm3316_vm2 = vmand %vm3232_vm13, %vm3274_vm14 }
 0x276   : > { %v2169_v60 = vpop.f32.mrf.mxu2 }
 0x277   : > { %v3732_v7 = vadd.f32 %v3731_v28, %v3691_v52  ;;  %v3780_v14 = vmul.f32 %v3691_v52, %v2892_v6  ;;  %v2270_v59 = vadd.f32 %v2169_v60, %v2040_v63  ;;  %v6147_v28 = vpop.f32.mrf.mxu3  ;;  %vm3357_vm6 = vcmp.ge.f32.partialorder %v3189_v10, 1.0 }
 0x278   : > { %v1942_v3 = vpop.f32.mrf.mxu1  ;;  %v3065_v52 = vmul.f32 0.055555556, %v3023_v5  ;;  %vm6154_vm8 = vmand %vm3315_vm5, %vm3357_vm6  ;;  %vm3441_vm12 = vcmp.le.f32.partialorder %v3189_v10, 16.0  ;;  %v3024_v15 = vadd.f32 0.5, %v2982_v27  ;;  %v2647_v10 = vrot.slane %v5476_v37, 2 }
 0x279   : > { %v3821_v55 = vadd.f32 %v3820_v44, %v3780_v14  ;;  %v2559_v26 = vadd.f32 %v5970_v41, %v2270_v59  ;;  %v7318_v41 = vcvt.s32.f32 %v6045_v38  ;;  %v6163_v44 = vadd.s32 64, %v5943_v61  ;;  %vm3483_vm15 = vmand %vm6154_vm8, %vm3441_vm12 }
 0x27a   : > { %v3107_v40 = vfloor.f32 %v3065_v52 }
 0x27b   : > { %v2795_v8 = vpop.f32.mrf.mxu0  ;;  %v2893_v34 = vadd.f32 %v2792_v48, %v2559_v26  ;;  %1981 = vmatmul.bf16.gmra.mxu1 %v6061_v4  ;;  %2211 = vmatmul.bf16.gmra.mxu2 %v6141_v22  ;;  %v3190_v59 = vsub.f32 %v7318_v41, %v3148_v53  ;;  %v2041_v4 = vadd.f32 %v1942_v3, %v5481_v13  ;;  %v3066_v53 = vmul.f32 0.055555556, %v3024_v15 }
 0x27c   : > { %v2983_v13 = vcvt.s32.f32 %v6163_v44  ;;  %v2337_v41 = vrot.slane %v6180_v11, 1  ;;  %vm3233_vm5 = vcmp.ge.f32.partialorder %v3107_v40, 1.0  ;;  %vm3275_vm6 = vcmp.le.f32.partialorder %v3107_v40, 16.0 }
 0x27d   : > { %v4606_v48 = vpack.c.bf16 %v2893_v34, %v2892_v6  ;;  %v3692_v63 = vmul.f32 %v4452_v43, %v2893_v34  ;;  %vm3358_vm1 = vcmp.ge.f32.partialorder %v3190_v59, 1.0  ;;  %v2646_v6 = vrot.slane %v5469_v19, 1  ;;  %vm3317_vm12 = vmand %vm3233_vm5, %vm3275_vm6 }
 0x27e   : > { %2834 = vmatmul.bf16.gmra.mxu0 %v2645_v24  ;;  %v2172_v5 = vpop.f32.mrf.mxu2  ;;  %v3149_v43 = vmul.f32 18.0, %v3107_v40  ;;  %vm3442_vm3 = vcmp.le.f32.partialorder %v3190_v59, 16.0  ;;  %vm6188_vm4 = vmand %vm3316_vm2, %vm3358_vm1 }
 0x27f   : > { %4706 = vst [vmem:[%s6080_s26 + $0x8] sm:$0xff] %v4606_v48   ;;  %v3733_v60 = vadd.f32 %v3732_v7, %v3692_v63  ;;  %v3781_v14 = vmul.f32 %v3692_v63, %v2893_v34  ;;  %v2271_v38 = vadd.f32 %v2172_v5, %v2041_v4  ;;  %v6172_v3 = vpop.f32.mrf.mxu3  ;;  %v4453_v34 = vsel %vm3483_vm15, 1.0, %v4802_v32  ;;  %vm3484_vm8 = vmand %vm6188_vm4, %vm3442_vm3 }
 0x280   : > { %v1944_v24 = vpop.f32.mrf.mxu1  ;;  %v3108_v48 = vfloor.f32 %v3066_v53  ;;  %v3025_v63 = vadd.f32 0.5, %v2983_v13  ;;  %v6203_v5 = vor.u32 %v2647_v10, %v2646_v6 }
 0x281   : > { %v3822_v26 = vadd.f32 %v3821_v55, %v3781_v14  ;;  %v2560_v52 = vadd.f32 %v5999_v46, %v2271_v38  ;;  %v1803_v55 = vor.u32 %v1801_v30, %v5440_v31  ;;  %v1804_v46 = vrot.slane %v5476_v37, 1  ;;  %v7321_v30 = vld [vmem:[#allocation41_spill] sm:$0xff] }
 0x282   : > { %v2042_v4 = vadd.f32 %v1944_v24, %v7321_v30  ;;  %v3191_v14 = vsub.f32 %v2981_v47, %v3149_v43  ;;  %v3150_v6 = vmul.f32 18.0, %v3108_v48  ;;  %v3067_v57 = vmul.f32 0.055555556, %v3025_v63 }
 0x283   : > { %v2797_v7 = vpop.f32.mrf.mxu0  ;;  %v2894_v15 = vadd.f32 %v2795_v8, %v2560_v52  ;;  %v2338_v8 = vsel %vm2309_vm9, %v2335_v1, %v2337_v41  ;;  %v6213_v24 = vsel %vm1765_vm10, %v1803_v55, %v1804_v46  ;;  %v2984_v47 = vcvt.s32.f32 %v6200_v49 }
 0x284   : > { %2515 = vmatmul.bf16.gmra.mxu3 %v2338_v8  ;;  %v2649_v59 = vsel %vm2598_vm11, %v6120_v36, %v6203_v5  ;;  %vm3359_vm13 = vcmp.ge.f32.partialorder %v3191_v14, 1.0  ;;  %v4454_v55 = vsel %vm3484_vm8, 1.0, %v4802_v32  ;;  %vm3443_vm15 = vcmp.le.f32.partialorder %v3191_v14, 16.0 }
 0x285   : > { %v3693_v31 = vmul.f32 %v4453_v34, %v2894_v15  ;;  %vm6227_vm14 = vmand %vm3317_vm12, %vm3359_vm13  ;;  %v3192_v36 = vsub.f32 %v2982_v27, %v3150_v6  ;;  %v3109_v40 = vfloor.f32 %v3067_v57  ;;  %vm3234_vm1 = vcmp.ge.f32.partialorder %v3108_v48, 1.0 }
 0x286   : > { %v2174_v38 = vpop.f32.mrf.mxu2  ;;  %vm3276_vm2 = vcmp.le.f32.partialorder %v3108_v48, 16.0  ;;  %vm3485_vm3 = vmand %vm6227_vm14, %vm3443_vm15 }
 0x287   : > { %v3734_v53 = vadd.f32 %v3733_v60, %v3693_v31  ;;  %v3782_v52 = vmul.f32 %v3693_v31, %v2894_v15  ;;  %v2272_v54 = vadd.f32 %v2174_v38, %v2042_v4  ;;  %v6216_v10 = vpop.f32.mrf.mxu3  ;;  %vm3360_vm4 = vcmp.ge.f32.partialorder %v3192_v36, 1.0  ;;  %vm3318_vm5 = vmand %vm3234_vm1, %vm3276_vm2 }
 0x288   : > { %v1947_v1 = vpop.f32.mrf.mxu1  ;;  %v3151_v14 = vmul.f32 18.0, %v3109_v40  ;;  %v4455_v57 = vsel %vm3485_vm3, 1.0, %v4802_v32  ;;  %vm3444_vm6 = vcmp.le.f32.partialorder %v3192_v36, 16.0  ;;  %vm6261_vm8 = vmand %vm3318_vm5, %vm3360_vm4  ;;  %vm3235_vm12 = vcmp.ge.f32.partialorder %v3109_v40, 1.0 }
 0x289   : > { %v3823_v43 = vadd.f32 %v3822_v26, %v3782_v52  ;;  %v2561_v60 = vadd.f32 %v6016_v18, %v2272_v54  ;;  %v3026_v26 = vadd.f32 0.5, %v2984_v47  ;;  %v2043_v8 = vadd.f32 %v1947_v1, %v5519_v42  ;;  %vm3486_vm14 = vmand %vm6261_vm8, %vm3444_vm6 }
 0x28a   : > { %v2651_v42 = vrot.slane %v5508_v12, 2  ;;  %vm3277_vm13 = vcmp.le.f32.partialorder %v3109_v40, 16.0 }
 0x28b   : > { %v2800_v34 = vpop.f32.mrf.mxu0  ;;  %v2895_v39 = vadd.f32 %v2797_v7, %v2561_v60  ;;  %1986 = vmatmul.bf16.gmra.mxu1 %v6141_v22  ;;  %2216 = vmatmul.bf16.gmra.mxu2 %v6213_v24  ;;  %v6237_v22 = vadd.s32 80, %v5943_v61  ;;  %v3068_v38 = vmul.f32 0.055555556, %v3026_v26  ;;  %v6253_v60 = vld [vmem:[%s4851_s25 + $0x80] sm:$0xff]  ;;  %v6273_v26 = vadd.s32 88, %v5943_v61  ;;  %vm3319_vm15 = vmand %vm3235_vm12, %vm3277_vm13 }
 0x28d   : > { %v4611_v63 = vpack.c.bf16 %v2895_v39, %v2894_v15  ;;  %v3694_v7 = vmul.f32 %v4454_v55, %v2895_v39  ;;  %v2650_v15 = vrot.slane %v5501_v20, 1  ;;  %v2985_v6 = vcvt.s32.f32 %v6237_v22 }
 0x28e   : > { %2839 = vmatmul.bf16.gmra.mxu0 %v2649_v59  ;;  %v2177_v31 = vpop.f32.mrf.mxu2  ;;  %v2339_v59 = vrot.slane %v6253_v60, 1  ;;  %v3110_v18 = vfloor.f32 %v3068_v38 }
 0x28f   : > { %4707 = vst [vmem:[%s6080_s26 + $0x10] sm:$0xff] %v4611_v63   ;;  %v3735_v30 = vadd.f32 %v3734_v53, %v3694_v7  ;;  %v3783_v4 = vmul.f32 %v3694_v7, %v2895_v39  ;;  %v2273_v45 = vadd.f32 %v2177_v31, %v2043_v8  ;;  %v6245_v52 = vpop.f32.mrf.mxu3  ;;  %v6265_v39 = vor.u32 %v2651_v42, %v2650_v15 }
 0x290   : > { %v1949_v27 = vpop.f32.mrf.mxu1  ;;  %v3027_v63 = vadd.f32 0.5, %v2985_v6  ;;  %v4456_v42 = vsel %vm3486_vm14, 1.0, %v4802_v32  ;;  %vm3236_vm4 = vcmp.ge.f32.partialorder %v3110_v18, 1.0  ;;  %vm3278_vm5 = vcmp.le.f32.partialorder %v3110_v18, 16.0 }
 0x291   : > { %v3824_v54 = vadd.f32 %v3823_v43, %v3783_v4  ;;  %v2562_v1 = vadd.f32 %v6064_v25, %v2273_v45  ;;  %v1806_v43 = vor.u32 %v1804_v46, %v5469_v19  ;;  %v1807_v25 = vrot.slane %v5508_v12, 1  ;;  %vm3320_vm12 = vmand %vm3236_vm4, %vm3278_vm5 }
 0x292   : > { %v2044_v37 = vadd.f32 %v1949_v27, %v5534_v56  ;;  %v3193_v46 = vsub.f32 %v2983_v13, %v3151_v14  ;;  %v2653_v44 = vsel %vm2598_vm11, %v6203_v5, %v6265_v39  ;;  %v3152_v13 = vmul.f32 18.0, %v3110_v18 }
 0x293   : > { %v2802_v53 = vpop.f32.mrf.mxu0  ;;  %v2896_v55 = vadd.f32 %v2800_v34, %v2562_v1  ;;  %v2340_v34 = vsel %vm2309_vm9, %v2337_v41, %v2339_v59  ;;  %v6286_v56 = vsel %vm1765_vm10, %v1806_v43, %v1807_v25  ;;  %v2986_v4 = vcvt.s32.f32 %v6273_v26 }
 0x294   : > { %2520 = vmatmul.bf16.gmra.mxu3 %v2340_v34  ;;  %vm3361_vm1 = vcmp.ge.f32.partialorder %v3193_v46, 1.0  ;;  %v3069_v15 = vmul.f32 0.055555556, %v3027_v63  ;;  %vm3445_vm3 = vcmp.le.f32.partialorder %v3193_v46, 16.0  ;;  %v2655_v46 = vrot.slane %v5546_v2, 2 }
 0x295   : > { %v3695_v19 = vmul.f32 %v4455_v57, %v2896_v55  ;;  %vm6299_vm2 = vmand %vm3319_vm15, %vm3361_vm1  ;;  %v3028_v40 = vadd.f32 0.5, %v2986_v4  ;;  %v6345_v12 = vadd.s32 104, %v5943_v61 }
 0x296   : > { %v2179_v7 = vpop.f32.mrf.mxu2  ;;  %v3111_v57 = vfloor.f32 %v3069_v15  ;;  %vm3487_vm6 = vmand %vm6299_vm2, %vm3445_vm3 }
 0x297   : > { %v3736_v8 = vadd.f32 %v3735_v30, %v3695_v19  ;;  %v3784_v11 = vmul.f32 %v3695_v19, %v2896_v55  ;;  %v2274_v31 = vadd.f32 %v2179_v7, %v2044_v37  ;;  %v6292_v30 = vpop.f32.mrf.mxu3  ;;  %v3070_v19 = vmul.f32 0.055555556, %v3028_v40 }
 0x298   : > { %v1952_v41 = vpop.f32.mrf.mxu1  ;;  %vm3237_vm15 = vcmp.ge.f32.partialorder %v3111_v57, 1.0  ;;  %vm3279_vm1 = vcmp.le.f32.partialorder %v3111_v57, 16.0 }
 0x299   : > { %v3825_v45 = vadd.f32 %v3824_v54, %v3784_v11  ;;  %v2563_v36 = vadd.f32 %v6100_v62, %v2274_v31  ;;  %v3194_v62 = vsub.f32 %v2984_v47, %v3152_v13  ;;  %v6308_v54 = vadd.s32 96, %v5943_v61  ;;  %vm3321_vm3 = vmand %vm3237_vm15, %vm3279_vm1 }
 0x29a   : > { %v3153_v31 = vmul.f32 18.0, %v3111_v57  ;;  %v3112_v15 = vfloor.f32 %v3070_v19 }
 0x29b   : > { %v2805_v27 = vpop.f32.mrf.mxu0  ;;  %v2897_v38 = vadd.f32 %v2802_v53, %v2563_v36  ;;  %1991 = vmatmul.bf16.gmra.mxu1 %v6213_v24  ;;  %2221 = vmatmul.bf16.gmra.mxu2 %v6286_v56  ;;  %v7328_v24 = vld [vmem:[#allocation42_spill] sm:$0xff]  ;;  %vm3362_vm8 = vcmp.ge.f32.partialorder %v3194_v62, 1.0  ;;  %v2987_v37 = vcvt.s32.f32 %v6308_v54  ;;  %vm3446_vm13 = vcmp.le.f32.partialorder %v3194_v62, 16.0 }
 0x29c   : > { %v2045_v14 = vadd.f32 %v1952_v41, %v7328_v24  ;;  %v4457_v41 = vsel %vm3487_vm6, 1.0, %v4802_v32  ;;  %vm6333_vm14 = vmand %vm3320_vm12, %vm3362_vm8  ;;  %v3195_v40 = vsub.f32 %v2985_v6, %v3153_v31  ;;  %v2988_v6 = vcvt.s32.f32 %v6345_v12 }
 0x29d   : > { %v4616_v1 = vpack.c.bf16 %v2897_v38, %v2896_v55  ;;  %v3696_v53 = vmul.f32 %v4456_v42, %v2897_v38  ;;  %v2654_v55 = vrot.slane %v5539_v58, 1  ;;  %v3029_v42 = vadd.f32 0.5, %v2987_v37  ;;  %vm3488_vm2 = vmand %vm6333_vm14, %vm3446_vm13 }
 0x29e   : > { %2844 = vmatmul.bf16.gmra.mxu0 %v2653_v44  ;;  %v2182_v43 = vpop.f32.mrf.mxu2  ;;  %v6325_v44 = vld [vmem:[%s4851_s25 + $0x88] sm:$0xff]  ;;  %vm3363_vm4 = vcmp.ge.f32.partialorder %v3195_v40, 1.0  ;;  %vm3447_vm6 = vcmp.le.f32.partialorder %v3195_v40, 16.0  ;;  %vm3238_vm8 = vcmp.ge.f32.partialorder %v3112_v15, 1.0  ;;  %vm3280_vm12 = vcmp.le.f32.partialorder %v3112_v15, 16.0 }
 0x29f   : > { %4708 = vst [vmem:[%s6080_s26 + $0x18] sm:$0xff] %v4616_v1   ;;  %v3737_v48 = vadd.f32 %v3736_v8, %v3696_v53  ;;  %v3785_v34 = vmul.f32 %v3696_v53, %v2897_v38  ;;  %v2275_v49 = vadd.f32 %v2182_v43, %v2045_v14  ;;  %v6317_v63 = vpop.f32.mrf.mxu3  ;;  %v2341_v13 = vrot.slane %v6325_v44, 1  ;;  %vm6372_vm5 = vmand %vm3321_vm3, %vm3363_vm4 }
 0x2a0   : > { %v1954_v47 = vpop.f32.mrf.mxu1  ;;  %v6348_v5 = vor.u32 %v2655_v46, %v2654_v55  ;;  %v3154_v43 = vmul.f32 18.0, %v3112_v15  ;;  %v3071_v22 = vmul.f32 0.055555556, %v3029_v42  ;;  %v4458_v55 = vsel %vm3488_vm2, 1.0, %v4802_v32  ;;  %v7334_v46 = vld [vmem:[#allocation46_spill] sm:$0xff]  ;;  %vm3489_vm13 = vmand %vm6372_vm5, %vm3447_vm6 }
 0x2a1   : > { %v3826_v7 = vadd.f32 %v3825_v45, %v3785_v34  ;;  %v2564_v11 = vadd.f32 %v6147_v28, %v2275_v49  ;;  %v1809_v45 = vor.u32 %v1807_v25, %v5501_v20  ;;  %v1810_v28 = vrot.slane %v5546_v2, 1  ;;  %v7331_v25 = vld [vmem:[#allocation43_spill] sm:$0xff]  ;;  %vm3322_vm15 = vmand %vm3238_vm8, %vm3280_vm12 }
 0x2a2   : > { %v2046_v38 = vadd.f32 %v1954_v47, %v7331_v25  ;;  %v2657_v62 = vsel %vm2598_vm11, %v6265_v39, %v6348_v5  ;;  %v3196_v39 = vsub.f32 %v2986_v4, %v3154_v43  ;;  %v3113_v57 = vfloor.f32 %v3071_v22  ;;  %v6398_v43 = vld [vmem:[%s4851_s25 + $0x90] sm:$0xff]  ;;  %v7339_v2 = vld [vmem:[#allocation47_spill] sm:$0xff] }
 0x2a3   : > { %v2807_v8 = vpop.f32.mrf.mxu0  ;;  %v2898_v36 = vadd.f32 %v2805_v27, %v2564_v11  ;;  %v2342_v27 = vsel %vm2309_vm9, %v2339_v59, %v2341_v13  ;;  %v6358_v14 = vsel %vm1765_vm10, %v1809_v45, %v1810_v28  ;;  %v2343_v22 = vrot.slane %v6398_v43, 1 }
 0x2a4   : > { %2525 = vmatmul.bf16.gmra.mxu3 %v2342_v27  ;;  %vm3364_vm14 = vcmp.ge.f32.partialorder %v3196_v39, 1.0  ;;  %v7336_v27 = vld [vmem:[#allocation45_spill] sm:$0xff]  ;;  %v3155_v40 = vmul.f32 18.0, %v3113_v57  ;;  %vm3448_vm1 = vcmp.le.f32.partialorder %v3196_v39, 16.0  ;;  %vm3239_vm3 = vcmp.ge.f32.partialorder %v3113_v57, 1.0 }
 0x2a5   : > { %v3697_v20 = vmul.f32 %v4457_v41, %v2898_v36  ;;  %vm6406_vm2 = vmand %vm3322_vm15, %vm3364_vm14  ;;  %vm3281_vm4 = vcmp.le.f32.partialorder %v3113_v57, 16.0 }
 0x2a6   : > { %v2184_v1 = vpop.f32.mrf.mxu2  ;;  %vm3490_vm5 = vmand %vm6406_vm2, %vm3448_vm1 }
 0x2a7   : > { %v3738_v53 = vadd.f32 %v3737_v48, %v3697_v20  ;;  %v3786_v24 = vmul.f32 %v3697_v20, %v2898_v36  ;;  %v2276_v60 = vadd.f32 %v2184_v1, %v2046_v38  ;;  %v6361_v34 = vpop.f32.mrf.mxu3  ;;  %v2659_v20 = vrot.slane %v7336_v27, 2  ;;  %vm3323_vm6 = vmand %vm3239_vm3, %vm3281_vm4 }
 0x2a8   : > { %v1957_v59 = vpop.f32.mrf.mxu1 }
 0x2a9   : > { %v3827_v49 = vadd.f32 %v3826_v7, %v3786_v24  ;;  %v2565_v48 = vadd.f32 %v6172_v3, %v2276_v60  ;;  %v3030_v7 = vadd.f32 0.5, %v2988_v6  ;;  %v2047_v31 = vadd.f32 %v1957_v59, %v7334_v46 }
 0x2aa   : > { %v4459_v59 = vsel %vm3489_vm13, 1.0, %v4802_v32  ;;  %v3197_v3 = vsub.f32 %v2987_v37, %v3155_v40 }
 0x2ab   : > { %v2810_v47 = vpop.f32.mrf.mxu0  ;;  %v2899_v19 = vadd.f32 %v2807_v8, %v2565_v48  ;;  %1996 = vmatmul.bf16.gmra.mxu1 %v6286_v56  ;;  %2226 = vmatmul.bf16.gmra.mxu2 %v6358_v14  ;;  %v6382_v56 = vadd.s32 112, %v5943_v61  ;;  %v3072_v25 = vmul.f32 0.055555556, %v3030_v7 }
 0x2ac   : > { %vm3365_vm8 = vcmp.ge.f32.partialorder %v3197_v3, 1.0  ;;  %vm3449_vm13 = vcmp.le.f32.partialorder %v3197_v3, 16.0  ;;  %v2663_v3 = vrot.slane %v5619_v23, 2 }
 0x2ad   : > { %v4621_v11 = vpack.c.bf16 %v2899_v19, %v2898_v36  ;;  %v3698_v8 = vmul.f32 %v4458_v55, %v2899_v19  ;;  %v7335_v36 = vld [vmem:[#allocation44_spill] sm:$0xff]  ;;  %v2989_v60 = vcvt.s32.f32 %v6382_v56  ;;  %v3114_v55 = vfloor.f32 %v3072_v25  ;;  %vm6444_vm12 = vmand %vm3323_vm6, %vm3365_vm8 }
 0x2ae   : > { %2849 = vmatmul.bf16.gmra.mxu0 %v2657_v62  ;;  %v2187_v41 = vpop.f32.mrf.mxu2  ;;  %v2658_v42 = vrot.slane %v7335_v36, 1  ;;  %v6453_v25 = vadd.s32 128, %v5943_v61  ;;  %vm3491_vm1 = vmand %vm6444_vm12, %vm3449_vm13 }
 0x2af   : > { %4709 = vst [vmem:[%s6080_s26 + $0x20] sm:$0xff] %v4621_v11   ;;  %v3739_v45 = vadd.f32 %v3738_v53, %v3698_v8  ;;  %v3787_v18 = vmul.f32 %v3698_v8, %v2899_v19  ;;  %v2277_v26 = vadd.f32 %v2187_v41, %v2047_v31  ;;  %v6390_v38 = vpop.f32.mrf.mxu3  ;;  %v6418_v19 = vadd.s32 120, %v5943_v61 }
 0x2b0   : > { %v1959_v4 = vpop.f32.mrf.mxu1  ;;  %v6410_v62 = vor.u32 %v2659_v20, %v2658_v42  ;;  %v3031_v7 = vadd.f32 0.5, %v2989_v60  ;;  %v3156_v31 = vmul.f32 18.0, %v3114_v55  ;;  %v4460_v42 = vsel %vm3490_vm5, 1.0, %v4802_v32 }
 0x2b1   : > { %v3828_v1 = vadd.f32 %v3827_v49, %v3787_v18  ;;  %v2566_v24 = vadd.f32 %v6216_v10, %v2277_v26  ;;  %v1812_v49 = vor.u32 %v1810_v28, %v5539_v58  ;;  %v1813_v10 = vrot.slane %v7336_v27, 1 }
 0x2b2   : > { %v2048_v28 = vadd.f32 %v1959_v4, %v7339_v2  ;;  %v2661_v37 = vsel %vm2598_vm11, %v6348_v5, %v6410_v62  ;;  %v2990_v41 = vcvt.s32.f32 %v6418_v19  ;;  %v3073_v4 = vmul.f32 0.055555556, %v3031_v7 }
 0x2b3   : > { %v2812_v53 = vpop.f32.mrf.mxu0  ;;  %v2900_v48 = vadd.f32 %v2810_v47, %v2566_v24  ;;  %v2344_v47 = vsel %vm2309_vm9, %v2341_v13, %v2343_v22  ;;  %v6431_v54 = vsel %vm1765_vm10, %v1812_v49, %v1813_v10  ;;  %vm3240_vm14 = vcmp.ge.f32.partialorder %v3114_v55, 1.0 }
 0x2b4   : > { %2530 = vmatmul.bf16.gmra.mxu3 %v2344_v47  ;;  %v3032_v57 = vadd.f32 0.5, %v2990_v41  ;;  %v3115_v40 = vfloor.f32 %v3073_v4  ;;  %vm3282_vm15 = vcmp.le.f32.partialorder %v3114_v55, 16.0  ;;  %v6490_v27 = vadd.s32 136, %v5943_v61 }
 0x2b5   : > { %v3699_v58 = vmul.f32 %v4459_v59, %v2900_v48  ;;  %vm3324_vm3 = vmand %vm3240_vm14, %vm3282_vm15 }
 0x2b6   : > { %v2189_v11 = vpop.f32.mrf.mxu2  ;;  %v3074_v47 = vmul.f32 0.055555556, %v3032_v57  ;;  %vm3241_vm6 = vcmp.ge.f32.partialorder %v3115_v40, 1.0  ;;  %vm3283_vm8 = vcmp.le.f32.partialorder %v3115_v40, 16.0 }
 0x2b7   : > { %v3740_v8 = vadd.f32 %v3739_v45, %v3699_v58  ;;  %v3788_v44 = vmul.f32 %v3699_v58, %v2900_v48  ;;  %v2278_v46 = vadd.f32 %v2189_v11, %v2048_v28  ;;  %v6437_v45 = vpop.f32.mrf.mxu3  ;;  %v2991_v58 = vcvt.s32.f32 %v6453_v25  ;;  %vm3325_vm13 = vmand %vm3241_vm6, %vm3283_vm8 }
 0x2b8   : > { %v1962_v13 = vpop.f32.mrf.mxu1 }
 0x2b9   : > { %v3829_v18 = vadd.f32 %v3828_v1, %v3788_v44  ;;  %v2567_v39 = vadd.f32 %v6245_v52, %v2278_v46  ;;  %v3198_v52 = vsub.f32 %v2988_v6, %v3156_v31  ;;  %v4461_v44 = vsel %vm3491_vm1, 1.0, %v4802_v32  ;;  %v6470_v46 = vld [vmem:[%s4851_s25 + $0x98] sm:$0xff]  }
 0x2ba   : > { %v1815_v31 = vor.u32 %v1813_v10, %v7335_v36  ;;  %v7345_v10 = vld [vmem:[#allocation49_spill] sm:$0xff] }
 0x2bb   : > { %v2815_v26 = vpop.f32.mrf.mxu0  ;;  %v2901_v20 = vadd.f32 %v2812_v53, %v2567_v39  ;;  %2001 = vmatmul.bf16.gmra.mxu1 %v6358_v14  ;;  %2231 = vmatmul.bf16.gmra.mxu2 %v6431_v54  ;;  %v7342_v14 = vld [vmem:[#allocation48_spill] sm:$0xff]  ;;  %vm3366_vm2 = vcmp.ge.f32.partialorder %v3198_v52, 1.0  ;;  %vm3450_vm4 = vcmp.le.f32.partialorder %v3198_v52, 16.0  ;;  %v3033_v39 = vadd.f32 0.5, %v2991_v58 }
 0x2bc   : > { %v2049_v53 = vadd.f32 %v1962_v13, %v7342_v14  ;;  %v2345_v13 = vrot.slane %v6470_v46, 1  ;;  %vm6478_vm5 = vmand %vm3324_vm3, %vm3366_vm2 }
 0x2bd   : > { %v4626_v1 = vpack.c.bf16 %v2901_v20, %v2900_v48  ;;  %v3700_v24 = vmul.f32 %v4460_v42, %v2901_v20  ;;  %v2662_v48 = vrot.slane %v5612_v35, 1  ;;  %vm3492_vm12 = vmand %vm6478_vm5, %vm3450_vm4  ;;  %v3075_v56 = vmul.f32 0.055555556, %v3033_v39 }
 0x2be   : > { %2854 = vmatmul.bf16.gmra.mxu0 %v2661_v37  ;;  %v2192_v59 = vpop.f32.mrf.mxu2 }
 0x2bf   : > { %4710 = vst [vmem:[%s6080_s26 + $0x28] sm:$0xff] %v4626_v1   ;;  %v3741_v49 = vadd.f32 %v3740_v8, %v3700_v24  ;;  %v3789_v15 = vmul.f32 %v3700_v24, %v2901_v20  ;;  %v2279_v12 = vadd.f32 %v2192_v59, %v2049_v53  ;;  %v6462_v2 = vpop.f32.mrf.mxu3  ;;  %v3157_v8 = vmul.f32 18.0, %v3115_v40 }
 0x2c0   : > { %v1964_v6 = vpop.f32.mrf.mxu1  ;;  %v6493_v42 = vor.u32 %v2663_v3, %v2662_v48  ;;  %v3117_v40 = vfloor.f32 %v3075_v56 }
 0x2c1   : > { %v3830_v28 = vadd.f32 %v3829_v18, %v3789_v15  ;;  %v2568_v7 = vadd.f32 %v6292_v30, %v2279_v12  ;;  %v1816_v30 = vrot.slane %v5619_v23, 1  ;;  %v3116_v18 = vfloor.f32 %v3074_v47 }
 0x2c2   : > { %v2050_v4 = vadd.f32 %v1964_v6, %v7345_v10  ;;  %v3199_v20 = vsub.f32 %v2989_v60, %v3157_v8  ;;  %v2992_v60 = vcvt.s32.f32 %v6490_v27  ;;  %v2665_v52 = vsel %vm2598_vm11, %v6410_v62, %v6493_v42 }
 0x2c3   : > { %v2817_v11 = vpop.f32.mrf.mxu0  ;;  %v2902_v37 = vadd.f32 %v2815_v26, %v2568_v7  ;;  %v2346_v26 = vsel %vm2309_vm9, %v2343_v22, %v2345_v13  ;;  %v6503_v24 = vsel %vm1765_vm10, %v1815_v31, %v1816_v30  ;;  %v3158_v14 = vmul.f32 18.0, %v3116_v18  ;;  %v7348_v7 = vld [vmem:[#allocation50_spill] sm:$0xff] }
 0x2c4   : > { %2535 = vmatmul.bf16.gmra.mxu3 %v2346_v26  ;;  %vm3367_vm14 = vcmp.ge.f32.partialorder %v3199_v20, 1.0  ;;  %v4462_v12 = vsel %vm3492_vm12, 1.0, %v4802_v32  ;;  %vm3451_vm1 = vcmp.le.f32.partialorder %v3199_v20, 16.0  ;;  %v3034_v48 = vadd.f32 0.5, %v2992_v60 }
 0x2c5   : > { %v3701_v36 = vmul.f32 %v4461_v44, %v2902_v37  ;;  %vm6517_vm15 = vmand %vm3325_vm13, %vm3367_vm14  ;;  %v3200_v62 = vsub.f32 %v2990_v41, %v3158_v14  ;;  %vm3242_vm2 = vcmp.ge.f32.partialorder %v3116_v18, 1.0  ;;  %vm3284_vm3 = vcmp.le.f32.partialorder %v3116_v18, 16.0 }
 0x2c6   : > { %v2194_v5 = vpop.f32.mrf.mxu2  ;;  %vm3493_vm4 = vmand %vm6517_vm15, %vm3451_vm1  ;;  %v2667_v31 = vrot.slane %v5654_v29, 2  ;;  %v3076_v55 = vmul.f32 0.055555556, %v3034_v48  ;;  %v6551_v14 = vadd.s32 152, %v5943_v61  ;;  %vm3243_vm13 = vcmp.ge.f32.partialorder %v3117_v40, 1.0 }
 0x2c7   : > { %v3742_v57 = vadd.f32 %v3741_v49, %v3701_v36  ;;  %v3790_v1 = vmul.f32 %v3701_v36, %v2902_v37  ;;  %v2280_v43 = vadd.f32 %v2194_v5, %v2050_v4  ;;  %v6506_v53 = vpop.f32.mrf.mxu3  ;;  %vm3368_vm5 = vcmp.ge.f32.partialorder %v3200_v62, 1.0  ;;  %vm3326_vm6 = vmand %vm3242_vm2, %vm3284_vm3 }
 0x2c8   : > { %v1967_v22 = vpop.f32.mrf.mxu1  ;;  %v3159_v4 = vmul.f32 18.0, %v3117_v40  ;;  %v4463_v5 = vsel %vm3493_vm4, 1.0, %v4802_v32  ;;  %vm6554_vm8 = vmand %vm3326_vm6, %vm3368_vm5  ;;  %vm3452_vm12 = vcmp.le.f32.partialorder %v3200_v62, 16.0  ;;  %vm3285_vm14 = vcmp.le.f32.partialorder %v3117_v40, 16.0 }
 0x2c9   : > { %v3831_v59 = vadd.f32 %v3830_v28, %v3790_v1  ;;  %v2569_v49 = vadd.f32 %v6317_v63, %v2280_v43  ;;  %vm3494_vm15 = vmand %vm6554_vm8, %vm3452_vm12  ;;  %v2994_v46 = vcvt.s32.f32 %v6551_v14  ;;  %v6598_v40 = vadd.s32 160, %v5943_v61 }
 0x2ca   : > { %vm3327_vm1 = vmand %vm3243_vm13, %vm3285_vm14 }
 0x2cb   : > { %v2820_v15 = vpop.f32.mrf.mxu0  ;;  %v2903_v6 = vadd.f32 %v2817_v11, %v2569_v49  ;;  %2006 = vmatmul.bf16.gmra.mxu1 %v6431_v54  ;;  %2236 = vmatmul.bf16.gmra.mxu2 %v6503_v24  ;;  %v2051_v11 = vadd.f32 %v1967_v22, %v7348_v7  ;;  %v6527_v54 = vadd.s32 144, %v5943_v61  ;;  %v1818_v22 = vor.u32 %v1816_v30, %v5612_v35  ;;  %v7351_v30 = vld [vmem:[#allocation51_spill] sm:$0xff] }
 0x2cd   : > { %v4631_v47 = vpack.c.bf16 %v2903_v6, %v2902_v37  ;;  %v3702_v28 = vmul.f32 %v4462_v12, %v2903_v6  ;;  %v2666_v37 = vrot.slane %v5647_v17, 1  ;;  %v2993_v20 = vcvt.s32.f32 %v6527_v54 }
 0x2ce   : > { %2859 = vmatmul.bf16.gmra.mxu0 %v2665_v52  ;;  %v2197_v3 = vpop.f32.mrf.mxu2 }
 0x2cf   : > { %4711 = vst [vmem:[%s6080_s26 + $0x30] sm:$0xff] %v4631_v47   ;;  %v3743_v8 = vadd.f32 %v3742_v57, %v3702_v28  ;;  %v3791_v44 = vmul.f32 %v3702_v28, %v2903_v6  ;;  %v2281_v19 = vadd.f32 %v2197_v3, %v2051_v11  ;;  %v6535_v39 = vpop.f32.mrf.mxu3  ;;  %v6543_v57 = vld [vmem:[%s4851_s25 + $0xa0] sm:$0xff]   ;;  %v6558_v56 = vor.u32 %v2667_v31, %v2666_v37 }
 0x2d0   : > { %v1969_v41 = vpop.f32.mrf.mxu1  ;;  %v2347_v1 = vrot.slane %v6543_v57, 1  ;;  %v3035_v52 = vadd.f32 0.5, %v2993_v20 }
 0x2d1   : > { %v3832_v26 = vadd.f32 %v3831_v59, %v3791_v44  ;;  %v2570_v36 = vadd.f32 %v6361_v34, %v2281_v19  ;;  %v1819_v34 = vrot.slane %v5654_v29, 1  ;;  %v3118_v59 = vfloor.f32 %v3076_v55 }
 0x2d2   : > { %v2348_v35 = vsel %vm2309_vm9, %v2345_v13, %v2347_v1  ;;  %v2052_v49 = vadd.f32 %v1969_v41, %v7351_v30  ;;  %v3077_v3 = vmul.f32 0.055555556, %v3035_v52 }
 0x2d3   : > { %v2822_v10 = vpop.f32.mrf.mxu0  ;;  %v2904_v43 = vadd.f32 %v2820_v15, %v2570_v36  ;;  %v3201_v15 = vsub.f32 %v2991_v58, %v3159_v4  ;;  %v6577_v25 = vsel %vm1765_vm10, %v1818_v22, %v1819_v34  ;;  %v2669_v58 = vsel %vm2598_vm11, %v6493_v42, %v6558_v56 }
 0x2d4   : > { %2540 = vmatmul.bf16.gmra.mxu3 %v2348_v35  ;;  %v3160_v47 = vmul.f32 18.0, %v3118_v59  ;;  %v3036_v42 = vadd.f32 0.5, %v2994_v46  ;;  %v3119_v31 = vfloor.f32 %v3077_v3  ;;  %vm3244_vm5 = vcmp.ge.f32.partialorder %v3118_v59, 1.0 }
 0x2d5   : > { %v3703_v23 = vmul.f32 %v4463_v5, %v2904_v43  ;;  %vm3369_vm2 = vcmp.ge.f32.partialorder %v3201_v15, 1.0  ;;  %vm3453_vm4 = vcmp.le.f32.partialorder %v3201_v15, 16.0  ;;  %vm3286_vm6 = vcmp.le.f32.partialorder %v3118_v59, 16.0 }
 0x2d6   : > { %v2199_v12 = vpop.f32.mrf.mxu2  ;;  %vm6591_vm3 = vmand %vm3327_vm1, %vm3369_vm2  ;;  %v3078_v27 = vmul.f32 0.055555556, %v3036_v42  ;;  %v2670_v4 = vrot.slane %v5679_v16, 1  ;;  %v2995_v5 = vcvt.s32.f32 %v6598_v40  ;;  %v2671_v35 = vrot.slane %v5686_v51, 2 }
 0x2d7   : > { %v3744_v6 = vadd.f32 %v3743_v8, %v3703_v23  ;;  %v3792_v63 = vmul.f32 %v3703_v23, %v2904_v43  ;;  %v2282_v48 = vadd.f32 %v2199_v12, %v2052_v49  ;;  %v6582_v28 = vpop.f32.mrf.mxu3  ;;  %v4464_v8 = vsel %vm3494_vm15, 1.0, %v4802_v32  ;;  %vm3495_vm8 = vmand %vm6591_vm3, %vm3453_vm4  ;;  %v6614_v49 = vld [vmem:[%s4851_s25] sm:$0xff]  }
 0x2d8   : > { %v1972_v13 = vpop.f32.mrf.mxu1  ;;  %vm3328_vm13 = vmand %vm3244_vm5, %vm3286_vm6  ;;  %v3161_v23 = vmul.f32 18.0, %v3119_v31  ;;  %v4465_v30 = vsel %vm3495_vm8, 1.0, %v4802_v32  ;;  %v2368_v15 = vrot.slane %v6614_v49, 1  ;;  %v1821_v12 = vor.u32 %v1819_v34, %v5647_v17 }
 0x2d9   : > { %v3833_v7 = vadd.f32 %v3832_v26, %v3792_v63  ;;  %v2571_v62 = vadd.f32 %v6390_v38, %v2282_v48  ;;  %v3202_v38 = vsub.f32 %v2992_v60, %v3160_v47  ;;  %v3037_v63 = vadd.f32 0.5, %v2995_v5 }
 0x2da   : > { %v2375_v48 = vsel %vm2309_vm9, %v2347_v1, %v2368_v15  ;;  %v6636_v17 = vadd.s32 168, %v5943_v61  ;;  %vm3245_vm1 = vcmp.ge.f32.partialorder %v3119_v31, 1.0  ;;  %vm3287_vm2 = vcmp.le.f32.partialorder %v3119_v31, 16.0 }
 0x2db   : > { %v2825_v11 = vpop.f32.mrf.mxu0  ;;  %v2905_v44 = vadd.f32 %v2822_v10, %v2571_v62  ;;  %2011 = vmatmul.bf16.gmra.mxu1 %v6503_v24  ;;  %2241 = vmatmul.bf16.gmra.mxu2 %v6577_v25  ;;  %v2053_v24 = vadd.f32 %v1972_v13, %v5700_v33  ;;  %vm3370_vm12 = vcmp.ge.f32.partialorder %v3202_v38, 1.0  ;;  %vm3454_vm14 = vcmp.le.f32.partialorder %v3202_v38, 16.0  ;;  %vm3329_vm4 = vmand %vm3245_vm1, %vm3287_vm2 }
 0x2dc   : > { %vm6623_vm15 = vmand %vm3328_vm13, %vm3370_vm12  ;;  %v6639_v13 = vor.u32 %v2671_v35, %v2670_v4  ;;  %v3079_v54 = vmul.f32 0.055555556, %v3037_v63  ;;  %v7358_v4 = vld [vmem:[#allocation52_spill] sm:$0xff] }
 0x2dd   : > { %v4636_v41 = vpack.c.bf16 %v2905_v44, %v2904_v43  ;;  %v3704_v37 = vmul.f32 %v4464_v8, %v2905_v44  ;;  %vm3496_vm3 = vmand %vm6623_vm15, %vm3454_vm14 }
 0x2de   : > { %2864 = vmatmul.bf16.gmra.mxu0 %v2669_v58  ;;  %v2202_v55 = vpop.f32.mrf.mxu2  ;;  %v3203_v58 = vsub.f32 %v2993_v20, %v3161_v23  ;;  %v2996_v20 = vcvt.s32.f32 %v6636_v17  ;;  %v2673_v42 = vsel %vm2598_vm11, %v6558_v56, %v6639_v13  ;;  %v4466_v19 = vsel %vm3496_vm3, 1.0, %v4802_v32 }
 0x2df   : > { %4712 = vst [vmem:[%s6080_s26 + $0x38] sm:$0xff] %v4636_v41   ;;  %v3745_v26 = vadd.f32 %v3744_v6, %v3704_v37  ;;  %v3793_v36 = vmul.f32 %v3704_v37, %v2905_v44  ;;  %v2283_v10 = vadd.f32 %v2202_v55, %v2053_v24  ;;  %v6606_v33 = vpop.f32.mrf.mxu3  ;;  %v1822_v6 = vrot.slane %v5686_v51, 1 }
 0x2e0   : > { %v1974_v60 = vpop.f32.mrf.mxu1  ;;  %vm3371_vm5 = vcmp.ge.f32.partialorder %v3203_v58, 1.0  ;;  %vm3455_vm8 = vcmp.le.f32.partialorder %v3203_v58, 16.0  ;;  %v3121_v37 = vfloor.f32 %v3079_v54  ;;  %v3038_v24 = vadd.f32 0.5, %v2996_v20 }
 0x2e1   : > { %v3834_v43 = vadd.f32 %v3833_v7, %v3793_v36  ;;  %v2572_v22 = vadd.f32 %v6437_v45, %v2283_v10  ;;  %v6620_v45 = vfloor.f32 %v3078_v27  ;;  %v2054_v34 = vadd.f32 %v1974_v60, %v5715_v50  ;;  %vm6665_vm6 = vmand %vm3329_vm4, %vm3371_vm5 }
 0x2e2   : > { %v6650_v50 = vsel %vm1765_vm10, %v1821_v12, %v1822_v6  ;;  %vm3497_vm14 = vmand %vm6665_vm6, %vm3455_vm8  ;;  %v3163_v12 = vmul.f32 18.0, %v3121_v37  ;;  %vm3247_vm4 = vcmp.ge.f32.partialorder %v3121_v37, 1.0  ;;  %vm3289_vm5 = vcmp.le.f32.partialorder %v3121_v37, 16.0 }
 0x2e3   : > { %v2827_v18 = vpop.f32.mrf.mxu0  ;;  %v2906_v52 = vadd.f32 %v2825_v11, %v2572_v22  ;;  %v3162_v1 = vmul.f32 18.0, %v6620_v45  ;;  %vm3246_vm12 = vcmp.ge.f32.partialorder %v6620_v45, 1.0  ;;  %vm3288_vm13 = vcmp.le.f32.partialorder %v6620_v45, 16.0  ;;  %vm3331_vm8 = vmand %vm3247_vm4, %vm3289_vm5 }
 0x2e4   : > { %2545 = vmatmul.bf16.gmra.mxu3 %v2375_v48  ;;  %v2675_v22 = vrot.slane %v5731_v9, 2  ;;  %vm3330_vm1 = vmand %vm3246_vm12, %vm3288_vm13  ;;  %v4467_v63 = vsel %vm3497_vm14, 1.0, %v4802_v32  ;;  %vm1855_vm5 = vcmask 1047552  }
 0x2e5   : > { %v3705_v29 = vmul.f32 %v4465_v30, %v2906_v52 }
 0x2e6   : > { %v2204_v47 = vpop.f32.mrf.mxu2 }
 0x2e7   : > { %v3746_v7 = vadd.f32 %v3745_v26, %v3705_v29  ;;  %v3794_v62 = vmul.f32 %v3705_v29, %v2906_v52  ;;  %v2284_v57 = vadd.f32 %v2204_v47, %v2054_v34  ;;  %v6659_v38 = vpop.f32.mrf.mxu3  ;;  %v6673_v26 = vadd.s32 176, %v5943_v61 }
 0x2e8   : > { %v1977_v11 = vpop.f32.mrf.mxu1  ;;  %v1824_v34 = vor.u32 %v1822_v6, %v5679_v16  ;;  %v3205_v6 = vsub.f32 %v2995_v5, %v3163_v12  ;;  %v7365_v12 = vld [vmem:[#allocation3_spill] sm:$0xff] }
 0x2e9   : > { %v3835_v3 = vadd.f32 %v3834_v43, %v3794_v62  ;;  %v2573_v8 = vadd.f32 %v6462_v2, %v2284_v57  ;;  %v3204_v2 = vsub.f32 %v2994_v46, %v3162_v1  ;;  %v4793_v46 = vld [vmem:[%s4851_s25 + $0x8] sm:$0xff]   ;;  %v2674_v43 = vrot.slane %v7358_v4, 1 }
 0x2ea   : > { %v4588_v36 = vunpack.c.l.b16 %v4793_v46  ;;  %v2997_v59 = vcvt.s32.f32 %v6673_v26  ;;  %v6711_v57 = vadd.s32 184, %v5943_v61  ;;  %vm3373_vm12 = vcmp.ge.f32.partialorder %v3205_v6, 1.0 }
 0x2eb   : > { %v2830_v44 = vpop.f32.mrf.mxu0  ;;  %v2907_v41 = vadd.f32 %v2827_v18, %v2573_v8  ;;  %2016 = vmatmul.bf16.gmra.mxu1 %v6577_v25  ;;  %2246 = vmatmul.bf16.gmra.mxu2 %v6650_v50  ;;  %v2055_v25 = vadd.f32 %v1977_v11, %v5735_v21  ;;  %vm3372_vm15 = vcmp.ge.f32.partialorder %v3204_v2, 1.0  ;;  %v3080_v18 = vmul.f32 0.055555556, %v3038_v24  ;;  %vm6734_vm13 = vmand %vm3331_vm8, %vm3373_vm12 }
 0x2ec   : > { %v6684_v35 = vpack.c.b16 %v4588_v36, %v4588_v36  ;;  %vm3456_vm2 = vcmp.le.f32.partialorder %v3204_v2, 16.0  ;;  %vm6699_vm3 = vmand %vm3330_vm1, %vm3372_vm15  ;;  %v6703_v45 = vor.u32 %v2675_v22, %v2674_v43  ;;  %v3039_v1 = vadd.f32 0.5, %v2997_v59 }
 0x2ed   : > { %v4641_v31 = vpack.c.bf16 %v2907_v41, %v2906_v52  ;;  %v3706_v55 = vmul.f32 %v4466_v19, %v2907_v41  ;;  %v3122_v47 = vfloor.f32 %v3080_v18  ;;  %vm3498_vm6 = vmand %vm6699_vm3, %vm3456_vm2  ;;  %vm3457_vm14 = vcmp.le.f32.partialorder %v3205_v6, 16.0  ;;  %v7368_v6 = vld [vmem:[#allocation54_spill] sm:$0xff] }
 0x2ee   : > { %2869 = vmatmul.bf16.gmra.mxu0 %v2673_v42  ;;  %v2207_v14 = vpop.f32.mrf.mxu2  ;;  %v2369_v48 = vrot.slane %v6684_v35, 1  ;;  %v2677_v40 = vsel %vm2598_vm11, %v6639_v13, %v6703_v45  ;;  %v3081_v2 = vmul.f32 0.055555556, %v3039_v1  ;;  %v4468_v56 = vsel %vm3498_vm6, 1.0, %v4802_v32  ;;  %vm3499_vm2 = vmand %vm6734_vm13, %vm3457_vm14 }
 0x2ef   : > { %4713 = vst [vmem:[%s6080_s26 + $0x40] sm:$0xff] %v4641_v31   ;;  %v3747_v10 = vadd.f32 %v3746_v7, %v3706_v55  ;;  %v3795_v27 = vmul.f32 %v3706_v55, %v2907_v41  ;;  %v2285_v60 = vadd.f32 %v2207_v14, %v2055_v25  ;;  %v6705_v7 = vpop.f32.mrf.mxu3  ;;  %v3164_v5 = vmul.f32 18.0, %v3122_v47  ;;  %v7363_v25 = vld [vmem:[#allocation53_spill] sm:$0xff]  ;;  %vm6777_vm12 = vmand %vm1855_vm5, %vm1765_vm10 }
 0x2f0   : > { %v1979_v21 = vpop.f32.mrf.mxu1  ;;  %v2370_v62 = vsel %vm2309_vm9, %v2368_v15, %v2369_v48  ;;  %v6743_v31 = vadd.s32 192, %v5943_v61  ;;  %v3123_v46 = vfloor.f32 %v3081_v2  ;;  %vm3248_vm15 = vcmp.ge.f32.partialorder %v3122_v47, 1.0  ;;  %vm6787_vm13 = vmand %vm2309_vm9, %vm2598_vm11 }
 0x2f1   : > { %v3836_v23 = vadd.f32 %v3835_v3, %v3795_v27  ;;  %v2574_v30 = vadd.f32 %v6506_v53, %v2285_v60  ;;  %v1825_v53 = vrot.slane %v5731_v9, 1  ;;  %v2056_v51 = vadd.f32 %v1979_v21, %v5744_v0  ;;  %v7364_v21 = vld [vmem:[#allocation2_spill] sm:$0xff] }
 0x2f2   : > { %vm3290_vm1 = vcmp.le.f32.partialorder %v3122_v47, 16.0  ;;  %v2698_v43 = vrot.slane %v7364_v21, 1  ;;  %v2999_v18 = vcvt.s32.f32 %v6743_v31  ;;  %v3165_v48 = vmul.f32 18.0, %v3123_v46 }
 0x2f3   : > { %v2832_v52 = vpop.f32.mrf.mxu0  ;;  %v2908_v29 = vadd.f32 %v2830_v44, %v2574_v30  ;;  %v6724_v0 = vsel %vm1765_vm10, %v1824_v34, %v1825_v53  ;;  %v2998_v44 = vcvt.s32.f32 %v6711_v57  ;;  %vm3332_vm4 = vmand %vm3248_vm15, %vm3290_vm1  ;;  %v6762_v58 = vor.u32 %v1825_v53, %v7358_v4 }
 0x2f4   : > { %2550 = vmatmul.bf16.gmra.mxu3 %v2370_v62  ;;  %v3041_v47 = vadd.f32 0.5, %v2999_v18  ;;  %v3207_v53 = vsub.f32 %v2997_v59, %v3165_v48  ;;  %vm3249_vm14 = vcmp.ge.f32.partialorder %v3123_v46, 1.0  ;;  %vm3291_vm15 = vcmp.le.f32.partialorder %v3123_v46, 16.0 }
 0x2f5   : > { %v3707_v16 = vmul.f32 %v4467_v63, %v2908_v29  ;;  %v3040_v24 = vadd.f32 0.5, %v2998_v44  ;;  %v2699_v63 = vrot.slane %v7365_v12, 2  ;;  %v7373_v59 = vrot.slane %v7365_v12, 1  ;;  %vm3333_vm9 = vmand %vm3249_vm14, %vm3291_vm15 }
 0x2f6   : > { %v2209_v11 = vpop.f32.mrf.mxu2 }
 0x2f7   : > { %v3748_v54 = vadd.f32 %v3747_v10, %v3707_v16  ;;  %v3796_v3 = vmul.f32 %v3707_v16, %v2908_v29  ;;  %v2286_v8 = vadd.f32 %v2209_v11, %v2056_v51  ;;  %v6746_v10 = vpop.f32.mrf.mxu3  ;;  %v3082_v22 = vmul.f32 0.055555556, %v3040_v24 }
 0x2f8   : > { %v1982_v15 = vpop.f32.mrf.mxu1  ;;  %v6773_v16 = vadd.s32 200, %v5943_v61  ;;  %v6781_v4 = vor.u32 %v2699_v63, %v2698_v43 }
 0x2f9   : > { %v3837_v42 = vadd.f32 %v3836_v23, %v3796_v3  ;;  %v2575_v19 = vadd.f32 %v6535_v39, %v2286_v8  ;;  %v3206_v39 = vsub.f32 %v2996_v20, %v3164_v5  ;;  %v2057_v14 = vadd.f32 %v1982_v15, %v7363_v25 }
 0x2fa   : > { %v2087_v5 = vsel %vm6777_vm12, %v6762_v58, %v7373_v59  ;;  %v3000_v2 = vcvt.s32.f32 %v6773_v16  ;;  %v2701_v25 = vshrl.u32 %v6684_v35, 16 }
 0x2fb   : > { %v2835_v41 = vpop.f32.mrf.mxu0  ;;  %v2909_v37 = vadd.f32 %v2832_v52, %v2575_v19  ;;  %2021 = vmatmul.bf16.gmra.mxu1 %v6650_v50  ;;  %2251 = vmatmul.bf16.gmra.mxu2 %v6724_v0  ;;  %vm3374_vm3 = vcmp.ge.f32.partialorder %v3206_v39, 1.0  ;;  %vm3458_vm8 = vcmp.le.f32.partialorder %v3206_v39, 16.0  ;;  %v3083_v19 = vmul.f32 0.055555556, %v3041_v47 }
 0x2fc   : > { %vm6764_vm6 = vmand %vm3332_vm4, %vm3374_vm3  ;;  %vm3459_vm3 = vcmp.le.f32.partialorder %v3207_v53, 16.0 }
 0x2fd   : > { %v4646_v55 = vpack.c.bf16 %v2909_v37, %v2908_v29  ;;  %v3708_v50 = vmul.f32 %v4468_v56, %v2909_v37  ;;  %v4469_v29 = vsel %vm3499_vm2, 1.0, %v4802_v32  ;;  %vm3500_vm1 = vmand %vm6764_vm6, %vm3458_vm8  ;;  %vm3375_vm2 = vcmp.ge.f32.partialorder %v3207_v53, 1.0 }
 0x2fe   : > { %2874 = vmatmul.bf16.gmra.mxu0 %v2677_v40  ;;  %v2212_v36 = vpop.f32.mrf.mxu2  ;;  %v4584_v40 = vunpack.c.l.b16 %v6614_v49  ;;  %v2710_v49 = vsel %vm6787_vm13, %v6703_v45, %v6781_v4  ;;  %v4470_v39 = vsel %vm3500_vm1, 1.0, %v4802_v32  ;;  %vm6814_vm4 = vmand %vm3333_vm9, %vm3375_vm2 }
 0x2ff   : > { %4714 = vst [vmem:[%s6080_s26 + $0x48] sm:$0xff] %v4646_v55   ;;  %v3749_v27 = vadd.f32 %v3748_v54, %v3708_v50  ;;  %v3797_v17 = vmul.f32 %v3708_v50, %v2909_v37  ;;  %v2287_v20 = vadd.f32 %v2212_v36, %v2057_v14  ;;  %v3125_v14 = vfloor.f32 %v3083_v19  ;;  %vm3501_vm8 = vmand %vm6814_vm4, %vm3459_vm3  ;;  %v7379_v54 = vld [vmem:[#allocation37_spill] sm:$0xff] }
 0x300   : > { %v1984_v60 = vpop.f32.mrf.mxu1  ;;  %v1849_v55 = vpack.c.b16 %v4584_v40, %v4584_v40 }
 0x301   : > { %v3838_v23 = vadd.f32 %v3837_v42, %v3797_v17  ;;  %v2576_v30 = vadd.f32 %v6582_v28, %v2287_v20  ;;  %v6768_v28 = vfloor.f32 %v3082_v22  ;;  %v2058_v1 = vadd.f32 %v1984_v60, %v7368_v6 }
 0x302   : > { %v6825_v20 = vadd.s32 208, %v5943_v61  ;;  %v1851_v21 = vshll.u32 %v1849_v55, 16  ;;  %v2703_v22 = vrot.slane %v2701_v25, 1  ;;  %v3167_v48 = vmul.f32 18.0, %v3125_v14 }
 0x303   : > { %v2837_v52 = vpop.f32.mrf.mxu0  ;;  %v2910_v34 = vadd.f32 %v2835_v41, %v2576_v30  ;;  %v3166_v42 = vmul.f32 18.0, %v6768_v28  ;;  %v6801_v41 = vpop.f32.mrf.mxu3  ;;  %vm3250_vm5 = vcmp.ge.f32.partialorder %v6768_v28, 1.0  ;;  %vm3292_vm6 = vcmp.le.f32.partialorder %v6768_v28, 16.0 }
 0x304   : > { %vm3334_vm14 = vmand %vm3250_vm5, %vm3292_vm6  ;;  %v6848_v28 = vadd.s32 216, %v5943_v61  ;;  %vm3251_vm9 = vcmp.ge.f32.partialorder %v3125_v14, 1.0  ;;  %vm3293_vm2 = vcmp.le.f32.partialorder %v3125_v14, 16.0 }
 0x305   : > { %v3709_v51 = vmul.f32 %v4469_v29, %v2910_v34  ;;  %v3208_v45 = vsub.f32 %v2998_v44, %v3166_v42  ;;  %v3001_v29 = vcvt.s32.f32 %v6825_v20  ;;  %vm3335_vm4 = vmand %vm3251_vm9, %vm3293_vm2 }
 0x306   : > { %v2214_v11 = vpop.f32.mrf.mxu2 }
 0x307   : > { %v3750_v3 = vadd.f32 %v3749_v27, %v3709_v51  ;;  %v3798_v8 = vmul.f32 %v3709_v51, %v2910_v34  ;;  %v2288_v15 = vadd.f32 %v2214_v11, %v2058_v1  ;;  %v7376_v27 = vld [vmem:[#allocation55_spill] sm:$0xff]  ;;  %vm3376_vm13 = vcmp.ge.f32.partialorder %v3208_v45, 1.0 }
 0x308   : > { %v1987_v26 = vpop.f32.mrf.mxu1  ;;  %v1853_v51 = vrot.slane %v1851_v21, 1  ;;  %vm6843_vm15 = vmand %vm3334_vm14, %vm3376_vm13  ;;  %vm3460_vm1 = vcmp.le.f32.partialorder %v3208_v45, 16.0  ;;  %v6879_v45 = vadd.s32 224, %v5943_v61 }
 0x309   : > { %v3839_v56 = vadd.f32 %v3838_v23, %v3798_v8  ;;  %v2577_v37 = vadd.f32 %v6606_v33, %v2288_v15  ;;  %v2081_v33 = vshll.u32 %v6684_v35, 16  ;;  %v2059_v17 = vadd.f32 %v1987_v26, %v7376_v27  ;;  %vm3502_vm3 = vmand %vm6843_vm15, %vm3460_vm1 }
 0x30a   : > { %v3209_v8 = vsub.f32 %v2999_v18, %v3167_v48  ;;  %v3043_v15 = vadd.f32 0.5, %v3001_v29  ;;  %v1857_v42 = vsel %vm6777_vm12, %v6762_v58, %v1853_v51  ;;  %v4472_v58 = vsel %vm3502_vm3, 1.0, %v4802_v32 }
 0x30b   : > { %v2840_v13 = vpop.f32.mrf.mxu0  ;;  %v2911_v24 = vadd.f32 %v2837_v52, %v2577_v37  ;;  %2026 = vmatmul.bf16.gmra.mxu1 %v6724_v0  ;;  %2256 = vmatmul.bf16.gmra.mxu2 %v2087_v5  ;;  %v3042_v0 = vadd.f32 0.5, %v3000_v2  ;;  %v2704_v23 = vrot.slane %v2081_v33, 2  ;;  %v6840_v62 = vpop.f32.mrf.mxu3  ;;  %v2083_v6 = vrot.slane %v2081_v33, 1 }
 0x30c   : > { %vm3377_vm5 = vcmp.ge.f32.partialorder %v3209_v8, 1.0  ;;  %v3085_v55 = vmul.f32 0.055555556, %v3043_v15  ;;  %v6896_v48 = vadd.s32 232, %v5943_v61 }
 0x30d   : > { %v4651_v46 = vpack.c.bf16 %v2911_v24, %v2910_v34  ;;  %v3710_v36 = vmul.f32 %v4470_v39, %v2911_v24  ;;  %v3084_v30 = vmul.f32 0.055555556, %v3042_v0  ;;  %v4471_v34 = vsel %vm3501_vm8, 1.0, %v4802_v32  ;;  %v7383_v0 = vld [vmem:[#allocation12_spill] sm:$0xff] }
 0x30e   : > { %2879 = vmatmul.bf16.gmra.mxu0 %v2710_v49  ;;  %v2217_v60 = vpop.f32.mrf.mxu2  ;;  %v3004_v15 = vcvt.s32.f32 %v6896_v48 }
 0x30f   : > { %4715 = vst [vmem:[%s6080_s26 + $0x50] sm:$0xff] %v4651_v46   ;;  %v3751_v57 = vadd.f32 %v3750_v3, %v3710_v36  ;;  %v3799_v44 = vmul.f32 %v3710_v36, %v2911_v24  ;;  %v2289_v35 = vadd.f32 %v2217_v60, %v2059_v17  ;;  %v3126_v53 = vfloor.f32 %v3084_v30 }
 0x310   : > { %v1989_v43 = vpop.f32.mrf.mxu1  ;;  %v3127_v36 = vfloor.f32 %v3085_v55 }
 0x311   : > { %v3840_v52 = vadd.f32 %v3839_v56, %v3799_v44  ;;  %v2578_v12 = vadd.f32 %v6659_v38, %v2289_v35  ;;  %v2705_v38 = vor.u32 %v2704_v23, %v2703_v22  ;;  %v2060_v3 = vadd.f32 %v1989_v43, %v7379_v54  ;;  %v7380_v56 = vld [vmem:[#allocation5_spill] sm:$0xff] }
 0x312   : > { %v2084_v31 = vsel %vm1765_vm10, %v7380_v56, %v2083_v6  ;;  %v3168_v37 = vmul.f32 18.0, %v3126_v53  ;;  %vm6868_vm10 = vmand %vm3335_vm4, %vm3377_vm5  ;;  %vm3252_vm12 = vcmp.ge.f32.partialorder %v3126_v53, 1.0  ;;  %vm3294_vm6 = vcmp.le.f32.partialorder %v3126_v53, 16.0 }
 0x313   : > { %v2842_v63 = vpop.f32.mrf.mxu0  ;;  %v2912_v47 = vadd.f32 %v2840_v13, %v2578_v12  ;;  %v2706_v18 = vsel %vm2598_vm11, %v6781_v4, %v2705_v38  ;;  %v3002_v13 = vcvt.s32.f32 %v6848_v28  ;;  %vm3461_vm11 = vcmp.le.f32.partialorder %v3209_v8, 16.0  ;;  %v6874_v33 = vpop.f32.mrf.mxu3  ;;  %vm3336_vm13 = vmand %vm3252_vm12, %vm3294_vm6 }
 0x314   : > { %vm3503_vm8 = vmand %vm6868_vm10, %vm3461_vm11  ;;  %v3003_v44 = vcvt.s32.f32 %v6879_v45  ;;  %v3169_v22 = vmul.f32 18.0, %v3127_v36  ;;  %vm3253_vm9 = vcmp.ge.f32.partialorder %v3127_v36, 1.0  ;;  %vm3295_vm2 = vcmp.le.f32.partialorder %v3127_v36, 16.0 }
 0x315   : > { %v3711_v11 = vmul.f32 %v4471_v34, %v2912_v47  ;;  %v3044_v50 = vadd.f32 0.5, %v3002_v13  ;;  %v4473_v23 = vsel %vm3503_vm8, 1.0, %v4802_v32  ;;  %v7386_v34 = vld [vmem:[#allocation4_spill] sm:$0xff]  ;;  %vm3337_vm4 = vmand %vm3253_vm9, %vm3295_vm2  ;;  %v3046_v56 = vadd.f32 0.5, %v3004_v15 }
 0x316   : > { %v2219_v40 = vpop.f32.mrf.mxu2  ;;  %v3211_v51 = vsub.f32 %v3001_v29, %v3169_v22 }
 0x317   : > { %v3752_v26 = vadd.f32 %v3751_v57, %v3711_v11  ;;  %v3800_v59 = vmul.f32 %v3711_v11, %v2912_v47  ;;  %v2290_v5 = vadd.f32 %v2219_v40, %v2060_v3  ;;  %v3086_v57 = vmul.f32 0.055555556, %v3044_v50 }
 0x318   : > { %v1992_v19 = vpop.f32.mrf.mxu1  ;;  %vm3379_vm5 = vcmp.ge.f32.partialorder %v3211_v51, 1.0  ;;  %vm3463_vm11 = vcmp.le.f32.partialorder %v3211_v51, 16.0 }
 0x319   : > { %v3841_v49 = vadd.f32 %v3840_v52, %v3800_v59  ;;  %v2579_v39 = vadd.f32 %v6705_v7, %v2290_v5  ;;  %v3210_v7 = vsub.f32 %v3000_v2, %v3168_v37  ;;  %v2061_v46 = vadd.f32 %v1992_v19, %v7383_v0  ;;  %vm6908_vm10 = vmand %vm3337_vm4, %vm3379_vm5 }
 0x31a   : > { %v3128_v12 = vfloor.f32 %v3086_v57  ;;  %vm3505_vm8 = vmand %vm6908_vm10, %vm3463_vm11 }
 0x31b   : > { %v2845_v24 = vpop.f32.mrf.mxu0  ;;  %v2913_v9 = vadd.f32 %v2842_v63, %v2579_v39  ;;  %2031 = vmatmul.bf16.gmra.mxu1 %v1857_v42  ;;  %2261 = vmatmul.bf16.gmra.mxu2 %v2084_v31  ;;  %vm3378_vm14 = vcmp.ge.f32.partialorder %v3210_v7, 1.0  ;;  %vm3462_vm1 = vcmp.le.f32.partialorder %v3210_v7, 16.0  ;;  %v3045_v63 = vadd.f32 0.5, %v3003_v44  ;;  %v6901_v1 = vpop.f32.mrf.mxu3 }
 0x31c   : > { %vm6889_vm15 = vmand %vm3336_vm13, %vm3378_vm14  ;;  %v3170_v3 = vmul.f32 18.0, %v3128_v12  ;;  %vm3254_vm12 = vcmp.ge.f32.partialorder %v3128_v12, 1.0  ;;  %vm3296_vm6 = vcmp.le.f32.partialorder %v3128_v12, 16.0  ;;  %v4475_v0 = vsel %vm3505_vm8, 1.0, %v4802_v32 }
 0x31d   : > { %v4656_v25 = vpack.c.bf16 %v2913_v9, %v2912_v47  ;;  %v3712_v14 = vmul.f32 %v4472_v58, %v2913_v9  ;;  %vm3504_vm3 = vmand %vm6889_vm15, %vm3462_vm1  ;;  %v3087_v8 = vmul.f32 0.055555556, %v3045_v63 }
 0x31e   : > { %2884 = vmatmul.bf16.gmra.mxu0 %v2706_v18  ;;  %v2222_v27 = vpop.f32.mrf.mxu2  ;;  %v3212_v42 = vsub.f32 %v3002_v13, %v3170_v3  ;;  %v7389_v18 = vld [vmem:[#allocation6_spill] sm:$0xff]  ;;  %vm3338_vm14 = vmand %vm3254_vm12, %vm3296_vm6 }
 0x31f   : > { %4716 = vst [vmem:[%s6080_s26 + $0x58] sm:$0xff] %v4656_v25   ;;  %v3753_v17 = vadd.f32 %v3752_v26, %v3712_v14  ;;  %v3801_v16 = vmul.f32 %v3712_v14, %v2913_v9  ;;  %v2291_v2 = vadd.f32 %v2222_v27, %v2061_v46  ;;  %v4474_v26 = vsel %vm3504_vm3, 1.0, %v4802_v32 }
 0x320   : > { %v1994_v60 = vpop.f32.mrf.mxu1  ;;  %v3129_v19 = vfloor.f32 %v3087_v8  ;;  %vm3380_vm13 = vcmp.ge.f32.partialorder %v3212_v42, 1.0  ;;  %v3088_v9 = vmul.f32 0.055555556, %v3046_v56  ;;  %vm3464_vm1 = vcmp.le.f32.partialorder %v3212_v42, 16.0 }
 0x321   : > { %v3842_v35 = vadd.f32 %v3841_v49, %v3801_v16  ;;  %v2580_v21 = vadd.f32 %v6746_v10, %v2291_v2  ;;  %v2062_v47 = vadd.f32 %v1994_v60, %v7386_v34  ;;  %v6918_v49 = vadd.s32 240, %v5943_v61  ;;  %vm3422_vm15 = vmand %vm3338_vm14, %vm3380_vm13  ;;  %v7390_v16 = vld [vmem:[#allocation7_spill] sm:$0xff] }
 0x322   : > { %v3171_v25 = vmul.f32 18.0, %v3129_v19  ;;  %v3130_v36 = vfloor.f32 %v3088_v9  ;;  %v6930_v27 = vadd.s32 248, %v5943_v61  ;;  %vm3255_vm9 = vcmp.ge.f32.partialorder %v3129_v19, 1.0  ;;  %vm3506_vm3 = vmand %vm3422_vm15, %vm3464_vm1 }
 0x323   : > { %v2847_v43 = vpop.f32.mrf.mxu0  ;;  %v2914_v30 = vadd.f32 %v2845_v24, %v2580_v21  ;;  %v6924_v13 = vpop.f32.mrf.mxu3  ;;  %v3005_v14 = vcvt.s32.f32 %v6918_v49  ;;  %vm3297_vm2 = vcmp.le.f32.partialorder %v3129_v19, 16.0 }
 0x324   : > { %vm3339_vm4 = vmand %vm3255_vm9, %vm3297_vm2  ;;  %vm3256_vm12 = vcmp.ge.f32.partialorder %v3130_v36, 1.0  ;;  %vm3298_vm6 = vcmp.le.f32.partialorder %v3130_v36, 16.0 }
 0x325   : > { %v3713_v10 = vmul.f32 %v4473_v23, %v2914_v30  ;;  %v3047_v60 = vadd.f32 0.5, %v3005_v14  ;;  %v3172_v23 = vmul.f32 18.0, %v3130_v36  ;;  %vm3340_vm13 = vmand %vm3256_vm12, %vm3298_vm6 }
 0x326   : > { %v2224_v6 = vpop.f32.mrf.mxu2 }
 0x327   : > { %v3754_v38 = vadd.f32 %v3753_v17, %v3713_v10  ;;  %v3802_v53 = vmul.f32 %v3713_v10, %v2914_v30  ;;  %v2292_v11 = vadd.f32 %v2224_v6, %v2062_v47  ;;  %v3089_v45 = vmul.f32 0.055555556, %v3047_v60 }
 0x328   : > { %v1997_v54 = vpop.f32.mrf.mxu1  ;;  %v3214_v51 = vsub.f32 %v3004_v15, %v3172_v23  ;;  %v6951_v6 = vadd.s32 256, %v5943_v61  ;;  %v6990_v23 = vadd.s32 272, %v5943_v61 }
 0x329   : > { %v3843_v40 = vadd.f32 %v3842_v35, %v3802_v53  ;;  %v2581_v20 = vadd.f32 %v6801_v41, %v2292_v11  ;;  %v2063_v37 = vadd.f32 %v1997_v54, %v7389_v18  ;;  %v7393_v11 = vld [vmem:[#allocation15_spill] sm:$0xff]  ;;  %v3131_v3 = vfloor.f32 %v3089_v45 }
 0x32a   : > { %vm3382_vm14 = vcmp.ge.f32.partialorder %v3214_v51, 1.0  ;;  %vm3466_vm1 = vcmp.le.f32.partialorder %v3214_v51, 16.0 }
 0x32b   : > { %v2850_v29 = vpop.f32.mrf.mxu0  ;;  %v2915_v59 = vadd.f32 %v2847_v43, %v2581_v20  ;;  %v6940_v10 = vpop.f32.mrf.mxu3  ;;  %v3173_v19 = vmul.f32 18.0, %v3131_v3  ;;  %vm6961_vm15 = vmand %vm3340_vm13, %vm3382_vm14  ;;  %vm3257_vm9 = vcmp.ge.f32.partialorder %v3131_v3, 1.0  ;;  %vm3299_vm2 = vcmp.le.f32.partialorder %v3131_v3, 16.0 }
 0x32c   : > { %v7002_v3 = vadd.s32 280, %v5943_v61 }
 0x32d   : > { %v4661_v41 = vpack.c.bf16 %v2915_v59, %v2914_v30  ;;  %v3714_v31 = vmul.f32 %v4474_v26, %v2915_v59  ;;  %v3006_v30 = vcvt.s32.f32 %v6930_v27  ;;  %v3007_v26 = vcvt.s32.f32 %v6951_v6 }
 0x32e   : > { %v2227_v39 = vpop.f32.mrf.mxu2 }
 0x32f   : > { %4717 = vst [vmem:[%s6080_s26 + $0x60] sm:$0xff] %v4661_v41   ;;  %v3755_v24 = vadd.f32 %v3754_v38, %v3714_v31  ;;  %v3803_v55 = vmul.f32 %v3714_v31, %v2915_v59  ;;  %v2293_v58 = vadd.f32 %v2227_v39, %v2063_v37  ;;  %v3049_v39 = vadd.f32 0.5, %v3007_v26 }
 0x330   : > { %v1999_v28 = vpop.f32.mrf.mxu1 }
 0x331   : > { %v3844_v4 = vadd.f32 %v3843_v40, %v3803_v55  ;;  %v2582_v7 = vadd.f32 %v6840_v62, %v2293_v58  ;;  %v2064_v2 = vadd.f32 %v1999_v28, %v7390_v16  ;;  %v3213_v62 = vsub.f32 %v3003_v44, %v3171_v25  ;;  %v7396_v55 = vld [vmem:[#allocation17_spill] sm:$0xff] }
 0x332   : > { %v4476_v44 = vsel %vm3506_vm3, 1.0, %v4802_v32  ;;  %v3215_v28 = vsub.f32 %v3005_v14, %v3173_v19  ;;  %vm3508_vm3 = vmand %vm6961_vm15, %vm3466_vm1 }
 0x333   : > { %v2852_v50 = vpop.f32.mrf.mxu0  ;;  %v2916_v46 = vadd.f32 %v2850_v29, %v2582_v7  ;;  %vm3381_vm5 = vcmp.ge.f32.partialorder %v3213_v62, 1.0  ;;  %vm3465_vm11 = vcmp.le.f32.partialorder %v3213_v62, 16.0  ;;  %v6965_v18 = vpop.f32.mrf.mxu3  ;;  %v4478_v49 = vsel %vm3508_vm3, 1.0, %v4802_v32 }
 0x334   : > { %vm6942_vm10 = vmand %vm3339_vm4, %vm3381_vm5  ;;  %vm3383_vm5 = vcmp.ge.f32.partialorder %v3215_v28, 1.0 }
 0x335   : > { %v3715_v17 = vmul.f32 %v4475_v0, %v2916_v46  ;;  %vm3507_vm8 = vmand %vm6942_vm10, %vm3465_vm11  ;;  %vm3467_vm11 = vcmp.le.f32.partialorder %v3215_v28, 16.0 }
 0x336   : > { %v2229_v57 = vpop.f32.mrf.mxu2  ;;  %v4477_v56 = vsel %vm3507_vm8, 1.0, %v4802_v32  ;;  %vm3341_vm4 = vmand %vm3257_vm9, %vm3299_vm2 }
 0x337   : > { %v3756_v35 = vadd.f32 %v3755_v24, %v3715_v17  ;;  %v3804_v21 = vmul.f32 %v3715_v17, %v2916_v46  ;;  %v2294_v43 = vadd.f32 %v2229_v57, %v2064_v2  ;;  %vm6980_vm10 = vmand %vm3341_vm4, %vm3383_vm5 }
 0x338   : > { %v2002_v22 = vpop.f32.mrf.mxu1  ;;  %vm3509_vm8 = vmand %vm6980_vm10, %vm3467_vm11 }
 0x339   : > { %v3845_v52 = vadd.f32 %v3844_v4, %v3804_v21  ;;  %v2583_v12 = vadd.f32 %v6874_v33, %v2294_v43  ;;  %v3048_v33 = vadd.f32 0.5, %v3006_v30  ;;  %v2065_v54 = vadd.f32 %v2002_v22, %v7393_v11  ;;  %v7399_v43 = vld [vmem:[#allocation8_spill] sm:$0xff] }
 0x33b   : > { %v2855_v63 = vpop.f32.mrf.mxu0  ;;  %v2917_v34 = vadd.f32 %v2852_v50, %v2583_v12  ;;  %v3090_v15 = vmul.f32 0.055555556, %v3048_v33  ;;  %v6992_v12 = vpop.f32.mrf.mxu3 }
 0x33d   : > { %v4666_v38 = vpack.c.bf16 %v2917_v34, %v2916_v46  ;;  %v3716_v53 = vmul.f32 %v4476_v44, %v2917_v34  ;;  %v3132_v37 = vfloor.f32 %v3090_v15  ;;  %v3091_v46 = vmul.f32 0.055555556, %v3049_v39 }
 0x33e   : > { %v2232_v8 = vpop.f32.mrf.mxu2 }
 0x33f   : > { %4718 = vst [vmem:[%s6080_s26 + $0x68] sm:$0xff] %v4666_v38   ;;  %v3757_v40 = vadd.f32 %v3756_v35, %v3716_v53  ;;  %v3805_v20 = vmul.f32 %v3716_v53, %v2917_v34  ;;  %v2295_v29 = vadd.f32 %v2232_v8, %v2065_v54  ;;  %v3174_v0 = vmul.f32 18.0, %v3132_v37 }
 0x340   : > { %v2004_v48 = vpop.f32.mrf.mxu1  ;;  %v3133_v57 = vfloor.f32 %v3091_v46  ;;  %vm3258_vm12 = vcmp.ge.f32.partialorder %v3132_v37, 1.0  ;;  %vm3300_vm6 = vcmp.le.f32.partialorder %v3132_v37, 16.0  ;;  %v3009_v38 = vcvt.s32.f32 %v6990_v23 }
 0x341   : > { %v3846_v59 = vadd.f32 %v3845_v52, %v3805_v20  ;;  %v2584_v5 = vadd.f32 %v6901_v1, %v2295_v29  ;;  %v6970_v1 = vadd.s32 264, %v5943_v61  ;;  %v2066_v58 = vadd.f32 %v2004_v48, %v7396_v55  ;;  %vm3342_vm14 = vmand %vm3258_vm12, %vm3300_vm6 }
 0x342   : > { %v3216_v60 = vsub.f32 %v3006_v30, %v3174_v0  ;;  %v3175_v33 = vmul.f32 18.0, %v3133_v57  ;;  %v4479_v53 = vsel %vm3509_vm8, 1.0, %v4802_v32  ;;  %v3051_v29 = vadd.f32 0.5, %v3009_v38 }
 0x343   : > { %v2857_v42 = vpop.f32.mrf.mxu0  ;;  %v2918_v41 = vadd.f32 %v2855_v63, %v2584_v5  ;;  %v3008_v36 = vcvt.s32.f32 %v6970_v1  ;;  %vm3259_vm9 = vcmp.ge.f32.partialorder %v3133_v57, 1.0  ;;  %vm3301_vm2 = vcmp.le.f32.partialorder %v3133_v57, 16.0  ;;  %v2533_v19 = vpop.f32.mrf.mxu3 }
 0x344   : > { %vm3384_vm13 = vcmp.ge.f32.partialorder %v3216_v60, 1.0  ;;  %vm3468_vm1 = vcmp.le.f32.partialorder %v3216_v60, 16.0  ;;  %vm3343_vm4 = vmand %vm3259_vm9, %vm3301_vm2 }
 0x345   : > { %v3717_v24 = vmul.f32 %v4477_v56, %v2918_v41  ;;  %v3050_v35 = vadd.f32 0.5, %v3008_v36  ;;  %vm3426_vm15 = vmand %vm3342_vm14, %vm3384_vm13 }
 0x346   : > { %v2234_v9 = vpop.f32.mrf.mxu2  ;;  %vm3510_vm3 = vmand %vm3426_vm15, %vm3468_vm1 }
 0x347   : > { %v3758_v4 = vadd.f32 %v3757_v40, %v3717_v24  ;;  %v3806_v7 = vmul.f32 %v3717_v24, %v2918_v41  ;;  %v2296_v50 = vadd.f32 %v2234_v9, %v2066_v58  ;;  %v3092_v44 = vmul.f32 0.055555556, %v3050_v35  ;;  %v7400_v40 = vld [vmem:[#allocation9_spill] sm:$0xff] }
 0x348   : > { %v2007_v25 = vpop.f32.mrf.mxu1  ;;  %v4480_v39 = vsel %vm3510_vm3, 1.0, %v4802_v32 }
 0x349   : > { %v3847_v17 = vadd.f32 %v3846_v59, %v3806_v7  ;;  %v2585_v16 = vadd.f32 %v6924_v13, %v2296_v50  ;;  %v2067_v22 = vadd.f32 %v2007_v25, %v7399_v43  ;;  %v3134_v54 = vfloor.f32 %v3092_v44  ;;  %v7403_v7 = vld [vmem:[#allocation21_spill] sm:$0xff] }
 0x34b   : > { %v2860_v2 = vpop.f32.mrf.mxu0  ;;  %v2919_v14 = vadd.f32 %v2857_v42, %v2585_v16  ;;  %v3176_v56 = vmul.f32 18.0, %v3134_v54  ;;  %vm3260_vm12 = vcmp.ge.f32.partialorder %v3134_v54, 1.0  ;;  %vm3302_vm6 = vcmp.le.f32.partialorder %v3134_v54, 16.0  ;;  %v2536_v35 = vpop.f32.mrf.mxu3 }
 0x34c   : > { %vm3344_vm13 = vmand %vm3260_vm12, %vm3302_vm6 }
 0x34d   : > { %v4671_v13 = vpack.c.bf16 %v2919_v14, %v2918_v41  ;;  %v3718_v21 = vmul.f32 %v4478_v49, %v2919_v14  ;;  %v3010_v41 = vcvt.s32.f32 %v7002_v3  ;;  %v3218_v58 = vsub.f32 %v3008_v36, %v3176_v56 }
 0x34e   : > { %v2237_v52 = vpop.f32.mrf.mxu2 }
 0x34f   : > { %4719 = vst [vmem:[%s6080_s26 + $0x70] sm:$0xff] %v4671_v13   ;;  %v3759_v63 = vadd.f32 %v3758_v4, %v3718_v21  ;;  %v3807_v27 = vmul.f32 %v3718_v21, %v2919_v14  ;;  %v2297_v30 = vadd.f32 %v2237_v52, %v2067_v22  ;;  %v3052_v28 = vadd.f32 0.5, %v3010_v41 }
 0x350   : > { %v2009_v45 = vpop.f32.mrf.mxu1  ;;  %vm3386_vm14 = vcmp.ge.f32.partialorder %v3218_v58, 1.0  ;;  %vm3470_vm1 = vcmp.le.f32.partialorder %v3218_v58, 16.0  ;;  %v7034_v22 = vadd.s32 296, %v5943_v61 }
 0x351   : > { %v3848_v34 = vadd.f32 %v3847_v17, %v3807_v27  ;;  %v2586_v47 = vadd.f32 %v6940_v10, %v2297_v30  ;;  %v2068_v20 = vadd.f32 %v2009_v45, %v7400_v40  ;;  %v3217_v10 = vsub.f32 %v3007_v26, %v3175_v33  ;;  %vm3428_vm15 = vmand %vm3344_vm13, %vm3386_vm14 }
 0x352   : > { %v3093_v26 = vmul.f32 0.055555556, %v3051_v29  ;;  %v3094_v36 = vmul.f32 0.055555556, %v3052_v28  ;;  %vm3512_vm3 = vmand %vm3428_vm15, %vm3470_vm1 }
 0x353   : > { %v2862_v51 = vpop.f32.mrf.mxu0  ;;  %v2920_v11 = vadd.f32 %v2860_v2, %v2586_v47  ;;  %vm3385_vm5 = vcmp.ge.f32.partialorder %v3217_v10, 1.0  ;;  %vm3469_vm11 = vcmp.le.f32.partialorder %v3217_v10, 16.0  ;;  %v4482_v23 = vsel %vm3512_vm3, 1.0, %v4802_v32 }
 0x354   : > { %vm7012_vm10 = vmand %vm3343_vm4, %vm3385_vm5  ;;  %v3135_v25 = vfloor.f32 %v3093_v26  ;;  %v3136_v21 = vfloor.f32 %v3094_v36 }
 0x355   : > { %v3719_v8 = vmul.f32 %v4479_v53, %v2920_v11  ;;  %vm3511_vm8 = vmand %vm7012_vm10, %vm3469_vm11  ;;  %v3012_v53 = vcvt.s32.f32 %v7034_v22 }
 0x356   : > { %v2239_v48 = vpop.f32.mrf.mxu2  ;;  %v3177_v60 = vmul.f32 18.0, %v3135_v25  ;;  %v4481_v57 = vsel %vm3511_vm8, 1.0, %v4802_v32  ;;  %vm3261_vm9 = vcmp.ge.f32.partialorder %v3135_v25, 1.0  ;;  %vm3303_vm2 = vcmp.le.f32.partialorder %v3135_v25, 16.0 }
 0x357   : > { %v3760_v15 = vadd.f32 %v3759_v63, %v3719_v8  ;;  %v3808_v59 = vmul.f32 %v3719_v8, %v2920_v11  ;;  %v2298_v5 = vadd.f32 %v2239_v48, %v2068_v20  ;;  %v7404_v63 = vld [vmem:[#allocation23_spill] sm:$0xff]  ;;  %vm3345_vm4 = vmand %vm3261_vm9, %vm3303_vm2  ;;  %v2538_v20 = vpop.f32.mrf.mxu3  ;;  %v3054_v48 = vadd.f32 0.5, %v3012_v53 }
 0x358   : > { %v2012_v42 = vpop.f32.mrf.mxu1  ;;  %v3219_v27 = vsub.f32 %v3009_v38, %v3177_v60  ;;  %vm3262_vm12 = vcmp.ge.f32.partialorder %v3136_v21, 1.0  ;;  %vm3304_vm6 = vcmp.le.f32.partialorder %v3136_v21, 16.0 }
 0x359   : > { %v3849_v31 = vadd.f32 %v3848_v34, %v3808_v59  ;;  %v2587_v37 = vadd.f32 %v6965_v18, %v2298_v5  ;;  %v7021_v18 = vadd.s32 288, %v5943_v61  ;;  %v2069_v50 = vadd.f32 %v2012_v42, %v7403_v7  ;;  %v7407_v5 = vld [vmem:[#allocation10_spill] sm:$0xff]  ;;  %vm3346_vm14 = vmand %vm3262_vm12, %vm3304_vm6 }
 0x35a   : > { %vm3387_vm5 = vcmp.ge.f32.partialorder %v3219_v27, 1.0  ;;  %vm3471_vm11 = vcmp.le.f32.partialorder %v3219_v27, 16.0 }
 0x35b   : > { %v2865_v6 = vpop.f32.mrf.mxu0  ;;  %v2921_v24 = vadd.f32 %v2862_v51, %v2587_v37  ;;  %v3011_v2 = vcvt.s32.f32 %v7021_v18  ;;  %v3178_v51 = vmul.f32 18.0, %v3136_v21  ;;  %vm7041_vm10 = vmand %vm3345_vm4, %vm3387_vm5 }
 0x35c   : > { %vm3513_vm8 = vmand %vm7041_vm10, %vm3471_vm11 }
 0x35d   : > { %v4676_v9 = vpack.c.bf16 %v2921_v24, %v2920_v11  ;;  %v3720_v4 = vmul.f32 %v4480_v39, %v2921_v24  ;;  %v3053_v43 = vadd.f32 0.5, %v3011_v2  ;;  %v3220_v10 = vsub.f32 %v3010_v41, %v3178_v51 }
 0x35e   : > { %v2242_v0 = vpop.f32.mrf.mxu2  ;;  %v3096_v41 = vmul.f32 0.055555556, %v3054_v48  ;;  %v4483_v28 = vsel %vm3513_vm8, 1.0, %v4802_v32 }
 0x35f   : > { %4720 = vst [vmem:[%s6080_s26 + $0x78] sm:$0xff] %v4676_v9   ;;  %v3761_v46 = vadd.f32 %v3760_v15, %v3720_v4  ;;  %v3809_v17 = vmul.f32 %v3720_v4, %v2921_v24  ;;  %v2299_v16 = vadd.f32 %v2242_v0, %v2069_v50  ;;  %v3095_v33 = vmul.f32 0.055555556, %v3053_v43  ;;  %v7410_v0 = vld [vmem:[#allocation11_spill] sm:$0xff]  ;;  %v2541_v36 = vpop.f32.mrf.mxu3 }
 0x360   : > { %v2014_v1 = vpop.f32.mrf.mxu1  ;;  %vm3388_vm13 = vcmp.ge.f32.partialorder %v3220_v10, 1.0  ;;  %vm3472_vm1 = vcmp.le.f32.partialorder %v3220_v10, 16.0  ;;  %v3138_v7 = vfloor.f32 %v3096_v41  ;;  %v7064_v50 = vadd.s32 312, %v5943_v61 }
 0x361   : > { %v3850_v49 = vadd.f32 %v3849_v31, %v3809_v17  ;;  %v2588_v14 = vadd.f32 %v6992_v12, %v2299_v16  ;;  %v2070_v12 = vadd.f32 %v2014_v1, %v7404_v63  ;;  %v3137_v29 = vfloor.f32 %v3095_v33  ;;  %vm7059_vm15 = vmand %vm3346_vm14, %vm3388_vm13 }
 0x362   : > { %vm3514_vm3 = vmand %vm7059_vm15, %vm3472_vm1  ;;  %vm3264_vm12 = vcmp.ge.f32.partialorder %v3138_v7, 1.0  ;;  %vm3306_vm6 = vcmp.le.f32.partialorder %v3138_v7, 16.0 }
 0x363   : > { %v2867_v62 = vpop.f32.mrf.mxu0  ;;  %v2922_v13 = vadd.f32 %v2865_v6, %v2588_v14  ;;  %v3179_v55 = vmul.f32 18.0, %v3137_v29  ;;  %vm3263_vm9 = vcmp.ge.f32.partialorder %v3137_v29, 1.0  ;;  %vm3305_vm2 = vcmp.le.f32.partialorder %v3137_v29, 16.0  ;;  %vm3348_vm13 = vmand %vm3264_vm12, %vm3306_vm6 }
 0x364   : > { %vm3347_vm4 = vmand %vm3263_vm9, %vm3305_vm2  ;;  %v4484_v43 = vsel %vm3514_vm3, 1.0, %v4802_v32 }
 0x365   : > { %v3721_v52 = vmul.f32 %v4481_v57, %v2922_v13  ;;  %v3221_v17 = vsub.f32 %v3011_v2, %v3179_v55  ;;  %v3180_v57 = vmul.f32 18.0, %v3138_v7 }
 0x366   : > { %v2244_v30 = vpop.f32.mrf.mxu2 }
 0x367   : > { %v3762_v45 = vadd.f32 %v3761_v46, %v3721_v52  ;;  %v3810_v44 = vmul.f32 %v3721_v52, %v2922_v13  ;;  %v2300_v34 = vadd.f32 %v2244_v30, %v2070_v12  ;;  %vm3389_vm5 = vcmp.ge.f32.partialorder %v3221_v17, 1.0 }
 0x368   : > { %v2017_v47 = vpop.f32.mrf.mxu1  ;;  %vm7075_vm10 = vmand %vm3347_vm4, %vm3389_vm5  ;;  %vm3473_vm11 = vcmp.le.f32.partialorder %v3221_v17, 16.0  ;;  %v3222_v12 = vsub.f32 %v3012_v53, %v3180_v57  ;;  %v7084_v30 = vadd.s32 320, %v5943_v61  ;;  %v2543_v53 = vpop.f32.mrf.mxu3 }
 0x369   : > { %v3851_v11 = vadd.f32 %v3850_v49, %v3810_v44  ;;  %v2589_v54 = vadd.f32 %v2533_v19, %v2300_v34  ;;  %v2071_v42 = vadd.f32 %v2017_v47, %v7407_v5  ;;  %v7051_v19 = vadd.s32 304, %v5943_v61  ;;  %v7413_v34 = vld [vmem:[#allocation27_spill] sm:$0xff]  ;;  %vm3515_vm8 = vmand %vm7075_vm10, %vm3473_vm11 }
 0x36a   : > { %vm3390_vm14 = vcmp.ge.f32.partialorder %v3222_v12, 1.0  ;;  %v4485_v29 = vsel %vm3515_vm8, 1.0, %v4802_v32  ;;  %vm3474_vm1 = vcmp.le.f32.partialorder %v3222_v12, 16.0 }
 0x36b   : > { %v2870_v8 = vpop.f32.mrf.mxu0  ;;  %v2923_v38 = vadd.f32 %v2867_v62, %v2589_v54  ;;  %v3013_v58 = vcvt.s32.f32 %v7051_v19  ;;  %vm3432_vm15 = vmand %vm3348_vm13, %vm3390_vm14 }
 0x36c   : > { %vm3516_vm3 = vmand %vm3432_vm15, %vm3474_vm1 }
 0x36d   : > { %v4681_v15 = vpack.c.bf16 %v2923_v38, %v2922_v13  ;;  %v3722_v59 = vmul.f32 %v4482_v23, %v2923_v38  ;;  %v3055_v16 = vadd.f32 0.5, %v3013_v58 }
 0x36e   : > { %v2247_v56 = vpop.f32.mrf.mxu2 }
 0x36f   : > { %4721 = vst [vmem:[%s6080_s26 + $0x80] sm:$0xff] %v4681_v15   ;;  %v3763_v31 = vadd.f32 %v3762_v45, %v3722_v59  ;;  %v3811_v37 = vmul.f32 %v3722_v59, %v2923_v38  ;;  %v2301_v6 = vadd.f32 %v2247_v56, %v2071_v42  ;;  %v3097_v21 = vmul.f32 0.055555556, %v3055_v16  ;;  %v7414_v56 = vld [vmem:[#allocation29_spill] sm:$0xff] }
 0x370   : > { %v2019_v3 = vpop.f32.mrf.mxu1  ;;  %v3015_v38 = vcvt.s32.f32 %v7084_v30 }
 0x371   : > { %v3852_v26 = vadd.f32 %v3851_v11, %v3811_v37  ;;  %v2590_v39 = vadd.f32 %v2536_v35, %v2301_v6  ;;  %v2072_v46 = vadd.f32 %v2019_v3, %v7410_v0  ;;  %v3014_v35 = vcvt.s32.f32 %v7064_v50 }
 0x372   : > { %v3139_v51 = vfloor.f32 %v3097_v21  ;;  %v3057_v5 = vadd.f32 0.5, %v3015_v38  ;;  %v7099_v6 = vadd.s32 328, %v5943_v61  ;;  %v4486_v61 = vsel %vm3516_vm3, 1.0, %v4802_v32 }
 0x373   : > { %v2872_v24 = vpop.f32.mrf.mxu0  ;;  %v2924_v9 = vadd.f32 %v2870_v8, %v2590_v39  ;;  %v3056_v27 = vadd.f32 0.5, %v3014_v35 }
 0x374   : > { %v3181_v10 = vmul.f32 18.0, %v3139_v51  ;;  %vm3265_vm9 = vcmp.ge.f32.partialorder %v3139_v51, 1.0  ;;  %vm3307_vm2 = vcmp.le.f32.partialorder %v3139_v51, 16.0  ;;  %v3016_v19 = vcvt.s32.f32 %v7099_v6 }
 0x375   : > { %v3723_v25 = vmul.f32 %v4483_v28, %v2924_v9  ;;  %v3098_v23 = vmul.f32 0.055555556, %v3056_v27  ;;  %v3099_v28 = vmul.f32 0.055555556, %v3057_v5  ;;  %vm3349_vm4 = vmand %vm3265_vm9, %vm3307_vm2  ;;  %v7418_v27 = vld [vmem:[#allocation14_spill] sm:$0xff] }
 0x376   : > { %v2249_v1 = vpop.f32.mrf.mxu2  ;;  %v3223_v37 = vsub.f32 %v3013_v58, %v3181_v10  ;;  %v2546_v58 = vpop.f32.mrf.mxu3  ;;  %v7419_v10 = vld [vmem:[#allocation33_spill] sm:$0xff] }
 0x377   : > { %v3764_v49 = vadd.f32 %v3763_v31, %v3723_v25  ;;  %v3812_v14 = vmul.f32 %v3723_v25, %v2924_v9  ;;  %v2302_v62 = vadd.f32 %v2249_v1, %v2072_v46  ;;  %v3140_v59 = vfloor.f32 %v3098_v23 }
 0x378   : > { %v2022_v60 = vpop.f32.mrf.mxu1  ;;  %vm3391_vm5 = vcmp.ge.f32.partialorder %v3223_v37, 1.0  ;;  %vm3475_vm11 = vcmp.le.f32.partialorder %v3223_v37, 16.0  ;;  %v3141_v17 = vfloor.f32 %v3099_v28 }
 0x379   : > { %v3853_v13 = vadd.f32 %v3852_v26, %v3812_v14  ;;  %v2591_v18 = vadd.f32 %v2538_v20, %v2302_v62  ;;  %v2073_v47 = vadd.f32 %v2022_v60, %v7413_v34  ;;  %v3182_v55 = vmul.f32 18.0, %v3140_v59  ;;  %vm7103_vm10 = vmand %vm3349_vm4, %vm3391_vm5 }
 0x37a   : > { %v3058_v14 = vadd.f32 0.5, %v3016_v19  ;;  %vm3266_vm12 = vcmp.ge.f32.partialorder %v3140_v59, 1.0  ;;  %vm3308_vm6 = vcmp.le.f32.partialorder %v3140_v59, 16.0  ;;  %vm3517_vm8 = vmand %vm7103_vm10, %vm3475_vm11  ;;  %vm3267_vm9 = vcmp.ge.f32.partialorder %v3141_v17, 1.0 }
 0x37b   : > { %v2875_v2 = vpop.f32.mrf.mxu0  ;;  %v2925_v52 = vadd.f32 %v2872_v24, %v2591_v18  ;;  %v3224_v46 = vsub.f32 %v3014_v35, %v3182_v55  ;;  %vm3350_vm14 = vmand %vm3266_vm12, %vm3308_vm6  ;;  %vm3309_vm2 = vcmp.le.f32.partialorder %v3141_v17, 16.0 }
 0x37c   : > { %v3100_v21 = vmul.f32 0.055555556, %v3058_v14  ;;  %vm3351_vm4 = vmand %vm3267_vm9, %vm3309_vm2 }
 0x37d   : > { %v4686_v45 = vpack.c.bf16 %v2925_v52, %v2924_v9  ;;  %v3724_v44 = vmul.f32 %v4484_v43, %v2925_v52  ;;  %vm3392_vm13 = vcmp.ge.f32.partialorder %v3224_v46, 1.0  ;;  %v4487_v43 = vsel %vm3517_vm8, 1.0, %v4802_v32 }
 0x37e   : > { %v2252_v33 = vpop.f32.mrf.mxu2  ;;  %v2548_v63 = vpop.f32.mrf.mxu3  ;;  %vm3434_vm15 = vmand %vm3350_vm14, %vm3392_vm13  ;;  %vm3476_vm1 = vcmp.le.f32.partialorder %v3224_v46, 16.0  ;;  %v3142_v34 = vfloor.f32 %v3100_v21 }
 0x37f   : > { %4722 = vst [vmem:[%s6080_s26 + $0x88] sm:$0xff] %v4686_v45   ;;  %v3765_v11 = vadd.f32 %v3764_v49, %v3724_v44  ;;  %v3813_v54 = vmul.f32 %v3724_v44, %v2925_v52  ;;  %v2303_v8 = vadd.f32 %v2252_v33, %v2073_v47  ;;  %vm3518_vm3 = vmand %vm3434_vm15, %vm3476_vm1 }
 0x380   : > { %v2024_v22 = vpop.f32.mrf.mxu1  ;;  %v3184_v23 = vmul.f32 18.0, %v3142_v34  ;;  %vm3268_vm12 = vcmp.ge.f32.partialorder %v3142_v34, 1.0  ;;  %vm3310_vm6 = vcmp.le.f32.partialorder %v3142_v34, 16.0 }
 0x381   : > { %v3854_v40 = vadd.f32 %v3853_v13, %v3813_v54  ;;  %v2592_v20 = vadd.f32 %v2541_v36, %v2303_v8  ;;  %v2074_v31 = vadd.f32 %v2024_v22, %v7414_v56  ;;  %v7417_v36 = vld [vmem:[#allocation13_spill] sm:$0xff]  ;;  %vm3352_vm13 = vmand %vm3268_vm12, %vm3310_vm6 }
 0x383   : > { %v2877_v48 = vpop.f32.mrf.mxu0  ;;  %v2926_v15 = vadd.f32 %v2875_v2, %v2592_v20  ;;  %v3183_v2 = vmul.f32 18.0, %v3141_v17 }
 0x385   : > { %v3725_v42 = vmul.f32 %v4485_v29, %v2926_v15  ;;  %v3225_v44 = vsub.f32 %v3015_v38, %v3183_v2 }
 0x386   : > { %v2254_v3 = vpop.f32.mrf.mxu2 }
 0x387   : > { %v3766_v41 = vadd.f32 %v3765_v11, %v3725_v42  ;;  %v3814_v26 = vmul.f32 %v3725_v42, %v2926_v15  ;;  %v2304_v39 = vadd.f32 %v2254_v3, %v2074_v31  ;;  %vm3393_vm5 = vcmp.ge.f32.partialorder %v3225_v44, 1.0 }
 0x388   : > { %v2027_v24 = vpop.f32.mrf.mxu1  ;;  %vm3435_vm10 = vmand %vm3351_vm4, %vm3393_vm5  ;;  %vm3477_vm11 = vcmp.le.f32.partialorder %v3225_v44, 16.0 }
 0x389   : > { %v3855_v9 = vadd.f32 %v3854_v40, %v3814_v26  ;;  %v2593_v4 = vadd.f32 %v2543_v53, %v2304_v39  ;;  %v2075_v49 = vadd.f32 %v2027_v24, %v7417_v36  ;;  %v4488_v40 = vsel %vm3518_vm3, 1.0, %v4802_v32  ;;  %vm3519_vm8 = vmand %vm3435_vm10, %vm3477_vm11  ;;  %v7420_v24 = vld [vmem:[#allocation34_spill] sm:$0xff] }
 0x38a   : > { %v4489_v3 = vsel %vm3519_vm8, 1.0, %v4802_v32 }
 0x38b   : > { %v2927_v7 = vadd.f32 %v2877_v48, %v2593_v4  ;;  %v2880_v25 = vpop.f32.mrf.mxu0  ;;  %v3226_v48 = vsub.f32 %v3016_v19, %v3184_v23 }
 0x38d   : > { %v4691_v16 = vpack.c.bf16 %v2927_v7, %v2926_v15  ;;  %v3726_v1 = vmul.f32 %v4486_v61, %v2927_v7  ;;  %v2551_v15 = vpop.f32.mrf.mxu3  ;;  %vm3394_vm14 = vcmp.ge.f32.partialorder %v3226_v48, 1.0  ;;  %vm3478_vm1 = vcmp.le.f32.partialorder %v3226_v48, 16.0 }
 0x38e   : > { %v2257_v62 = vpop.f32.mrf.mxu2  ;;  %vm3436_vm15 = vmand %vm3352_vm13, %vm3394_vm14 }
 0x38f   : > { %4723 = vst [vmem:[%s6080_s26 + $0x90] sm:$0xff] %v4691_v16   ;;  %v3767_v60 = vadd.f32 %v3766_v41, %v3726_v1  ;;  %v3815_v57 = vmul.f32 %v3726_v1, %v2927_v7  ;;  %v2305_v13 = vadd.f32 %v2257_v62, %v2075_v49  ;;  %vm3520_vm9 = vmand %vm3436_vm15, %vm3478_vm1 }
 0x390   : > { %v2029_v18 = vpop.f32.mrf.mxu1  ;;  %v4490_v0 = vsel %vm3520_vm9, 1.0, %v4802_v32 }
 0x391   : > { %v3856_v50 = vadd.f32 %v3855_v9, %v3815_v57  ;;  %v2594_v35 = vadd.f32 %v2546_v58, %v2305_v13  ;;  %v2076_v45 = vadd.f32 %v2029_v18, %v7418_v27 }
 0x393   : > { %v2928_v52 = vadd.f32 %v2880_v25, %v2594_v35  ;;  %v2882_v47 = vpop.f32.mrf.mxu0 }
 0x395   : > { %v3727_v12 = vmul.f32 %v4487_v43, %v2928_v52  ;;  %v2553_v61 = vpop.f32.mrf.mxu3 }
 0x396   : > { %v2259_v51 = vpop.f32.mrf.mxu2 }
 0x397   : > { %v3768_v33 = vadd.f32 %v3767_v60, %v3727_v12  ;;  %v3816_v11 = vmul.f32 %v3727_v12, %v2928_v52  ;;  %v2306_v54 = vadd.f32 %v2259_v51, %v2076_v45 }
 0x398   : > { %v2032_v8 = vpop.f32.mrf.mxu1 }
 0x399   : > { %v3857_v22 = vadd.f32 %v3856_v50, %v3816_v11  ;;  %v2595_v53 = vadd.f32 %v2548_v63, %v2306_v54  ;;  %v2077_v29 = vadd.f32 %v2032_v8, %v7419_v10 }
 0x39b   : > { %v2929_v30 = vadd.f32 %v2882_v47, %v2595_v53  ;;  %v2885_v31 = vpop.f32.mrf.mxu0 }
 0x39d   : > { %v4696_v38 = vpack.c.bf16 %v2929_v30, %v2928_v52  ;;  %v3728_v20 = vmul.f32 %v4488_v40, %v2929_v30 }
 0x39e   : > { %v2262_v59 = vpop.f32.mrf.mxu2 }
 0x39f   : > { %4724 = vst [vmem:[%s6080_s26 + $0x98] sm:$0xff] %v4696_v38   ;;  %v3769_v5 = vadd.f32 %v3768_v33, %v3728_v20  ;;  %v3817_v42 = vmul.f32 %v3728_v20, %v2929_v30  ;;  %v2307_v56 = vadd.f32 %v2262_v59, %v2077_v29 }
 0x3a0   : > { %v2034_v41 = vpop.f32.mrf.mxu1 }
 0x3a1   : > { %v3858_v37 = vadd.f32 %v3857_v22, %v3817_v42  ;;  %v2596_v6 = vadd.f32 %v2551_v15, %v2307_v56  ;;  %v2078_v55 = vadd.f32 %v2034_v41, %v7420_v24 }
 0x3a3   : > { %v2930_v26 = vadd.f32 %v2885_v31, %v2596_v6  ;;  %v2887_v25 = vpop.f32.mrf.mxu0 }
 0x3a5   : > { %v3729_v39 = vmul.f32 %v4489_v3, %v2930_v26 }
 0x3a6   : > { %v2264_v28 = vpop.f32.mrf.mxu2 }
 0x3a7   : > { %v3770_v9 = vadd.f32 %v3769_v5, %v3729_v39  ;;  %v3818_v4 = vmul.f32 %v3729_v39, %v2930_v26  ;;  %v2308_v19 = vadd.f32 %v2264_v28, %v2078_v55 }
 0x3a9   : > { %v3859_v58 = vadd.f32 %v3858_v37, %v3818_v4  ;;  %v2597_v7 = vadd.f32 %v2553_v61, %v2308_v19 }
 0x3ab   : > { %v2931_v46 = vadd.f32 %v2887_v25, %v2597_v7 }
 0x3ad   : > { %v4701_v17 = vpack.c.bf16 %v2931_v46, %v2930_v26  ;;  %v3730_v16 = vmul.f32 %v4490_v0, %v2931_v46 }
 0x3af   : > { %4725 = vst [vmem:[%s6080_s26 + $0xa0] sm:$0xff] %v4701_v17   ;;  %v3771_v1 = vadd.f32 %v3770_v9, %v3730_v16  ;;  %v3819_v36 = vmul.f32 %v3730_v16, %v2931_v46 }
 0x3b1   : > { %v3772_v49 = vrot.slane %v3771_v1, 4  ;;  %v3860_v14 = vadd.f32 %v3859_v58, %v3819_v36 }
 0x3b3   : > { %v3773_v62 = vadd.f32 %v3772_v49, %v3771_v1  ;;  %v3861_v60 = vrot.slane %v3860_v14, 4 }
 0x3b5   : > { %v3774_v57 = vrot.slane %v3773_v62, 2  ;;  %v3862_v13 = vadd.f32 %v3861_v60, %v3860_v14 }
 0x3b7   : > { %v3775_v18 = vadd.f32 %v3774_v57, %v3773_v62  ;;  %v3863_v50 = vrot.slane %v3862_v13, 2 }
 0x3b9   : > { %v3776_v35 = vrot.slane %v3775_v18, 1  ;;  %v3864_v2 = vadd.f32 %v3863_v50, %v3862_v13 }
 0x3bb   : > { %v3865_v21 = vrot.slane %v3864_v2, 1  ;;  %v3777_v32 = vadd.f32 %v3776_v35, %v3775_v18 }
 0x3bd   : > { %v3866_v43 = vadd.f32 %v3865_v21, %v3864_v2 }
 0x3bf   : > { %v3867_v52 = vsel %vm574_vm0, %v3777_v32, %v3866_v43 }
 0x3c0   : > { %v3869_v63 = vsel %vm550_vm7, %v3867_v52, 0.0 }
 0x3c1   : > { %3870 = vst [vmem:[%s181_s28] sm:$0xff] %v3869_v63 }
 0x3c2 PF: > { %s14_s12 = sadd.s32 1, %s4800_s12  }
 0x3c3   : > { %p11_p4 = scmp.ge.s32.totalorder %s14_s12, 4  }
 0x3c5   :  { %13 = sbr.rel (!%p11_p4) target bundleno = 1 (0x1), region = 78 }

// kernel: basic_block_face.4
= control target key start
LH: loop header
LB: loop body
LE: loop exit
PB: predicated region body
PF: predicated region fallthrough
CT: control target
= control target key end

     0   :  { %s5242_s21 = smov 0   ;;  %s7483_s0 = inlined_call_operand.vmem [shape: bf16[2,336,128], index: 0, kind: input, shape index: {}]   ;;  %s7484_s1 = inlined_call_operand.vmem [shape: bf16[9,128,128], index: 1, kind: input, shape index: {}]   ;;  %s7485_s2 = inlined_call_operand.vmem [shape: f32[1,128], index: 2, kind: input, shape index: {}]   ;;  %s7486_s3 = inlined_call_operand.vmem [shape: f32[1,128], index: 3, kind: input, shape index: {}]   ;;  %s7487_s4 = inlined_call_operand.vmem [shape: f32[1,128], index: 4, kind: input, shape index: {}]   ;;  %s7488_s5 = inlined_call_operand.vmem [shape: bf16[2,336,128], index: 5, kind: output, shape index: {0}]   ;;  %s7489_s6 = inlined_call_operand.vmem [shape: f32[2,8,128], index: 6, kind: output, shape index: {1}]  }
   0x1 LB: > { %s4386_s22 = sadd.s32 4294967295, %s5204_s21   ;;  %p4390_p0 = scmp.ge.s32.totalorder %s5204_s21, 1  ;;  %s5204_s21 = sphi %s5242_s21, %s17_s21  }
   0x2   : > { %p215_p1 = scmp.lt.s32.totalorder %s5204_s21, 3 }
   0x4   : > { %p216_p2 = pnand %p4390_p0, %p215_p1 }
   0x6   : > { %219 = sbr.rel (%p216_p2) target bundleno = 1115 (0x45b), region = 40 }
   0xb   : > { %v4869_v0 = vld [vmem:[%s7484_s1 + $0x78] sm:$0xff]  ;;  %p249_p3 = scmp.lt.s32.totalorder %s4386_s22, 1  ;;  %v347_v1 = vlaneseq  ;;  %v4868_v2 = vld [vmem:[%s7484_s1 + $0x70] sm:$0xff]  ;;  %v4867_v9 = vld [vmem:[%s7484_s1 + $0x68] sm:$0xff] }
   0xc   : > { %5155 = vmatpush.bf16.msra.mxu1 %v4869_v0  ;;  %5156 = vmatpush.bf16.msra.mxu2 %v4869_v0  ;;  %v5293_v14 = vld [vmem:[%s7485_s2] ss:$0 sm:$0xff]  ;;  %v4865_v48 = vld [vmem:[%s7484_s1 + $0x58] sm:$0xff]  ;;  %v4864_v58 = vld [vmem:[%s7484_s1 + $0x50] sm:$0xff] }
   0xd   : > { %s8006_s22 = smov (!%p249_p3, %s4386_s22), 1  ;;  %v5258_v3 = vshrl.u32 %v347_v1, 7  ;;  %1805 = vmatpush.bf16.msra.mxu0 %v4869_v0  ;;  %5157 = vmatpush.bf16.msra.mxu3 %v4869_v0  ;;  %v5313_v26 = vld [vmem:[%s7486_s3] ss:$0 sm:$0xff] }
   0xe   : > { %s5179_s27 = smul.u32 168, %s8006_s22  ;;  %v4866_v31 = vld [vmem:[%s7484_s1 + $0x60] sm:$0xff] }
   0xf   : > { %v5262_v4 = vadd.s32 64, %v5258_v3  ;;  %v5265_v5 = vadd.s32 72, %v5258_v3  ;;  %v5268_v6 = vadd.s32 80, %v5258_v3  ;;  %v5271_v7 = vadd.s32 88, %v5258_v3  ;;  %v5350_v57 = vld [vmem:[%s7487_s4] ss:$0 sm:$0xff] }
  0x10   : > { %v5274_v8 = vadd.s32 160, %v5258_v3  ;;  %5158 = vmatpush.bf16.msra.mxu1 %v4868_v2  ;;  %5159 = vmatpush.bf16.msra.mxu2 %v4868_v2  ;;  %s5284_s8 = scalar_lea.vmem %s7483_s0, %s5179_s27  ;;  %v5301_v18 = vadd.s32 168, %v5258_v3  ;;  %v5304_v19 = vadd.s32 176, %v5258_v3  ;;  %v5307_v20 = vadd.s32 184, %v5258_v3  ;;  %s7259_s24 = scalar_lea.vmem %s7488_s5, %s5179_s27 }
  0x11   : > { %v398_v10 = vcvt.s32.f32 %v5262_v4  ;;  %v399_v11 = vcvt.s32.f32 %v5265_v5  ;;  %v400_v12 = vcvt.s32.f32 %v5268_v6  ;;  %v401_v13 = vcvt.s32.f32 %v5271_v7  ;;  %1806 = vmatpush.bf16.msra.mxu0 %v4868_v2  ;;  %v5118_v15 = vld [vmem:[%s5284_s8 + $0x20] sm:$0xff]   ;;  %v5119_v16 = vld [vmem:[%s5284_s8 + $0x28] sm:$0xff]   ;;  %v5298_v17 = vld [vmem:[%s5284_s8 + $0x50] sm:$0xff]   ;;  %5160 = vmatpush.bf16.msra.mxu3 %v4868_v2  ;;  %s4393_s27 = sshll.u32 %s8006_s22, 3 }
  0x12   : > { %v410_v21 = vcvt.s32.f32 %v5274_v8  ;;  %v4944_v22 = vunpack.c.l.bf16 %v5118_v15  ;;  %v4945_v23 = vunpack.c.h.bf16 %v5118_v15  ;;  %v4948_v24 = vunpack.c.l.bf16 %v5119_v16  ;;  %v5125_v62 = vld [vmem:[%s5284_s8 + $0x58] sm:$0xff]   ;;  %v4863_v5 = vld [vmem:[%s7484_s1 + $0x48] sm:$0xff]  ;;  %s262_s28 = scalar_lea.vmem %s7489_s6, %s4393_s27 }
  0x13   : > { %v4949_v25 = vunpack.c.h.bf16 %v5119_v16  ;;  %v440_v27 = vadd.f32 0.5, %v398_v10  ;;  %v441_v28 = vadd.f32 0.5, %v399_v11  ;;  %v442_v29 = vadd.f32 0.5, %v400_v12 }
  0x14   : > { %v443_v30 = vadd.f32 0.5, %v401_v13  ;;  %5161 = vmatpush.bf16.msra.mxu1 %v4867_v9  ;;  %5162 = vmatpush.bf16.msra.mxu2 %v4867_v9  ;;  %v1032_v32 = vmul.f32 %v5293_v14, %v4944_v22  ;;  %v1033_v33 = vmul.f32 %v5293_v14, %v4945_v23  ;;  %v1034_v34 = vmul.f32 %v5293_v14, %v4948_v24  ;;  %v5133_v23 = vld [vmem:[%s5284_s8 + $0x98] sm:$0xff]  }
  0x15   : > { %v4968_v35 = vunpack.c.l.bf16 %v5298_v17  ;;  %1807 = vmatpush.bf16.msra.mxu0 %v4867_v9  ;;  %v482_v36 = vmul.f32 0.055555556, %v440_v27  ;;  %v483_v37 = vmul.f32 0.055555556, %v441_v28  ;;  %v484_v38 = vmul.f32 0.055555556, %v442_v29  ;;  %5163 = vmatpush.bf16.msra.mxu3 %v4867_v9 }
  0x16   : > { %v1035_v39 = vmul.f32 %v5293_v14, %v4949_v25  ;;  %v485_v40 = vmul.f32 0.055555556, %v443_v30  ;;  %v5326_v41 = vadd.f32 %v5313_v26, %v1032_v32  ;;  %v5329_v42 = vadd.f32 %v5313_v26, %v1033_v33  ;;  %v5134_v28 = vld [vmem:[%s5284_s8 + $0xa0] sm:$0xff]  }
  0x17   : > { %v5332_v43 = vadd.f32 %v5313_v26, %v1034_v34  ;;  %v524_v44 = vfloor.f32 %v482_v36  ;;  %v525_v45 = vfloor.f32 %v483_v37  ;;  %v526_v46 = vfloor.f32 %v484_v38 }
  0x18   : > { %v5335_v47 = vadd.f32 %v5313_v26, %v1035_v39  ;;  %5164 = vmatpush.bf16.msra.mxu1 %v4866_v31  ;;  %5165 = vmatpush.bf16.msra.mxu2 %v4866_v31  ;;  %v527_v49 = vfloor.f32 %v485_v40  ;;  %v1166_v1 = vmul.f32 %v5350_v57, %v5326_v41  ;;  %v1167_v2 = vmul.f32 %v5350_v57, %v5329_v42 }
  0x19   : > { %1808 = vmatpush.bf16.msra.mxu0 %v4866_v31  ;;  %v566_v50 = vmul.f32 18.0, %v524_v44  ;;  %v567_v51 = vmul.f32 18.0, %v525_v45  ;;  %v568_v52 = vmul.f32 18.0, %v526_v46  ;;  %vm650_vm3 = vcmp.ge.f32.partialorder %v524_v44, 1.0  ;;  %5166 = vmatpush.bf16.msra.mxu3 %v4866_v31  ;;  %v4862_v31 = vld [vmem:[%s7484_s1 + $0x40] sm:$0xff] }
  0x1a   : > { %v569_v53 = vmul.f32 18.0, %v527_v49  ;;  %vm651_vm4 = vcmp.ge.f32.partialorder %v525_v45, 1.0  ;;  %vm652_vm5 = vcmp.ge.f32.partialorder %v526_v46, 1.0  ;;  %vm653_vm6 = vcmp.ge.f32.partialorder %v527_v49, 1.0 }
  0x1b   : > { %v608_v54 = vsub.f32 %v398_v10, %v566_v50  ;;  %v5343_v55 = vsub.f32 %v399_v11, %v567_v51  ;;  %v5345_v56 = vsub.f32 %v400_v12, %v568_v52  ;;  %vm692_vm7 = vcmp.le.f32.partialorder %v524_v44, 16.0 }
  0x1c   : > { %5167 = vmatpush.bf16.msra.mxu1 %v4865_v48  ;;  %5168 = vmatpush.bf16.msra.mxu2 %v4865_v48  ;;  %v5357_v59 = vsub.f32 %v401_v13, %v569_v53  ;;  %vm693_vm8 = vcmp.le.f32.partialorder %v525_v45, 16.0  ;;  %vm694_vm9 = vcmp.le.f32.partialorder %v526_v46, 16.0  ;;  %vm695_vm10 = vcmp.le.f32.partialorder %v527_v49, 16.0  ;;  %vm5360_vm11 = vmand %vm650_vm3, %vm692_vm7 }
  0x1d   : > { %1809 = vmatpush.bf16.msra.mxu0 %v4865_v48  ;;  %vm5365_vm12 = vmand %vm651_vm4, %vm693_vm8  ;;  %vm776_vm13 = vcmp.ge.f32.partialorder %v608_v54, 1.0  ;;  %vm777_vm14 = vcmp.ge.f32.partialorder %v5343_v55, 1.0  ;;  %vm778_vm15 = vcmp.ge.f32.partialorder %v5345_v56, 1.0  ;;  %5169 = vmatpush.bf16.msra.mxu3 %v4865_v48  ;;  %vm861_vm4 = vcmp.le.f32.partialorder %v5343_v55, 16.0  ;;  %v4877_v48 = vld [vmem:[%s7484_s1 + $0xb8] sm:$0xff] }
  0x1e   : > { %vm5373_vm1 = vmand %vm652_vm5, %vm694_vm9  ;;  %vm779_vm3 = vcmp.ge.f32.partialorder %v5357_v59, 1.0  ;;  %vm862_vm7 = vcmp.le.f32.partialorder %v5345_v56, 16.0  ;;  %vm863_vm8 = vcmp.le.f32.partialorder %v5357_v59, 16.0  ;;  %vm1123_vm2 = vcmp.gt.f32.partialorder %v5335_v47, 0.0 }
  0x1f   : > { %vm5383_vm0 = vmand %vm653_vm6, %vm695_vm10  ;;  %v1168_v4 = vmul.f32 %v5350_v57, %v5332_v43  ;;  %v1169_v7 = vmul.f32 %v5350_v57, %v5335_v47  ;;  %v4969_v9 = vunpack.c.h.bf16 %v5298_v17  ;;  %v4972_v10 = vunpack.c.l.bf16 %v5125_v62 }
  0x20   : > { %5170 = vmatpush.bf16.msra.mxu1 %v4864_v58  ;;  %5171 = vmatpush.bf16.msra.mxu2 %v4864_v58  ;;  %vm5400_vm5 = vmand %vm5360_vm11, %vm776_vm13  ;;  %v4973_v11 = vunpack.c.h.bf16 %v5125_v62  ;;  %vm7619_vm9 = vcmp.gt.f32.partialorder %v5326_v41, 0.0  ;;  %vm7620_vm10 = vcmp.gt.f32.partialorder %v5329_v42, 0.0  ;;  %vm7621_vm11 = vcmp.gt.f32.partialorder %v5332_v43, 0.0 }
  0x21   : > { %1810 = vmatpush.bf16.msra.mxu0 %v4864_v58  ;;  %vm5411_vm6 = vmand %vm5365_vm12, %vm777_vm14  ;;  %v1208_v13 = vsel %vm7619_vm9, %v5326_v41, %v1166_v1  ;;  %v1209_v15 = vsel %vm7620_vm10, %v5329_v42, %v1167_v2  ;;  %v1210_v16 = vsel %vm7621_vm11, %v5332_v43, %v1168_v4  ;;  %v411_v22 = vcvt.s32.f32 %v5301_v18  ;;  %5172 = vmatpush.bf16.msra.mxu3 %v4864_v58 }
  0x22   : > { %vm5429_vm12 = vmand %vm5373_vm1, %vm778_vm15  ;;  %v1211_v24 = vsel %vm1123_vm2, %v5335_v47, %v1169_v7  ;;  %v412_v25 = vcvt.s32.f32 %v5304_v19  ;;  %v413_v27 = vcvt.s32.f32 %v5307_v20  ;;  %v452_v18 = vadd.f32 0.5, %v410_v21 }
  0x23   : > { %vm5444_vm13 = vmand %vm5383_vm0, %vm779_vm3  ;;  %v453_v29 = vadd.f32 0.5, %v411_v22  ;;  %v1044_v30 = vmul.f32 %v5293_v14, %v4968_v35  ;;  %v1045_v19 = vmul.f32 %v5293_v14, %v4969_v9  ;;  %v5453_v20 = vmul.f32 %v5293_v14, %v4972_v10 }
  0x24   : > { %5173 = vmatpush.bf16.msra.mxu1 %v4863_v5  ;;  %5174 = vmatpush.bf16.msra.mxu2 %v4863_v5  ;;  %vm7626_vm0 = vcmp.le.f32.partialorder %v608_v54, 16.0  ;;  %v454_v32 = vadd.f32 0.5, %v412_v25  ;;  %v455_v33 = vadd.f32 0.5, %v413_v27  ;;  %v494_v17 = vmul.f32 0.055555556, %v452_v18  ;;  %vm903_vm2 = vmand %vm5411_vm6, %vm861_vm4 }
  0x25   : > { %vm902_vm1 = vmand %vm5400_vm5, %vm7626_vm0  ;;  %v5462_v34 = vmul.f32 %v5293_v14, %v4973_v11  ;;  %1811 = vmatpush.bf16.msra.mxu0 %v4863_v5  ;;  %v7497_v35 = vmov 0.0   ;;  %v495_v37 = vmul.f32 0.055555556, %v453_v29  ;;  %v5472_v38 = vadd.f32 %v5313_v26, %v1044_v30  ;;  %5175 = vmatpush.bf16.msra.mxu3 %v4863_v5 }
  0x26   : > { %v5469_v36 = vsel %vm902_vm1, 1.0, %v7497_v35  ;;  %v5475_v39 = vadd.f32 %v5313_v26, %v1045_v19  ;;  %vm904_vm14 = vmand %vm5429_vm12, %vm862_vm7  ;;  %v5482_v40 = vsel %vm903_vm2, 1.0, %v7497_v35  ;;  %v496_v42 = vmul.f32 0.055555556, %v454_v32 }
  0x27   : > { %7627 = vst [vmem:[#allocation2_spill] sm:$0xff] %v5469_v36  ;;  %v1250_v41 = vmul.f32 %v5469_v36, %v1208_v13  ;;  %v497_v43 = vmul.f32 0.055555556, %v455_v33  ;;  %vm905_vm15 = vmand %vm5444_vm13, %vm863_vm8  ;;  %v5490_v44 = vsel %vm904_vm14, 1.0, %v7497_v35  ;;  %v1251_v45 = vmul.f32 %v5482_v40, %v1209_v15  ;;  %v4861_v13 = vld [vmem:[%s7484_s1 + $0x38] sm:$0xff] }
  0x28   : > { %7628 = vst [vmem:[#allocation3_spill] sm:$0xff] %v5482_v40  ;;  %v536_v46 = vfloor.f32 %v494_v17  ;;  %v537_v47 = vfloor.f32 %v495_v37  ;;  %5176 = vmatpush.bf16.msra.mxu1 %v4862_v31  ;;  %5177 = vmatpush.bf16.msra.mxu2 %v4862_v31  ;;  %v5497_v49 = vsel %vm905_vm15, 1.0, %v7497_v35  ;;  %v1252_v50 = vmul.f32 %v5490_v44, %v1210_v16  ;;  %v4893_v15 = vld [vmem:[%s7484_s1 + $0x138] sm:$0xff] }
  0x29   : > { %7629 = vst [vmem:[#allocation4_spill] sm:$0xff] %v5490_v44  ;;  %v1292_v51 = vpack.c.bf16 %v1250_v41, %v1250_v41  ;;  %vm7490_vm3 = vcmask 1040384   ;;  %v538_v52 = vfloor.f32 %v496_v42  ;;  %1812 = vmatpush.bf16.msra.mxu0 %v4862_v31  ;;  %v1253_v53 = vmul.f32 %v5497_v49, %v1211_v24  ;;  %5178 = vmatpush.bf16.msra.mxu3 %v4862_v31 }
  0x2a   : > { %7630 = vst [vmem:[#allocation5_spill] sm:$0xff] %v5497_v49  ;;  %v1293_v54 = vpack.c.bf16 %v1251_v45, %v1251_v45  ;;  %v539_v55 = vfloor.f32 %v497_v43  ;;  %v578_v56 = vmul.f32 18.0, %v536_v46  ;;  %v1294_v58 = vpack.c.bf16 %v1252_v50, %v1252_v50 }
  0x2b   : > { %v1401_v59 = vunpack.c.l.b16 %v1292_v51  ;;  %v579_v60 = vmul.f32 18.0, %v537_v47  ;;  %v580_v61 = vmul.f32 18.0, %v538_v52  ;;  %v1295_v62 = vpack.c.bf16 %v1253_v53, %v1253_v53 }
  0x2c   : > { %2238 = vmatpush.bf16.msrb.mxu2 %v4877_v48  ;;  %v1402_v63 = vunpack.c.l.b16 %v1293_v54  ;;  %v581_v0 = vmul.f32 18.0, %v539_v55  ;;  %v620_v1 = vsub.f32 %v410_v21, %v578_v56  ;;  %v1403_v2 = vunpack.c.l.b16 %v1294_v58  ;;  %1967 = vmatpush.bf16.msrb.mxu1 %v4861_v13 }
  0x2d   : > { %v621_v4 = vsub.f32 %v411_v22, %v579_v60  ;;  %v5503_v5 = vsub.f32 %v412_v25, %v580_v61  ;;  %vm662_vm4 = vcmp.ge.f32.partialorder %v536_v46, 1.0  ;;  %v1404_v6 = vunpack.c.l.b16 %v1295_v62  ;;  %2711 = vmatpush.bf16.msrb.mxu0 %v4893_v15 }
  0x2e   : > { %v5505_v7 = vpack.c.b16 %v1402_v63, %v1401_v59  ;;  %v5507_v9 = vsub.f32 %v413_v27, %v581_v0  ;;  %vm663_vm7 = vcmp.ge.f32.partialorder %v537_v47, 1.0  ;;  %vm664_vm8 = vcmp.ge.f32.partialorder %v538_v52, 1.0 }
  0x2f   : > { %vm665_vm5 = vcmp.ge.f32.partialorder %v539_v55, 1.0  ;;  %vm704_vm6 = vcmp.le.f32.partialorder %v536_v46, 16.0  ;;  %vm705_vm9 = vcmp.le.f32.partialorder %v537_v47, 16.0  ;;  %v5509_v10 = vpack.c.b16 %v1404_v6, %v1403_v2 }
  0x30   : > { %7631 = vst [vmem:[#allocation6_spill] sm:$0xff] %v5505_v7  ;;  %v7491_v8 = vrot.slane %v5505_v7, 7  ;;  %vm706_vm10 = vcmp.le.f32.partialorder %v538_v52, 16.0  ;;  %vm707_vm11 = vcmp.le.f32.partialorder %v539_v55, 16.0  ;;  %vm5512_vm12 = vmand %vm662_vm4, %vm704_vm6  ;;  %vm788_vm0 = vcmp.ge.f32.partialorder %v620_v1, 1.0 }
  0x31   : > { %7632 = vst [vmem:[#allocation7_spill] sm:$0xff] %v5509_v10  ;;  %vm5516_vm13 = vmand %vm663_vm7, %vm705_vm9  ;;  %vm789_vm1 = vcmp.ge.f32.partialorder %v621_v4, 1.0  ;;  %vm791_vm14 = vcmp.ge.f32.partialorder %v5507_v9, 1.0  ;;  %v1686_v12 = vrot.slane %v5509_v10, 7  ;;  %vm872_vm4 = vcmp.le.f32.partialorder %v620_v1, 16.0 }
  0x32   : > { %vm5524_vm15 = vmand %vm664_vm8, %vm706_vm10  ;;  %vm873_vm6 = vcmp.le.f32.partialorder %v621_v4, 16.0  ;;  %vm874_vm7 = vcmp.le.f32.partialorder %v5503_v5, 16.0  ;;  %v1092_v16 = vadd.f32 %v5313_v26, %v5453_v20  ;;  %v1093_v22 = vadd.f32 %v5313_v26, %v5462_v34 }
  0x33   : > { %vm5530_vm9 = vmand %vm665_vm5, %vm707_vm11  ;;  %vm1132_vm8 = vcmp.gt.f32.partialorder %v5472_v38, 0.0  ;;  %v1687_v24 = vsel %vm7490_vm3, %v7491_v8, %v1686_v12  ;;  %vm1133_vm10 = vcmp.gt.f32.partialorder %v5475_v39, 0.0  ;;  %v1178_v27 = vmul.f32 %v5350_v57, %v5472_v38 }
  0x34   : > { %vm5549_vm5 = vmand %vm5512_vm12, %vm788_vm0  ;;  %v1179_v18 = vmul.f32 %v5350_v57, %v5475_v39  ;;  %1843 = vmatmul.bf16.vlgmr.msra.gmra.mxu1 %v1687_v24  ;;  %vm1134_vm12 = vcmp.gt.f32.partialorder %v1092_v16, 0.0  ;;  %vm1135_vm0 = vcmp.gt.f32.partialorder %v1093_v22, 0.0  ;;  %v1180_v30 = vmul.f32 %v5350_v57, %v1092_v16 }
  0x35   : > { %vm5562_vm11 = vmand %vm5516_vm13, %vm789_vm1  ;;  %v1181_v19 = vmul.f32 %v5350_v57, %v1093_v22  ;;  %vm7645_vm3 = vcmp.ge.f32.partialorder %v5503_v5, 1.0  ;;  %v1220_v31 = vsel %vm1132_vm8, %v5472_v38, %v1178_v27  ;;  %v5004_v33 = vunpack.c.l.bf16 %v5133_v23 }
  0x36   : > { %vm5572_vm2 = vmand %vm5524_vm15, %vm7645_vm3  ;;  %v1221_v32 = vsel %vm1133_vm10, %v5475_v39, %v1179_v18  ;;  %v5005_v17 = vunpack.c.h.bf16 %v5133_v23  ;;  %v1222_v37 = vsel %vm1134_vm12, %v1092_v16, %v1180_v30  ;;  %v5008_v42 = vunpack.c.l.bf16 %v5134_v28  ;;  %v4876_v16 = vld [vmem:[%s7484_s1 + $0xb0] sm:$0xff] }
  0x37   : > { %vm5584_vm13 = vmand %vm5530_vm9, %vm791_vm14  ;;  %v1223_v41 = vsel %vm1135_vm0, %v1093_v22, %v1181_v19  ;;  %v5009_v43 = vunpack.c.h.bf16 %v5134_v28  ;;  %v386_v38 = vadd.s32 304, %v5258_v3  ;;  %v387_v39 = vadd.s32 312, %v5258_v3  ;;  %2239 = vmatpush.bf16.msrb.mxu2 %v4876_v16 }
  0x38   : > { %vm914_vm3 = vmand %vm5549_vm5, %vm872_vm4  ;;  %v388_v45 = vadd.s32 320, %v5258_v3  ;;  %v5595_v46 = vadd.s32 328, %v5258_v3  ;;  %v5604_v48 = vmul.f32 %v5293_v14, %v5004_v33  ;;  %v5607_v50 = vmul.f32 %v5293_v14, %v5005_v17 }
  0x39   : > { %vm915_vm1 = vmand %vm5562_vm11, %vm873_vm6  ;;  %v5601_v47 = vsel %vm914_vm3, 1.0, %v7497_v35  ;;  %v5610_v51 = vmul.f32 %v5293_v14, %v5008_v42  ;;  %v428_v54 = vcvt.s32.f32 %v386_v38  ;;  %v429_v55 = vcvt.s32.f32 %v387_v39 }
  0x3a   : > { %7650 = vst [vmem:[#allocation8_spill] sm:$0xff] %v5601_v47  ;;  %vm916_vm14 = vmand %vm5572_vm2, %vm874_vm7  ;;  %v5617_v52 = vsel %vm915_vm1, 1.0, %v7497_v35  ;;  %v1262_v53 = vmul.f32 %v5601_v47, %v1220_v31  ;;  %vm7652_vm15 = vcmp.le.f32.partialorder %v5507_v9, 16.0  ;;  %v430_v59 = vcvt.s32.f32 %v388_v45 }
  0x3b   : > { %7651 = vst [vmem:[#allocation9_spill] sm:$0xff] %v5617_v52  ;;  %vm917_vm4 = vmand %vm5584_vm13, %vm7652_vm15  ;;  %v5625_v56 = vsel %vm916_vm14, 1.0, %v7497_v35  ;;  %v1263_v58 = vmul.f32 %v5617_v52, %v1221_v32  ;;  %v431_v60 = vcvt.s32.f32 %v5595_v46  ;;  %v470_v0 = vadd.f32 0.5, %v428_v54 }
  0x3c   : > { %7653 = vst [vmem:[#allocation10_spill] sm:$0xff] %v5625_v56  ;;  %v5630_v61 = vsel %vm917_vm4, 1.0, %v7497_v35  ;;  %v1264_v62 = vmul.f32 %v5625_v56, %v1222_v37  ;;  %v1304_v63 = vpack.c.bf16 %v1262_v53, %v1262_v53  ;;  %v471_v4 = vadd.f32 0.5, %v429_v55 }
  0x3d   : > { %7654 = vst [vmem:[#allocation11_spill] sm:$0xff] %v5630_v61  ;;  %v1265_v1 = vmul.f32 %v5630_v61, %v1223_v41  ;;  %v1305_v2 = vpack.c.bf16 %v1263_v58, %v1263_v58  ;;  %v472_v5 = vadd.f32 0.5, %v430_v59  ;;  %v473_v21 = vadd.f32 0.5, %v431_v60  ;;  %v5120_v58 = vld [vmem:[%s5284_s8 + $0x30] sm:$0xff]  }
  0x3e   : > { %v1306_v6 = vpack.c.bf16 %v1264_v62, %v1264_v62  ;;  %v1413_v9 = vunpack.c.l.b16 %v1304_v63  ;;  %v512_v11 = vmul.f32 0.055555556, %v470_v0  ;;  %v513_v24 = vmul.f32 0.055555556, %v471_v4 }
  0x3f   : > { %v1307_v22 = vpack.c.bf16 %v1265_v1, %v1265_v1  ;;  %v1414_v23 = vunpack.c.l.b16 %v1305_v2  ;;  %v514_v25 = vmul.f32 0.055555556, %v472_v5  ;;  %v515_v18 = vmul.f32 0.055555556, %v473_v21 }
  0x40   : > { %v1415_v27 = vunpack.c.l.b16 %v1306_v6  ;;  %v554_v28 = vfloor.f32 %v512_v11  ;;  %v1065_v29 = vmul.f32 %v5293_v14, %v5009_v43  ;;  %v555_v20 = vfloor.f32 %v513_v24 }
  0x41   : > { %v1416_v30 = vunpack.c.l.b16 %v1307_v22  ;;  %v5644_v19 = vpack.c.b16 %v1414_v23, %v1413_v9  ;;  %v556_v31 = vfloor.f32 %v514_v25  ;;  %v557_v32 = vfloor.f32 %v515_v18  ;;  %v5718_v23 = vld [vmem:[%s5284_s8 + $0x60] sm:$0xff]  }
  0x42   : > { %v596_v33 = vmul.f32 18.0, %v554_v28  ;;  %vm680_vm2 = vcmp.ge.f32.partialorder %v554_v28, 1.0  ;;  %vm722_vm6 = vcmp.le.f32.partialorder %v554_v28, 16.0  ;;  %v597_v37 = vmul.f32 18.0, %v555_v20 }
  0x43   : > { %v5646_v17 = vpack.c.b16 %v1416_v30, %v1415_v27  ;;  %v7492_v34 = vrot.slane %v5644_v19, 7  ;;  %v598_v41 = vmul.f32 18.0, %v556_v31  ;;  %v599_v42 = vmul.f32 18.0, %v557_v32  ;;  %vm5652_vm12 = vmand %vm680_vm2, %vm722_vm6 }
  0x44   : > { %v638_v43 = vsub.f32 %v428_v54, %v596_v33  ;;  %vm681_vm7 = vcmp.ge.f32.partialorder %v555_v20, 1.0  ;;  %vm682_vm9 = vcmp.ge.f32.partialorder %v556_v31, 1.0  ;;  %v639_v39 = vsub.f32 %v429_v55, %v597_v37 }
  0x45   : > { %v1698_v38 = vrot.slane %v5646_v17, 7  ;;  %v640_v45 = vsub.f32 %v430_v59, %v598_v41  ;;  %vm683_vm8 = vcmp.ge.f32.partialorder %v557_v32, 1.0  ;;  %v641_v46 = vsub.f32 %v431_v60, %v599_v42 }
  0x46   : > { %vm723_vm5 = vcmp.le.f32.partialorder %v555_v20, 16.0  ;;  %vm724_vm10 = vcmp.le.f32.partialorder %v556_v31, 16.0  ;;  %vm725_vm11 = vcmp.le.f32.partialorder %v557_v32, 16.0  ;;  %v7655_v53 = vmov 0 }
  0x47   : > { %v7656_v53 = vsel %vm5652_vm12, 4294967295, %v7655_v53  ;;  %vm7657_vm0 = vcmask 1040384   ;;  %vm5661_vm13 = vmand %vm681_vm7, %vm723_vm5  ;;  %vm806_vm3 = vcmp.ge.f32.partialorder %v638_v43, 1.0  ;;  %vm807_vm1 = vcmp.ge.f32.partialorder %v639_v39, 1.0 }
  0x48   : > { %v1699_v54 = vsel %vm7657_vm0, %v7492_v34, %v1698_v38  ;;  %vm5667_vm14 = vmand %vm682_vm9, %vm724_vm10  ;;  %vm808_vm15 = vcmp.ge.f32.partialorder %v640_v45, 1.0  ;;  %vm809_vm4 = vcmp.ge.f32.partialorder %v641_v46, 1.0  ;;  %vm890_vm2 = vcmp.le.f32.partialorder %v638_v43, 16.0 }
  0x49   : > { %1873 = vmatmul.bf16.vlgmr.msra.gmra.mxu2 %v1699_v54  ;;  %vm891_vm6 = vcmp.le.f32.partialorder %v639_v39, 16.0  ;;  %vm5672_vm12 = vmand %vm683_vm8, %vm725_vm11  ;;  %v1108_v62 = vadd.f32 %v5313_v26, %v5604_v48  ;;  %v1109_v63 = vadd.f32 %v5313_v26, %v5607_v50  ;;  %v1110_v0 = vadd.f32 %v5313_v26, %v5610_v51 }
  0x4a   : > { %vm7664_vm9 = vnez %v7656_v53  ;;  %vm893_vm8 = vcmp.le.f32.partialorder %v641_v46, 16.0  ;;  %v1111_v2 = vadd.f32 %v5313_v26, %v1065_v29  ;;  %v4952_v4 = vunpack.c.l.bf16 %v5120_v58  ;;  %vm5692_vm10 = vmand %vm5661_vm13, %vm807_vm1 }
  0x4b   : > { %vm5684_vm5 = vmand %vm7664_vm9, %vm806_vm3  ;;  %v4953_v5 = vunpack.c.h.bf16 %v5120_v58  ;;  %vm1150_vm11 = vcmp.gt.f32.partialorder %v1108_v62, 0.0  ;;  %vm1151_vm0 = vcmp.gt.f32.partialorder %v1109_v63, 0.0  ;;  %vm1152_vm7 = vcmp.gt.f32.partialorder %v1110_v0, 0.0 }
  0x4c   : > { %v1196_v50 = vmul.f32 %v5350_v57, %v1108_v62  ;;  %vm5700_vm3 = vmand %vm5667_vm14, %vm808_vm15  ;;  %vm1153_vm9 = vcmp.gt.f32.partialorder %v1111_v2, 0.0  ;;  %v1197_v6 = vmul.f32 %v5350_v57, %v1109_v63  ;;  %v1198_v9 = vmul.f32 %v5350_v57, %v1110_v0 }
  0x4d   : > { %v1199_v21 = vmul.f32 %v5350_v57, %v1111_v2  ;;  %vm5710_vm13 = vmand %vm5672_vm12, %vm809_vm4  ;;  %v360_v15 = vadd.s32 96, %v5258_v3  ;;  %v361_v16 = vadd.s32 104, %v5258_v3  ;;  %v1036_v22 = vmul.f32 %v5293_v14, %v4952_v4 }
  0x4e   : > { %v1238_v13 = vsel %vm1150_vm11, %v1108_v62, %v1196_v50  ;;  %vm932_vm1 = vmand %vm5684_vm5, %vm890_vm2  ;;  %v1239_v24 = vsel %vm1151_vm0, %v1109_v63, %v1197_v6  ;;  %v1240_v25 = vsel %vm1152_vm7, %v1110_v0, %v1198_v9  ;;  %v1037_v18 = vmul.f32 %v5293_v14, %v4953_v5 }
  0x4f   : > { %v1241_v27 = vsel %vm1153_vm9, %v1111_v2, %v1199_v21  ;;  %vm933_vm12 = vmand %vm5692_vm10, %vm891_vm6  ;;  %v5729_v28 = vsel %vm932_vm1, 1.0, %v7497_v35  ;;  %v402_v29 = vcvt.s32.f32 %v360_v15  ;;  %v403_v30 = vcvt.s32.f32 %v361_v16 }
  0x50   : > { %7673 = vst [vmem:[#allocation12_spill] sm:$0xff] %v5729_v28  ;;  %v1082_v20 = vadd.f32 %v5313_v26, %v1036_v22  ;;  %vm7674_vm14 = vcmp.le.f32.partialorder %v640_v45, 16.0  ;;  %v5736_v31 = vsel %vm933_vm12, 1.0, %v7497_v35  ;;  %v1280_v32 = vmul.f32 %v5729_v28, %v1238_v13  ;;  %vm935_vm4 = vmand %vm5710_vm13, %vm893_vm8 }
  0x51   : > { %vm934_vm15 = vmand %vm5700_vm3, %vm7674_vm14  ;;  %7675 = vst [vmem:[#allocation13_spill] sm:$0xff] %v5736_v31  ;;  %v1083_v33 = vadd.f32 %v5313_v26, %v1037_v18  ;;  %v4976_v37 = vunpack.c.l.bf16 %v5718_v23  ;;  %v1281_v42 = vmul.f32 %v5736_v31, %v1239_v24  ;;  %v444_v43 = vadd.f32 0.5, %v402_v29 }
  0x52   : > { %v5745_v41 = vsel %vm934_vm15, 1.0, %v7497_v35  ;;  %v445_v39 = vadd.f32 0.5, %v403_v30  ;;  %v5749_v45 = vsel %vm935_vm4, 1.0, %v7497_v35  ;;  %v1322_v54 = vpack.c.bf16 %v1280_v32, %v1280_v32 }
  0x53   : > { %7676 = vst [vmem:[#allocation14_spill] sm:$0xff] %v5745_v41  ;;  %v1282_v53 = vmul.f32 %v5745_v41, %v1240_v25  ;;  %vm1671_vm2 = vcmask 1044480   ;;  %vm1124_vm6 = vcmp.gt.f32.partialorder %v1082_v20, 0.0  ;;  %v1283_v46 = vmul.f32 %v5749_v45, %v1241_v27 }
  0x54   : > { %7677 = vst [vmem:[#allocation15_spill] sm:$0xff] %v5749_v45  ;;  %v1323_v55 = vpack.c.bf16 %v1281_v42, %v1281_v42  ;;  %v486_v58 = vmul.f32 0.055555556, %v444_v43  ;;  %v487_v59 = vmul.f32 0.055555556, %v445_v39  ;;  %v1431_v62 = vunpack.c.l.b16 %v1322_v54 }
  0x55   : > { %v1324_v60 = vpack.c.bf16 %v1282_v53, %v1282_v53  ;;  %vm1125_vm7 = vcmp.gt.f32.partialorder %v1083_v33, 0.0  ;;  %v1170_v63 = vmul.f32 %v5350_v57, %v1082_v20  ;;  %v1325_v0 = vpack.c.bf16 %v1283_v46, %v1283_v46 }
  0x56   : > { %v1329_v1 = vunpack.c.l.b16 %v1323_v55  ;;  %v528_v2 = vfloor.f32 %v486_v58  ;;  %v529_v4 = vfloor.f32 %v487_v59  ;;  %v1171_v48 = vmul.f32 %v5350_v57, %v1083_v33 }
  0x57   : > { %v1330_v5 = vunpack.c.l.b16 %v1324_v60  ;;  %v1212_v50 = vsel %vm1124_vm6, %v1082_v20, %v1170_v63  ;;  %v4977_v51 = vunpack.c.h.bf16 %v5718_v23  ;;  %v1331_v6 = vunpack.c.l.b16 %v1325_v0  ;;  %v4860_v23 = vld [vmem:[%s7484_s1 + $0x30] sm:$0xff]  ;;  %v5771_v20 = vld [vmem:[%s5284_s8] sm:$0xff]  }
  0x58   : > { %v5756_v9 = vpack.c.b16 %v1329_v1, %v1431_v62  ;;  %v570_v21 = vmul.f32 18.0, %v528_v2  ;;  %v571_v11 = vmul.f32 18.0, %v529_v4  ;;  %vm654_vm5 = vcmp.ge.f32.partialorder %v528_v2, 1.0  ;;  %1968 = vmatpush.bf16.msrb.mxu1 %v4860_v23 }
  0x59   : > { %v5758_v13 = vpack.c.b16 %v1330_v5, %v1329_v1  ;;  %vm655_vm8 = vcmp.ge.f32.partialorder %v529_v4, 1.0  ;;  %vm696_vm10 = vcmp.le.f32.partialorder %v528_v2, 16.0  ;;  %v5760_v15 = vpack.c.b16 %v1331_v6, %v1331_v6 }
  0x5a   : > { %v5762_v16 = vpack.c.b16 %v1331_v6, %v1330_v5  ;;  %v612_v22 = vsub.f32 %v402_v29, %v570_v21  ;;  %v613_v24 = vsub.f32 %v403_v30, %v571_v11  ;;  %vm738_vm11 = vmand %vm654_vm5, %vm696_vm10  ;;  %vm697_vm0 = vcmp.le.f32.partialorder %v529_v4, 16.0  ;;  %v4892_v4 = vld [vmem:[%s7484_s1 + $0x130] sm:$0xff]  ;;  %v4875_v5 = vld [vmem:[%s7484_s1 + $0xa8] sm:$0xff] }
  0x5b   : > { %v1672_v25 = vrot.slane %v5758_v13, 3  ;;  %v1213_v27 = vsel %vm1125_vm7, %v1083_v33, %v1171_v48  ;;  %v372_v18 = vadd.s32 192, %v5258_v3  ;;  %v1673_v32 = vrot.slane %v5760_v15, 3  ;;  %vm739_vm3 = vmand %vm655_vm8, %vm697_vm0  ;;  %2712 = vmatpush.bf16.msrb.mxu0 %v4892_v4  ;;  %2240 = vmatpush.bf16.msrb.mxu2 %v4875_v5 }
  0x5c   : > { %vm780_vm9 = vcmp.ge.f32.partialorder %v612_v22, 1.0  ;;  %vm781_vm13 = vcmp.ge.f32.partialorder %v613_v24, 1.0  ;;  %vm864_vm1 = vcmp.le.f32.partialorder %v612_v22, 16.0  ;;  %vm865_vm14 = vcmp.le.f32.partialorder %v613_v24, 16.0 }
  0x5d   : > { %vm822_vm12 = vmand %vm738_vm11, %vm780_vm9  ;;  %v373_v29 = vadd.s32 200, %v5258_v3  ;;  %v414_v30 = vcvt.s32.f32 %v372_v18  ;;  %v1048_v42 = vmul.f32 %v5293_v14, %v4976_v37  ;;  %v1674_v33 = vsel %vm1671_vm2, %v1672_v25, %v1673_v32 }
  0x5e   : > { %vm823_vm15 = vmand %vm739_vm3, %vm781_vm13  ;;  %v1049_v43 = vmul.f32 %v5293_v14, %v4977_v51  ;;  %v4928_v39 = vunpack.c.l.bf16 %v5771_v20  ;;  %v4929_v53 = vunpack.c.h.bf16 %v5771_v20  ;;  %1813 = vmatmul.bf16.vlgmr.msra.gmra.mxu0 %v1674_v33  ;;  %v5784_v58 = vadd.s32 8, %v5258_v3 }
  0x5f   : > { %vm906_vm4 = vmand %vm822_vm12, %vm864_vm1  ;;  %v415_v54 = vcvt.s32.f32 %v373_v29  ;;  %v456_v46 = vadd.f32 0.5, %v414_v30  ;;  %v1094_v55 = vadd.f32 %v5313_v26, %v1048_v42  ;;  %v390_v60 = vcvt.s32.f32 %v5258_v3 }
  0x60   : > { %vm907_vm6 = vmand %vm823_vm15, %vm865_vm14  ;;  %v5788_v37 = vsel %vm906_vm4, 1.0, %v7497_v35  ;;  %v1095_v59 = vadd.f32 %v5313_v26, %v1049_v43  ;;  %v1024_v62 = vmul.f32 %v5293_v14, %v4928_v39  ;;  %v391_v25 = vcvt.s32.f32 %v5784_v58 }
  0x61   : > { %7678 = vst [vmem:[#allocation16_spill] sm:$0xff] %v5788_v37  ;;  %v5794_v63 = vsel %vm907_vm6, 1.0, %v7497_v35  ;;  %v1254_v0 = vmul.f32 %v5788_v37, %v1212_v50  ;;  %v457_v1 = vadd.f32 0.5, %v415_v54  ;;  %v498_v2 = vmul.f32 0.055555556, %v456_v46  ;;  %v4859_v50 = vld [vmem:[%s7484_s1 + $0x28] sm:$0xff] }
  0x62   : > { %7679 = vst [vmem:[#allocation17_spill] sm:$0xff] %v5794_v63  ;;  %v1255_v48 = vmul.f32 %v5794_v63, %v1213_v27  ;;  %vm1136_vm2 = vcmp.gt.f32.partialorder %v1094_v55, 0.0  ;;  %vm1137_vm7 = vcmp.gt.f32.partialorder %v1095_v59, 0.0  ;;  %v1182_v51 = vmul.f32 %v5350_v57, %v1094_v55  ;;  %1969 = vmatpush.bf16.msrb.mxu1 %v4859_v50 }
  0x63   : > { %v1296_v6 = vpack.c.bf16 %v1254_v0, %v1254_v0  ;;  %v499_v21 = vmul.f32 0.055555556, %v457_v1  ;;  %v540_v11 = vfloor.f32 %v498_v2  ;;  %v1183_v22 = vmul.f32 %v5350_v57, %v1095_v59 }
  0x64   : > { %v1297_v24 = vpack.c.bf16 %v1255_v48, %v1255_v48  ;;  %v1224_v23 = vsel %vm1136_vm2, %v1094_v55, %v1182_v51  ;;  %v432_v27 = vadd.f32 0.5, %v390_v60  ;;  %v433_v43 = vadd.f32 0.5, %v391_v25 }
  0x65   : > { %v1405_v18 = vunpack.c.l.b16 %v1296_v6  ;;  %v541_v20 = vfloor.f32 %v499_v21  ;;  %v582_v29 = vmul.f32 18.0, %v540_v11  ;;  %vm666_vm5 = vcmp.ge.f32.partialorder %v540_v11, 1.0 }
  0x66   : > { %v1406_v42 = vunpack.c.l.b16 %v1297_v24  ;;  %vm708_vm8 = vcmp.le.f32.partialorder %v540_v11, 16.0  ;;  %v1225_v33 = vsel %vm1137_vm7, %v1095_v59, %v1183_v22  ;;  %v474_v58 = vmul.f32 0.055555556, %v432_v27 }
  0x67   : > { %v583_v39 = vmul.f32 18.0, %v541_v20  ;;  %v624_v46 = vsub.f32 %v414_v30, %v582_v29  ;;  %vm667_vm10 = vcmp.ge.f32.partialorder %v541_v20, 1.0  ;;  %vm709_vm11 = vcmp.le.f32.partialorder %v541_v20, 16.0  ;;  %vm750_vm0 = vmand %vm666_vm5, %vm708_vm8  ;;  %v5844_v20 = vld [vmem:[%s5284_s8 + $0x68] sm:$0xff]  }
  0x68   : > { %v5813_v55 = vpack.c.b16 %v1406_v42, %v1405_v18  ;;  %v475_v0 = vmul.f32 0.055555556, %v433_v43  ;;  %v1025_v1 = vmul.f32 %v5293_v14, %v4929_v53  ;;  %vm5816_vm3 = vmand %vm667_vm10, %vm709_vm11  ;;  %v1070_v59 = vadd.f32 %v5313_v26, %v1024_v62  ;;  %v5121_v18 = vld [vmem:[%s5284_s8 + $0x38] sm:$0xff]  }
  0x69   : > { %v625_v2 = vsub.f32 %v415_v54, %v583_v39  ;;  %vm792_vm9 = vcmp.ge.f32.partialorder %v624_v46, 1.0  ;;  %vm876_vm13 = vcmp.le.f32.partialorder %v624_v46, 16.0  ;;  %v516_v5 = vfloor.f32 %v474_v58 }
  0x6a   : > { %7680 = vst [vmem:[#allocation18_spill] sm:$0xff] %v5813_v55  ;;  %v7495_v30 = vrot.slane %v5813_v55, 7  ;;  %vm834_vm1 = vmand %vm750_vm0, %vm792_vm9  ;;  %v517_v48 = vfloor.f32 %v475_v0  ;;  %v1071_v51 = vadd.f32 %v5313_v26, %v1025_v1  ;;  %vm1112_vm4 = vcmp.gt.f32.partialorder %v1070_v59, 0.0 }
  0x6b   : > { %vm793_vm12 = vcmp.ge.f32.partialorder %v625_v2, 1.0  ;;  %vm877_vm14 = vcmp.le.f32.partialorder %v625_v2, 16.0  ;;  %vm918_vm15 = vmand %vm834_vm1, %vm876_vm13  ;;  %v1158_v53 = vmul.f32 %v5350_v57, %v1070_v59  ;;  %vm7683_vm6 = vcmask 1040384  }
  0x6c   : > { %v1689_v54 = vsel %vm7683_vm6, %v1686_v12, %v7495_v30  ;;  %vm835_vm2 = vmand %vm5816_vm3, %vm793_vm12  ;;  %v5832_v62 = vsel %vm918_vm15, 1.0, %v7497_v35  ;;  %v558_v50 = vmul.f32 18.0, %v516_v5  ;;  %v559_v6 = vmul.f32 18.0, %v517_v48 }
  0x6d   : > { %7684 = vst [vmem:[#allocation19_spill] sm:$0xff] %v5832_v62  ;;  %1848 = vmatmul.bf16.gmra.mxu1 %v1689_v54  ;;  %vm919_vm7 = vmand %vm835_vm2, %vm877_vm14  ;;  %v1266_v21 = vmul.f32 %v5832_v62, %v1224_v23  ;;  %vm642_vm5 = vcmp.ge.f32.partialorder %v516_v5, 1.0  ;;  %vm643_vm8 = vcmp.ge.f32.partialorder %v517_v48, 1.0  ;;  %vm684_vm10 = vcmp.le.f32.partialorder %v516_v5, 16.0  ;;  %v5128_v62 = vld [vmem:[%s5284_s8 + $0x70] sm:$0xff]  }
  0x6e   : > { %v5836_v11 = vsel %vm919_vm7, 1.0, %v7497_v35  ;;  %v600_v12 = vsub.f32 %v390_v60, %v558_v50  ;;  %v601_v22 = vsub.f32 %v391_v25, %v559_v6  ;;  %vm685_vm11 = vcmp.le.f32.partialorder %v517_v48, 16.0  ;;  %vm726_vm0 = vmand %vm642_vm5, %vm684_vm10  ;;  %v5868_v50 = vld [vmem:[%s7485_s2] ss:$0 sm:$0xff] }
  0x6f   : > { %7685 = vst [vmem:[#allocation20_spill] sm:$0xff] %v5836_v11  ;;  %v1267_v24 = vmul.f32 %v5836_v11, %v1225_v33  ;;  %v1308_v27 = vpack.c.bf16 %v1266_v21, %v1266_v21  ;;  %vm727_vm3 = vmand %vm643_vm8, %vm685_vm11  ;;  %vm1113_vm9 = vcmp.gt.f32.partialorder %v1071_v51, 0.0  ;;  %v1159_v23 = vmul.f32 %v5350_v57, %v1071_v51 }
  0x70   : > { %vm768_vm13 = vcmp.ge.f32.partialorder %v600_v12, 1.0  ;;  %vm769_vm1 = vcmp.ge.f32.partialorder %v601_v22, 1.0  ;;  %vm852_vm12 = vcmp.le.f32.partialorder %v600_v12, 16.0  ;;  %vm853_vm14 = vcmp.le.f32.partialorder %v601_v22, 16.0 }
  0x71   : > { %v1309_v29 = vpack.c.bf16 %v1267_v24, %v1267_v24  ;;  %v1417_v42 = vunpack.c.l.b16 %v1308_v27  ;;  %vm810_vm15 = vmand %vm726_vm0, %vm768_vm13  ;;  %v1200_v60 = vsel %vm1112_vm4, %v1070_v59, %v1158_v53  ;;  %v1201_v25 = vsel %vm1113_vm9, %v1071_v51, %v1159_v23 }
  0x72   : > { %vm811_vm6 = vmand %vm727_vm3, %vm769_vm1  ;;  %v4956_v33 = vunpack.c.l.bf16 %v5121_v18  ;;  %v4957_v43 = vunpack.c.h.bf16 %v5121_v18  ;;  %v362_v39 = vadd.s32 112, %v5258_v3  ;;  %v363_v46 = vadd.s32 120, %v5258_v3 }
  0x73   : > { %v1418_v58 = vunpack.c.l.b16 %v1309_v29  ;;  %vm894_vm2 = vmand %vm810_vm15, %vm852_vm12  ;;  %v4980_v0 = vunpack.c.l.bf16 %v5844_v20  ;;  %v4981_v1 = vunpack.c.h.bf16 %v5844_v20  ;;  %v5852_v2 = vadd.s32 208, %v5258_v3 }
  0x74   : > { %vm895_vm7 = vmand %vm811_vm6, %vm853_vm14  ;;  %v5856_v4 = vsel %vm894_vm2, 1.0, %v7497_v35  ;;  %v404_v59 = vcvt.s32.f32 %v362_v39  ;;  %v405_v5 = vcvt.s32.f32 %v363_v46  ;;  %v1038_v48 = vmul.f32 %v5293_v14, %v4956_v33 }
  0x75   : > { %7686 = vst [vmem:[#allocation21_spill] sm:$0xff] %v5856_v4  ;;  %v5859_v51 = vpack.c.b16 %v1418_v58, %v1417_v42  ;;  %v5862_v53 = vsel %vm895_vm7, 1.0, %v7497_v35  ;;  %v1242_v54 = vmul.f32 %v5856_v4, %v1200_v60  ;;  %v1039_v6 = vmul.f32 %v5868_v50, %v4957_v43 }
  0x76   : > { %7687 = vst [vmem:[#allocation22_spill] sm:$0xff] %v5862_v53  ;;  %v1243_v21 = vmul.f32 %v5862_v53, %v1201_v25  ;;  %v446_v12 = vadd.f32 0.5, %v404_v59  ;;  %v447_v22 = vadd.f32 0.5, %v405_v5  ;;  %v1084_v14 = vadd.f32 %v5313_v26, %v1038_v48 }
  0x77   : > { %v7494_v24 = vrot.slane %v5859_v51, 7  ;;  %v1284_v27 = vpack.c.bf16 %v1242_v54, %v1242_v54  ;;  %v1085_v23 = vadd.f32 %v5313_v26, %v1039_v6  ;;  %v5876_v18 = vadd.s32 216, %v5258_v3 }
  0x78   : > { %v1285_v20 = vpack.c.bf16 %v1243_v21, %v1243_v21  ;;  %v488_v29 = vmul.f32 0.055555556, %v446_v12  ;;  %v489_v42 = vmul.f32 0.055555556, %v447_v22  ;;  %vm1126_vm4 = vcmp.gt.f32.partialorder %v1084_v14, 0.0  ;;  %v5894_v22 = vld [vmem:[%s5284_s8 + $0x8] sm:$0xff]  }
  0x79   : > { %vm7688_vm5 = vcmask 1040384   ;;  %v5883_v25 = vunpack.c.l.b16 %v1284_v27  ;;  %vm1127_vm8 = vcmp.gt.f32.partialorder %v1085_v23, 0.0  ;;  %v1172_v33 = vmul.f32 %v5350_v57, %v1084_v14 }
  0x7a   : > { %v1701_v60 = vsel %vm7688_vm5, %v1698_v38, %v7494_v24  ;;  %v1394_v26 = vunpack.c.l.b16 %v1285_v20  ;;  %v530_v43 = vfloor.f32 %v488_v29  ;;  %v531_v39 = vfloor.f32 %v489_v42  ;;  %vm7693_vm1 = vmmov %vm7688_vm5 }
  0x7b   : > { %7689 = vst [vmem:[#allocation23_spill] sm:$0xff] %v5883_v25  ;;  %1878 = vmatmul.bf16.gmra.mxu2 %v1701_v60  ;;  %v1173_v46 = vmul.f32 %v5350_v57, %v1085_v23  ;;  %v1214_v58 = vsel %vm1126_vm4, %v1084_v14, %v1172_v33  ;;  %v416_v48 = vcvt.s32.f32 %v5852_v2  ;;  %v417_v54 = vcvt.s32.f32 %v5876_v18  ;;  %v5971_v18 = vld [vmem:[%s5284_s8 + $0x88] sm:$0xff]  }
  0x7c   : > { %v1050_v6 = vmul.f32 %v5868_v50, %v4980_v0  ;;  %v5891_v38 = vpack.c.b16 %v1394_v26, %v5883_v25  ;;  %v572_v21 = vmul.f32 18.0, %v530_v43  ;;  %v573_v12 = vmul.f32 18.0, %v531_v39 }
  0x7d   : > { %vm656_vm10 = vcmp.ge.f32.partialorder %v530_v43, 1.0  ;;  %vm657_vm11 = vcmp.ge.f32.partialorder %v531_v39, 1.0  ;;  %vm698_vm0 = vcmp.le.f32.partialorder %v530_v43, 16.0  ;;  %vm699_vm3 = vcmp.le.f32.partialorder %v531_v39, 16.0 }
  0x7e   : > { %7690 = vst [vmem:[#allocation24_spill] sm:$0xff] %v5891_v38  ;;  %v1215_v27 = vsel %vm1127_vm8, %v1085_v23, %v1173_v46  ;;  %v7493_v14 = vrot.slane %v5891_v38, 7  ;;  %v614_v20 = vsub.f32 %v404_v59, %v572_v21  ;;  %v615_v29 = vsub.f32 %v405_v5, %v573_v12  ;;  %vm740_vm9 = vmand %vm656_vm10, %vm698_vm0  ;;  %v5910_v23 = vld [vmem:[%s7486_s3] ss:$0 sm:$0xff] }
  0x7f   : > { %v458_v0 = vadd.f32 0.5, %v416_v48  ;;  %vm5900_vm13 = vmand %vm657_vm11, %vm699_vm3  ;;  %v459_v60 = vadd.f32 0.5, %v417_v54  ;;  %v1051_v33 = vmul.f32 %v5868_v50, %v4981_v1  ;;  %v1096_v59 = vadd.f32 %v5910_v23, %v1050_v6 }
  0x80   : > { %v4932_v5 = vunpack.c.l.bf16 %v5894_v22  ;;  %v1738_v26 = vsel %vm7693_vm1, %v1673_v32, %v7493_v14  ;;  %vm782_vm12 = vcmp.ge.f32.partialorder %v614_v20, 1.0  ;;  %vm783_vm14 = vcmp.ge.f32.partialorder %v615_v29, 1.0 }
  0x81   : > { %vm866_vm15 = vcmp.le.f32.partialorder %v614_v20, 16.0  ;;  %1818 = vmatmul.bf16.gmra.mxu0 %v1738_v26  ;;  %vm824_vm6 = vmand %vm740_vm9, %vm782_vm12  ;;  %vm867_vm2 = vcmp.le.f32.partialorder %v615_v29, 16.0  ;;  %v500_v1 = vmul.f32 0.055555556, %v458_v0  ;;  %v501_v43 = vmul.f32 0.055555556, %v459_v60 }
  0x82   : > { %v1097_v39 = vadd.f32 %v5910_v23, %v1051_v33  ;;  %vm825_vm7 = vmand %vm5900_vm13, %vm783_vm14  ;;  %vm1138_vm4 = vcmp.gt.f32.partialorder %v1096_v59, 0.0  ;;  %v1184_v46 = vmul.f32 %v5350_v57, %v1096_v59  ;;  %v4933_v6 = vunpack.c.h.bf16 %v5894_v22  ;;  %v5930_v20 = vld [vmem:[%s7487_s4] ss:$0 sm:$0xff]  ;;  %v4891_v26 = vld [vmem:[%s7484_s1 + $0x128] sm:$0xff] }
  0x83   : > { %v5925_v32 = vadd.s32 16, %v5258_v3  ;;  %vm908_vm5 = vmand %vm824_vm6, %vm866_vm15  ;;  %v542_v21 = vfloor.f32 %v500_v1  ;;  %v543_v12 = vfloor.f32 %v501_v43  ;;  %v5938_v60 = vadd.s32 24, %v5258_v3  ;;  %v4874_v1 = vld [vmem:[%s7484_s1 + $0xa0] sm:$0xff]  ;;  %2713 = vmatpush.bf16.msrb.mxu0 %v4891_v26 }
  0x84   : > { %vm1139_vm8 = vcmp.gt.f32.partialorder %v1097_v39, 0.0  ;;  %v1185_v0 = vmul.f32 %v5930_v20, %v1097_v39  ;;  %vm909_vm10 = vmand %vm825_vm7, %vm867_vm2  ;;  %v5935_v57 = vsel %vm908_vm5, 1.0, %v7497_v35  ;;  %v1226_v42 = vsel %vm1138_vm4, %v1096_v59, %v1184_v46  ;;  %v4858_v46 = vld [vmem:[%s7484_s1 + $0x20] sm:$0xff]  ;;  %2241 = vmatpush.bf16.msrb.mxu2 %v4874_v1 }
  0x85   : > { %7694 = vst [vmem:[#allocation25_spill] sm:$0xff] %v5935_v57  ;;  %v392_v33 = vcvt.s32.f32 %v5925_v32  ;;  %v5948_v29 = vsel %vm909_vm10, 1.0, %v7497_v35  ;;  %v1256_v43 = vmul.f32 %v5935_v57, %v1214_v58  ;;  %v584_v8 = vmul.f32 18.0, %v542_v21  ;;  %1970 = vmatpush.bf16.msrb.mxu1 %v4858_v46  ;;  %v5968_v1 = vld [vmem:[%s5284_s8 + $0x80] sm:$0xff]  }
  0x86   : > { %7695 = vst [vmem:[#allocation26_spill] sm:$0xff] %v5948_v29  ;;  %v585_v59 = vmul.f32 18.0, %v543_v12  ;;  %v1257_v34 = vmul.f32 %v5948_v29, %v1215_v27  ;;  %vm668_vm11 = vcmp.ge.f32.partialorder %v542_v21, 1.0  ;;  %vm669_vm0 = vcmp.ge.f32.partialorder %v543_v12, 1.0 }
  0x87   : > { %vm710_vm3 = vcmp.le.f32.partialorder %v542_v21, 16.0  ;;  %v1298_v14 = vpack.c.bf16 %v1256_v43, %v1256_v43  ;;  %v626_v24 = vsub.f32 %v416_v48, %v584_v8  ;;  %vm711_vm9 = vcmp.le.f32.partialorder %v543_v12, 16.0 }
  0x88   : > { %v627_v58 = vsub.f32 %v417_v54, %v585_v59  ;;  %vm752_vm13 = vmand %vm668_vm11, %vm710_vm3  ;;  %v1299_v30 = vpack.c.bf16 %v1257_v34, %v1257_v34  ;;  %v1227_v21 = vsel %vm1139_vm8, %v1097_v39, %v1185_v0  ;;  %v393_v26 = vcvt.s32.f32 %v5938_v60 }
  0x89   : > { %vm5959_vm1 = vmand %vm669_vm0, %vm711_vm9  ;;  %v434_v2 = vadd.f32 0.5, %v392_v33  ;;  %v1407_v8 = vunpack.c.l.b16 %v1298_v14  ;;  %vm794_vm12 = vcmp.ge.f32.partialorder %v626_v24, 1.0  ;;  %vm878_vm15 = vcmp.le.f32.partialorder %v626_v24, 16.0 }
  0x8a   : > { %vm795_vm14 = vcmp.ge.f32.partialorder %v627_v58, 1.0  ;;  %v1408_v34 = vunpack.c.l.b16 %v1299_v30  ;;  %vm836_vm6 = vmand %vm752_vm13, %vm794_vm12  ;;  %vm879_vm2 = vcmp.le.f32.partialorder %v627_v58, 16.0  ;;  %v435_v48 = vadd.f32 0.5, %v393_v26 }
  0x8b   : > { %v476_v54 = vmul.f32 0.055555556, %v434_v2  ;;  %vm837_vm7 = vmand %vm5959_vm1, %vm795_vm14  ;;  %v1026_v39 = vmul.f32 %v5868_v50, %v4932_v5  ;;  %v1027_v12 = vmul.f32 %v5868_v50, %v4933_v6  ;;  %v4992_v14 = vunpack.c.l.bf16 %v5968_v1 }
  0x8c   : > { %v4993_v24 = vunpack.c.h.bf16 %v5968_v1  ;;  %v5981_v0 = vpack.c.b16 %v1408_v34, %v1407_v8  ;;  %vm920_vm4 = vmand %vm836_vm6, %vm878_vm15  ;;  %v477_v30 = vmul.f32 0.055555556, %v435_v48  ;;  %v4996_v43 = vunpack.c.l.bf16 %v5971_v18 }
  0x8d   : > { %v518_v60 = vfloor.f32 %v476_v54  ;;  %vm921_vm5 = vmand %vm837_vm7, %vm879_vm2  ;;  %v5985_v59 = vsel %vm920_vm4, 1.0, %v7497_v35  ;;  %v1072_v22 = vadd.f32 %v5910_v23, %v1026_v39  ;;  %v1073_v5 = vadd.f32 %v5910_v23, %v1027_v12 }
  0x8e   : > { %7698 = vst [vmem:[#allocation27_spill] sm:$0xff] %v5981_v0  ;;  %v7496_v46 = vrot.slane %v5981_v0, 7  ;;  %v5992_v58 = vsel %vm921_vm5, 1.0, %v7497_v35  ;;  %v1268_v27 = vmul.f32 %v5985_v59, %v1226_v42  ;;  %v519_v2 = vfloor.f32 %v477_v30 }
  0x8f   : > { %7699 = vst [vmem:[#allocation28_spill] sm:$0xff] %v5985_v59  ;;  %v1269_v1 = vmul.f32 %v5992_v58, %v1227_v21  ;;  %v560_v8 = vmul.f32 18.0, %v518_v60  ;;  %vm644_vm8 = vcmp.ge.f32.partialorder %v518_v60, 1.0  ;;  %vm686_vm10 = vcmp.le.f32.partialorder %v518_v60, 16.0 }
  0x90   : > { %7700 = vst [vmem:[#allocation29_spill] sm:$0xff] %v5992_v58  ;;  %v7701_v34 = vrot.slane %v5813_v55, 7  ;;  %vm7702_vm11 = vcmask 1040384   ;;  %v1310_v54 = vpack.c.bf16 %v1268_v27, %v1268_v27  ;;  %v561_v39 = vmul.f32 18.0, %v519_v2  ;;  %vm728_vm9 = vmand %vm644_vm8, %vm686_vm10 }
  0x91   : > { %vm645_vm0 = vcmp.ge.f32.partialorder %v519_v2, 1.0  ;;  %v1311_v12 = vpack.c.bf16 %v1269_v1, %v1269_v1  ;;  %v602_v42 = vsub.f32 %v392_v33, %v560_v8  ;;  %vm687_vm3 = vcmp.le.f32.partialorder %v519_v2, 16.0  ;;  %vm7706_vm10 = vmmov %vm7702_vm11 }
  0x92   : > { %v1691_v48 = vsel %vm7702_vm11, %v7701_v34, %v7496_v46  ;;  %vm1114_vm13 = vcmp.gt.f32.partialorder %v1072_v22, 0.0  ;;  %v1419_v21 = vunpack.c.l.b16 %v1310_v54  ;;  %v603_v30 = vsub.f32 %v393_v26, %v561_v39  ;;  %vm729_vm1 = vmand %vm645_vm0, %vm687_vm3 }
  0x93   : > { %1853 = vmatmul.bf16.gmra.mxu1 %v1691_v48  ;;  %vm1115_vm12 = vcmp.gt.f32.partialorder %v1073_v5, 0.0  ;;  %v1160_v60 = vmul.f32 %v5930_v20, %v1072_v22  ;;  %v1420_v6 = vunpack.c.l.b16 %v1311_v12  ;;  %vm770_vm14 = vcmp.ge.f32.partialorder %v602_v42, 1.0 }
  0x94   : > { %vm854_vm15 = vcmp.le.f32.partialorder %v602_v42, 16.0  ;;  %v1161_v27 = vmul.f32 %v5930_v20, %v1073_v5  ;;  %vm771_vm6 = vcmp.ge.f32.partialorder %v603_v30, 1.0  ;;  %vm812_vm2 = vmand %vm728_vm9, %vm770_vm14  ;;  %vm855_vm7 = vcmp.le.f32.partialorder %v603_v30, 16.0 }
  0x95   : > { %v1202_v1 = vsel %vm1114_vm13, %v1072_v22, %v1160_v60  ;;  %v380_v32 = vadd.s32 256, %v5258_v3  ;;  %v6006_v33 = vpack.c.b16 %v1420_v6, %v1419_v21  ;;  %vm813_vm4 = vmand %vm729_vm1, %vm771_vm6  ;;  %v381_v26 = vadd.s32 264, %v5258_v3 }
  0x96   : > { %v1203_v2 = vsel %vm1115_vm12, %v1073_v5, %v1161_v27  ;;  %v382_v8 = vadd.s32 272, %v5258_v3  ;;  %vm896_vm5 = vmand %vm812_vm2, %vm854_vm15  ;;  %v383_v34 = vadd.s32 280, %v5258_v3  ;;  %v1056_v54 = vmul.f32 %v5868_v50, %v4992_v14 }
  0x97   : > { %v422_v48 = vcvt.s32.f32 %v380_v32  ;;  %v1057_v39 = vmul.f32 %v5868_v50, %v4993_v24  ;;  %v7502_v22 = vrot.slane %v6006_v33, 7  ;;  %vm897_vm8 = vmand %vm813_vm4, %vm855_vm7  ;;  %v6015_v6 = vsel %vm896_vm5, 1.0, %v7497_v35 }
  0x98   : > { %7703 = vst [vmem:[#allocation30_spill] sm:$0xff] %v6015_v6  ;;  %v423_v12 = vcvt.s32.f32 %v381_v26  ;;  %v424_v5 = vcvt.s32.f32 %v382_v8  ;;  %v6018_v42 = vsel %vm897_vm8, 1.0, %v7497_v35  ;;  %v1244_v21 = vmul.f32 %v6015_v6, %v1202_v1  ;;  %v4890_v26 = vld [vmem:[%s7484_s1 + $0x120] sm:$0xff]  ;;  %vm7715_vm7 = vmmov %vm7706_vm10 }
  0x99   : > { %7704 = vst [vmem:[#allocation31_spill] sm:$0xff] %v6018_v42  ;;  %v425_v30 = vcvt.s32.f32 %v383_v34  ;;  %v464_v60 = vadd.f32 0.5, %v422_v48  ;;  %v7705_v14 = vrot.slane %v5859_v51, 7  ;;  %v1245_v27 = vmul.f32 %v6018_v42, %v1203_v2  ;;  %2714 = vmatpush.bf16.msrb.mxu0 %v4890_v26 }
  0x9a   : > { %v465_v32 = vadd.f32 0.5, %v423_v12  ;;  %v466_v46 = vadd.f32 0.5, %v424_v5  ;;  %v1286_v8 = vpack.c.bf16 %v1244_v21, %v1244_v21  ;;  %v1058_v34 = vmul.f32 %v5868_v50, %v4996_v43 }
  0x9b   : > { %v1703_v24 = vsel %vm7706_vm10, %v7705_v14, %v7502_v22  ;;  %v467_v35 = vadd.f32 0.5, %v425_v30  ;;  %v506_v1 = vmul.f32 0.055555556, %v464_v60  ;;  %v1287_v45 = vpack.c.bf16 %v1245_v27, %v1245_v27 }
  0x9c   : > { %1883 = vmatmul.bf16.gmra.mxu2 %v1703_v24  ;;  %v507_v41 = vmul.f32 0.055555556, %v465_v32  ;;  %v508_v31 = vmul.f32 0.055555556, %v466_v46  ;;  %v7707_v14 = vunpack.c.h.bf16 %v5971_v18  ;;  %v6036_v22 = vunpack.c.l.b16 %v1286_v8 }
  0x9d   : > { %v509_v28 = vmul.f32 0.055555556, %v467_v35  ;;  %v548_v58 = vfloor.f32 %v506_v1  ;;  %v1102_v21 = vadd.f32 %v5910_v23, %v1056_v54  ;;  %v1396_v24 = vunpack.c.l.b16 %v1287_v45 }
  0x9e   : > { %v1059_v2 = vmul.f32 %v5868_v50, %v7707_v14  ;;  %7708 = vst [vmem:[#allocation32_spill] sm:$0xff] %v6036_v22  ;;  %v549_v60 = vfloor.f32 %v507_v41  ;;  %v550_v59 = vfloor.f32 %v508_v31  ;;  %v1103_v11 = vadd.f32 %v5910_v23, %v1057_v39 }
  0x9f   : > { %v551_v43 = vfloor.f32 %v509_v28  ;;  %v590_v27 = vmul.f32 18.0, %v548_v58  ;;  %vm674_vm11 = vcmp.ge.f32.partialorder %v548_v58, 1.0  ;;  %vm716_vm0 = vcmp.le.f32.partialorder %v548_v58, 16.0 }
  0xa0   : > { %v6041_v18 = vpack.c.b16 %v1396_v24, %v6036_v22  ;;  %v591_v46 = vmul.f32 18.0, %v549_v60  ;;  %v592_v32 = vmul.f32 18.0, %v550_v59  ;;  %vm675_vm3 = vcmp.ge.f32.partialorder %v549_v60, 1.0  ;;  %vm6044_vm12 = vmand %vm674_vm11, %vm716_vm0 }
  0xa1   : > { %v593_v26 = vmul.f32 18.0, %v551_v43  ;;  %v632_v35 = vsub.f32 %v422_v48, %v590_v27  ;;  %vm676_vm9 = vcmp.ge.f32.partialorder %v550_v59, 1.0  ;;  %vm677_vm13 = vcmp.ge.f32.partialorder %v551_v43, 1.0 }
  0xa2   : > { %7709 = vst [vmem:[#allocation33_spill] sm:$0xff] %v6041_v18  ;;  %v7507_v41 = vrot.slane %v6041_v18, 7  ;;  %v633_v31 = vsub.f32 %v423_v12, %v591_v46  ;;  %v634_v45 = vsub.f32 %v424_v5, %v592_v32  ;;  %vm717_vm1 = vcmp.le.f32.partialorder %v549_v60, 16.0  ;;  %v5122_v5 = vld [vmem:[%s5284_s8 + $0x40] sm:$0xff]  }
  0xa3   : > { %v635_v58 = vsub.f32 %v425_v30, %v593_v26  ;;  %vm718_vm14 = vcmp.le.f32.partialorder %v550_v59, 16.0  ;;  %vm719_vm15 = vcmp.le.f32.partialorder %v551_v43, 16.0  ;;  %vm6048_vm6 = vmand %vm675_vm3, %vm717_vm1  ;;  %vm800_vm2 = vcmp.ge.f32.partialorder %v632_v35, 1.0 }
  0xa4   : > { %v7714_v48 = vrot.slane %v5891_v38, 7  ;;  %vm6057_vm4 = vmand %vm676_vm9, %vm718_vm14  ;;  %vm801_vm5 = vcmp.ge.f32.partialorder %v633_v31, 1.0  ;;  %vm802_vm8 = vcmp.ge.f32.partialorder %v634_v45, 1.0  ;;  %vm884_vm0 = vcmp.le.f32.partialorder %v632_v35, 16.0 }
  0xa5   : > { %vm6063_vm10 = vmand %vm677_vm13, %vm719_vm15  ;;  %vm803_vm11 = vcmp.ge.f32.partialorder %v635_v58, 1.0  ;;  %vm885_vm3 = vcmp.le.f32.partialorder %v633_v31, 16.0  ;;  %vm886_vm1 = vcmp.le.f32.partialorder %v634_v45, 16.0  ;;  %v1104_v8 = vadd.f32 %v5910_v23, %v1058_v34 }
  0xa6   : > { %v1679_v39 = vsel %vm7715_vm7, %v7714_v48, %v7507_v41  ;;  %vm6069_vm7 = vmand %vm6044_vm12, %vm800_vm2  ;;  %v1105_v1 = vadd.f32 %v5910_v23, %v1059_v2  ;;  %vm1144_vm9 = vcmp.gt.f32.partialorder %v1102_v21, 0.0  ;;  %vm1145_vm14 = vcmp.gt.f32.partialorder %v1103_v11, 0.0 }
  0xa7   : > { %1823 = vmatmul.bf16.gmra.mxu0 %v1679_v39  ;;  %vm6077_vm13 = vmand %vm6048_vm6, %vm801_vm5  ;;  %v1190_v24 = vmul.f32 %v5930_v20, %v1102_v21  ;;  %v1191_v60 = vmul.f32 %v5930_v20, %v1103_v11  ;;  %v4960_v43 = vunpack.c.l.bf16 %v5122_v5  ;;  %v4961_v27 = vunpack.c.h.bf16 %v5122_v5 }
  0xa8   : > { %vm6086_vm12 = vmand %vm6057_vm4, %vm802_vm8  ;;  %vm1146_vm15 = vcmp.gt.f32.partialorder %v1104_v8, 0.0  ;;  %vm1147_vm2 = vcmp.gt.f32.partialorder %v1105_v1, 0.0  ;;  %v1192_v2 = vmul.f32 %v5930_v20, %v1104_v8  ;;  %v1193_v46 = vmul.f32 %v5930_v20, %v1105_v1 }
  0xa9   : > { %vm6095_vm6 = vmand %vm6063_vm10, %vm803_vm11  ;;  %vm887_vm5 = vcmp.le.f32.partialorder %v635_v58, 16.0  ;;  %v1232_v26 = vsel %vm1144_vm9, %v1102_v21, %v1190_v24  ;;  %v364_v28 = vadd.s32 128, %v5258_v3  ;;  %v365_v54 = vadd.s32 136, %v5258_v3 }
  0xaa   : > { %vm926_vm4 = vmand %vm6069_vm7, %vm884_vm0  ;;  %v1233_v48 = vsel %vm1145_vm14, %v1103_v11, %v1191_v60  ;;  %v1234_v39 = vsel %vm1146_vm15, %v1104_v8, %v1192_v2  ;;  %v1040_v12 = vmul.f32 %v5868_v50, %v4960_v43  ;;  %v1041_v5 = vmul.f32 %v5868_v50, %v4961_v27 }
  0xab   : > { %vm927_vm8 = vmand %vm6077_vm13, %vm885_vm3  ;;  %v7728_v21 = vmov 0.0   ;;  %v1235_v24 = vsel %vm1147_vm2, %v1105_v1, %v1193_v46  ;;  %v406_v41 = vcvt.s32.f32 %v364_v28  ;;  %v407_v35 = vcvt.s32.f32 %v365_v54 }
  0xac   : > { %v6111_v59 = vsel %vm926_vm4, 1.0, %v7728_v21  ;;  %vm928_vm10 = vmand %vm6086_vm12, %vm886_vm1  ;;  %v6118_v11 = vsel %vm927_vm8, 1.0, %v7728_v21  ;;  %v1086_v31 = vadd.f32 %v5910_v23, %v1040_v12  ;;  %v1087_v8 = vadd.f32 %v5910_v23, %v1041_v5 }
  0xad   : > { %7729 = vst [vmem:[#allocation34_spill] sm:$0xff] %v6111_v59  ;;  %v1274_v30 = vmul.f32 %v6111_v59, %v1232_v26  ;;  %vm929_vm11 = vmand %vm6095_vm6, %vm887_vm5  ;;  %v6127_v1 = vsel %vm928_vm10, 1.0, %v7728_v21  ;;  %v1275_v45 = vmul.f32 %v6118_v11, %v1233_v48  ;;  %v448_v14 = vadd.f32 0.5, %v406_v41 }
  0xae   : > { %7730 = vst [vmem:[#allocation35_spill] sm:$0xff] %v6118_v11  ;;  %v449_v60 = vadd.f32 0.5, %v407_v35  ;;  %v6131_v43 = vsel %vm929_vm11, 1.0, %v7728_v21  ;;  %v1276_v27 = vmul.f32 %v6127_v1, %v1234_v39  ;;  %v4984_v2 = vunpack.c.l.bf16 %v5128_v62 }
  0xaf   : > { %7731 = vst [vmem:[#allocation36_spill] sm:$0xff] %v6127_v1  ;;  %v1316_v34 = vpack.c.bf16 %v1274_v30, %v1274_v30  ;;  %v1277_v46 = vmul.f32 %v6131_v43, %v1235_v24  ;;  %v1317_v58 = vpack.c.bf16 %v1275_v45, %v1275_v45  ;;  %v490_v26 = vmul.f32 0.055555556, %v448_v14 }
  0xb0   : > { %7732 = vst [vmem:[#allocation37_spill] sm:$0xff] %v6131_v43  ;;  %v491_v32 = vmul.f32 0.055555556, %v449_v60  ;;  %v1318_v28 = vpack.c.bf16 %v1276_v27, %v1276_v27  ;;  %vm1128_vm0 = vcmp.gt.f32.partialorder %v1086_v31, 0.0  ;;  %vm1129_vm3 = vcmp.gt.f32.partialorder %v1087_v8, 0.0 }
  0xb1   : > { %v1425_v54 = vunpack.c.l.b16 %v1316_v34  ;;  %v1319_v12 = vpack.c.bf16 %v1277_v46, %v1277_v46  ;;  %v1426_v48 = vunpack.c.l.b16 %v1317_v58  ;;  %v532_v5 = vfloor.f32 %v490_v26 }
  0xb2   : > { %v533_v11 = vfloor.f32 %v491_v32  ;;  %v1427_v59 = vunpack.c.l.b16 %v1318_v28  ;;  %v1174_v61 = vmul.f32 %v5930_v20, %v1086_v31  ;;  %v1175_v39 = vmul.f32 %v5930_v20, %v1087_v8 }
  0xb3   : > { %v4985_v30 = vunpack.c.h.bf16 %v5128_v62  ;;  %v1428_v1 = vunpack.c.l.b16 %v1319_v12  ;;  %v6137_v56 = vpack.c.b16 %v1426_v48, %v1425_v54  ;;  %v574_v24 = vmul.f32 18.0, %v532_v5  ;;  %v4873_v62 = vld [vmem:[%s7484_s1 + $0x98] sm:$0xff] }
  0xb4   : > { %v575_v45 = vmul.f32 18.0, %v533_v11  ;;  %vm658_vm1 = vcmp.ge.f32.partialorder %v532_v5, 1.0  ;;  %vm659_vm7 = vcmp.ge.f32.partialorder %v533_v11, 1.0  ;;  %vm700_vm9 = vcmp.le.f32.partialorder %v532_v5, 16.0  ;;  %2242 = vmatpush.bf16.msrb.mxu2 %v4873_v62 }
  0xb5   : > { %vm701_vm14 = vcmp.le.f32.partialorder %v533_v11, 16.0  ;;  %v6139_v14 = vpack.c.b16 %v1428_v1, %v1427_v59  ;;  %v7514_v60 = vrot.slane %v6137_v56, 7  ;;  %v616_v27 = vsub.f32 %v406_v41, %v574_v24  ;;  %vm742_vm13 = vmand %vm658_vm1, %vm700_vm9  ;;  %v6154_v1 = vld [vmem:[%s5284_s8 + $0x10] sm:$0xff]  }
  0xb6   : > { %v617_v34 = vsub.f32 %v407_v35, %v575_v45  ;;  %vm6145_vm12 = vmand %vm659_vm7, %vm701_vm14  ;;  %v1216_v58 = vsel %vm1128_vm0, %v1086_v31, %v1174_v61  ;;  %v376_v26 = vadd.s32 224, %v5258_v3  ;;  %v377_v59 = vadd.s32 232, %v5258_v3 }
  0xb7   : > { %v1052_v11 = vmul.f32 %v5868_v50, %v4984_v2  ;;  %v7515_v41 = vrot.slane %v6139_v14, 7  ;;  %vm784_vm15 = vcmp.ge.f32.partialorder %v616_v27, 1.0  ;;  %vm868_vm6 = vcmp.le.f32.partialorder %v616_v27, 16.0 }
  0xb8   : > { %vm785_vm2 = vcmp.ge.f32.partialorder %v617_v34, 1.0  ;;  %vm826_vm5 = vmand %vm742_vm13, %vm784_vm15  ;;  %vm869_vm4 = vcmp.le.f32.partialorder %v617_v34, 16.0  ;;  %v418_v35 = vcvt.s32.f32 %v376_v26  ;;  %v419_v32 = vcvt.s32.f32 %v377_v59 }
  0xb9   : > { %v1053_v61 = vmul.f32 %v5868_v50, %v4985_v30  ;;  %vm7735_vm8 = vcmask 1040384   ;;  %vm827_vm10 = vmand %vm6145_vm12, %vm785_vm2  ;;  %v1217_v2 = vsel %vm1129_vm3, %v1087_v8, %v1175_v39  ;;  %v1098_v28 = vadd.f32 %v5910_v23, %v1052_v11 }
  0xba   : > { %v1711_v31 = vsel %vm7735_vm8, %v7514_v60, %v7515_v41  ;;  %v4936_v54 = vunpack.c.l.bf16 %v6154_v1  ;;  %vm910_vm11 = vmand %vm826_vm5, %vm868_vm6  ;;  %v460_v12 = vadd.f32 0.5, %v418_v35  ;;  %v461_v48 = vadd.f32 0.5, %v419_v32  ;;  %v4885_v41 = vld [vmem:[%s7484_s1 + $0xf8] sm:$0xff]  ;;  %v4884_v60 = vld [vmem:[%s7484_s1 + $0xf0] sm:$0xff] }
  0xbb   : > { %1903 = vmatmul.bf16.vlgmr.msra.gmra.mxu3 %v1711_v31  ;;  %v1099_v5 = vadd.f32 %v5910_v23, %v1053_v61  ;;  %v6170_v30 = vadd.s32 32, %v5258_v3  ;;  %vm911_vm0 = vmand %vm827_vm10, %vm869_vm4  ;;  %v6174_v24 = vsel %vm910_vm11, 1.0, %v7728_v21  ;;  %vm1140_vm1 = vcmp.gt.f32.partialorder %v1098_v28, 0.0 }
  0xbc   : > { %7736 = vst [vmem:[#allocation38_spill] sm:$0xff] %v6174_v24  ;;  %v1186_v8 = vmul.f32 %v5930_v20, %v1098_v28  ;;  %v6178_v39 = vadd.s32 40, %v5258_v3  ;;  %v6181_v45 = vsel %vm911_vm0, 1.0, %v7728_v21  ;;  %v1258_v27 = vmul.f32 %v6174_v24, %v1216_v58  ;;  %v4857_v58 = vld [vmem:[%s7484_s1 + $0x18] sm:$0xff]  ;;  %2469 = vmatpush.bf16.msrb.mxu3 %v4885_v41 }
  0xbd   : > { %7737 = vst [vmem:[#allocation39_spill] sm:$0xff] %v6181_v45  ;;  %v502_v62 = vmul.f32 0.055555556, %v460_v12  ;;  %v503_v46 = vmul.f32 0.055555556, %v461_v48  ;;  %v1259_v26 = vmul.f32 %v6181_v45, %v1217_v2  ;;  %vm1141_vm3 = vcmp.gt.f32.partialorder %v1099_v5, 0.0  ;;  %1971 = vmatpush.bf16.msrb.mxu1 %v4857_v58 }
  0xbe   : > { %v1187_v34 = vmul.f32 %v5930_v20, %v1099_v5  ;;  %v4937_v59 = vunpack.c.h.bf16 %v6154_v1  ;;  %v1300_v11 = vpack.c.bf16 %v1258_v27, %v1258_v27  ;;  %v1228_v2 = vsel %vm1140_vm1, %v1098_v28, %v1186_v8 }
  0xbf   : > { %v544_v61 = vfloor.f32 %v502_v62  ;;  %v545_v31 = vfloor.f32 %v503_v46  ;;  %v1301_v12 = vpack.c.bf16 %v1259_v26, %v1259_v26  ;;  %v7519_v48 = vcvt.s32.f32 %v6178_v39 }
  0xc0   : > { %v1028_v1 = vmul.f32 %v5868_v50, %v4936_v54  ;;  %v1409_v27 = vunpack.c.l.b16 %v1300_v11  ;;  %v7740_v54 = vcvt.s32.f32 %v6170_v30  ;;  %2470 = vmatpush.bf16.msrb.mxu3 %v4884_v60  ;;  %v7743_v60 = vrot.slane %v5981_v0, 7 }
  0xc1   : > { %v586_v62 = vmul.f32 18.0, %v544_v61  ;;  %v587_v46 = vmul.f32 18.0, %v545_v31  ;;  %vm670_vm7 = vcmp.ge.f32.partialorder %v544_v61, 1.0  ;;  %v1410_v43 = vunpack.c.l.b16 %v1301_v12 }
  0xc2   : > { %vm671_vm9 = vcmp.ge.f32.partialorder %v545_v31, 1.0  ;;  %vm712_vm14 = vcmp.le.f32.partialorder %v544_v61, 16.0  ;;  %vm713_vm13 = vcmp.le.f32.partialorder %v545_v31, 16.0  ;;  %v436_v11 = vadd.f32 0.5, %v7740_v54  ;;  %v6218_v31 = vld [vmem:[%s5284_s8 + $0x90] sm:$0xff]  }
  0xc3   : > { %v628_v28 = vsub.f32 %v418_v35, %v586_v62  ;;  %v629_v8 = vsub.f32 %v419_v32, %v587_v46  ;;  %vm6200_vm12 = vmand %vm670_vm7, %vm712_vm14  ;;  %v437_v41 = vadd.f32 0.5, %v7519_v48  ;;  %v6208_v58 = vpack.c.b16 %v1410_v43, %v1409_v27 }
  0xc4   : > { %vm6210_vm15 = vmand %vm671_vm9, %vm713_vm13  ;;  %v1229_v61 = vsel %vm1141_vm3, %v1099_v5, %v1187_v34  ;;  %v1029_v35 = vmul.f32 %v5868_v50, %v4937_v59  ;;  %v1074_v32 = vadd.f32 %v5910_v23, %v1028_v1  ;;  %v478_v12 = vmul.f32 0.055555556, %v436_v11 }
  0xc5   : > { %vm796_vm2 = vcmp.ge.f32.partialorder %v628_v28, 1.0  ;;  %vm797_vm6 = vcmp.ge.f32.partialorder %v629_v8, 1.0  ;;  %vm880_vm5 = vcmp.le.f32.partialorder %v628_v28, 16.0  ;;  %vm881_vm4 = vcmp.le.f32.partialorder %v629_v8, 16.0  ;;  %v4889_v8 = vld [vmem:[%s7484_s1 + $0x118] sm:$0xff] }
  0xc6   : > { %v7518_v43 = vrot.slane %v6208_v58, 7  ;;  %vm838_vm8 = vmand %vm6200_vm12, %vm796_vm2  ;;  %v479_v27 = vmul.f32 0.055555556, %v437_v41  ;;  %v1075_v5 = vadd.f32 %v5910_v23, %v1029_v35  ;;  %vm1116_vm11 = vcmp.gt.f32.partialorder %v1074_v32, 0.0  ;;  %2715 = vmatpush.bf16.msrb.mxu0 %v4889_v8 }
  0xc7   : > { %vm839_vm10 = vmand %vm6210_vm15, %vm797_vm6  ;;  %v1162_v34 = vmul.f32 %v5930_v20, %v1074_v32  ;;  %v5000_v59 = vunpack.c.l.bf16 %v6218_v31  ;;  %v5001_v1 = vunpack.c.h.bf16 %v6218_v31  ;;  %vm7744_vm0 = vcmask 1040384  }
  0xc8   : > { %v1693_v62 = vsel %vm7744_vm0, %v7743_v60, %v7518_v43  ;;  %vm922_vm1 = vmand %vm838_vm8, %vm880_vm5  ;;  %v520_v46 = vfloor.f32 %v478_v12  ;;  %v521_v28 = vfloor.f32 %v479_v27  ;;  %v6235_v26 = vadd.s32 288, %v5258_v3  ;;  %v4872_v27 = vld [vmem:[%s7484_s1 + $0x90] sm:$0xff]  ;;  %v4883_v60 = vld [vmem:[%s7484_s1 + $0xe8] sm:$0xff] }
  0xc9   : > { %1858 = vmatmul.bf16.gmra.mxu1 %v1693_v62  ;;  %vm923_vm3 = vmand %vm839_vm10, %vm881_vm4  ;;  %v6239_v52 = vsel %vm922_vm1, 1.0, %v7728_v21  ;;  %vm1117_vm7 = vcmp.gt.f32.partialorder %v1075_v5, 0.0  ;;  %v1163_v54 = vmul.f32 %v5930_v20, %v1075_v5  ;;  %v6243_v11 = vadd.s32 296, %v5258_v3  ;;  %2243 = vmatpush.bf16.msrb.mxu2 %v4872_v27 }
  0xca   : > { %7745 = vst [vmem:[#allocation40_spill] sm:$0xff] %v6239_v52  ;;  %v6246_v41 = vsel %vm923_vm3, 1.0, %v7728_v21  ;;  %v1270_v35 = vmul.f32 %v6239_v52, %v1228_v2  ;;  %v562_v31 = vmul.f32 18.0, %v520_v46  ;;  %v563_v12 = vmul.f32 18.0, %v521_v28  ;;  %2471 = vmatpush.bf16.msrb.mxu3 %v4883_v60 }
  0xcb   : > { %7746 = vst [vmem:[#allocation41_spill] sm:$0xff] %v6246_v41  ;;  %v1271_v62 = vmul.f32 %v6246_v41, %v1229_v61  ;;  %vm646_vm9 = vcmp.ge.f32.partialorder %v520_v46, 1.0  ;;  %vm647_vm14 = vcmp.ge.f32.partialorder %v521_v28, 1.0  ;;  %vm688_vm13 = vcmp.le.f32.partialorder %v520_v46, 16.0 }
  0xcc   : > { %v1312_v2 = vpack.c.bf16 %v1270_v35, %v1270_v35  ;;  %v7747_v43 = vcvt.s32.f32 %v6170_v30  ;;  %v7748_v52 = vcvt.s32.f32 %v6178_v39  ;;  %vm689_vm12 = vcmp.le.f32.partialorder %v521_v28, 16.0  ;;  %vm6263_vm15 = vmand %vm646_vm9, %vm688_vm13  ;;  %v6275_v39 = vld [vmem:[%s5284_s8 + $0x48] sm:$0xff]  }
  0xcd   : > { %v1313_v22 = vpack.c.bf16 %v1271_v62, %v1271_v62  ;;  %vm6267_vm2 = vmand %vm647_vm14, %vm689_vm12  ;;  %v1204_v46 = vsel %vm1116_vm11, %v1074_v32, %v1162_v34  ;;  %v426_v30 = vcvt.s32.f32 %v6235_v26  ;;  %v1205_v32 = vsel %vm1117_vm7, %v1075_v5, %v1163_v54 }
  0xce   : > { %v604_v48 = vsub.f32 %v7747_v43, %v562_v31  ;;  %v605_v47 = vsub.f32 %v7748_v52, %v563_v12  ;;  %v427_v43 = vcvt.s32.f32 %v6243_v11  ;;  %v1421_v28 = vunpack.c.l.b16 %v1312_v2 }
  0xcf   : > { %v1422_v52 = vunpack.c.l.b16 %v1313_v22  ;;  %v468_v35 = vadd.f32 0.5, %v426_v30  ;;  %v1060_v34 = vmul.f32 %v5868_v50, %v5000_v59  ;;  %v1061_v26 = vmul.f32 %v5868_v50, %v5001_v1 }
  0xd0   : > { %vm772_vm6 = vcmp.ge.f32.partialorder %v604_v48, 1.0  ;;  %vm773_vm5 = vcmp.ge.f32.partialorder %v605_v47, 1.0  ;;  %vm856_vm4 = vcmp.le.f32.partialorder %v604_v48, 16.0  ;;  %vm857_vm10 = vcmp.le.f32.partialorder %v605_v47, 16.0 }
  0xd1   : > { %vm814_vm8 = vmand %vm6263_vm15, %vm772_vm6  ;;  %v469_v31 = vadd.f32 0.5, %v427_v43  ;;  %v4964_v11 = vunpack.c.l.bf16 %v6275_v39  ;;  %v6285_v12 = vpack.c.b16 %v1422_v52, %v1421_v28  ;;  %v510_v22 = vmul.f32 0.055555556, %v468_v35 }
  0xd2   : > { %vm815_vm11 = vmand %vm6267_vm2, %vm773_vm5  ;;  %v4965_v47 = vunpack.c.h.bf16 %v6275_v39  ;;  %v1106_v8 = vadd.f32 %v5910_v23, %v1060_v34  ;;  %v1107_v5 = vadd.f32 %v5910_v23, %v1061_v26  ;;  %v6294_v59 = vadd.s32 144, %v5258_v3 }
  0xd3   : > { %vm898_vm0 = vmand %vm814_vm8, %vm856_vm4  ;;  %v511_v25 = vmul.f32 0.055555556, %v469_v31  ;;  %v7525_v1 = vrot.slane %v6285_v12, 7  ;;  %v552_v60 = vfloor.f32 %v510_v22  ;;  %v6303_v61 = vadd.s32 152, %v5258_v3 }
  0xd4   : > { %vm899_vm1 = vmand %vm815_vm11, %vm857_vm10  ;;  %v6289_v48 = vsel %vm898_vm0, 1.0, %v7728_v21  ;;  %vm1148_vm3 = vcmp.gt.f32.partialorder %v1106_v8, 0.0  ;;  %v7755_v39 = vrot.slane %v6006_v33, 7  ;;  %vm7756_vm7 = vcmask 1040384  }
  0xd5   : > { %7753 = vst [vmem:[#allocation42_spill] sm:$0xff] %v6289_v48  ;;  %v6298_v54 = vsel %vm899_vm1, 1.0, %v7728_v21  ;;  %v1246_v27 = vmul.f32 %v6289_v48, %v1204_v46  ;;  %v553_v2 = vfloor.f32 %v511_v25  ;;  %v594_v35 = vmul.f32 18.0, %v552_v60  ;;  %v4923_v48 = vld [vmem:[%s7484_s1 + $0x228] sm:$0xff] }
  0xd6   : > { %7754 = vst [vmem:[#allocation43_spill] sm:$0xff] %v6298_v54  ;;  %v1247_v62 = vmul.f32 %v6298_v54, %v1205_v32  ;;  %v1705_v28 = vsel %vm7756_vm7, %v7755_v39, %v7525_v1  ;;  %vm678_vm9 = vcmp.ge.f32.partialorder %v552_v60, 1.0  ;;  %vm720_vm13 = vcmp.le.f32.partialorder %v552_v60, 16.0 }
  0xd7   : > { %v1288_v52 = vpack.c.bf16 %v1246_v27, %v1246_v27  ;;  %1888 = vmatmul.bf16.gmra.mxu2 %v1705_v28  ;;  %v595_v46 = vmul.f32 18.0, %v553_v2  ;;  %vm679_vm14 = vcmp.ge.f32.partialorder %v553_v2, 1.0  ;;  %v636_v34 = vsub.f32 %v426_v30, %v594_v35  ;;  %vm762_vm15 = vmand %vm678_vm9, %vm720_vm13  ;;  %v6315_v28 = vld [vmem:[%s5284_s8 + $0x78] sm:$0xff]  }
  0xd8   : > { %v1289_v31 = vpack.c.bf16 %v1247_v62, %v1247_v62  ;;  %vm721_vm12 = vcmp.le.f32.partialorder %v553_v2, 16.0  ;;  %v1194_v26 = vmul.f32 %v5930_v20, %v1106_v8  ;;  %v1195_v39 = vmul.f32 %v5930_v20, %v1107_v5 }
  0xd9   : > { %v1397_v32 = vunpack.c.l.b16 %v1288_v52  ;;  %v637_v25 = vsub.f32 %v427_v43, %v595_v46  ;;  %vm763_vm2 = vmand %vm679_vm14, %vm721_vm12  ;;  %v408_v27 = vcvt.s32.f32 %v6294_v59  ;;  %vm804_vm6 = vcmp.ge.f32.partialorder %v636_v34, 1.0 }
  0xda   : > { %v1398_v22 = vunpack.c.l.b16 %v1289_v31  ;;  %vm888_vm5 = vcmp.le.f32.partialorder %v636_v34, 16.0  ;;  %vm1149_vm4 = vcmp.gt.f32.partialorder %v1107_v5, 0.0  ;;  %v409_v62 = vcvt.s32.f32 %v6303_v61  ;;  %vm846_vm10 = vmand %vm762_vm15, %vm804_vm6 }
  0xdb   : > { %vm805_vm8 = vcmp.ge.f32.partialorder %v637_v25, 1.0  ;;  %vm889_vm11 = vcmp.le.f32.partialorder %v637_v25, 16.0  ;;  %v1236_v30 = vsel %vm1148_vm3, %v1106_v8, %v1194_v26  ;;  %v450_v43 = vadd.f32 0.5, %v408_v27  ;;  %vm930_vm1 = vmand %vm846_vm10, %vm888_vm5 }
  0xdc   : > { %v6317_v60 = vpack.c.b16 %v1398_v22, %v1397_v32  ;;  %vm847_vm0 = vmand %vm763_vm2, %vm805_vm8  ;;  %v451_v2 = vadd.f32 0.5, %v409_v62  ;;  %v1042_v52 = vmul.f32 %v5868_v50, %v4964_v11  ;;  %v1043_v59 = vmul.f32 %v5868_v50, %v4965_v47 }
  0xdd   : > { %v1237_v61 = vsel %vm1149_vm4, %v1107_v5, %v1195_v39  ;;  %v4988_v31 = vunpack.c.l.bf16 %v6315_v28  ;;  %vm931_vm7 = vmand %vm847_vm0, %vm889_vm11  ;;  %v6327_v46 = vsel %vm930_vm1, 1.0, %v7728_v21  ;;  %v492_v8 = vmul.f32 0.055555556, %v450_v43 }
  0xde   : > { %7757 = vst [vmem:[#allocation44_spill] sm:$0xff] %v6317_v60  ;;  %v7524_v35 = vrot.slane %v6317_v60, 7  ;;  %v493_v32 = vmul.f32 0.055555556, %v451_v2  ;;  %v1088_v26 = vadd.f32 %v5910_v23, %v1042_v52  ;;  %v7759_v50 = vrot.slane %v6041_v18, 7 }
  0xdf   : > { %7758 = vst [vmem:[#allocation45_spill] sm:$0xff] %v6327_v46  ;;  %vm7760_vm3 = vcmask 1040384   ;;  %v6336_v47 = vsel %vm931_vm7, 1.0, %v7728_v21  ;;  %v1278_v5 = vmul.f32 %v6327_v46, %v1236_v30  ;;  %v4989_v34 = vunpack.c.h.bf16 %v6315_v28  ;;  %v4856_v28 = vld [vmem:[%s7484_s1 + $0x10] sm:$0xff] }
  0xe0   : > { %v1681_v11 = vsel %vm7760_vm3, %v7759_v50, %v7524_v35  ;;  %7761 = vst [vmem:[#allocation46_spill] sm:$0xff] %v6336_v47  ;;  %v1279_v22 = vmul.f32 %v6336_v47, %v1237_v61  ;;  %v534_v25 = vfloor.f32 %v492_v8  ;;  %v535_v39 = vfloor.f32 %v493_v32  ;;  %1972 = vmatpush.bf16.msrb.mxu1 %v4856_v28 }
  0xe1   : > { %1828 = vmatmul.bf16.gmra.mxu0 %v1681_v11  ;;  %v1089_v43 = vadd.f32 %v5910_v23, %v1043_v59  ;;  %v1320_v2 = vpack.c.bf16 %v1278_v5, %v1278_v5  ;;  %vm1130_vm9 = vcmp.gt.f32.partialorder %v1088_v26, 0.0  ;;  %v1176_v52 = vmul.f32 %v5930_v20, %v1088_v26 }
  0xe2   : > { %v6344_v50 = vadd.s32 240, %v5258_v3  ;;  %v1321_v35 = vpack.c.bf16 %v1279_v22, %v1279_v22  ;;  %v576_v1 = vmul.f32 18.0, %v534_v25  ;;  %v577_v41 = vmul.f32 18.0, %v535_v39 }
  0xe3   : > { %vm660_vm14 = vcmp.ge.f32.partialorder %v534_v25, 1.0  ;;  %v1429_v30 = vunpack.c.l.b16 %v1320_v2  ;;  %vm661_vm13 = vcmp.ge.f32.partialorder %v535_v39, 1.0  ;;  %vm702_vm12 = vcmp.le.f32.partialorder %v534_v25, 16.0 }
  0xe4   : > { %vm703_vm15 = vcmp.le.f32.partialorder %v535_v39, 16.0  ;;  %v1430_v59 = vunpack.c.l.b16 %v1321_v35  ;;  %v618_v61 = vsub.f32 %v408_v27, %v576_v1  ;;  %v619_v8 = vsub.f32 %v409_v62, %v577_v41  ;;  %vm744_vm2 = vmand %vm660_vm14, %vm702_vm12  ;;  %v6361_v35 = vld [vmem:[%s7485_s2] ss:$0 sm:$0xff]  ;;  %v6367_v27 = vld [vmem:[%s5284_s8 + $0x18] sm:$0xff]  }
  0xe5   : > { %v1177_v32 = vmul.f32 %v5930_v20, %v1089_v43  ;;  %vm6350_vm6 = vmand %vm661_vm13, %vm703_vm15  ;;  %vm1131_vm5 = vcmp.gt.f32.partialorder %v1089_v43, 0.0  ;;  %v6355_v5 = vadd.s32 248, %v5258_v3  ;;  %v420_v22 = vcvt.s32.f32 %v6344_v50 }
  0xe6   : > { %v1054_v41 = vmul.f32 %v6361_v35, %v4988_v31  ;;  %v6364_v1 = vpack.c.b16 %v1430_v59, %v1429_v30  ;;  %vm786_vm4 = vcmp.ge.f32.partialorder %v618_v61, 1.0  ;;  %vm787_vm8 = vcmp.ge.f32.partialorder %v619_v8, 1.0 }
  0xe7   : > { %vm870_vm10 = vcmp.le.f32.partialorder %v618_v61, 16.0  ;;  %vm828_vm11 = vmand %vm744_vm2, %vm786_vm4  ;;  %vm871_vm0 = vcmp.le.f32.partialorder %v619_v8, 16.0  ;;  %v421_v62 = vcvt.s32.f32 %v6355_v5  ;;  %v462_v25 = vadd.f32 0.5, %v420_v22 }
  0xe8   : > { %v1055_v39 = vmul.f32 %v6361_v35, %v4989_v34  ;;  %v7527_v2 = vrot.slane %v6364_v1, 7  ;;  %vm829_vm1 = vmand %vm6350_vm6, %vm787_vm8  ;;  %v1218_v31 = vsel %vm1130_vm9, %v1088_v26, %v1176_v52  ;;  %v1219_v50 = vsel %vm1131_vm5, %v1089_v43, %v1177_v32 }
  0xe9   : > { %v1100_v28 = vadd.f32 %v5910_v23, %v1054_v41  ;;  %vm912_vm7 = vmand %vm828_vm11, %vm870_vm10  ;;  %v463_v30 = vadd.f32 0.5, %v421_v62  ;;  %v504_v59 = vmul.f32 0.055555556, %v462_v25  ;;  %v4940_v5 = vunpack.c.l.bf16 %v6367_v27 }
  0xea   : > { %v1101_v61 = vadd.f32 %v5910_v23, %v1055_v39  ;;  %v7764_v34 = vrot.slane %v6139_v14, 7  ;;  %vm913_vm14 = vmand %vm829_vm1, %vm871_vm0  ;;  %v6386_v26 = vsel %vm912_vm7, 1.0, %v7728_v21  ;;  %v4941_v43 = vunpack.c.h.bf16 %v6367_v27 }
  0xeb   : > { %7765 = vst [vmem:[#allocation47_spill] sm:$0xff] %v6386_v26  ;;  %v6390_v52 = vadd.s32 48, %v5258_v3  ;;  %v6393_v23 = vsel %vm913_vm14, 1.0, %v7728_v21  ;;  %v1260_v32 = vmul.f32 %v6386_v26, %v1218_v31  ;;  %v505_v41 = vmul.f32 0.055555556, %v463_v30  ;;  %v4888_v31 = vld [vmem:[%s7484_s1 + $0x110] sm:$0xff] }
  0xec   : > { %v1713_v11 = vsel %vm7760_vm3, %v7764_v34, %v7527_v2  ;;  %7766 = vst [vmem:[#allocation48_spill] sm:$0xff] %v6393_v23  ;;  %v546_v25 = vfloor.f32 %v504_v59  ;;  %v1261_v39 = vmul.f32 %v6393_v23, %v1219_v50  ;;  %vm1142_vm9 = vcmp.gt.f32.partialorder %v1100_v28, 0.0  ;;  %v4871_v50 = vld [vmem:[%s7484_s1 + $0x88] sm:$0xff]  ;;  %2716 = vmatpush.bf16.msrb.mxu0 %v4888_v31 }
  0xed   : > { %1908 = vmatmul.bf16.gmra.mxu3 %v1713_v11  ;;  %vm1143_vm13 = vcmp.gt.f32.partialorder %v1101_v61, 0.0  ;;  %v1188_v8 = vmul.f32 %v5930_v20, %v1100_v28  ;;  %v1302_v34 = vpack.c.bf16 %v1260_v32, %v1260_v32  ;;  %v547_v2 = vfloor.f32 %v505_v41  ;;  %v4882_v11 = vld [vmem:[%s7484_s1 + $0xe0] sm:$0xff]  ;;  %v4855_v41 = vld [vmem:[%s7484_s1 + $0x8] sm:$0xff]  ;;  %2244 = vmatpush.bf16.msrb.mxu2 %v4871_v50 }
  0xee   : > { %v588_v27 = vmul.f32 18.0, %v546_v25  ;;  %vm672_vm12 = vcmp.ge.f32.partialorder %v546_v25, 1.0  ;;  %v1303_v30 = vpack.c.bf16 %v1261_v39, %v1261_v39  ;;  %vm714_vm15 = vcmp.le.f32.partialorder %v546_v25, 16.0  ;;  %v6410_v20 = vld [vmem:[%s7487_s4] ss:$0 sm:$0xff]  ;;  %2472 = vmatpush.bf16.msrb.mxu3 %v4882_v11  ;;  %v4881_v25 = vld [vmem:[%s7484_s1 + $0xd8] sm:$0xff]  ;;  %1973 = vmatpush.bf16.msrb.mxu1 %v4855_v41 }
  0xef   : > { %v1189_v59 = vmul.f32 %v6410_v20, %v1101_v61  ;;  %v355_v32 = vadd.s32 56, %v5258_v3  ;;  %v1411_v47 = vunpack.c.l.b16 %v1302_v34  ;;  %v589_v46 = vmul.f32 18.0, %v547_v2  ;;  %vm6417_vm6 = vmand %vm672_vm12, %vm714_vm15 }
  0xf0   : > { %v630_v23 = vsub.f32 %v420_v22, %v588_v27  ;;  %vm673_vm2 = vcmp.ge.f32.partialorder %v547_v2, 1.0  ;;  %v1412_v26 = vunpack.c.l.b16 %v1303_v30  ;;  %vm715_vm5 = vcmp.le.f32.partialorder %v547_v2, 16.0 }
  0xf1   : > { %v396_v3 = vcvt.s32.f32 %v6390_v52  ;;  %v397_v45 = vcvt.s32.f32 %v355_v32  ;;  %v631_v34 = vsub.f32 %v421_v62, %v589_v46  ;;  %vm6425_vm4 = vmand %vm673_vm2, %vm715_vm5  ;;  %v1030_v27 = vmul.f32 %v6361_v35, %v4940_v5 }
  0xf2   : > { %vm798_vm8 = vcmp.ge.f32.partialorder %v630_v23, 1.0  ;;  %vm882_vm10 = vcmp.le.f32.partialorder %v630_v23, 16.0  ;;  %v6430_v11 = vpack.c.b16 %v1412_v26, %v1411_v47  ;;  %v1230_v2 = vsel %vm1142_vm9, %v1100_v28, %v1188_v8  ;;  %2473 = vmatpush.bf16.msrb.mxu3 %v4881_v25  ;;  %v4880_v47 = vld [vmem:[%s7484_s1 + $0xd0] sm:$0xff] }
  0xf3   : > { %vm840_vm11 = vmand %vm6417_vm6, %vm798_vm8  ;;  %v438_v52 = vadd.f32 0.5, %v396_v3  ;;  %v439_v31 = vadd.f32 0.5, %v397_v45  ;;  %vm799_vm0 = vcmp.ge.f32.partialorder %v631_v34, 1.0  ;;  %vm883_vm1 = vcmp.le.f32.partialorder %v631_v34, 16.0 }
  0xf4   : > { %vm924_vm7 = vmand %vm840_vm11, %vm882_vm10  ;;  %v1231_v46 = vsel %vm1143_vm13, %v1101_v61, %v1189_v59  ;;  %v1031_v62 = vmul.f32 %v6361_v35, %v4941_v43  ;;  %v1694_v5 = vrot.slane %v6430_v11, 7  ;;  %v5197_v35 = vld [vmem:[%s7486_s3] ss:$0 sm:$0xff]  ;;  %v7772_v8 = vrot.slane %v6208_v58, 7 }
  0xf5   : > { %vm841_vm3 = vmand %vm6425_vm4, %vm799_vm0  ;;  %v6444_v28 = vsel %vm924_vm7, 1.0, %v7728_v21  ;;  %v480_v26 = vmul.f32 0.055555556, %v438_v52  ;;  %v481_v23 = vmul.f32 0.055555556, %v439_v31  ;;  %v1076_v43 = vadd.f32 %v5197_v35, %v1030_v27 }
  0xf6   : > { %7771 = vst [vmem:[#allocation49_spill] sm:$0xff] %v6444_v28  ;;  %vm925_vm14 = vmand %vm841_vm3, %vm883_vm1  ;;  %v1272_v61 = vmul.f32 %v6444_v28, %v1230_v2  ;;  %vm7773_vm9 = vcmask 1040384   ;;  %v1077_v25 = vadd.f32 %v5197_v35, %v1031_v62  ;;  %v1714_v34 = vrot.slane %v5756_v9, 7  ;;  %2474 = vmatpush.bf16.msrb.mxu3 %v4880_v47  ;;  %v4870_v35 = vld [vmem:[%s7484_s1 + $0x80] sm:$0xff] }
  0xf7   : > { %v1695_v50 = vsel %vm7773_vm9, %v7772_v8, %v1694_v5  ;;  %v6456_v30 = vsel %vm925_vm14, 1.0, %v7728_v21  ;;  %v522_v59 = vfloor.f32 %v480_v26  ;;  %v523_v32 = vfloor.f32 %v481_v23  ;;  %vm7778_vm8 = vmmov %vm7773_vm9  ;;  %2245 = vmatpush.bf16.msrb.mxu2 %v4870_v35 }
  0xf8   : > { %7774 = vst [vmem:[#allocation50_spill] sm:$0xff] %v6456_v30  ;;  %1863 = vmatmul.bf16.gmra.mxu1 %v1695_v50  ;;  %v1273_v41 = vmul.f32 %v6456_v30, %v1231_v46  ;;  %v1314_v39 = vpack.c.bf16 %v1272_v61, %v1272_v61  ;;  %v1164_v26 = vmul.f32 %v6410_v20, %v1076_v43  ;;  %vm1118_vm4 = vcmp.gt.f32.partialorder %v1076_v43, 0.0  ;;  %v4909_v46 = vld [vmem:[%s7484_s1 + $0x1b8] sm:$0xff] }
  0xf9   : > { %v564_v22 = vmul.f32 18.0, %v522_v59  ;;  %v565_v27 = vmul.f32 18.0, %v523_v32  ;;  %vm648_vm13 = vcmp.ge.f32.partialorder %v522_v59, 1.0  ;;  %vm649_vm12 = vcmp.ge.f32.partialorder %v523_v32, 1.0 }
  0xfa   : > { %v1315_v2 = vpack.c.bf16 %v1273_v41, %v1273_v41  ;;  %v1423_v52 = vunpack.c.l.b16 %v1314_v39  ;;  %vm690_vm15 = vcmp.le.f32.partialorder %v522_v59, 16.0  ;;  %vm691_vm2 = vcmp.le.f32.partialorder %v523_v32, 16.0  ;;  %v4878_v32 = vld [vmem:[%s7484_s1 + $0xc0] sm:$0xff] }
  0xfb   : > { %v606_v31 = vsub.f32 %v396_v3, %v564_v22  ;;  %v607_v8 = vsub.f32 %v397_v45, %v565_v27  ;;  %vm732_vm6 = vmand %vm648_vm13, %vm690_vm15  ;;  %v1165_v62 = vmul.f32 %v6410_v20, %v1077_v25  ;;  %v7777_v47 = vrot.slane %v6364_v1, 7  ;;  %v4879_v45 = vld [vmem:[%s7484_s1 + $0xc8] sm:$0xff]  ;;  %v4854_v41 = vld [vmem:[%s7484_s1] sm:$0xff]  ;;  %3255 = vmatpush.bf16.msra.mxu2 %v4909_v46 }
  0xfc   : > { %v1424_v23 = vunpack.c.l.b16 %v1315_v2  ;;  %vm6461_vm5 = vmand %vm649_vm12, %vm691_vm2  ;;  %vm1119_vm1 = vcmp.gt.f32.partialorder %v1077_v25, 0.0  ;;  %v4887_v20 = vld [vmem:[%s7484_s1 + $0x108] sm:$0xff]  ;;  %v6481_v50 = vshrl.u32 %v5891_v38, 16  ;;  %v1206_v59 = vsel %vm1118_vm4, %v1076_v43, %v1164_v26  ;;  %2475 = vmatpush.bf16.msrb.mxu3 %v4879_v45  ;;  %v4886_v43 = vld [vmem:[%s7484_s1 + $0x100] sm:$0xff]  ;;  %1974 = vmatpush.bf16.msrb.mxu1 %v4854_v41 }
  0xfd   : > { %v1715_v61 = vsel %vm7778_vm8, %v7777_v47, %v1714_v34  ;;  %vm774_vm10 = vcmp.ge.f32.partialorder %v606_v31, 1.0  ;;  %vm775_vm11 = vcmp.ge.f32.partialorder %v607_v8, 1.0  ;;  %vm858_vm0 = vcmp.le.f32.partialorder %v606_v31, 16.0  ;;  %2717 = vmatpush.bf16.msrb.mxu0 %v4887_v20  ;;  %vm7783_vm12 = vmmov %vm7778_vm8 }
  0xfe   : > { %1913 = vmatmul.bf16.gmra.mxu3 %v1715_v61  ;;  %v6472_v3 = vpack.c.b16 %v1424_v23, %v1423_v52  ;;  %vm816_vm7 = vmand %vm732_vm6, %vm774_vm10  ;;  %vm859_vm3 = vcmp.le.f32.partialorder %v607_v8, 16.0  ;;  %7779 = vst [vmem:[#allocation51_spill] sm:$0xff] %v6481_v50  ;;  %v1207_v34 = vsel %vm1119_vm1, %v1077_v25, %v1165_v62  ;;  %v1344_v27 = vshrl.u32 %v5760_v15, 16 }
  0xff   : > { %vm817_vm14 = vmand %vm6461_vm5, %vm775_vm11  ;;  %v6504_v2 = vshll.u32 %v5891_v38, 16  ;;  %v7782_v52 = vrot.slane %v6285_v12, 7  ;;  %v2092_v8 = vrot.slane %v6481_v50, 7  ;;  %vm2091_vm15 = vsmask.f32 256 }
 0x100   : > { %v1706_v39 = vrot.slane %v6472_v3, 7  ;;  %vm900_vm9 = vmand %vm816_vm7, %vm858_vm0  ;;  %2476 = vmatpush.bf16.msrb.mxu3 %v4878_v32  ;;  %v7785_v61 = vrot.slane %v5644_v19, 7  ;;  %v2085_v20 = vrot.slane %v1344_v27, 3  ;;  %v1336_v41 = vshrl.u32 %v5758_v13, 16 }
 0x101   : > { %vm901_vm13 = vmand %vm817_vm14, %vm859_vm3  ;;  %v6500_v22 = vsel %vm900_vm9, 1.0, %v7728_v21  ;;  %7781 = vst [vmem:[#allocation53_spill] sm:$0xff] %v6504_v2  ;;  %2718 = vmatpush.bf16.msrb.mxu0 %v4886_v43  ;;  %v2093_v35 = vor.u32 %v2092_v8, %v6504_v2  ;;  %v1347_v43 = vshll.u32 %v5760_v15, 16  ;;  %v4901_v15 = vld [vmem:[%s7484_s1 + $0x178] sm:$0xff]  ;;  %vm1334_vm10 = vsmask.f32 5376 }
 0x102   : > { %7780 = vst [vmem:[#allocation52_spill] sm:$0xff] %v6500_v22  ;;  %v1707_v25 = vsel %vm7783_vm12, %v7782_v52, %v1706_v39  ;;  %v6510_v31 = vsel %vm901_vm13, 1.0, %v7728_v21  ;;  %v1248_v26 = vmul.f32 %v6500_v22, %v1206_v59  ;;  %vm7786_vm2 = vmmov %vm7778_vm8  ;;  %v1338_v46 = vrot.slane %v1336_v41, 2  ;;  %3025 = vmatpush.bf16.msra.mxu1 %v4901_v15 }
 0x103   : > { %7784 = vst [vmem:[#allocation54_spill] sm:$0xff] %v6510_v31  ;;  %1893 = vmatmul.bf16.gmra.mxu2 %v1707_v25  ;;  %v1249_v23 = vmul.f32 %v6510_v31, %v1207_v34  ;;  %v1697_v21 = vsel %vm7786_vm2, %v1694_v5, %v7785_v61  ;;  %vm7787_vm6 = vmmov %vm7786_vm2  ;;  %v1339_v34 = vshll.u32 %v5758_v13, 16  ;;  %v1346_v25 = vrot.slane %v1344_v27, 2  ;;  %v4917_v13 = vld [vmem:[%s7484_s1 + $0x1f8] sm:$0xff] }
 0x104   : > { %v1290_v62 = vpack.c.bf16 %v1248_v26, %v1248_v26  ;;  %vm2171_vm5 = vmand %vm7787_vm6, %vm2091_vm15  ;;  %v7789_v26 = vrot.slane %v6317_v60, 7  ;;  %v6545_v27 = vshrl.u32 %v6041_v18, 16  ;;  %v4925_v61 = vld [vmem:[%s7484_s1 + $0x238] sm:$0xff]  ;;  %3544 = vmatpush.bf16.msra.mxu3 %v4917_v13  ;;  %v2082_v24 = vrot.slane %v1336_v41, 3 }
 0x105   : > { %v1291_v47 = vpack.c.bf16 %v1249_v23, %v1249_v23  ;;  %v6531_v52 = vsel %vm2171_vm5, %v2085_v20, %v2093_v35  ;;  %vm7790_vm4 = vmmov %vm7786_vm2  ;;  %3878 = vmatpush.bf16.msra.mxu0 %v4925_v61  ;;  %v2083_v29 = vrot.slane %v1339_v34, 4  ;;  %v2086_v57 = vrot.slane %v1347_v43, 4 }
 0x106   : > { %v1399_v45 = vunpack.c.l.b16 %v1290_v62  ;;  %v1341_v62 = vrot.slane %v1339_v34, 3  ;;  %7791 = vst [vmem:[#allocation56_spill] sm:$0xff] %v6545_v27  ;;  %vm7793_vm8 = vmmov %vm7786_vm2  ;;  %vm2081_vm0 = vsmask.f32 4352  ;;  %v1456_v13 = vrot.slane %v6481_v50, 6 }
 0x107   : > { %v1400_v59 = vunpack.c.l.b16 %v1291_v47  ;;  %v1349_v47 = vrot.slane %v1347_v43, 3  ;;  %vm7796_vm11 = vmmov %vm7786_vm2  ;;  %v1459_v15 = vrot.slane %v6504_v2, 7  ;;  %vm1452_vm1 = vsmask.f32 1280 }
 0x108   : > { %1868 = vmatmul.bf16.gmra.mxu1 %v1697_v21  ;;  %v7792_v21 = vrot.slane %v6137_v56, 7  ;;  %v1342_v35 = vor.u32 %v1341_v62, %v1338_v46  ;;  %v7795_v46 = vrot.slane %v5505_v7, 7  ;;  %v2084_v62 = vor.u32 %v2083_v29, %v2082_v24  ;;  %vm8004_vm6 = vmmov %vm7790_vm4 }
 0x109   : > { %v6526_v32 = vpack.c.b16 %v1400_v59, %v1399_v45  ;;  %v1350_v59 = vor.u32 %v1349_v47, %v1346_v25  ;;  %v2087_v47 = vor.u32 %v2086_v57, %v2085_v20  ;;  %vm1652_vm7 = vcmask 1041408  }
 0x10a   : > { %v1709_v45 = vsel %vm7793_vm8, %v1706_v39, %v7792_v21  ;;  %vm1653_vm3 = vmand %vm1652_vm7, %vm1452_vm1  ;;  %v6570_v29 = vshll.u32 %v6317_v60, 16  ;;  %v1464_v43 = vrot.slane %v6545_v27, 6  ;;  %v4908_v21 = vld [vmem:[%s7484_s1 + $0x1b0] sm:$0xff]  ;;  %v6638_v37 = vshrl.u32 %v5509_v10, 16 }
 0x10b   : > { %7788 = vst [vmem:[#allocation55_spill] sm:$0xff] %v6526_v32  ;;  %v1682_v5 = vrot.slane %v6526_v32, 7  ;;  %v1351_v30 = vsel %vm1334_vm10, %v1342_v35, %v1350_v59  ;;  %v2088_v41 = vsel %vm2081_vm0, %v2084_v62, %v2087_v47  ;;  %v6581_v61 = vshrl.u32 %v6526_v32, 16  ;;  %v4900_v35 = vld [vmem:[%s7484_s1 + $0x170] sm:$0xff]  ;;  %3256 = vmatpush.bf16.msra.mxu2 %v4908_v21  ;;  %v6600_v47 = vpop.f32.mrf.mxu2 }
 0x10c   : > { %7798 = vst [vmem:[#allocation59_spill] sm:$0xff] %v6570_v29  ;;  %3026 = vmatpush.bf16.msra.mxu1 %v4900_v35  ;;  %v6620_v21 = vshll.u32 %v5505_v7, 16  ;;  %v6680_v53 = vshll.u32 %v5813_v55, 16  ;;  %vm3411_vm14 = vcmask 1046528   ;;  %vm2867_vm9 = vsmask.f32 7424 }
 0x10d   : > { %v1683_v23 = vsel %vm7790_vm4, %v7789_v26, %v1682_v5  ;;  %v6554_v26 = vshll.u32 %v6041_v18, 16  ;;  %v1685_v25 = vsel %vm7796_vm11, %v1682_v5, %v7795_v46  ;;  %7799 = vst [vmem:[#allocation60_spill] sm:$0xff] %v6581_v61  ;;  %v6595_v46 = vshll.u32 %v6526_v32, 16 }
 0x10e   : > { %2477 = vmatmul.bf16.vlgmr.msrb.gmra.mxu3 %v6531_v52  ;;  %1833 = vmatmul.bf16.gmra.mxu0 %v1683_v23  ;;  %v2094_v23 = vrot.slane %v6545_v27, 7  ;;  %7801 = vst [vmem:[#allocation62_spill] sm:$0xff] %v6600_v47  ;;  %vm3700_vm13 = vsmask.f32 6400  ;;  %vm2957_vm12 = vcmask 1047552  }
 0x10f   : > { %7794 = vst [vmem:[#allocation57_spill] sm:$0xff] %v6554_v26  ;;  %v1467_v5 = vrot.slane %v6554_v26, 7  ;;  %vm3811_vm2 = vmand %vm3411_vm14, %vm3700_vm13 }
 0x110   : > { %v2095_v28 = vor.u32 %v2094_v23, %v6554_v26  ;;  %7800 = vst [vmem:[#allocation61_spill] sm:$0xff] %v6595_v46 }
 0x111   : > { %7804 = vst [vmem:[#allocation65_spill] sm:$0xff] %v6620_v21 }
 0x112   : > { %v2096_v39 = vsel %vm2091_vm15, %v2092_v8, %v2095_v28  ;;  %v1460_v28 = vor.u32 %v1459_v15, %v1456_v13  ;;  %v6573_v8 = vpop.f32.mrf.mxu1  ;;  %7806 = vst [vmem:[#allocation67_spill] sm:$0xff] %v6638_v37 }
 0x113   : > { %1898 = vmatmul.bf16.gmra.mxu2 %v1709_v45  ;;  %v4916_v45 = vld [vmem:[%s7484_s1 + $0x1f0] sm:$0xff]  ;;  %7812 = vst [vmem:[#allocation73_spill] sm:$0xff] %v6680_v53 }
 0x114   : > { %v1654_v24 = vsel %vm1653_vm3, %v1350_v59, %v1460_v28  ;;  %3545 = vmatpush.bf16.msra.mxu3 %v4916_v45 }
 0x118   : > { %1975 = vmatmul.bf16.vlgmr.msrb.gmra.mxu1 %v1351_v30  ;;  %v6565_v30 = vshrl.u32 %v6317_v60, 16 }
 0x11a   : > { %7797 = vst [vmem:[#allocation58_spill] sm:$0xff] %v6565_v30  ;;  %v2097_v57 = vrot.slane %v6565_v30, 7  ;;  %v6592_v59 = vpop.f32.mrf.mxu1 }
 0x11c   : > { %v2098_v20 = vor.u32 %v2097_v57, %v6570_v29 }
 0x11e   : > { %2482 = vmatmul.bf16.gmra.mxu3 %v2096_v39  ;;  %1838 = vmatmul.bf16.gmra.mxu0 %v1685_v25  ;;  %v2099_v34 = vsel %vm2091_vm15, %v2094_v23, %v2098_v20  ;;  %v1468_v23 = vor.u32 %v1467_v5, %v1464_v43  ;;  %v2100_v25 = vrot.slane %v6581_v61, 7  ;;  %v1473_v20 = vrot.slane %v6565_v30, 6  ;;  %v6617_v5 = vpop.f32.mrf.mxu2 }
 0x11f   : > { %v1476_v43 = vrot.slane %v6570_v29, 7  ;;  %7803 = vst [vmem:[#allocation64_spill] sm:$0xff] %v6617_v5  ;;  %v6771_v30 = vshll.u32 %v6430_v11, 16 }
 0x120   : > { %v1469_v62 = vsel %vm1452_vm1, %v1460_v28, %v1468_v23  ;;  %v2101_v13 = vor.u32 %v2100_v25, %v6595_v46  ;;  %v6615_v28 = vshrl.u32 %v5505_v7, 16 }
 0x121   : > { %7829 = vst [vmem:[#allocation90_spill] sm:$0xff] %v6771_v30 }
 0x122   : > { %v6603_v15 = vpop.f32.mrf.mxu1  ;;  %7802 = vst [vmem:[#allocation63_spill] sm:$0xff] %v6615_v28  ;;  %v2103_v45 = vrot.slane %v6615_v28, 7 }
 0x123   : > { %2246 = vmatmul.bf16.vlgmr.msrb.gmra.mxu2 %v2088_v41  ;;  %v2102_v41 = vsel %vm2091_vm15, %v2097_v57, %v2101_v13  ;;  %v1477_v57 = vor.u32 %v1476_v43, %v1473_v20  ;;  %v1482_v43 = vrot.slane %v6581_v61, 6 }
 0x125   : > { %v1478_v13 = vsel %vm1452_vm1, %v1468_v23, %v1477_v57 }
 0x126   : > { %v6629_v63 = vpop.f32.mrf.mxu2 }
 0x127   : > { %7805 = vst [vmem:[#allocation66_spill] sm:$0xff] %v6629_v63 }
 0x128   : > { %1980 = vmatmul.bf16.gmra.mxu1 %v1654_v24  ;;  %v6606_v24 = vpop.f32.mrf.mxu0 }
 0x12a   : > { %v6623_v35 = vpop.f32.mrf.mxu1 }
 0x12e   : > { %2487 = vmatmul.bf16.gmra.mxu3 %v2099_v34  ;;  %2719 = vmatmul.bf16.vlgmr.msrb.gmra.mxu0 %v5891_v38  ;;  %v2104_v38 = vor.u32 %v2103_v45, %v6620_v21 }
 0x132   : > { %v6632_v20 = vpop.f32.mrf.mxu1 }
 0x133   : > { %2251 = vmatmul.bf16.gmra.mxu2 %v6531_v52  ;;  %v4924_v52 = vld [vmem:[%s7484_s1 + $0x230] sm:$0xff] }
 0x134   : > { %3879 = vmatpush.bf16.msra.mxu0 %v4924_v52  ;;  %v2105_v52 = vsel %vm2091_vm15, %v2100_v25, %v2104_v38  ;;  %v2106_v38 = vrot.slane %v6638_v37, 7  ;;  %v6646_v25 = vpop.f32.mrf.mxu2 }
 0x135   : > { %7808 = vst [vmem:[#allocation69_spill] sm:$0xff] %v6646_v25  ;;  %v1512_v25 = vrot.slane %v6680_v53, 7 }
 0x138   : > { %1985 = vmatmul.bf16.gmra.mxu1 %v1469_v62  ;;  %v6625_v62 = vpop.f32.mrf.mxu0  ;;  %3880 = vmatpush.bf16.msra.mxu0 %v4923_v48 }
 0x13a   : > { %v6650_v36 = vpop.f32.mrf.mxu1 }
 0x13c   : > { %v6660_v54 = vpop.f32.mrf.mxu2 }
 0x13d   : > { %7810 = vst [vmem:[#allocation71_spill] sm:$0xff] %v6660_v54 }
 0x13e   : > { %2492 = vmatmul.bf16.gmra.mxu3 %v2102_v41  ;;  %2724 = vmatmul.bf16.gmra.mxu0 %v6041_v18 }
 0x140   : > { %v6640_v23 = vpop.f32.mrf.mxu0 }
 0x143   : > { %2256 = vmatmul.bf16.gmra.mxu2 %v2096_v39  ;;  %v1485_v39 = vrot.slane %v6595_v46, 7 }
 0x145   : > { %v1486_v49 = vor.u32 %v1485_v39, %v1482_v43  ;;  %v6655_v43 = vpop.f32.mrf.mxu3  ;;  %v1491_v39 = vrot.slane %v6615_v28, 6 }
 0x146   : > { %7809 = vst [vmem:[#allocation70_spill] sm:$0xff] %v6655_v43  ;;  %v6677_v42 = vpop.f32.mrf.mxu1 }
 0x147   : > { %v1487_v44 = vsel %vm1452_vm1, %v1477_v57, %v1486_v49  ;;  %v4907_v57 = vld [vmem:[%s7484_s1 + $0x1a8] sm:$0xff] }
 0x148   : > { %1990 = vmatmul.bf16.gmra.mxu1 %v1478_v13  ;;  %v6643_v13 = vshll.u32 %v5509_v10, 16  ;;  %v6652_v31 = vpop.f32.mrf.mxu0  ;;  %3257 = vmatpush.bf16.msra.mxu2 %v4907_v57 }
 0x14a   : > { %7807 = vst [vmem:[#allocation68_spill] sm:$0xff] %v6643_v13  ;;  %v2107_v40 = vor.u32 %v2106_v38, %v6643_v13 }
 0x14c   : > { %v2108_v22 = vsel %vm2091_vm15, %v2103_v45, %v2107_v40  ;;  %v4899_v40 = vld [vmem:[%s7484_s1 + $0x168] sm:$0xff]  ;;  %v6672_v45 = vshrl.u32 %v5813_v55, 16 }
 0x14d   : > { %3027 = vmatpush.bf16.msra.mxu1 %v4899_v40  ;;  %v1500_v40 = vrot.slane %v6638_v37, 6 }
 0x14e   : > { %2497 = vmatmul.bf16.gmra.mxu3 %v2105_v52  ;;  %2729 = vmatmul.bf16.gmra.mxu0 %v6317_v60  ;;  %7811 = vst [vmem:[#allocation72_spill] sm:$0xff] %v6672_v45  ;;  %v2109_v4 = vrot.slane %v6672_v45, 7  ;;  %v6692_v48 = vpop.f32.mrf.mxu1 }
 0x150   : > { %v6683_v43 = vpop.f32.mrf.mxu0  ;;  %v2110_v57 = vor.u32 %v2109_v4, %v6680_v53 }
 0x153   : > { %2261 = vmatmul.bf16.gmra.mxu2 %v2099_v34  ;;  %v1494_v34 = vrot.slane %v6620_v21, 7  ;;  %v6686_v21 = vpop.f32.mrf.mxu3 }
 0x154   : > { %7813 = vst [vmem:[#allocation74_spill] sm:$0xff] %v6686_v21  ;;  %v6702_v21 = vshrl.u32 %v5981_v0, 16 }
 0x155   : > { %v1495_v6 = vor.u32 %v1494_v34, %v1491_v39  ;;  %v2111_v39 = vsel %vm2091_vm15, %v2106_v38, %v2110_v57  ;;  %v6707_v38 = vshll.u32 %v5981_v0, 16 }
 0x156   : > { %7816 = vst [vmem:[#allocation77_spill] sm:$0xff] %v6702_v21  ;;  %v2112_v57 = vrot.slane %v6702_v21, 7 }
 0x157   : > { %v1496_v28 = vsel %vm1452_vm1, %v1486_v49, %v1495_v6  ;;  %7818 = vst [vmem:[#allocation79_spill] sm:$0xff] %v6707_v38 }
 0x158   : > { %1995 = vmatmul.bf16.gmra.mxu1 %v1487_v44  ;;  %v4915_v44 = vld [vmem:[%s7484_s1 + $0x1e8] sm:$0xff]  ;;  %v6694_v34 = vpop.f32.mrf.mxu0 }
 0x159   : > { %3546 = vmatpush.bf16.msra.mxu3 %v4915_v44  ;;  %v6689_v44 = vpop.f32.mrf.mxu2 }
 0x15a   : > { %7814 = vst [vmem:[#allocation75_spill] sm:$0xff] %v6689_v44 }
 0x15e   : > { %2502 = vmatmul.bf16.gmra.mxu3 %v2108_v22  ;;  %2734 = vmatmul.bf16.gmra.mxu0 %v6526_v32 }
 0x160   : > { %v6714_v61 = vpop.f32.mrf.mxu0 }
 0x163   : > { %2266 = vmatmul.bf16.gmra.mxu2 %v2102_v41  ;;  %v1503_v41 = vrot.slane %v6643_v13, 7  ;;  %v2113_v13 = vor.u32 %v2112_v57, %v6707_v38 }
 0x165   : > { %v1504_v44 = vor.u32 %v1503_v41, %v1500_v40  ;;  %v2114_v40 = vsel %vm2091_vm15, %v2109_v4, %v2113_v13  ;;  %v6734_v4 = vshll.u32 %v6208_v58, 16 }
 0x167   : > { %v1505_v37 = vsel %vm1452_vm1, %v1495_v6, %v1504_v44  ;;  %v6727_v6 = vshrl.u32 %v6208_v58, 16  ;;  %7823 = vst [vmem:[#allocation84_spill] sm:$0xff] %v6734_v4  ;;  %v1530_v32 = vrot.slane %v6734_v4, 7 }
 0x168   : > { %2000 = vmatmul.bf16.gmra.mxu1 %v1496_v28  ;;  %v6704_v28 = vpop.f32.mrf.mxu2 }
 0x169   : > { %7817 = vst [vmem:[#allocation78_spill] sm:$0xff] %v6704_v28  ;;  %v2115_v13 = vrot.slane %v6727_v6, 7  ;;  %v1527_v27 = vrot.slane %v6727_v6, 6 }
 0x16a   : > { %7821 = vst [vmem:[#allocation82_spill] sm:$0xff] %v6727_v6 }
 0x16e   : > { %2507 = vmatmul.bf16.gmra.mxu3 %v2111_v39  ;;  %2739 = vmatmul.bf16.gmra.mxu0 %v5505_v7  ;;  %v4914_v7 = vld [vmem:[%s7484_s1 + $0x1e0] sm:$0xff] }
 0x16f   : > { %3547 = vmatpush.bf16.msra.mxu3 %v4914_v7  ;;  %v4922_v7 = vld [vmem:[%s7484_s1 + $0x220] sm:$0xff] }
 0x170   : > { %v6699_v49 = vpop.f32.mrf.mxu3  ;;  %v6719_v41 = vpop.f32.mrf.mxu2  ;;  %3881 = vmatpush.bf16.msra.mxu0 %v4922_v7  ;;  %v6795_v7 = vshrl.u32 %v5644_v19, 16 }
 0x171   : > { %7815 = vst [vmem:[#allocation76_spill] sm:$0xff] %v6699_v49 }
 0x172   : > { %7820 = vst [vmem:[#allocation81_spill] sm:$0xff] %v6719_v41 }
 0x173   : > { %2271 = vmatmul.bf16.gmra.mxu2 %v2105_v52  ;;  %v1509_v52 = vrot.slane %v6672_v45, 6  ;;  %v4906_v45 = vld [vmem:[%s7484_s1 + $0x1a0] sm:$0xff] }
 0x174   : > { %3258 = vmatpush.bf16.msra.mxu2 %v4906_v45  ;;  %v1518_v45 = vrot.slane %v6702_v21, 6 }
 0x175   : > { %v6710_v54 = vpop.f32.mrf.mxu1 }
 0x178   : > { %v6716_v49 = vpop.f32.mrf.mxu3  ;;  %2005 = vmatmul.bf16.gmra.mxu1 %v1505_v37  ;;  %v1513_v37 = vor.u32 %v1512_v25, %v1509_v52 }
 0x179   : > { %7819 = vst [vmem:[#allocation80_spill] sm:$0xff] %v6716_v49  ;;  %v6731_v49 = vpop.f32.mrf.mxu0 }
 0x17a   : > { %v1514_v41 = vsel %vm1452_vm1, %v1504_v44, %v1513_v37  ;;  %v1521_v44 = vrot.slane %v6707_v38, 7 }
 0x17d   : > { %v6721_v28 = vpop.f32.mrf.mxu1 }
 0x17e   : > { %2512 = vmatmul.bf16.gmra.mxu3 %v2114_v40  ;;  %2744 = vmatmul.bf16.gmra.mxu0 %v5509_v10 }
 0x181   : > { %v6729_v46 = vpop.f32.mrf.mxu3 }
 0x182   : > { %7822 = vst [vmem:[#allocation83_spill] sm:$0xff] %v6729_v46  ;;  %v2116_v46 = vor.u32 %v2115_v13, %v6734_v4 }
 0x183   : > { %2276 = vmatmul.bf16.gmra.mxu2 %v2108_v22 }
 0x184   : > { %v6749_v52 = vsel %vm2091_vm15, %v2112_v57, %v2116_v46  ;;  %v4898_v46 = vld [vmem:[%s7484_s1 + $0x160] sm:$0xff]  ;;  %v6768_v57 = vshrl.u32 %v6430_v11, 16 }
 0x185   : > { %v6740_v53 = vpop.f32.mrf.mxu1  ;;  %3028 = vmatpush.bf16.msra.mxu1 %v4898_v46 }
 0x186   : > { %v6743_v10 = vpop.f32.mrf.mxu2  ;;  %7828 = vst [vmem:[#allocation89_spill] sm:$0xff] %v6768_v57  ;;  %v2118_v21 = vrot.slane %v6768_v57, 7 }
 0x187   : > { %7824 = vst [vmem:[#allocation85_spill] sm:$0xff] %v6743_v10  ;;  %v1522_v10 = vor.u32 %v1521_v44, %v1518_v45 }
 0x188   : > { %2010 = vmatmul.bf16.gmra.mxu1 %v1514_v41  ;;  %v2119_v45 = vor.u32 %v2118_v21, %v6771_v30 }
 0x189   : > { %v6746_v25 = vpop.f32.mrf.mxu3 }
 0x18a   : > { %7825 = vst [vmem:[#allocation86_spill] sm:$0xff] %v6746_v25  ;;  %v6784_v46 = vsel %vm2091_vm15, %v2115_v13, %v2119_v45  ;;  %v6798_v13 = vshll.u32 %v5644_v19, 16  ;;  %v2121_v45 = vrot.slane %v6795_v7, 7 }
 0x18b   : > { %v6751_v22 = vpop.f32.mrf.mxu0 }
 0x18d   : > { %v6756_v63 = vpop.f32.mrf.mxu1 }
 0x18e   : > { %7826 = vst [vmem:[#allocation87_spill] sm:$0xff] %v6756_v63  ;;  %2517 = vmatmul.bf16.gmra.mxu3 %v6749_v52  ;;  %2749 = vmatmul.bf16.gmra.mxu0 %v5813_v55  ;;  %v6762_v41 = vpop.f32.mrf.mxu2  ;;  %v1523_v55 = vsel %vm1452_vm1, %v1513_v37, %v1522_v10 }
 0x18f   : > { %7827 = vst [vmem:[#allocation88_spill] sm:$0xff] %v6762_v41 }
 0x191   : > { %v2478_v25 = vpop.f32.mrf.mxu3 }
 0x193   : > { %v6774_v38 = vpop.f32.mrf.mxu0  ;;  %2281 = vmatmul.bf16.gmra.mxu2 %v2111_v39 }
 0x195   : > { %v1976_v41 = vpop.f32.mrf.mxu1 }
 0x196   : > { %v6780_v5 = vpop.f32.mrf.mxu2  ;;  %v1977_v6 = vadd.f32 %v1976_v41, %v6606_v24  ;;  %v1539_v24 = vrot.slane %v6771_v30, 7 }
 0x197   : > { %7830 = vst [vmem:[#allocation91_spill] sm:$0xff] %v6780_v5  ;;  %v1531_v5 = vor.u32 %v1530_v32, %v1527_v27 }
 0x198   : > { %2015 = vmatmul.bf16.gmra.mxu1 %v1523_v55 }
 0x199   : > { %v2480_v44 = vpop.f32.mrf.mxu3 }
 0x19b   : > { %v6786_v29 = vpop.f32.mrf.mxu0 }
 0x19d   : > { %v1978_v39 = vpop.f32.mrf.mxu1 }
 0x19e   : > { %2522 = vmatmul.bf16.gmra.mxu3 %v6784_v46  ;;  %2754 = vmatmul.bf16.gmra.mxu0 %v5981_v0  ;;  %v6792_v37 = vpop.f32.mrf.mxu2  ;;  %v1532_v0 = vsel %vm1452_vm1, %v1522_v10, %v1531_v5  ;;  %v1536_v10 = vrot.slane %v6768_v57, 6 }
 0x19f   : > { %7831 = vst [vmem:[#allocation92_spill] sm:$0xff] %v6792_v37  ;;  %v2122_v37 = vor.u32 %v2121_v45, %v6798_v13 }
 0x1a1   : > { %v2483_v55 = vpop.f32.mrf.mxu3  ;;  %v6807_v27 = vsel %vm2091_vm15, %v2118_v21, %v2122_v37  ;;  %v4913_v37 = vld [vmem:[%s7484_s1 + $0x1d8] sm:$0xff] }
 0x1a2   : > { %3548 = vmatpush.bf16.msra.mxu3 %v4913_v37 }
 0x1a3   : > { %v6801_v47 = vpop.f32.mrf.mxu0  ;;  %2286 = vmatmul.bf16.gmra.mxu2 %v2114_v40  ;;  %v1979_v40 = vadd.f32 %v1978_v39, %v6625_v62  ;;  %v4905_v39 = vld [vmem:[%s7484_s1 + $0x198] sm:$0xff] }
 0x1a4   : > { %3259 = vmatpush.bf16.msra.mxu2 %v4905_v39  ;;  %v1548_v39 = vrot.slane %v6798_v13, 7 }
 0x1a5   : > { %v1981_v4 = vpop.f32.mrf.mxu1 }
 0x1a6   : > { %v2247_v26 = vpop.f32.mrf.mxu2 }
 0x1a7   : > { %v2352_v50 = vadd.f32 %v2247_v26, %v1977_v6 }
 0x1a8   : > { %2020 = vmatmul.bf16.gmra.mxu1 %v1532_v0 }
 0x1a9   : > { %v2485_v2 = vpop.f32.mrf.mxu3  ;;  %v2583_v32 = vadd.f32 %v2478_v25, %v2352_v50  ;;  %v6817_v50 = vshrl.u32 %v5646_v17, 16  ;;  %v6820_v25 = vshll.u32 %v5646_v17, 16 }
 0x1ab   : > { %v2720_v63 = vpop.f32.mrf.mxu0  ;;  %v2124_v62 = vrot.slane %v6817_v50, 7 }
 0x1ac   : > { %v6809_v60 = vadd.f32 %v2720_v63, %v2583_v32  ;;  %v1540_v63 = vor.u32 %v1539_v24, %v1536_v10 }
 0x1ad   : > { %v1983_v18 = vpop.f32.mrf.mxu1 }
 0x1ae   : > { %7832 = vst [vmem:[#allocation93_spill] sm:$0xff] %v6809_v60  ;;  %2527 = vmatmul.bf16.gmra.mxu3 %v6807_v27  ;;  %2759 = vmatmul.bf16.gmra.mxu0 %v6208_v58  ;;  %v2249_v0 = vpop.f32.mrf.mxu2  ;;  %v1541_v24 = vsel %vm1452_vm1, %v1531_v5, %v1540_v63  ;;  %v1545_v5 = vrot.slane %v6795_v7, 6 }
 0x1af   : > { %v2353_v26 = vadd.f32 %v2249_v0, %v1979_v40  ;;  %v1982_v40 = vadd.f32 %v1981_v4, %v6640_v23  ;;  %v2125_v0 = vor.u32 %v2124_v62, %v6820_v25  ;;  %v1984_v23 = vadd.f32 %v1983_v18, %v6652_v31 }
 0x1b0   : > { %v1549_v31 = vor.u32 %v1548_v39, %v1545_v5 }
 0x1b1   : > { %v2488_v21 = vpop.f32.mrf.mxu3  ;;  %v2584_v6 = vadd.f32 %v2480_v44, %v2353_v26  ;;  %v4897_v44 = vld [vmem:[%s7484_s1 + $0x158] sm:$0xff]  ;;  %v6839_v30 = vsel %vm2091_vm15, %v2121_v45, %v2125_v0 }
 0x1b2   : > { %3029 = vmatpush.bf16.msra.mxu1 %v4897_v44 }
 0x1b3   : > { %v2722_v41 = vpop.f32.mrf.mxu0  ;;  %2291 = vmatmul.bf16.gmra.mxu2 %v6749_v52 }
 0x1b4   : > { %v6833_v32 = vadd.f32 %v2722_v41, %v2584_v6 }
 0x1b5   : > { %v1986_v10 = vpop.f32.mrf.mxu1 }
 0x1b6   : > { %7833 = vst [vmem:[#allocation94_spill] sm:$0xff] %v6833_v32  ;;  %v2252_v52 = vpop.f32.mrf.mxu2 }
 0x1b7   : > { %v2354_v26 = vadd.f32 %v2252_v52, %v1982_v40  ;;  %v6855_v40 = vshll.u32 %v5859_v51, 16 }
 0x1b8   : > { %2025 = vmatmul.bf16.gmra.mxu1 %v1541_v24 }
 0x1b9   : > { %v2490_v60 = vpop.f32.mrf.mxu3  ;;  %v2585_v57 = vadd.f32 %v2483_v55, %v2354_v26  ;;  %v4921_v55 = vld [vmem:[%s7484_s1 + $0x218] sm:$0xff]  ;;  %v1987_v26 = vadd.f32 %v1986_v10, %v6683_v43  ;;  %v1554_v43 = vrot.slane %v6817_v50, 6 }
 0x1ba   : > { %3882 = vmatpush.bf16.msra.mxu0 %v4921_v55 }
 0x1bb   : > { %v2725_v6 = vpop.f32.mrf.mxu0 }
 0x1bc   : > { %v6841_v41 = vadd.f32 %v2725_v6, %v2585_v57  ;;  %v6852_v57 = vshrl.u32 %v5859_v51, 16 }
 0x1bd   : > { %v1988_v4 = vpop.f32.mrf.mxu1 }
 0x1be   : > { %7834 = vst [vmem:[#allocation95_spill] sm:$0xff] %v6841_v41  ;;  %2532 = vmatmul.bf16.gmra.mxu3 %v6839_v30  ;;  %2764 = vmatmul.bf16.gmra.mxu0 %v6430_v11  ;;  %v2254_v37 = vpop.f32.mrf.mxu2  ;;  %v2127_v24 = vrot.slane %v6852_v57, 7 }
 0x1bf   : > { %v2355_v45 = vadd.f32 %v2254_v37, %v1984_v23  ;;  %v1550_v23 = vsel %vm1452_vm1, %v1540_v63, %v1549_v31  ;;  %v1557_v63 = vrot.slane %v6820_v25, 7 }
 0x1c0   : > { %v2128_v55 = vor.u32 %v2127_v24, %v6855_v40 }
 0x1c1   : > { %v2493_v44 = vpop.f32.mrf.mxu3  ;;  %v2586_v18 = vadd.f32 %v2485_v2, %v2355_v45 }
 0x1c2   : > { %v6865_v45 = vsel %vm2091_vm15, %v2124_v62, %v2128_v55 }
 0x1c3   : > { %v2727_v52 = vpop.f32.mrf.mxu0  ;;  %2296 = vmatmul.bf16.gmra.mxu2 %v6784_v46  ;;  %v1989_v46 = vadd.f32 %v1988_v4, %v6694_v34 }
 0x1c4   : > { %v6859_v0 = vadd.f32 %v2727_v52, %v2586_v18 }
 0x1c5   : > { %v1991_v6 = vpop.f32.mrf.mxu1 }
 0x1c6   : > { %7835 = vst [vmem:[#allocation96_spill] sm:$0xff] %v6859_v0  ;;  %v2257_v37 = vpop.f32.mrf.mxu2  ;;  %v1992_v55 = vadd.f32 %v1991_v6, %v6714_v61  ;;  %v1563_v61 = vrot.slane %v6852_v57, 6 }
 0x1c7   : > { %v2356_v2 = vadd.f32 %v2257_v37, %v1987_v26 }
 0x1c8   : > { %2030 = vmatmul.bf16.gmra.mxu1 %v1550_v23  ;;  %v6878_v23 = vshll.u32 %v6006_v33, 16 }
 0x1c9   : > { %v2495_v5 = vpop.f32.mrf.mxu3  ;;  %v2587_v39 = vadd.f32 %v2488_v21, %v2356_v2  ;;  %v6875_v21 = vshrl.u32 %v6006_v33, 16 }
 0x1cb   : > { %v2730_v41 = vpop.f32.mrf.mxu0  ;;  %v2130_v34 = vrot.slane %v6875_v21, 7 }
 0x1cc   : > { %v6867_v32 = vadd.f32 %v2730_v41, %v2587_v39  ;;  %v1558_v41 = vor.u32 %v1557_v63, %v1554_v43 }
 0x1cd   : > { %v1993_v18 = vpop.f32.mrf.mxu1 }
 0x1ce   : > { %7836 = vst [vmem:[#allocation97_spill] sm:$0xff] %v6867_v32  ;;  %2537 = vmatmul.bf16.gmra.mxu3 %v6865_v45  ;;  %2769 = vmatmul.bf16.gmra.mxu0 %v5644_v19  ;;  %v2259_v10 = vpop.f32.mrf.mxu2  ;;  %v1559_v39 = vsel %vm1452_vm1, %v1549_v31, %v1558_v41  ;;  %v1566_v31 = vrot.slane %v6855_v40, 7 }
 0x1cf   : > { %v2357_v52 = vadd.f32 %v2259_v10, %v1989_v46  ;;  %v2131_v10 = vor.u32 %v2130_v34, %v6878_v23 }
 0x1d1   : > { %v2498_v62 = vpop.f32.mrf.mxu3  ;;  %v2588_v26 = vadd.f32 %v2490_v60, %v2357_v52  ;;  %v6888_v52 = vsel %vm2091_vm15, %v2127_v24, %v2131_v10 }
 0x1d3   : > { %v2732_v4 = vpop.f32.mrf.mxu0  ;;  %2301 = vmatmul.bf16.gmra.mxu2 %v6807_v27  ;;  %v1994_v27 = vadd.f32 %v1993_v18, %v6731_v49  ;;  %v4896_v49 = vld [vmem:[%s7484_s1 + $0x150] sm:$0xff]  ;;  %v6907_v18 = vshrl.u32 %v6285_v12, 16 }
 0x1d4   : > { %v6882_v37 = vadd.f32 %v2732_v4, %v2588_v26  ;;  %3030 = vmatpush.bf16.msra.mxu1 %v4896_v49 }
 0x1d5   : > { %v1996_v2 = vpop.f32.mrf.mxu1  ;;  %v2133_v10 = vrot.slane %v6907_v18, 7 }
 0x1d6   : > { %7837 = vst [vmem:[#allocation98_spill] sm:$0xff] %v6882_v37  ;;  %v2262_v46 = vpop.f32.mrf.mxu2 }
 0x1d7   : > { %v2358_v60 = vadd.f32 %v2262_v46, %v1992_v55  ;;  %v6910_v46 = vshll.u32 %v6285_v12, 16 }
 0x1d8   : > { %2035 = vmatmul.bf16.gmra.mxu1 %v1559_v39  ;;  %v1567_v39 = vor.u32 %v1566_v31, %v1563_v61 }
 0x1d9   : > { %v2500_v43 = vpop.f32.mrf.mxu3  ;;  %v2589_v63 = vadd.f32 %v2493_v44, %v2358_v60  ;;  %v4904_v44 = vld [vmem:[%s7484_s1 + $0x190] sm:$0xff]  ;;  %v2134_v31 = vor.u32 %v2133_v10, %v6910_v46 }
 0x1da   : > { %3260 = vmatpush.bf16.msra.mxu2 %v4904_v44 }
 0x1db   : > { %v2735_v32 = vpop.f32.mrf.mxu0 }
 0x1dc   : > { %v6890_v0 = vadd.f32 %v2735_v32, %v2589_v63  ;;  %v4912_v32 = vld [vmem:[%s7484_s1 + $0x1d0] sm:$0xff] }
 0x1dd   : > { %v1998_v26 = vpop.f32.mrf.mxu1  ;;  %3549 = vmatpush.bf16.msra.mxu3 %v4912_v32  ;;  %v4920_v63 = vld [vmem:[%s7484_s1 + $0x210] sm:$0xff] }
 0x1de   : > { %7838 = vst [vmem:[#allocation99_spill] sm:$0xff] %v6890_v0  ;;  %2542 = vmatmul.bf16.gmra.mxu3 %v6888_v52  ;;  %2774 = vmatmul.bf16.gmra.mxu0 %v5646_v17  ;;  %v2264_v6 = vpop.f32.mrf.mxu2 }
 0x1df   : > { %v2359_v24 = vadd.f32 %v2264_v6, %v1994_v27  ;;  %v1997_v6 = vadd.f32 %v1996_v2, %v6751_v22  ;;  %3883 = vmatpush.bf16.msra.mxu0 %v4920_v63  ;;  %v1575_v2 = vrot.slane %v6878_v23, 7 }
 0x1e1   : > { %v2503_v4 = vpop.f32.mrf.mxu3  ;;  %v2590_v55 = vadd.f32 %v2495_v5, %v2359_v24  ;;  %v1568_v5 = vsel %vm1452_vm1, %v1558_v41, %v1567_v39  ;;  %v1572_v41 = vrot.slane %v6875_v21, 6 }
 0x1e3   : > { %v2737_v60 = vpop.f32.mrf.mxu0  ;;  %2306 = vmatmul.bf16.gmra.mxu2 %v6839_v30  ;;  %v6923_v30 = vsel %vm2091_vm15, %v2130_v34, %v2134_v31 }
 0x1e4   : > { %v6917_v27 = vadd.f32 %v2737_v60, %v2590_v55  ;;  %v1999_v55 = vadd.f32 %v1998_v26, %v6774_v38 }
 0x1e5   : > { %v2001_v44 = vpop.f32.mrf.mxu1 }
 0x1e6   : > { %7839 = vst [vmem:[#allocation100_spill] sm:$0xff] %v6917_v27  ;;  %v2267_v61 = vpop.f32.mrf.mxu2  ;;  %v2002_v31 = vadd.f32 %v2001_v44, %v6786_v29  ;;  %v1581_v29 = vrot.slane %v6907_v18, 6 }
 0x1e7   : > { %v2360_v32 = vadd.f32 %v2267_v61, %v1997_v6 }
 0x1e8   : > { %2040 = vmatmul.bf16.gmra.mxu1 %v1568_v5  ;;  %v6936_v5 = vshll.u32 %v6472_v3, 16 }
 0x1e9   : > { %v2505_v49 = vpop.f32.mrf.mxu3  ;;  %v2591_v24 = vadd.f32 %v2498_v62, %v2360_v32  ;;  %v6933_v62 = vshrl.u32 %v6472_v3, 16 }
 0x1eb   : > { %v2740_v0 = vpop.f32.mrf.mxu0  ;;  %v2136_v38 = vrot.slane %v6933_v62, 7 }
 0x1ec   : > { %v6925_v37 = vadd.f32 %v2740_v0, %v2591_v24  ;;  %v1576_v0 = vor.u32 %v1575_v2, %v1572_v41 }
 0x1ed   : > { %v2003_v22 = vpop.f32.mrf.mxu1 }
 0x1ee   : > { %7840 = vst [vmem:[#allocation101_spill] sm:$0xff] %v6925_v37  ;;  %2547 = vmatmul.bf16.gmra.mxu3 %v6923_v30  ;;  %2779 = vmatmul.bf16.gmra.mxu0 %v5859_v51  ;;  %v2269_v60 = vpop.f32.mrf.mxu2  ;;  %v1577_v24 = vsel %vm1452_vm1, %v1567_v39, %v1576_v0  ;;  %v1584_v39 = vrot.slane %v6910_v46, 7 }
 0x1ef   : > { %v2361_v63 = vadd.f32 %v2269_v60, %v1999_v55  ;;  %v2137_v60 = vor.u32 %v2136_v38, %v6936_v5 }
 0x1f1   : > { %v2508_v34 = vpop.f32.mrf.mxu3  ;;  %v2592_v6 = vadd.f32 %v2500_v43, %v2361_v63  ;;  %v6946_v63 = vsel %vm2091_vm15, %v2133_v10, %v2137_v60  ;;  %v4911_v60 = vld [vmem:[%s7484_s1 + $0x1c8] sm:$0xff] }
 0x1f2   : > { %3550 = vmatpush.bf16.msra.mxu3 %v4911_v60 }
 0x1f3   : > { %v2742_v26 = vpop.f32.mrf.mxu0  ;;  %2311 = vmatmul.bf16.gmra.mxu2 %v6865_v45  ;;  %v2004_v45 = vadd.f32 %v2003_v22, %v6801_v47 }
 0x1f4   : > { %v6940_v61 = vadd.f32 %v2742_v26, %v2592_v6 }
 0x1f5   : > { %v2006_v32 = vpop.f32.mrf.mxu1 }
 0x1f6   : > { %7841 = vst [vmem:[#allocation102_spill] sm:$0xff] %v6940_v61  ;;  %v2272_v55 = vpop.f32.mrf.mxu2 }
 0x1f7   : > { %v2362_v43 = vadd.f32 %v2272_v55, %v2002_v31  ;;  %v4903_v55 = vld [vmem:[%s7484_s1 + $0x188] sm:$0xff] }
 0x1f8   : > { %2045 = vmatmul.bf16.gmra.mxu1 %v1577_v24  ;;  %v6959_v24 = vshll.u32 %v6137_v56, 16  ;;  %3261 = vmatpush.bf16.msra.mxu2 %v4903_v55  ;;  %v1593_v55 = vrot.slane %v6936_v5, 7 }
 0x1f9   : > { %v2510_v41 = vpop.f32.mrf.mxu3  ;;  %v2593_v2 = vadd.f32 %v2503_v4, %v2362_v43  ;;  %v6956_v4 = vshrl.u32 %v6137_v56, 16 }
 0x1fb   : > { %v2745_v37 = vpop.f32.mrf.mxu0  ;;  %v2139_v47 = vrot.slane %v6956_v4, 7 }
 0x1fc   : > { %v6948_v27 = vadd.f32 %v2745_v37, %v2593_v2  ;;  %v1585_v37 = vor.u32 %v1584_v39, %v1581_v29 }
 0x1fd   : > { %v2008_v6 = vpop.f32.mrf.mxu1 }
 0x1fe   : > { %7842 = vst [vmem:[#allocation103_spill] sm:$0xff] %v6948_v27  ;;  %2552 = vmatmul.bf16.gmra.mxu3 %v6946_v63  ;;  %2784 = vmatmul.bf16.gmra.mxu0 %v6006_v33  ;;  %v2274_v44 = vpop.f32.mrf.mxu2 }
 0x1ff   : > { %v2363_v26 = vadd.f32 %v2274_v44, %v2004_v45  ;;  %v1586_v45 = vsel %vm1452_vm1, %v1576_v0, %v1585_v37  ;;  %v2009_v0 = vadd.f32 %v2008_v6, %v6592_v59 }
 0x201   : > { %v2513_v10 = vpop.f32.mrf.mxu3  ;;  %v2594_v31 = vadd.f32 %v2505_v49, %v2363_v26  ;;  %v2007_v49 = vadd.f32 %v2006_v32, %v6573_v8  ;;  %v4895_v8 = vld [vmem:[%s7484_s1 + $0x148] sm:$0xff] }
 0x202   : > { %3031 = vmatpush.bf16.msra.mxu1 %v4895_v8 }
 0x203   : > { %v2747_v22 = vpop.f32.mrf.mxu0  ;;  %2316 = vmatmul.bf16.gmra.mxu2 %v6888_v52  ;;  %v2140_v52 = vor.u32 %v2139_v47, %v6959_v24 }
 0x204   : > { %v6969_v43 = vadd.f32 %v2747_v22, %v2594_v31  ;;  %v1590_v22 = vrot.slane %v6933_v62, 6 }
 0x205   : > { %v2011_v2 = vpop.f32.mrf.mxu1  ;;  %v6975_v27 = vsel %vm2091_vm15, %v2136_v38, %v2140_v52  ;;  %v4919_v38 = vld [vmem:[%s7484_s1 + $0x208] sm:$0xff] }
 0x206   : > { %7843 = vst [vmem:[#allocation104_spill] sm:$0xff] %v6969_v43  ;;  %v2277_v29 = vpop.f32.mrf.mxu2  ;;  %3884 = vmatpush.bf16.msra.mxu0 %v4919_v38 }
 0x207   : > { %v2364_v39 = vadd.f32 %v2277_v29, %v2007_v49  ;;  %v1594_v49 = vor.u32 %v1593_v55, %v1590_v22 }
 0x208   : > { %2050 = vmatmul.bf16.gmra.mxu1 %v1586_v45  ;;  %v6994_v45 = vshll.u32 %v6139_v14, 16 }
 0x209   : > { %v2515_v44 = vpop.f32.mrf.mxu3  ;;  %v2595_v26 = vadd.f32 %v2508_v34, %v2364_v39 }
 0x20b   : > { %v2750_v61 = vpop.f32.mrf.mxu0 }
 0x20c   : > { %v6980_v32 = vadd.f32 %v2750_v61, %v2595_v26  ;;  %v6991_v61 = vshrl.u32 %v6139_v14, 16  ;;  %v2012_v26 = vadd.f32 %v2011_v2, %v6603_v15  ;;  %v1599_v15 = vrot.slane %v6956_v4, 6 }
 0x20d   : > { %v2013_v31 = vpop.f32.mrf.mxu1 }
 0x20e   : > { %7844 = vst [vmem:[#allocation105_spill] sm:$0xff] %v6980_v32  ;;  %2557 = vmatmul.bf16.gmra.mxu3 %v6975_v27  ;;  %2789 = vmatmul.bf16.gmra.mxu0 %v6285_v12  ;;  %v2279_v34 = vpop.f32.mrf.mxu2  ;;  %v2142_v29 = vrot.slane %v6991_v61, 7 }
 0x20f   : > { %v2365_v60 = vadd.f32 %v2279_v34, %v2009_v0  ;;  %v1595_v0 = vsel %vm1452_vm1, %v1585_v37, %v1594_v49  ;;  %v1602_v37 = vrot.slane %v6959_v24, 7 }
 0x210   : > { %v2143_v38 = vor.u32 %v2142_v29, %v6994_v45 }
 0x211   : > { %v2518_v59 = vpop.f32.mrf.mxu3  ;;  %v2596_v6 = vadd.f32 %v2510_v41, %v2365_v60 }
 0x212   : > { %v7004_v60 = vsel %vm2091_vm15, %v2139_v47, %v2143_v38 }
 0x213   : > { %v2752_v52 = vpop.f32.mrf.mxu0  ;;  %2321 = vmatmul.bf16.gmra.mxu2 %v6923_v30  ;;  %v2014_v30 = vadd.f32 %v2013_v31, %v6623_v35 }
 0x214   : > { %v6998_v39 = vadd.f32 %v2752_v52, %v2596_v6 }
 0x215   : > { %v2016_v8 = vpop.f32.mrf.mxu1 }
 0x216   : > { %7845 = vst [vmem:[#allocation106_spill] sm:$0xff] %v6998_v39  ;;  %v2282_v34 = vpop.f32.mrf.mxu2  ;;  %v2017_v38 = vadd.f32 %v2016_v8, %v6632_v20  ;;  %v1608_v20 = vrot.slane %v6991_v61, 6 }
 0x217   : > { %v2366_v41 = vadd.f32 %v2282_v34, %v2012_v26 }
 0x218   : > { %2055 = vmatmul.bf16.gmra.mxu1 %v1595_v0  ;;  %v7017_v0 = vshll.u32 %v6364_v1, 16 }
 0x219   : > { %v2520_v22 = vpop.f32.mrf.mxu3  ;;  %v2597_v55 = vadd.f32 %v2513_v10, %v2366_v41  ;;  %v7014_v10 = vshrl.u32 %v6364_v1, 16 }
 0x21b   : > { %v2755_v32 = vpop.f32.mrf.mxu0  ;;  %v2145_v35 = vrot.slane %v7014_v10, 7 }
 0x21c   : > { %v7006_v43 = vadd.f32 %v2755_v32, %v2597_v55  ;;  %v1603_v32 = vor.u32 %v1602_v37, %v1599_v15 }
 0x21d   : > { %v2018_v6 = vpop.f32.mrf.mxu1 }
 0x21e   : > { %7846 = vst [vmem:[#allocation107_spill] sm:$0xff] %v7006_v43  ;;  %2562 = vmatmul.bf16.gmra.mxu3 %v7004_v60  ;;  %2794 = vmatmul.bf16.gmra.mxu0 %v6472_v3  ;;  %v2284_v2 = vpop.f32.mrf.mxu2  ;;  %v1604_v55 = vsel %vm1452_vm1, %v1594_v49, %v1603_v32  ;;  %v1611_v49 = vrot.slane %v6994_v45, 7 }
 0x21f   : > { %v2367_v52 = vadd.f32 %v2284_v2, %v2014_v30  ;;  %v2146_v2 = vor.u32 %v2145_v35, %v7017_v0 }
 0x221   : > { %v2523_v47 = vpop.f32.mrf.mxu3  ;;  %v2598_v26 = vadd.f32 %v2515_v44, %v2367_v52  ;;  %v7027_v52 = vsel %vm2091_vm15, %v2142_v29, %v2146_v2  ;;  %v4910_v2 = vld [vmem:[%s7484_s1 + $0x1c0] sm:$0xff] }
 0x222   : > { %3551 = vmatpush.bf16.msra.mxu3 %v4910_v2  ;;  %v1620_v2 = vrot.slane %v7017_v0, 7 }
 0x223   : > { %v2757_v31 = vpop.f32.mrf.mxu0  ;;  %2326 = vmatmul.bf16.gmra.mxu2 %v6946_v63  ;;  %v2019_v63 = vadd.f32 %v2018_v6, %v6650_v36  ;;  %v1612_v6 = vor.u32 %v1611_v49, %v1608_v20 }
 0x224   : > { %v7021_v34 = vadd.f32 %v2757_v31, %v2598_v26 }
 0x225   : > { %v2021_v41 = vpop.f32.mrf.mxu1  ;;  %v1613_v20 = vsel %vm1452_vm1, %v1603_v32, %v1612_v6 }
 0x226   : > { %7847 = vst [vmem:[#allocation108_spill] sm:$0xff] %v7021_v34  ;;  %v2287_v30 = vpop.f32.mrf.mxu2 }
 0x227   : > { %v2368_v44 = vadd.f32 %v2287_v30, %v2017_v38  ;;  %v7043_v38 = vshll.u32 %v5756_v9, 16 }
 0x228   : > { %2060 = vmatmul.bf16.gmra.mxu1 %v1604_v55 }
 0x229   : > { %v2525_v15 = vpop.f32.mrf.mxu3  ;;  %v2599_v37 = vadd.f32 %v2518_v59, %v2368_v44  ;;  %v4902_v59 = vld [vmem:[%s7484_s1 + $0x180] sm:$0xff] }
 0x22a   : > { %3262 = vmatpush.bf16.msra.mxu2 %v4902_v59  ;;  %v4894_v44 = vld [vmem:[%s7484_s1 + $0x140] sm:$0xff] }
 0x22b   : > { %v2760_v43 = vpop.f32.mrf.mxu0  ;;  %3032 = vmatpush.bf16.msra.mxu1 %v4894_v44  ;;  %v7072_v44 = vshrl.u32 %v5762_v16, 16 }
 0x22c   : > { %v7029_v39 = vadd.f32 %v2760_v43, %v2599_v37  ;;  %v7040_v43 = vshrl.u32 %v5756_v9, 16 }
 0x22d   : > { %v2023_v26 = vpop.f32.mrf.mxu1  ;;  %7850 = vst [vmem:[#allocation111_spill] sm:$0xff] %v7072_v44 }
 0x22e   : > { %7848 = vst [vmem:[#allocation109_spill] sm:$0xff] %v7029_v39  ;;  %2567 = vmatmul.bf16.gmra.mxu3 %v7027_v52  ;;  %2799 = vmatmul.bf16.gmra.mxu0 %v6137_v56  ;;  %v2289_v8 = vpop.f32.mrf.mxu2  ;;  %v2148_v55 = vrot.slane %v7040_v43, 7  ;;  %v2024_v32 = vadd.f32 %v2023_v26, %v6692_v48  ;;  %v2398_v48 = vrot.slane %v7072_v44, 7  ;;  %v7076_v26 = vshll.u32 %v5762_v16, 16 }
 0x22f   : > { %v2369_v29 = vadd.f32 %v2289_v8, %v2019_v63 }
 0x230   : > { %7851 = vst [vmem:[#allocation112_spill] sm:$0xff] %v7076_v26 }
 0x231   : > { %v2528_v31 = vpop.f32.mrf.mxu3  ;;  %v2600_v36 = vadd.f32 %v2520_v22, %v2369_v29  ;;  %v2022_v22 = vadd.f32 %v2021_v41, %v6677_v42  ;;  %v4918_v42 = vld [vmem:[%s7484_s1 + $0x200] sm:$0xff] }
 0x232   : > { %3885 = vmatpush.bf16.msra.mxu0 %v4918_v42 }
 0x233   : > { %v2762_v30 = vpop.f32.mrf.mxu0  ;;  %2331 = vmatmul.bf16.gmra.mxu2 %v6975_v27  ;;  %v2149_v27 = vor.u32 %v2148_v55, %v7043_v38 }
 0x234   : > { %v7053_v37 = vadd.f32 %v2762_v30, %v2600_v36  ;;  %v1617_v30 = vrot.slane %v7014_v10, 6 }
 0x235   : > { %v2026_v63 = vpop.f32.mrf.mxu1  ;;  %v7059_v39 = vsel %vm2091_vm15, %v2145_v35, %v2149_v27 }
 0x236   : > { %v2292_v49 = vpop.f32.mrf.mxu2 }
 0x237   : > { %v2370_v8 = vadd.f32 %v2292_v49, %v2022_v22 }
 0x238   : > { %2065 = vmatmul.bf16.gmra.mxu1 %v1613_v20  ;;  %v1621_v20 = vor.u32 %v1620_v2, %v1617_v30 }
 0x239   : > { %v2530_v59 = vpop.f32.mrf.mxu3  ;;  %v2601_v29 = vadd.f32 %v2523_v47, %v2370_v8  ;;  %v2027_v8 = vadd.f32 %v2026_v63, %v6710_v54  ;;  %v1626_v54 = vrot.slane %v7040_v43, 6 }
 0x23a   : > { %v1622_v42 = vsel %vm1452_vm1, %v1612_v6, %v1621_v20  ;;  %v1629_v6 = vrot.slane %v7043_v38, 7 }
 0x23b   : > { %v2765_v34 = vpop.f32.mrf.mxu0 }
 0x23c   : > { %v7064_v41 = vadd.f32 %v2765_v34, %v2601_v29 }
 0x23d   : > { %v2028_v36 = vpop.f32.mrf.mxu1 }
 0x23e   : > { %7849 = vst [vmem:[#allocation110_spill] sm:$0xff] %v7064_v41  ;;  %2572 = vmatmul.bf16.gmra.mxu3 %v7059_v39  ;;  %2804 = vmatmul.bf16.gmra.mxu0 %v6139_v14  ;;  %v2294_v47 = vpop.f32.mrf.mxu2 }
 0x23f   : > { %v2371_v35 = vadd.f32 %v2294_v47, %v2024_v32  ;;  %v2401_v47 = vor.u32 %v7076_v26, %v2398_v48 }
 0x241   : > { %v2533_v22 = vpop.f32.mrf.mxu3  ;;  %v2602_v34 = vadd.f32 %v2525_v15, %v2371_v35  ;;  %v2402_v35 = vsel %vm2091_vm15, %v2148_v55, %v2401_v47  ;;  %v7855_v47 = vld [vmem:[#allocation33_spill] sm:$0xff]  ;;  %vm7399_vm15 = vmand %vm2957_vm12, %vm2867_vm9 }
 0x243   : > { %v2767_v49 = vpop.f32.mrf.mxu0  ;;  %2336 = vmatmul.bf16.gmra.mxu2 %v7004_v60  ;;  %v2029_v60 = vadd.f32 %v2028_v36, %v6721_v28 }
 0x244   : > { %v7079_v27 = vadd.f32 %v2767_v49, %v2602_v34 }
 0x245   : > { %v2031_v29 = vpop.f32.mrf.mxu1 }
 0x246   : > { %7852 = vst [vmem:[#allocation113_spill] sm:$0xff] %v7079_v27  ;;  %v2297_v32 = vpop.f32.mrf.mxu2  ;;  %v2032_v28 = vadd.f32 %v2031_v29, %v6740_v53 }
 0x247   : > { %v2372_v15 = vadd.f32 %v2297_v32, %v2027_v8 }
 0x248   : > { %2070 = vmatmul.bf16.gmra.mxu1 %v1622_v42 }
 0x249   : > { %v2535_v30 = vpop.f32.mrf.mxu3  ;;  %v2603_v2 = vadd.f32 %v2528_v31, %v2372_v15  ;;  %v1630_v31 = vor.u32 %v1629_v6, %v1626_v54  ;;  %v3412_v15 = vrot.slane %v7855_v47, 1 }
 0x24b   : > { %v2770_v44 = vpop.f32.mrf.mxu0 }
 0x24c   : > { %v7085_v41 = vadd.f32 %v2770_v44, %v2603_v2  ;;  %v1631_v44 = vsel %vm1452_vm1, %v1621_v20, %v1630_v31  ;;  %v7856_v2 = vld [vmem:[#allocation44_spill] sm:$0xff]  ;;  %v7859_v20 = vld [vmem:[#allocation53_spill] sm:$0xff] }
 0x24d   : > { %v2033_v34 = vpop.f32.mrf.mxu1 }
 0x24e   : > { %7853 = vst [vmem:[#allocation114_spill] sm:$0xff] %v7085_v41  ;;  %2577 = vmatmul.bf16.gmra.mxu3 %v2402_v35  ;;  %2809 = vmatmul.bf16.gmra.mxu0 %v6364_v1  ;;  %v2299_v63 = vpop.f32.mrf.mxu2  ;;  %v3413_v35 = vrot.slane %v7856_v2, 1 }
 0x24f   : > { %v2373_v48 = vadd.f32 %v2299_v63, %v2029_v60  ;;  %v7858_v63 = vld [vmem:[#allocation87_spill] sm:$0xff] }
 0x250   : > { %v3414_v54 = vsel %vm3411_vm14, %v3412_v15, %v3413_v35  ;;  %v2034_v53 = vadd.f32 %v2033_v34, %v7858_v63  ;;  %v7862_v34 = vld [vmem:[#allocation57_spill] sm:$0xff]  ;;  %v7864_v15 = vld [vmem:[#allocation62_spill] sm:$0xff] }
 0x251   : > { %v2538_v49 = vpop.f32.mrf.mxu3  ;;  %v2604_v8 = vadd.f32 %v2530_v59, %v2373_v48  ;;  %v7602_v48 = vrot.slane %v7859_v20, 1 }
 0x253   : > { %v2772_v42 = vpop.f32.mrf.mxu0  ;;  %2341 = vmatmul.bf16.gmra.mxu2 %v7027_v52 }
 0x254   : > { %v7092_v55 = vadd.f32 %v2772_v42, %v2604_v8 }
 0x255   : > { %v2036_v36 = vpop.f32.mrf.mxu1 }
 0x256   : > { %7854 = vst [vmem:[#allocation115_spill] sm:$0xff] %v7092_v55  ;;  %v2302_v32 = vpop.f32.mrf.mxu2  ;;  %v2037_v2 = vadd.f32 %v2036_v36, %v7864_v15  ;;  %v7869_v36 = vld [vmem:[#allocation64_spill] sm:$0xff] }
 0x257   : > { %v2374_v41 = vadd.f32 %v2302_v32, %v2032_v28  ;;  %v2870_v32 = vrot.slane %v7862_v34, 1 }
 0x258   : > { %2075 = vmatmul.bf16.gmra.mxu1 %v1631_v44  ;;  %v7860_v44 = vld [vmem:[#allocation51_spill] sm:$0xff] }
 0x259   : > { %v2540_v59 = vpop.f32.mrf.mxu3  ;;  %v2605_v60 = vadd.f32 %v2533_v22, %v2374_v41  ;;  %v7107_v41 = vor.u32 %v7602_v48, %v7860_v44 }
 0x25b   : > { %v2775_v52 = vpop.f32.mrf.mxu0  ;;  %7861 = vst [vmem:[#allocation44_spill] sm:$0xff] %v7107_v41 }
 0x25c   : > { %v7099_v6 = vadd.f32 %v2775_v52, %v2605_v60  ;;  %v7865_v52 = vld [vmem:[#allocation55_spill] sm:$0xff] }
 0x25d   : > { %v2038_v29 = vpop.f32.mrf.mxu1  ;;  %v3415_v63 = vrot.slane %v7865_v52, 1 }
 0x25e   : > { %7857 = vst [vmem:[#allocation33_spill] sm:$0xff] %v7099_v6  ;;  %3552 = vmatmul.bf16.vlgmr.msra.gmra.mxu3 %v3414_v54  ;;  %2814 = vmatmul.bf16.gmra.mxu0 %v5756_v9  ;;  %v2304_v8 = vpop.f32.mrf.mxu2  ;;  %v2871_v54 = vsel %vm2867_vm9, %v7107_v41, %v2870_v32  ;;  %v7866_v6 = vld [vmem:[#allocation56_spill] sm:$0xff]  ;;  %v2039_v15 = vadd.f32 %v2038_v29, %v7869_v36 }
 0x25f   : > { %v2375_v31 = vadd.f32 %v2304_v8, %v2034_v53  ;;  %v3416_v48 = vsel %vm3411_vm14, %v3413_v35, %v3415_v63  ;;  %v2872_v44 = vor.u32 %v2870_v32, %v7866_v6  ;;  %v3701_v32 = vrot.slane %v7866_v6, 1 }
 0x261   : > { %v2543_v42 = vpop.f32.mrf.mxu3  ;;  %v2606_v28 = vadd.f32 %v2535_v30, %v2375_v31 }
 0x263   : > { %v2777_v22 = vpop.f32.mrf.mxu0  ;;  %2346 = vmatmul.bf16.gmra.mxu2 %v7059_v39 }
 0x264   : > { %v7111_v47 = vadd.f32 %v2777_v22, %v2606_v28  ;;  %v7867_v28 = vld [vmem:[#allocation59_spill] sm:$0xff] }
 0x265   : > { %v2041_v60 = vpop.f32.mrf.mxu1  ;;  %v2873_v22 = vrot.slane %v7867_v28, 1  ;;  %v3705_v29 = vrot.slane %v7867_v28, 2 }
 0x266   : > { %7863 = vst [vmem:[#allocation87_spill] sm:$0xff] %v7111_v47  ;;  %v2307_v30 = vpop.f32.mrf.mxu2 }
 0x267   : > { %v2376_v53 = vadd.f32 %v2307_v30, %v2037_v2 }
 0x268   : > { %3033 = vmatmul.bf16.vlgmr.msra.gmra.mxu1 %v2871_v54  ;;  %v2874_v54 = vsel %vm2867_vm9, %v2872_v44, %v2873_v22 }
 0x269   : > { %v2545_v8 = vpop.f32.mrf.mxu3  ;;  %v2607_v31 = vadd.f32 %v2538_v49, %v2376_v53  ;;  %v3702_v53 = vrot.slane %v7862_v34, 2 }
 0x26b   : > { %v2780_v39 = vpop.f32.mrf.mxu0  ;;  %v3703_v55 = vor.u32 %v3702_v53, %v3701_v32 }
 0x26c   : > { %v7120_v47 = vadd.f32 %v2780_v39, %v2607_v31  ;;  %v7870_v31 = vld [vmem:[#allocation58_spill] sm:$0xff] }
 0x26d   : > { %v2043_v20 = vpop.f32.mrf.mxu1  ;;  %v3704_v39 = vrot.slane %v7870_v31, 1 }
 0x26e   : > { %7868 = vst [vmem:[#allocation57_spill] sm:$0xff] %v7120_v47  ;;  %3557 = vmatmul.bf16.gmra.mxu3 %v3416_v48  ;;  %2819 = vmatmul.bf16.gmra.mxu0 %v5762_v16  ;;  %v2309_v52 = vpop.f32.mrf.mxu2  ;;  %v7872_v48 = vld [vmem:[#allocation66_spill] sm:$0xff] }
 0x26f   : > { %v2377_v2 = vadd.f32 %v2309_v52, %v2039_v15  ;;  %v2042_v47 = vadd.f32 %v2041_v60, %v7872_v48  ;;  %v7873_v52 = vld [vmem:[#allocation6_spill] sm:$0xff] }
 0x270   : > { %v3417_v44 = vrot.slane %v7873_v52, 1 }
 0x271   : > { %v2548_v49 = vpop.f32.mrf.mxu3  ;;  %v2608_v30 = vadd.f32 %v2540_v59, %v2377_v2  ;;  %v3706_v59 = vor.u32 %v3705_v29, %v3704_v39 }
 0x272   : > { %v3418_v34 = vsel %vm3411_vm14, %v3415_v63, %v3417_v44 }
 0x273   : > { %v2782_v35 = vpop.f32.mrf.mxu0  ;;  %3263 = vmatmul.bf16.vlgmr.msra.gmra.mxu2 %v2874_v54  ;;  %v3707_v28 = vsel %vm3700_vm13, %v3703_v55, %v3706_v59  ;;  %v7877_v55 = vld [vmem:[#allocation60_spill] sm:$0xff] }
 0x274   : > { %v7129_v36 = vadd.f32 %v2782_v35, %v2608_v30  ;;  %v2875_v30 = vor.u32 %v2873_v22, %v7870_v31  ;;  %v7874_v35 = vld [vmem:[#allocation61_spill] sm:$0xff]  ;;  %v3708_v29 = vrot.slane %v7877_v55, 1 }
 0x275   : > { %v2046_v41 = vpop.f32.mrf.mxu1  ;;  %v2876_v60 = vrot.slane %v7874_v35, 1  ;;  %v3709_v22 = vrot.slane %v7874_v35, 2 }
 0x276   : > { %7871 = vst [vmem:[#allocation62_spill] sm:$0xff] %v7129_v36  ;;  %v2312_v15 = vpop.f32.mrf.mxu2  ;;  %v7876_v36 = vld [vmem:[#allocation69_spill] sm:$0xff] }
 0x277   : > { %v2378_v2 = vadd.f32 %v2312_v15, %v2042_v47  ;;  %v2044_v52 = vadd.f32 %v2043_v20, %v7876_v36  ;;  %v7880_v15 = vld [vmem:[#allocation7_spill] sm:$0xff]  ;;  %v2878_v35 = vor.u32 %v2876_v60, %v7877_v55 }
 0x278   : > { %3038 = vmatmul.bf16.gmra.mxu1 %v2874_v54 }
 0x279   : > { %v2550_v6 = vpop.f32.mrf.mxu3  ;;  %v2609_v27 = vadd.f32 %v2543_v42, %v2378_v2  ;;  %v2877_v42 = vsel %vm2867_vm9, %v2875_v30, %v2876_v60  ;;  %v3419_v2 = vrot.slane %v7880_v15, 1  ;;  %v7886_v15 = vld [vmem:[#allocation78_spill] sm:$0xff] }
 0x27b   : > { %v2785_v26 = vpop.f32.mrf.mxu0 }
 0x27c   : > { %v7137_v48 = vadd.f32 %v2785_v26, %v2609_v27  ;;  %v7879_v26 = vld [vmem:[#allocation71_spill] sm:$0xff] }
 0x27d   : > { %v2048_v32 = vpop.f32.mrf.mxu1  ;;  %v2047_v27 = vadd.f32 %v2046_v41, %v7879_v26  ;;  %v7883_v41 = vld [vmem:[#allocation75_spill] sm:$0xff] }
 0x27e   : > { %7875 = vst [vmem:[#allocation55_spill] sm:$0xff] %v7137_v48  ;;  %3562 = vmatmul.bf16.gmra.mxu3 %v3418_v34  ;;  %3886 = vmatmul.bf16.vlgmr.msra.gmra.mxu0 %v3707_v28  ;;  %v2314_v47 = vpop.f32.mrf.mxu2  ;;  %v3710_v34 = vor.u32 %v3709_v22, %v3708_v29  ;;  %v2049_v26 = vadd.f32 %v2048_v32, %v7883_v41 }
 0x27f   : > { %v2379_v54 = vadd.f32 %v2314_v47, %v2044_v52 }
 0x281   : > { %v2553_v53 = vpop.f32.mrf.mxu3  ;;  %v2610_v63 = vadd.f32 %v2545_v8, %v2379_v54  ;;  %v3420_v8 = vsel %vm3411_vm14, %v3417_v44, %v3419_v2  ;;  %v3711_v54 = vsel %vm3700_vm13, %v3706_v59, %v3710_v34  ;;  %v7884_v59 = vld [vmem:[#allocation63_spill] sm:$0xff] }
 0x283   : > { %v2787_v39 = vpop.f32.mrf.mxu0  ;;  %3268 = vmatmul.bf16.gmra.mxu2 %v2877_v42 }
 0x284   : > { %v7143_v31 = vadd.f32 %v2787_v39, %v2610_v63  ;;  %v7881_v63 = vld [vmem:[#allocation65_spill] sm:$0xff] }
 0x285   : > { %v2051_v20 = vpop.f32.mrf.mxu1  ;;  %v2879_v39 = vrot.slane %v7881_v63, 1  ;;  %v3713_v60 = vrot.slane %v7881_v63, 2 }
 0x286   : > { %7878 = vst [vmem:[#allocation56_spill] sm:$0xff] %v7143_v31  ;;  %v2317_v36 = vpop.f32.mrf.mxu2 }
 0x287   : > { %v2380_v28 = vadd.f32 %v2317_v36, %v2047_v27  ;;  %v3712_v36 = vrot.slane %v7884_v59, 1  ;;  %v2881_v63 = vor.u32 %v2879_v39, %v7884_v59 }
 0x288   : > { %3043 = vmatmul.bf16.gmra.mxu1 %v2877_v42 }
 0x289   : > { %v2555_v30 = vpop.f32.mrf.mxu3  ;;  %v2611_v52 = vadd.f32 %v2548_v49, %v2380_v28  ;;  %v2880_v49 = vsel %vm2867_vm9, %v2878_v35, %v2879_v39  ;;  %v2052_v28 = vadd.f32 %v2051_v20, %v7886_v15  ;;  %v7890_v20 = vld [vmem:[#allocation81_spill] sm:$0xff] }
 0x28b   : > { %v2790_v47 = vpop.f32.mrf.mxu0 }
 0x28c   : > { %v7151_v31 = vadd.f32 %v2790_v47, %v2611_v52 }
 0x28d   : > { %v2053_v48 = vpop.f32.mrf.mxu1 }
 0x28e   : > { %7882 = vst [vmem:[#allocation59_spill] sm:$0xff] %v7151_v31  ;;  %3567 = vmatmul.bf16.gmra.mxu3 %v3420_v8  ;;  %3891 = vmatmul.bf16.gmra.mxu0 %v3711_v54  ;;  %v2319_v29 = vpop.f32.mrf.mxu2  ;;  %v7887_v8 = vld [vmem:[#allocation18_spill] sm:$0xff]  ;;  %v3714_v54 = vor.u32 %v3713_v60, %v3712_v36  ;;  %v2054_v15 = vadd.f32 %v2053_v48, %v7890_v20 }
 0x28f   : > { %v2381_v42 = vadd.f32 %v2319_v29, %v2049_v26  ;;  %v3421_v47 = vrot.slane %v7887_v8, 1  ;;  %v7893_v8 = vld [vmem:[#allocation85_spill] sm:$0xff] }
 0x291   : > { %v2558_v22 = vpop.f32.mrf.mxu3  ;;  %v2612_v44 = vadd.f32 %v2550_v6, %v2381_v42  ;;  %v3422_v6 = vsel %vm3411_vm14, %v3419_v2, %v3421_v47  ;;  %v3715_v42 = vsel %vm3700_vm13, %v3710_v34, %v3714_v54  ;;  %v7891_v34 = vld [vmem:[#allocation67_spill] sm:$0xff] }
 0x293   : > { %v2792_v27 = vpop.f32.mrf.mxu0  ;;  %3273 = vmatmul.bf16.gmra.mxu2 %v2880_v49 }
 0x294   : > { %v7157_v55 = vadd.f32 %v2792_v27, %v2612_v44  ;;  %v7888_v44 = vld [vmem:[#allocation68_spill] sm:$0xff] }
 0x295   : > { %v2056_v32 = vpop.f32.mrf.mxu1  ;;  %v2882_v27 = vrot.slane %v7888_v44, 1  ;;  %v3717_v39 = vrot.slane %v7888_v44, 2 }
 0x296   : > { %7885 = vst [vmem:[#allocation64_spill] sm:$0xff] %v7157_v55  ;;  %v2322_v52 = vpop.f32.mrf.mxu2 }
 0x297   : > { %v2382_v41 = vadd.f32 %v2322_v52, %v2052_v28  ;;  %v3716_v52 = vrot.slane %v7891_v34, 1  ;;  %v2884_v44 = vor.u32 %v2882_v27, %v7891_v34 }
 0x298   : > { %3048 = vmatmul.bf16.gmra.mxu1 %v2880_v49 }
 0x299   : > { %v2560_v35 = vpop.f32.mrf.mxu3  ;;  %v2613_v26 = vadd.f32 %v2553_v53, %v2382_v41  ;;  %v2883_v53 = vsel %vm2867_vm9, %v2881_v63, %v2882_v27  ;;  %v2057_v41 = vadd.f32 %v2056_v32, %v7893_v8  ;;  %v7896_v32 = vld [vmem:[#allocation88_spill] sm:$0xff] }
 0x29b   : > { %v2795_v29 = vpop.f32.mrf.mxu0 }
 0x29c   : > { %v7165_v55 = vadd.f32 %v2795_v29, %v2613_v26 }
 0x29d   : > { %v2058_v31 = vpop.f32.mrf.mxu1 }
 0x29e   : > { %7889 = vst [vmem:[#allocation58_spill] sm:$0xff] %v7165_v55  ;;  %3572 = vmatmul.bf16.gmra.mxu3 %v3422_v6  ;;  %3896 = vmatmul.bf16.gmra.mxu0 %v3715_v42  ;;  %v2324_v36 = vpop.f32.mrf.mxu2  ;;  %v7894_v6 = vld [vmem:[#allocation27_spill] sm:$0xff]  ;;  %v3718_v42 = vor.u32 %v3717_v39, %v3716_v52  ;;  %v2059_v8 = vadd.f32 %v2058_v31, %v7896_v32 }
 0x29f   : > { %v2383_v49 = vadd.f32 %v2324_v36, %v2054_v15  ;;  %v3423_v29 = vrot.slane %v7894_v6, 1  ;;  %v7899_v6 = vld [vmem:[#allocation91_spill] sm:$0xff] }
 0x2a1   : > { %v2563_v60 = vpop.f32.mrf.mxu3  ;;  %v2614_v2 = vadd.f32 %v2555_v30, %v2383_v49  ;;  %v3424_v30 = vsel %vm3411_vm14, %v3421_v47, %v3423_v29  ;;  %v3719_v49 = vsel %vm3700_vm13, %v3714_v54, %v3718_v42  ;;  %v7897_v54 = vld [vmem:[#allocation72_spill] sm:$0xff] }
 0x2a3   : > { %v2797_v28 = vpop.f32.mrf.mxu0  ;;  %3278 = vmatmul.bf16.gmra.mxu2 %v2883_v53 }
 0x2a4   : > { %v7171_v59 = vadd.f32 %v2797_v28, %v2614_v2  ;;  %v7895_v2 = vld [vmem:[#allocation73_spill] sm:$0xff] }
 0x2a5   : > { %v2061_v48 = vpop.f32.mrf.mxu1  ;;  %v2885_v28 = vrot.slane %v7895_v2, 1  ;;  %v3721_v27 = vrot.slane %v7895_v2, 2 }
 0x2a6   : > { %7892 = vst [vmem:[#allocation66_spill] sm:$0xff] %v7171_v59  ;;  %v2327_v26 = vpop.f32.mrf.mxu2 }
 0x2a7   : > { %v2384_v20 = vadd.f32 %v2327_v26, %v2057_v41  ;;  %v3720_v26 = vrot.slane %v7897_v54, 1  ;;  %v2887_v2 = vor.u32 %v2885_v28, %v7897_v54 }
 0x2a8   : > { %3053 = vmatmul.bf16.gmra.mxu1 %v2883_v53 }
 0x2a9   : > { %v2565_v63 = vpop.f32.mrf.mxu3  ;;  %v2615_v15 = vadd.f32 %v2558_v22, %v2384_v20  ;;  %v2886_v22 = vsel %vm2867_vm9, %v2884_v44, %v2885_v28  ;;  %v2062_v20 = vadd.f32 %v2061_v48, %v7899_v6  ;;  %v7901_v48 = vld [vmem:[#allocation92_spill] sm:$0xff] }
 0x2ab   : > { %v2800_v36 = vpop.f32.mrf.mxu0 }
 0x2ac   : > { %v7179_v59 = vadd.f32 %v2800_v36, %v2615_v15  ;;  %v3722_v36 = vor.u32 %v3721_v27, %v3720_v26 }
 0x2ad   : > { %v2063_v55 = vpop.f32.mrf.mxu1 }
 0x2ae   : > { %3577 = vmatmul.bf16.gmra.mxu3 %v3424_v30  ;;  %3901 = vmatmul.bf16.gmra.mxu0 %v3719_v49  ;;  %v2329_v52 = vpop.f32.mrf.mxu2  ;;  %v3425_v30 = vrot.slane %v6208_v58, 1  ;;  %v2064_v6 = vadd.f32 %v2063_v55, %v7901_v48 }
 0x2af   : > { %v2385_v53 = vadd.f32 %v2329_v52, %v2059_v8  ;;  %v3723_v52 = vsel %vm3700_vm13, %v3718_v42, %v3722_v36  ;;  %v7902_v42 = vld [vmem:[#allocation77_spill] sm:$0xff] }
 0x2b1   : > { %v2568_v39 = vpop.f32.mrf.mxu3  ;;  %v2616_v47 = vadd.f32 %v2560_v35, %v2385_v53  ;;  %v3426_v35 = vsel %vm3411_vm14, %v3423_v29, %v3425_v30  ;;  %v7900_v53 = vld [vmem:[#allocation79_spill] sm:$0xff] }
 0x2b2   : > { %v3725_v28 = vrot.slane %v7900_v53, 2 }
 0x2b3   : > { %v2802_v41 = vpop.f32.mrf.mxu0  ;;  %3283 = vmatmul.bf16.gmra.mxu2 %v2886_v22 }
 0x2b4   : > { %v7185_v34 = vadd.f32 %v2802_v41, %v2616_v47  ;;  %v2888_v47 = vrot.slane %v7900_v53, 1 }
 0x2b5   : > { %v2066_v31 = vpop.f32.mrf.mxu1 }
 0x2b6   : > { %7898 = vst [vmem:[#allocation6_spill] sm:$0xff] %v7185_v34  ;;  %v2332_v15 = vpop.f32.mrf.mxu2  ;;  %v2890_v53 = vor.u32 %v2888_v47, %v7902_v42 }
 0x2b7   : > { %v2386_v49 = vadd.f32 %v2332_v15, %v2062_v20  ;;  %v3724_v20 = vrot.slane %v7902_v42, 1  ;;  %v7904_v15 = vld [vmem:[#allocation70_spill] sm:$0xff] }
 0x2b8   : > { %3058 = vmatmul.bf16.gmra.mxu1 %v2886_v22 }
 0x2b9   : > { %v2570_v44 = vpop.f32.mrf.mxu3  ;;  %v2617_v32 = vadd.f32 %v2563_v60, %v2386_v49  ;;  %v2889_v60 = vsel %vm2867_vm9, %v2887_v2, %v2888_v47  ;;  %v2067_v49 = vadd.f32 %v2066_v31, %v7904_v15  ;;  %v7906_v31 = vld [vmem:[#allocation74_spill] sm:$0xff] }
 0x2bb   : > { %v2805_v8 = vpop.f32.mrf.mxu0 }
 0x2bc   : > { %v7193_v41 = vadd.f32 %v2805_v8, %v2617_v32  ;;  %v3726_v8 = vor.u32 %v3725_v28, %v3724_v20 }
 0x2bd   : > { %v2068_v34 = vpop.f32.mrf.mxu1 }
 0x2be   : > { %3582 = vmatmul.bf16.gmra.mxu3 %v3426_v35  ;;  %3906 = vmatmul.bf16.gmra.mxu0 %v3723_v52  ;;  %v2334_v58 = vpop.f32.mrf.mxu2  ;;  %v3427_v35 = vrot.slane %v6430_v11, 1  ;;  %v2069_v15 = vadd.f32 %v2068_v34, %v7906_v31 }
 0x2bf   : > { %v2387_v22 = vadd.f32 %v2334_v58, %v2064_v6  ;;  %v3727_v58 = vsel %vm3700_vm13, %v3722_v36, %v3726_v8  ;;  %v7907_v36 = vld [vmem:[#allocation82_spill] sm:$0xff] }
 0x2c1   : > { %v2573_v26 = vpop.f32.mrf.mxu3  ;;  %v2618_v29 = vadd.f32 %v2565_v63, %v2387_v22  ;;  %v3428_v63 = vsel %vm3411_vm14, %v3425_v30, %v3427_v35  ;;  %v7905_v22 = vld [vmem:[#allocation84_spill] sm:$0xff] }
 0x2c2   : > { %v3729_v47 = vrot.slane %v7905_v22, 2 }
 0x2c3   : > { %v2807_v27 = vpop.f32.mrf.mxu0  ;;  %3288 = vmatmul.bf16.gmra.mxu2 %v2889_v60 }
 0x2c4   : > { %v7199_v54 = vadd.f32 %v2807_v27, %v2618_v29  ;;  %v2891_v29 = vrot.slane %v7905_v22, 1 }
 0x2c5   : > { %v2071_v55 = vpop.f32.mrf.mxu1 }
 0x2c6   : > { %7903 = vst [vmem:[#allocation61_spill] sm:$0xff] %v7199_v54  ;;  %v2337_v32 = vpop.f32.mrf.mxu2  ;;  %v2893_v22 = vor.u32 %v2891_v29, %v7907_v36 }
 0x2c7   : > { %v2388_v52 = vadd.f32 %v2337_v32, %v2067_v49  ;;  %v3728_v49 = vrot.slane %v7907_v36, 1  ;;  %v7909_v32 = vld [vmem:[#allocation76_spill] sm:$0xff] }
 0x2c8   : > { %3063 = vmatmul.bf16.gmra.mxu1 %v2889_v60 }
 0x2c9   : > { %v2575_v2 = vpop.f32.mrf.mxu3  ;;  %v2619_v48 = vadd.f32 %v2568_v39, %v2388_v52  ;;  %v2892_v39 = vsel %vm2867_vm9, %v2890_v53, %v2891_v29  ;;  %v2072_v52 = vadd.f32 %v2071_v55, %v7909_v32  ;;  %v7911_v55 = vld [vmem:[#allocation80_spill] sm:$0xff] }
 0x2cb   : > { %v2810_v6 = vpop.f32.mrf.mxu0 }
 0x2cc   : > { %v7207_v27 = vadd.f32 %v2810_v6, %v2619_v48  ;;  %v3730_v6 = vor.u32 %v3729_v47, %v3728_v49 }
 0x2cd   : > { %v2073_v54 = vpop.f32.mrf.mxu1 }
 0x2ce   : > { %3587 = vmatmul.bf16.gmra.mxu3 %v3428_v63  ;;  %3911 = vmatmul.bf16.gmra.mxu0 %v3727_v58  ;;  %v2339_v11 = vpop.f32.mrf.mxu2  ;;  %v3429_v63 = vrot.slane %v5644_v19, 1  ;;  %v2074_v32 = vadd.f32 %v2073_v54, %v7911_v55 }
 0x2cf   : > { %v2389_v60 = vadd.f32 %v2339_v11, %v2069_v15  ;;  %v3731_v11 = vsel %vm3700_vm13, %v3726_v8, %v3730_v6  ;;  %v7912_v8 = vld [vmem:[#allocation89_spill] sm:$0xff] }
 0x2d1   : > { %v2578_v20 = vpop.f32.mrf.mxu3  ;;  %v2620_v30 = vadd.f32 %v2570_v44, %v2389_v60  ;;  %v3430_v44 = vsel %vm3411_vm14, %v3427_v35, %v3429_v63  ;;  %v7910_v60 = vld [vmem:[#allocation90_spill] sm:$0xff] }
 0x2d2   : > { %v3733_v29 = vrot.slane %v7910_v60, 2 }
 0x2d3   : > { %v2812_v28 = vpop.f32.mrf.mxu0  ;;  %3293 = vmatmul.bf16.gmra.mxu2 %v2892_v39 }
 0x2d4   : > { %v7213_v42 = vadd.f32 %v2812_v28, %v2620_v30  ;;  %v2894_v30 = vrot.slane %v7910_v60, 1 }
 0x2d5   : > { %v2076_v34 = vpop.f32.mrf.mxu1 }
 0x2d6   : > { %7908 = vst [vmem:[#allocation69_spill] sm:$0xff] %v7213_v42  ;;  %v2342_v48 = vpop.f32.mrf.mxu2  ;;  %v2896_v60 = vor.u32 %v2894_v30, %v7912_v8 }
 0x2d7   : > { %v2390_v58 = vadd.f32 %v2342_v48, %v2072_v52  ;;  %v3732_v52 = vrot.slane %v7912_v8, 1  ;;  %v7913_v48 = vld [vmem:[#allocation83_spill] sm:$0xff] }
 0x2d8   : > { %3068 = vmatmul.bf16.gmra.mxu1 %v2892_v39 }
 0x2d9   : > { %v2580_v53 = vpop.f32.mrf.mxu3  ;;  %v2621_v31 = vadd.f32 %v2573_v26, %v2390_v58  ;;  %v2895_v26 = vsel %vm2867_vm9, %v2893_v22, %v2894_v30  ;;  %v2077_v58 = vadd.f32 %v2076_v34, %v7913_v48  ;;  %v7914_v34 = vld [vmem:[#allocation86_spill] sm:$0xff]  ;;  %v3737_v30 = vrot.slane %v6798_v13, 2 }
 0x2db   : > { %v2815_v15 = vpop.f32.mrf.mxu0 }
 0x2dc   : > { %v7221_v28 = vadd.f32 %v2815_v15, %v2621_v31  ;;  %v3734_v15 = vor.u32 %v3733_v29, %v3732_v52 }
 0x2dd   : > { %v2078_v42 = vpop.f32.mrf.mxu1 }
 0x2de   : > { %3592 = vmatmul.bf16.gmra.mxu3 %v3430_v44  ;;  %3916 = vmatmul.bf16.gmra.mxu0 %v3731_v11  ;;  %v2344_v19 = vpop.f32.mrf.mxu2  ;;  %v3431_v44 = vrot.slane %v5646_v17, 1 }
 0x2df   : > { %v2391_v39 = vadd.f32 %v2344_v19, %v2074_v32  ;;  %v3735_v19 = vsel %vm3700_vm13, %v3730_v6, %v3734_v15  ;;  %v3736_v6 = vrot.slane %v6795_v7, 1 }
 0x2e1   : > { %v3553_v49 = vpop.f32.mrf.mxu3  ;;  %v2622_v35 = vadd.f32 %v2575_v2, %v2391_v39  ;;  %v3432_v2 = vsel %vm3411_vm14, %v3429_v63, %v3431_v44  ;;  %v2897_v39 = vrot.slane %v6798_v13, 1 }
 0x2e3   : > { %v2817_v47 = vpop.f32.mrf.mxu0  ;;  %3298 = vmatmul.bf16.gmra.mxu2 %v2895_v26  ;;  %v2899_v13 = vor.u32 %v2897_v39, %v6795_v7  ;;  %v3741_v7 = vrot.slane %v6820_v25, 2 }
 0x2e4   : > { %v7227_v36 = vadd.f32 %v2817_v47, %v2622_v35  ;;  %v2079_v47 = vadd.f32 %v2078_v42, %v7914_v34 }
 0x2e5   : > { %v3034_v54 = vpop.f32.mrf.mxu1 }
 0x2e6   : > { %v2347_v31 = vpop.f32.mrf.mxu2 }
 0x2e7   : > { %v2392_v11 = vadd.f32 %v2347_v31, %v2077_v58  ;;  %v7916_v31 = vld [vmem:[#allocation93_spill] sm:$0xff] }
 0x2e8   : > { %3073 = vmatmul.bf16.gmra.mxu1 %v2895_v26  ;;  %v3139_v42 = vadd.f32 %v3034_v54, %v7916_v31 }
 0x2e9   : > { %v3555_v22 = vpop.f32.mrf.mxu3  ;;  %v2623_v55 = vadd.f32 %v2578_v20, %v2392_v11  ;;  %v2898_v20 = vsel %vm2867_vm9, %v2896_v60, %v2897_v39 }
 0x2eb   : > { %v2820_v32 = vpop.f32.mrf.mxu0 }
 0x2ec   : > { %v7235_v35 = vadd.f32 %v2820_v32, %v2623_v55  ;;  %v3433_v55 = vrot.slane %v5859_v51, 1 }
 0x2ed   : > { %v3036_v48 = vpop.f32.mrf.mxu1 }
 0x2ee   : > { %3597 = vmatmul.bf16.gmra.mxu3 %v3432_v2  ;;  %3921 = vmatmul.bf16.gmra.mxu0 %v3735_v19  ;;  %v2349_v17 = vpop.f32.mrf.mxu2  ;;  %v3738_v2 = vor.u32 %v3737_v30, %v3736_v6 }
 0x2ef   : > { %v2393_v26 = vadd.f32 %v2349_v17, %v2079_v47  ;;  %v2900_v17 = vrot.slane %v6820_v25, 1 }
 0x2f0   : > { %v3739_v34 = vsel %vm3700_vm13, %v3734_v15, %v3738_v2  ;;  %v7918_v15 = vld [vmem:[#allocation21_spill] sm:$0xff] }
 0x2f1   : > { %v3558_v52 = vpop.f32.mrf.mxu3  ;;  %v2624_v63 = vadd.f32 %v2580_v53, %v2393_v26  ;;  %v3434_v53 = vsel %vm3411_vm14, %v3431_v44, %v3433_v55  ;;  %v7917_v26 = vld [vmem:[#allocation94_spill] sm:$0xff]  ;;  %v2901_v6 = vsel %vm2867_vm9, %v2899_v13, %v2900_v17 }
 0x2f3   : > { %v2822_v29 = vpop.f32.mrf.mxu0  ;;  %3303 = vmatmul.bf16.gmra.mxu2 %v2898_v20 }
 0x2f4   : > { %v7241_v8 = vadd.f32 %v2822_v29, %v2624_v63  ;;  %v3140_v63 = vadd.f32 %v3036_v48, %v7917_v26 }
 0x2f5   : > { %v3039_v58 = vpop.f32.mrf.mxu1 }
 0x2f6   : > { %7915 = vst [vmem:[#allocation60_spill] sm:$0xff] %v7241_v8  ;;  %v3264_v11 = vpop.f32.mrf.mxu2 }
 0x2f7   : > { %v3369_v32 = vadd.f32 %v3264_v11, %v3139_v42  ;;  %v7919_v42 = vld [vmem:[#allocation95_spill] sm:$0xff] }
 0x2f8   : > { %3078 = vmatmul.bf16.gmra.mxu1 %v2898_v20  ;;  %v3141_v11 = vadd.f32 %v3039_v58, %v7919_v42 }
 0x2f9   : > { %v3560_v19 = vpop.f32.mrf.mxu3  ;;  %v3658_v47 = vadd.f32 %v3553_v49, %v3369_v32  ;;  %v3740_v49 = vrot.slane %v6817_v50, 1 }
 0x2fb   : > { %v3887_v60 = vpop.f32.mrf.mxu0  ;;  %v3742_v25 = vor.u32 %v3741_v7, %v3740_v49  ;;  %v7921_v49 = vld [vmem:[#allocation96_spill] sm:$0xff] }
 0x2fc   : > { %v3992_v20 = vadd.f32 %v3887_v60, %v3658_v47  ;;  %v3435_v47 = vrot.slane %v6006_v33, 1  ;;  %v2903_v33 = vrot.slane %v6855_v40, 1 }
 0x2fd   : > { %v3041_v54 = vpop.f32.mrf.mxu1  ;;  %v3743_v42 = vsel %vm3700_vm13, %v3738_v2, %v3742_v25 }
 0x2fe   : > { %3602 = vmatmul.bf16.gmra.mxu3 %v3434_v53  ;;  %3926 = vmatmul.bf16.gmra.mxu0 %v3739_v34  ;;  %v3266_v51 = vpop.f32.mrf.mxu2  ;;  %v4118_v39 = vmul.f32 %v7918_v15, %v3992_v20  ;;  %v7920_v53 = vld [vmem:[#allocation22_spill] sm:$0xff]  ;;  %v3436_v15 = vsel %vm3411_vm14, %v3433_v55, %v3435_v47  ;;  %v3142_v7 = vadd.f32 %v3041_v54, %v7921_v49  ;;  %v3745_v54 = vrot.slane %v6855_v40, 2 }
 0x2ff   : > { %v3370_v29 = vadd.f32 %v3266_v51, %v3140_v63 }
 0x300   : > { %v4207_v26 = vmul.f32 %v4118_v39, %v3992_v20 }
 0x301   : > { %v3563_v44 = vpop.f32.mrf.mxu3  ;;  %v3659_v30 = vadd.f32 %v3555_v22, %v3370_v29 }
 0x303   : > { %v3889_v31 = vpop.f32.mrf.mxu0  ;;  %3308 = vmatmul.bf16.gmra.mxu2 %v2901_v6 }
 0x304   : > { %v3993_v48 = vadd.f32 %v3889_v31, %v3659_v30 }
 0x305   : > { %v3044_v32 = vpop.f32.mrf.mxu1 }
 0x306   : > { %v5013_v22 = vpack.c.bf16 %v3993_v48, %v3992_v20  ;;  %v4119_v60 = vmul.f32 %v7920_v53, %v3993_v48  ;;  %v3269_v34 = vpop.f32.mrf.mxu2  ;;  %v2902_v53 = vor.u32 %v2900_v17, %v6817_v50  ;;  %v3744_v17 = vrot.slane %v6852_v57, 1 }
 0x307   : > { %v3371_v13 = vadd.f32 %v3269_v34, %v3141_v11 }
 0x308   : > { %5014 = vst [vmem:[%s7259_s24] sm:$0xff] %v5013_v22   ;;  %v4160_v63 = vadd.f32 %v4119_v60, %v4118_v39  ;;  %v4208_v51 = vmul.f32 %v4119_v60, %v3993_v48  ;;  %3083 = vmatmul.bf16.gmra.mxu1 %v2901_v6  ;;  %v7922_v39 = vld [vmem:[#allocation30_spill] sm:$0xff]  ;;  %v2904_v55 = vsel %vm2867_vm9, %v2902_v53, %v2903_v33  ;;  %v3437_v53 = vrot.slane %v6285_v12, 1 }
 0x309   : > { %v3565_v29 = vpop.f32.mrf.mxu3  ;;  %v3660_v30 = vadd.f32 %v3558_v52, %v3371_v13  ;;  %v3746_v49 = vor.u32 %v3745_v54, %v3744_v17  ;;  %v7925_v12 = vld [vmem:[#allocation98_spill] sm:$0xff] }
 0x30a   : > { %v4249_v31 = vadd.f32 %v4208_v51, %v4207_v26  ;;  %v7923_v26 = vld [vmem:[#allocation97_spill] sm:$0xff]  ;;  %v3438_v40 = vsel %vm3411_vm14, %v3435_v47, %v3437_v53 }
 0x30b   : > { %v3892_v58 = vpop.f32.mrf.mxu0  ;;  %v3143_v51 = vadd.f32 %v3044_v32, %v7923_v26  ;;  %v3747_v32 = vsel %vm3700_vm13, %v3742_v25, %v3746_v49 }
 0x30c   : > { %v3994_v8 = vadd.f32 %v3892_v58, %v3660_v30  ;;  %v7924_v58 = vld [vmem:[#allocation31_spill] sm:$0xff] }
 0x30d   : > { %v3046_v20 = vpop.f32.mrf.mxu1 }
 0x30e   : > { %3607 = vmatmul.bf16.gmra.mxu3 %v3436_v15  ;;  %3931 = vmatmul.bf16.gmra.mxu0 %v3743_v42  ;;  %v4120_v6 = vmul.f32 %v7922_v39, %v3994_v8  ;;  %v3271_v48 = vpop.f32.mrf.mxu2 }
 0x30f   : > { %v3372_v52 = vadd.f32 %v3271_v48, %v3142_v7 }
 0x310   : > { %v4161_v11 = vadd.f32 %v4160_v63, %v4120_v6  ;;  %v4209_v22 = vmul.f32 %v4120_v6, %v3994_v8 }
 0x311   : > { %v3568_v60 = vpop.f32.mrf.mxu3  ;;  %v3661_v2 = vadd.f32 %v3560_v19, %v3372_v52 }
 0x312   : > { %v4250_v34 = vadd.f32 %v4249_v31, %v4209_v22  ;;  %v2905_v22 = vor.u32 %v2903_v33, %v6852_v57  ;;  %v3748_v33 = vrot.slane %v6875_v21, 1 }
 0x313   : > { %v3894_v50 = vpop.f32.mrf.mxu0  ;;  %3313 = vmatmul.bf16.gmra.mxu2 %v2904_v55 }
 0x314   : > { %v3995_v13 = vadd.f32 %v3894_v50, %v3661_v2  ;;  %v2906_v2 = vrot.slane %v6878_v23, 1  ;;  %v3144_v50 = vadd.f32 %v3046_v20, %v7925_v12  ;;  %v3749_v20 = vrot.slane %v6878_v23, 2 }
 0x315   : > { %v3049_v30 = vpop.f32.mrf.mxu1 }
 0x316   : > { %v5018_v15 = vpack.c.bf16 %v3995_v13, %v3994_v8  ;;  %v4121_v63 = vmul.f32 %v7924_v58, %v3995_v13  ;;  %v3274_v42 = vpop.f32.mrf.mxu2  ;;  %v2907_v47 = vsel %vm2867_vm9, %v2905_v22, %v2906_v2  ;;  %v7927_v58 = vld [vmem:[#allocation99_spill] sm:$0xff] }
 0x317   : > { %v3373_v7 = vadd.f32 %v3274_v42, %v3143_v51 }
 0x318   : > { %5135 = vst [vmem:[%s7259_s24 + $0x8] sm:$0xff] %v5018_v15   ;;  %v4162_v19 = vadd.f32 %v4161_v11, %v4121_v63  ;;  %v4210_v31 = vmul.f32 %v4121_v63, %v3995_v13  ;;  %3088 = vmatmul.bf16.gmra.mxu1 %v2904_v55  ;;  %v7926_v11 = vld [vmem:[#allocation42_spill] sm:$0xff]  ;;  %v3145_v63 = vadd.f32 %v3049_v30, %v7927_v58  ;;  %v7931_v58 = vld [vmem:[#allocation101_spill] sm:$0xff] }
 0x319   : > { %v3570_v39 = vpop.f32.mrf.mxu3  ;;  %v3662_v6 = vadd.f32 %v3563_v44, %v3373_v7 }
 0x31a   : > { %v4251_v48 = vadd.f32 %v4250_v34, %v4210_v31  ;;  %v7928_v31 = vld [vmem:[#allocation43_spill] sm:$0xff] }
 0x31b   : > { %v3897_v52 = vpop.f32.mrf.mxu0 }
 0x31c   : > { %v3996_v8 = vadd.f32 %v3897_v52, %v3662_v6  ;;  %v3750_v52 = vor.u32 %v3749_v20, %v3748_v33 }
 0x31d   : > { %v3051_v17 = vpop.f32.mrf.mxu1 }
 0x31e   : > { %3612 = vmatmul.bf16.gmra.mxu3 %v3438_v40  ;;  %3936 = vmatmul.bf16.gmra.mxu0 %v3747_v32  ;;  %v4122_v55 = vmul.f32 %v7926_v11, %v3996_v8  ;;  %v3276_v54 = vpop.f32.mrf.mxu2  ;;  %v3439_v40 = vrot.slane %v6472_v3, 1  ;;  %v3751_v30 = vsel %vm3700_vm13, %v3746_v49, %v3750_v52  ;;  %v7929_v3 = vld [vmem:[#allocation100_spill] sm:$0xff] }
 0x31f   : > { %v3374_v44 = vadd.f32 %v3276_v54, %v3144_v50  ;;  %v2909_v54 = vrot.slane %v6910_v46, 1 }
 0x320   : > { %v4163_v34 = vadd.f32 %v4162_v19, %v4122_v55  ;;  %v4211_v13 = vmul.f32 %v4122_v55, %v3996_v8  ;;  %v3440_v23 = vsel %vm3411_vm14, %v3437_v53, %v3439_v40  ;;  %v2908_v55 = vor.u32 %v2906_v2, %v6875_v21 }
 0x321   : > { %v3573_v26 = vpop.f32.mrf.mxu3  ;;  %v3663_v25 = vadd.f32 %v3565_v29, %v3374_v44  ;;  %v3146_v44 = vadd.f32 %v3051_v17, %v7929_v3  ;;  %v3752_v2 = vrot.slane %v6907_v18, 1  ;;  %v3753_v17 = vrot.slane %v6910_v46, 2 }
 0x322   : > { %v4252_v51 = vadd.f32 %v4251_v48, %v4211_v13  ;;  %v2910_v53 = vsel %vm2867_vm9, %v2908_v55, %v2909_v54  ;;  %v2911_v3 = vor.u32 %v2909_v54, %v6907_v18  ;;  %v3756_v54 = vrot.slane %v6933_v62, 1 }
 0x323   : > { %v3899_v57 = vpop.f32.mrf.mxu0  ;;  %3318 = vmatmul.bf16.gmra.mxu2 %v2907_v47 }
 0x324   : > { %v3997_v15 = vadd.f32 %v3899_v57, %v3663_v25 }
 0x325   : > { %v3054_v42 = vpop.f32.mrf.mxu1 }
 0x326   : > { %v5023_v7 = vpack.c.bf16 %v3997_v15, %v3996_v8  ;;  %v4123_v19 = vmul.f32 %v7928_v31, %v3997_v15  ;;  %v3279_v6 = vpop.f32.mrf.mxu2 }
 0x327   : > { %v3375_v32 = vadd.f32 %v3279_v6, %v3145_v63  ;;  %v3147_v63 = vadd.f32 %v3054_v42, %v7931_v58 }
 0x328   : > { %5136 = vst [vmem:[%s7259_s24 + $0x10] sm:$0xff] %v5023_v7   ;;  %v4164_v29 = vadd.f32 %v4163_v34, %v4123_v19  ;;  %v4212_v48 = vmul.f32 %v4123_v19, %v3997_v15  ;;  %3093 = vmatmul.bf16.gmra.mxu1 %v2907_v47  ;;  %v7930_v34 = vld [vmem:[#allocation52_spill] sm:$0xff]  ;;  %v7932_v19 = vld [vmem:[#allocation54_spill] sm:$0xff] }
 0x329   : > { %v3575_v22 = vpop.f32.mrf.mxu3  ;;  %v3664_v12 = vadd.f32 %v3568_v60, %v3375_v32 }
 0x32a   : > { %v4253_v50 = vadd.f32 %v4252_v51, %v4212_v48  ;;  %v3754_v48 = vor.u32 %v3753_v17, %v3752_v2  ;;  %v7935_v2 = vld [vmem:[#allocation103_spill] sm:$0xff] }
 0x32b   : > { %v3902_v11 = vpop.f32.mrf.mxu0 }
 0x32c   : > { %v3998_v8 = vadd.f32 %v3902_v11, %v3664_v12  ;;  %v3755_v42 = vsel %vm3700_vm13, %v3750_v52, %v3754_v48 }
 0x32d   : > { %v3056_v13 = vpop.f32.mrf.mxu1 }
 0x32e   : > { %3617 = vmatmul.bf16.gmra.mxu3 %v3440_v23  ;;  %3941 = vmatmul.bf16.gmra.mxu0 %v3751_v30  ;;  %v4124_v47 = vmul.f32 %v7930_v34, %v3998_v8  ;;  %v3281_v25 = vpop.f32.mrf.mxu2 }
 0x32f   : > { %v3376_v60 = vadd.f32 %v3281_v25, %v3146_v44  ;;  %v2912_v44 = vrot.slane %v6936_v5, 1  ;;  %v7934_v25 = vld [vmem:[#allocation2_spill] sm:$0xff] }
 0x330   : > { %v4165_v51 = vadd.f32 %v4164_v29, %v4124_v47  ;;  %v4213_v57 = vmul.f32 %v4124_v47, %v3998_v8  ;;  %v3441_v29 = vrot.slane %v6137_v56, 1  ;;  %v7933_v56 = vld [vmem:[#allocation102_spill] sm:$0xff] }
 0x331   : > { %v3578_v33 = vpop.f32.mrf.mxu3  ;;  %v3665_v49 = vadd.f32 %v3570_v39, %v3376_v60  ;;  %v3148_v34 = vadd.f32 %v3056_v13, %v7933_v56  ;;  %v3757_v13 = vrot.slane %v6936_v5, 2 }
 0x332   : > { %v4254_v20 = vadd.f32 %v4253_v50, %v4213_v57  ;;  %v3442_v46 = vsel %vm3411_vm14, %v3439_v40, %v3441_v29  ;;  %v2913_v40 = vsel %vm2867_vm9, %v2911_v3, %v2912_v44 }
 0x333   : > { %v3904_v21 = vpop.f32.mrf.mxu0  ;;  %3323 = vmatmul.bf16.gmra.mxu2 %v2910_v53 }
 0x334   : > { %v3999_v15 = vadd.f32 %v3904_v21, %v3665_v49 }
 0x335   : > { %v3059_v7 = vpop.f32.mrf.mxu1 }
 0x336   : > { %v5028_v31 = vpack.c.bf16 %v3999_v15, %v3998_v8  ;;  %v4125_v6 = vmul.f32 %v7932_v19, %v3999_v15  ;;  %v3284_v32 = vpop.f32.mrf.mxu2  ;;  %v3149_v17 = vadd.f32 %v3059_v7, %v7935_v2 }
 0x337   : > { %v3377_v12 = vadd.f32 %v3284_v32, %v3147_v63  ;;  %v7936_v63 = vld [vmem:[#allocation3_spill] sm:$0xff]  ;;  %v3758_v32 = vor.u32 %v3757_v13, %v3756_v54  ;;  %v7940_v13 = vld [vmem:[#allocation5_spill] sm:$0xff] }
 0x338   : > { %5137 = vst [vmem:[%s7259_s24 + $0x18] sm:$0xff] %v5028_v31   ;;  %v4166_v39 = vadd.f32 %v4165_v51, %v4125_v6  ;;  %v4214_v50 = vmul.f32 %v4125_v6, %v3999_v15  ;;  %3098 = vmatmul.bf16.gmra.mxu1 %v2910_v53  ;;  %v3443_v6 = vrot.slane %v6139_v14, 1  ;;  %v7937_v14 = vld [vmem:[#allocation104_spill] sm:$0xff] }
 0x339   : > { %v3580_v23 = vpop.f32.mrf.mxu3  ;;  %v3666_v11 = vadd.f32 %v3573_v26, %v3377_v12  ;;  %v3759_v7 = vsel %vm3700_vm13, %v3754_v48, %v3758_v32 }
 0x33a   : > { %v4255_v30 = vadd.f32 %v4254_v20, %v4214_v50  ;;  %v3444_v5 = vsel %vm3411_vm14, %v3441_v29, %v3443_v6 }
 0x33b   : > { %v3907_v55 = vpop.f32.mrf.mxu0 }
 0x33c   : > { %v4000_v8 = vadd.f32 %v3907_v55, %v3666_v11 }
 0x33d   : > { %v3061_v47 = vpop.f32.mrf.mxu1 }
 0x33e   : > { %3622 = vmatmul.bf16.gmra.mxu3 %v3442_v46  ;;  %3946 = vmatmul.bf16.gmra.mxu0 %v3755_v42  ;;  %v4126_v60 = vmul.f32 %v7934_v25, %v4000_v8  ;;  %v3286_v51 = vpop.f32.mrf.mxu2  ;;  %v2914_v42 = vor.u32 %v2912_v44, %v6933_v62  ;;  %v3150_v3 = vadd.f32 %v3061_v47, %v7937_v14  ;;  %v3760_v44 = vrot.slane %v6956_v4, 1 }
 0x33f   : > { %v3378_v26 = vadd.f32 %v3286_v51, %v3148_v34  ;;  %v7938_v34 = vld [vmem:[#allocation4_spill] sm:$0xff]  ;;  %v3761_v47 = vrot.slane %v6959_v24, 2 }
 0x340   : > { %v4167_v57 = vadd.f32 %v4166_v39, %v4126_v60  ;;  %v4215_v53 = vmul.f32 %v4126_v60, %v4000_v8 }
 0x341   : > { %v3583_v49 = vpop.f32.mrf.mxu3  ;;  %v3667_v52 = vadd.f32 %v3575_v22, %v3378_v26 }
 0x342   : > { %v4256_v20 = vadd.f32 %v4255_v30, %v4215_v53 }
 0x343   : > { %v3909_v18 = vpop.f32.mrf.mxu0  ;;  %3328 = vmatmul.bf16.gmra.mxu2 %v2913_v40 }
 0x344   : > { %v4001_v21 = vadd.f32 %v3909_v18, %v3667_v52  ;;  %v7939_v52 = vld [vmem:[#allocation105_spill] sm:$0xff] }
 0x345   : > { %v3064_v15 = vpop.f32.mrf.mxu1 }
 0x346   : > { %v5033_v58 = vpack.c.bf16 %v4001_v21, %v4000_v8  ;;  %v4127_v31 = vmul.f32 %v7936_v63, %v4001_v21  ;;  %v3289_v19 = vpop.f32.mrf.mxu2  ;;  %v2915_v8 = vrot.slane %v6959_v24, 1 }
 0x347   : > { %v3379_v12 = vadd.f32 %v3289_v19, %v3149_v17  ;;  %v3445_v17 = vrot.slane %v6364_v1, 1  ;;  %v7941_v1 = vld [vmem:[#allocation106_spill] sm:$0xff] }
 0x348   : > { %5138 = vst [vmem:[%s7259_s24 + $0x20] sm:$0xff] %v5033_v58   ;;  %v4168_v22 = vadd.f32 %v4167_v57, %v4127_v31  ;;  %v4216_v39 = vmul.f32 %v4127_v31, %v4001_v21  ;;  %3103 = vmatmul.bf16.gmra.mxu1 %v2913_v40  ;;  %v2916_v29 = vsel %vm2867_vm9, %v2914_v42, %v2915_v8 }
 0x349   : > { %v3585_v50 = vpop.f32.mrf.mxu3  ;;  %v3668_v11 = vadd.f32 %v3578_v33, %v3379_v12  ;;  %v3762_v58 = vor.u32 %v3761_v47, %v3760_v44  ;;  %v3446_v24 = vsel %vm3411_vm14, %v3443_v6, %v3445_v17  ;;  %v3447_v47 = vrot.slane %v5756_v9, 1  ;;  %v7945_v9 = vld [vmem:[#allocation108_spill] sm:$0xff] }
 0x34a   : > { %v4257_v30 = vadd.f32 %v4256_v20, %v4216_v39  ;;  %v3151_v20 = vadd.f32 %v3064_v15, %v7939_v52 }
 0x34b   : > { %v3912_v46 = vpop.f32.mrf.mxu0  ;;  %v3763_v15 = vsel %vm3700_vm13, %v3758_v32, %v3762_v58 }
 0x34c   : > { %v4002_v55 = vadd.f32 %v3912_v46, %v3668_v11 }
 0x34d   : > { %v3066_v56 = vpop.f32.mrf.mxu1 }
 0x34e   : > { %3627 = vmatmul.bf16.gmra.mxu3 %v3444_v5  ;;  %3951 = vmatmul.bf16.gmra.mxu0 %v3759_v7  ;;  %v4128_v25 = vmul.f32 %v7938_v34, %v4002_v55  ;;  %v3291_v60 = vpop.f32.mrf.mxu2  ;;  %v2918_v5 = vrot.slane %v6994_v45, 1  ;;  %v3152_v46 = vadd.f32 %v3066_v56, %v7941_v1  ;;  %v3765_v56 = vrot.slane %v6994_v45, 2 }
 0x34f   : > { %v3380_v33 = vadd.f32 %v3291_v60, %v3150_v3  ;;  %v3448_v45 = vsel %vm3411_vm14, %v3445_v17, %v3447_v47 }
 0x350   : > { %v4169_v51 = vadd.f32 %v4168_v22, %v4128_v25  ;;  %v4217_v26 = vmul.f32 %v4128_v25, %v4002_v55 }
 0x351   : > { %v3588_v57 = vpop.f32.mrf.mxu3  ;;  %v3669_v48 = vadd.f32 %v3580_v23, %v3380_v33 }
 0x352   : > { %v4258_v53 = vadd.f32 %v4257_v30, %v4217_v26  ;;  %v2917_v30 = vor.u32 %v2915_v8, %v6956_v4  ;;  %v3764_v8 = vrot.slane %v6991_v61, 1 }
 0x353   : > { %v3914_v62 = vpop.f32.mrf.mxu0  ;;  %3333 = vmatmul.bf16.gmra.mxu2 %v2916_v29 }
 0x354   : > { %v4003_v40 = vadd.f32 %v3914_v62, %v3669_v48  ;;  %v2919_v6 = vsel %vm2867_vm9, %v2917_v30, %v2918_v5 }
 0x355   : > { %v3069_v18 = vpop.f32.mrf.mxu1 }
 0x356   : > { %v5038_v54 = vpack.c.bf16 %v4003_v40, %v4002_v55  ;;  %v4129_v21 = vmul.f32 %v7940_v13, %v4003_v40  ;;  %v3294_v2 = vpop.f32.mrf.mxu2  ;;  %v7942_v55 = vld [vmem:[#allocation16_spill] sm:$0xff] }
 0x357   : > { %v3381_v63 = vadd.f32 %v3294_v2, %v3151_v20 }
 0x358   : > { %5139 = vst [vmem:[%s7259_s24 + $0x28] sm:$0xff] %v5038_v54   ;;  %v4170_v23 = vadd.f32 %v4169_v51, %v4129_v21  ;;  %v4218_v31 = vmul.f32 %v4129_v21, %v4003_v40  ;;  %3108 = vmatmul.bf16.gmra.mxu1 %v2916_v29  ;;  %v7943_v51 = vld [vmem:[#allocation107_spill] sm:$0xff]  ;;  %v3766_v40 = vor.u32 %v3765_v56, %v3764_v8 }
 0x359   : > { %v3590_v19 = vpop.f32.mrf.mxu3  ;;  %v3670_v12 = vadd.f32 %v3583_v49, %v3381_v63  ;;  %v3153_v26 = vadd.f32 %v3069_v18, %v7943_v51 }
 0x35a   : > { %v4259_v22 = vadd.f32 %v4258_v53, %v4218_v31  ;;  %v7944_v53 = vld [vmem:[#allocation17_spill] sm:$0xff]  ;;  %v3767_v18 = vsel %vm3700_vm13, %v3762_v58, %v3766_v40  ;;  %v2921_v31 = vrot.slane %v7017_v0, 1 }
 0x35b   : > { %v3917_v39 = vpop.f32.mrf.mxu0 }
 0x35c   : > { %v4004_v11 = vadd.f32 %v3917_v39, %v3670_v12 }
 0x35d   : > { %v3071_v7 = vpop.f32.mrf.mxu1 }
 0x35e   : > { %3632 = vmatmul.bf16.gmra.mxu3 %v3446_v24  ;;  %3956 = vmatmul.bf16.gmra.mxu0 %v3763_v15  ;;  %v4130_v42 = vmul.f32 %v7942_v55, %v4004_v11  ;;  %v3296_v14 = vpop.f32.mrf.mxu2  ;;  %v3154_v12 = vadd.f32 %v3071_v7, %v7945_v9  ;;  %v7946_v24 = vld [vmem:[#allocation25_spill] sm:$0xff]  ;;  %v3769_v7 = vrot.slane %v7017_v0, 2 }
 0x35f   : > { %v3382_v49 = vadd.f32 %v3296_v14, %v3152_v46 }
 0x360   : > { %v4171_v3 = vadd.f32 %v4170_v23, %v4130_v42  ;;  %v4219_v34 = vmul.f32 %v4130_v42, %v4004_v11  ;;  %v2920_v23 = vor.u32 %v2918_v5, %v6991_v61  ;;  %v3768_v5 = vrot.slane %v7014_v10, 1  ;;  %v7947_v42 = vld [vmem:[#allocation109_spill] sm:$0xff] }
 0x361   : > { %v3593_v25 = vpop.f32.mrf.mxu3  ;;  %v3671_v32 = vadd.f32 %v3585_v50, %v3382_v49 }
 0x362   : > { %v4260_v60 = vadd.f32 %v4259_v22, %v4219_v34  ;;  %v2922_v17 = vsel %vm2867_vm9, %v2920_v23, %v2921_v31  ;;  %v7948_v34 = vld [vmem:[#allocation26_spill] sm:$0xff] }
 0x363   : > { %v3919_v4 = vpop.f32.mrf.mxu0  ;;  %3338 = vmatmul.bf16.gmra.mxu2 %v2919_v6 }
 0x364   : > { %v4005_v33 = vadd.f32 %v3919_v4, %v3671_v32  ;;  %v3770_v4 = vor.u32 %v3769_v7, %v3768_v5 }
 0x365   : > { %v3074_v29 = vpop.f32.mrf.mxu1 }
 0x366   : > { %v5043_v48 = vpack.c.bf16 %v4005_v33, %v4004_v11  ;;  %v4131_v62 = vmul.f32 %v7944_v53, %v4005_v33  ;;  %v3299_v44 = vpop.f32.mrf.mxu2  ;;  %v3155_v14 = vadd.f32 %v3074_v29, %v7947_v42  ;;  %v3771_v29 = vsel %vm3700_vm13, %v3766_v40, %v3770_v4 }
 0x367   : > { %v3383_v52 = vadd.f32 %v3299_v44, %v3153_v26  ;;  %v2924_v44 = vrot.slane %v7043_v38, 1 }
 0x368   : > { %5140 = vst [vmem:[%s7259_s24 + $0x30] sm:$0xff] %v5043_v48   ;;  %v4172_v50 = vadd.f32 %v4171_v3, %v4131_v62  ;;  %v4220_v20 = vmul.f32 %v4131_v62, %v4005_v33  ;;  %3113 = vmatmul.bf16.gmra.mxu1 %v2919_v6  ;;  %v2923_v62 = vor.u32 %v2921_v31, %v7014_v10  ;;  %v7950_v31 = vld [vmem:[#allocation110_spill] sm:$0xff] }
 0x369   : > { %v3595_v54 = vpop.f32.mrf.mxu3  ;;  %v3672_v13 = vadd.f32 %v3588_v57, %v3383_v52 }
 0x36a   : > { %v4261_v21 = vadd.f32 %v4260_v60, %v4220_v20  ;;  %v3449_v60 = vrot.slane %v5762_v16, 1 }
 0x36b   : > { %v3922_v2 = vpop.f32.mrf.mxu0 }
 0x36c   : > { %v4006_v63 = vadd.f32 %v3922_v2, %v3672_v13  ;;  %v3450_v0 = vsel %vm3411_vm14, %v3447_v47, %v3449_v60  ;;  %v2925_v47 = vsel %vm2867_vm9, %v2923_v62, %v2924_v44  ;;  %v7957_v62 = vld [vmem:[#allocation111_spill] sm:$0xff] }
 0x36d   : > { %v3076_v22 = vpop.f32.mrf.mxu1 }
 0x36e   : > { %3637 = vmatmul.bf16.gmra.mxu3 %v3448_v45  ;;  %3961 = vmatmul.bf16.gmra.mxu0 %v3767_v18  ;;  %v4132_v39 = vmul.f32 %v7946_v24, %v4006_v63  ;;  %v3301_v15 = vpop.f32.mrf.mxu2  ;;  %v3156_v16 = vadd.f32 %v3076_v22, %v7053_v37  ;;  %v3773_v37 = vrot.slane %v7043_v38, 2  ;;  %v7951_v24 = vld [vmem:[#allocation39_spill] sm:$0xff] }
 0x36f   : > { %v3384_v57 = vadd.f32 %v3301_v15, %v3154_v12 }
 0x370   : > { %v4173_v11 = vadd.f32 %v4172_v50, %v4132_v39  ;;  %v4221_v30 = vmul.f32 %v4132_v39, %v4006_v63  ;;  %v7949_v50 = vld [vmem:[#allocation38_spill] sm:$0xff] }
 0x371   : > { %v3598_v1 = vpop.f32.mrf.mxu3  ;;  %v3673_v58 = vadd.f32 %v3590_v19, %v3384_v57  ;;  %v7952_v57 = vld [vmem:[#allocation24_spill] sm:$0xff] }
 0x372   : > { %v4262_v46 = vadd.f32 %v4261_v21, %v4221_v30 }
 0x373   : > { %v3924_v61 = vpop.f32.mrf.mxu0  ;;  %3343 = vmatmul.bf16.gmra.mxu2 %v2922_v17 }
 0x374   : > { %v4007_v55 = vadd.f32 %v3924_v61, %v3673_v58 }
 0x375   : > { %v3079_v49 = vpop.f32.mrf.mxu1 }
 0x376   : > { %v5048_v3 = vpack.c.bf16 %v4007_v55, %v4006_v63  ;;  %v4133_v6 = vmul.f32 %v7948_v34, %v4007_v55  ;;  %v3304_v32 = vpop.f32.mrf.mxu2  ;;  %v3772_v63 = vrot.slane %v7040_v43, 1  ;;  %v3157_v9 = vadd.f32 %v3079_v49, %v7950_v31  ;;  %v7953_v49 = vld [vmem:[#allocation112_spill] sm:$0xff]  ;;  %v7954_v34 = vld [vmem:[#allocation113_spill] sm:$0xff]  ;;  %v7960_v31 = vld [vmem:[#allocation23_spill] sm:$0xff] }
 0x377   : > { %v3385_v8 = vadd.f32 %v3304_v32, %v3155_v14  ;;  %v2926_v14 = vor.u32 %v2924_v44, %v7040_v43  ;;  %v3776_v44 = vrot.slane %v7957_v62, 1 }
 0x378   : > { %5141 = vst [vmem:[%s7259_s24 + $0x38] sm:$0xff] %v5048_v3   ;;  %v4174_v19 = vadd.f32 %v4173_v11, %v4133_v6  ;;  %v4222_v56 = vmul.f32 %v4133_v6, %v4007_v55  ;;  %3118 = vmatmul.bf16.gmra.mxu1 %v2922_v17  ;;  %v3470_v11 = vrot.slane %v7952_v57, 1  ;;  %v3774_v30 = vor.u32 %v3773_v37, %v3772_v63 }
 0x379   : > { %v3600_v33 = vpop.f32.mrf.mxu3  ;;  %v3674_v51 = vadd.f32 %v3593_v25, %v3385_v8  ;;  %v2927_v3 = vrot.slane %v7953_v49, 1  ;;  %v7955_v8 = vld [vmem:[#allocation47_spill] sm:$0xff] }
 0x37a   : > { %v4263_v26 = vadd.f32 %v4262_v46, %v4222_v56  ;;  %v3477_v5 = vsel %vm3411_vm14, %v3449_v60, %v3470_v11  ;;  %v3775_v55 = vsel %vm3700_vm13, %v3770_v4, %v3774_v30 }
 0x37b   : > { %v3927_v48 = vpop.f32.mrf.mxu0  ;;  %v2928_v60 = vsel %vm2867_vm9, %v2926_v14, %v2927_v3  ;;  %v2929_v57 = vor.u32 %v2927_v3, %v7957_v62 }
 0x37c   : > { %v4008_v53 = vadd.f32 %v3927_v48, %v3674_v51  ;;  %v7956_v48 = vld [vmem:[#allocation32_spill] sm:$0xff] }
 0x37d   : > { %v3081_v52 = vpop.f32.mrf.mxu1 }
 0x37e   : > { %3642 = vmatmul.bf16.gmra.mxu3 %v3450_v0  ;;  %3966 = vmatmul.bf16.gmra.mxu0 %v3771_v29  ;;  %v4134_v20 = vmul.f32 %v7949_v50, %v4008_v53  ;;  %v3306_v13 = vpop.f32.mrf.mxu2  ;;  %v3158_v6 = vadd.f32 %v3081_v52, %v7954_v34  ;;  %v7382_v29 = vpack.c.b16 %v7956_v48, %v7956_v48  ;;  %v7958_v50 = vld [vmem:[#allocation114_spill] sm:$0xff] }
 0x37f   : > { %v3386_v25 = vadd.f32 %v3306_v13, %v3156_v16  ;;  %v3777_v16 = vrot.slane %v7953_v49, 2 }
 0x380   : > { %v4175_v21 = vadd.f32 %v4174_v19, %v4134_v20  ;;  %v4223_v45 = vmul.f32 %v4134_v20, %v4008_v53 }
 0x381   : > { %v3603_v2 = vpop.f32.mrf.mxu3  ;;  %v3675_v40 = vadd.f32 %v3595_v54, %v3386_v25 }
 0x382   : > { %v4264_v18 = vadd.f32 %v4263_v26, %v4223_v45 }
 0x383   : > { %v3929_v10 = vpop.f32.mrf.mxu0  ;;  %3348 = vmatmul.bf16.gmra.mxu2 %v2925_v47 }
 0x384   : > { %v4009_v23 = vadd.f32 %v3929_v10, %v3675_v40  ;;  %v3778_v40 = vor.u32 %v3777_v16, %v3776_v44 }
 0x385   : > { %v3084_v12 = vpop.f32.mrf.mxu1 }
 0x386   : > { %v5053_v22 = vpack.c.bf16 %v4009_v23, %v4008_v53  ;;  %v4135_v39 = vmul.f32 %v7951_v24, %v4009_v23  ;;  %v3309_v15 = vpop.f32.mrf.mxu2  ;;  %v3159_v20 = vadd.f32 %v3084_v12, %v7958_v50 }
 0x387   : > { %v3387_v17 = vadd.f32 %v3309_v15, %v3157_v9  ;;  %v2951_v9 = vpack.c.b16 %v7960_v31, %v7960_v31  ;;  %v7971_v31 = vld [vmem:[#allocation10_spill] sm:$0xff] }
 0x388   : > { %5142 = vst [vmem:[%s7259_s24 + $0x40] sm:$0xff] %v5053_v22   ;;  %v4176_v54 = vadd.f32 %v4175_v21, %v4135_v39  ;;  %v4224_v58 = vmul.f32 %v4135_v39, %v4009_v23  ;;  %3123 = vmatmul.bf16.gmra.mxu1 %v2925_v47  ;;  %v7959_v21 = vld [vmem:[#allocation48_spill] sm:$0xff]  ;;  %v3471_v47 = vrot.slane %v7382_v29, 1  ;;  %v3779_v39 = vsel %vm3700_vm13, %v3774_v30, %v3778_v40 }
 0x389   : > { %v7369_v46 = vpop.f32.mrf.mxu3  ;;  %v3676_v61 = vadd.f32 %v3598_v1, %v3387_v17  ;;  %v7961_v17 = vld [vmem:[#allocation115_spill] sm:$0xff] }
 0x38a   : > { %v4265_v38 = vadd.f32 %v4264_v18, %v4224_v58  ;;  %v3472_v22 = vsel %vm3411_vm14, %v3470_v11, %v3471_v47 }
 0x38b   : > { %v3932_v7 = vpop.f32.mrf.mxu0 }
 0x38c   : > { %v4010_v42 = vadd.f32 %v3932_v7, %v3676_v61  ;;  %v2953_v61 = vshll.u32 %v2951_v9, 16 }
 0x38d   : > { %v3086_v32 = vpop.f32.mrf.mxu1 }
 0x38e   : > { %3647 = vmatmul.bf16.gmra.mxu3 %v3477_v5  ;;  %3971 = vmatmul.bf16.gmra.mxu0 %v3775_v55  ;;  %v4136_v19 = vmul.f32 %v7955_v8, %v4010_v42  ;;  %v3311_v56 = vpop.f32.mrf.mxu2 }
 0x38f   : > { %v3388_v1 = vadd.f32 %v3311_v56, %v3158_v6  ;;  %v2955_v6 = vrot.slane %v2953_v61, 1 }
 0x390   : > { %v4177_v51 = vadd.f32 %v4176_v54, %v4136_v19  ;;  %v4225_v26 = vmul.f32 %v4136_v19, %v4010_v42  ;;  %v3160_v54 = vadd.f32 %v3086_v32, %v7961_v17  ;;  %v7967_v19 = vld [vmem:[#allocation51_spill] sm:$0xff] }
 0x391   : > { %v7378_v0 = vpop.f32.mrf.mxu3  ;;  %v3677_v4 = vadd.f32 %v3600_v33, %v3388_v1  ;;  %v3800_v56 = vrot.slane %v7967_v19, 1 }
 0x392   : > { %v4266_v43 = vadd.f32 %v4265_v38, %v4225_v26  ;;  %v7964_v38 = vld [vmem:[#allocation8_spill] sm:$0xff]  ;;  %v7968_v26 = vld [vmem:[#allocation33_spill] sm:$0xff] }
 0x393   : > { %v3934_v53 = vpop.f32.mrf.mxu0  ;;  %3353 = vmatmul.bf16.gmra.mxu2 %v2928_v60 }
 0x394   : > { %v4011_v52 = vadd.f32 %v3934_v53, %v3677_v4  ;;  %v7969_v53 = vld [vmem:[#allocation9_spill] sm:$0xff] }
 0x395   : > { %v3089_v13 = vpop.f32.mrf.mxu1 }
 0x396   : > { %v5058_v25 = vpack.c.bf16 %v4011_v52, %v4010_v42  ;;  %v4137_v45 = vmul.f32 %v7959_v21, %v4011_v52  ;;  %v3314_v33 = vpop.f32.mrf.mxu2  ;;  %v7965_v42 = vld [vmem:[#allocation53_spill] sm:$0xff] }
 0x397   : > { %v3389_v18 = vadd.f32 %v3314_v33, %v3159_v20  ;;  %v7966_v14 = vrot.slane %v7965_v42, 1  ;;  %v3801_v1 = vrot.slane %v7965_v42, 2  ;;  %v3183_v20 = vshll.u32 %v7382_v29, 16 }
 0x398   : > { %5143 = vst [vmem:[%s7259_s24 + $0x48] sm:$0xff] %v5058_v25   ;;  %v4178_v10 = vadd.f32 %v4177_v51, %v4137_v45  ;;  %v4226_v63 = vmul.f32 %v4137_v45, %v4011_v52  ;;  %3128 = vmatmul.bf16.gmra.mxu1 %v2928_v60  ;;  %v3161_v60 = vadd.f32 %v3089_v13, %v7968_v26 }
 0x399   : > { %v7390_v37 = vpop.f32.mrf.mxu3  ;;  %v3678_v23 = vadd.f32 %v3603_v2, %v3389_v18  ;;  %v3189_v49 = vsel %vm7399_vm15, %v2929_v57, %v7966_v14  ;;  %v3802_v44 = vor.u32 %v3801_v1, %v3800_v56  ;;  %v3185_v18 = vrot.slane %v3183_v20, 1 }
 0x39a   : > { %v4267_v12 = vadd.f32 %v4266_v43, %v4226_v63  ;;  %v2959_v43 = vsel %vm7399_vm15, %v2929_v57, %v2955_v6  ;;  %v7972_v57 = vld [vmem:[#allocation44_spill] sm:$0xff]  ;;  %v3806_v61 = vrot.slane %v3183_v20, 2 }
 0x39b   : > { %v3937_v24 = vpop.f32.mrf.mxu0  ;;  %v3812_v33 = vsel %vm3811_vm2, %v3778_v40, %v3802_v44 }
 0x39c   : > { %v4012_v15 = vadd.f32 %v3937_v24, %v3678_v23  ;;  %v3803_v24 = vshrl.u32 %v7382_v29, 16  ;;  %v7974_v29 = vld [vmem:[#allocation11_spill] sm:$0xff] }
 0x39d   : > { %v3091_v2 = vpop.f32.mrf.mxu1 }
 0x39e   : > { %3652 = vmatmul.bf16.gmra.mxu3 %v3472_v22  ;;  %3976 = vmatmul.bf16.gmra.mxu0 %v3779_v39  ;;  %v4138_v5 = vmul.f32 %v7964_v38, %v4012_v15  ;;  %v3316_v11 = vpop.f32.mrf.mxu2 }
 0x39f   : > { %v3390_v7 = vadd.f32 %v3316_v11, %v3160_v54 }
 0x3a0   : > { %v4179_v55 = vadd.f32 %v4178_v10, %v4138_v5  ;;  %v4227_v30 = vmul.f32 %v4138_v5, %v4012_v15  ;;  %v7970_v10 = vld [vmem:[#allocation87_spill] sm:$0xff]  ;;  %v7973_v5 = vld [vmem:[#allocation57_spill] sm:$0xff] }
 0x3a1   : > { %v3613_v3 = vpop.f32.mrf.mxu3  ;;  %v3679_v34 = vadd.f32 %v7369_v46, %v3390_v7  ;;  %v3162_v63 = vadd.f32 %v3091_v2, %v7970_v10  ;;  %v3805_v2 = vrot.slane %v3803_v24, 1 }
 0x3a2   : > { %v4268_v32 = vadd.f32 %v4267_v12, %v4227_v30 }
 0x3a3   : > { %v3939_v8 = vpop.f32.mrf.mxu0  ;;  %3358 = vmatmul.bf16.gmra.mxu2 %v3189_v49  ;;  %v3807_v14 = vor.u32 %v3806_v61, %v3805_v2 }
 0x3a4   : > { %v4013_v51 = vadd.f32 %v3939_v8, %v3679_v34 }
 0x3a5   : > { %v3094_v4 = vpop.f32.mrf.mxu1  ;;  %v3808_v56 = vsel %vm3700_vm13, %v3802_v44, %v3807_v14 }
 0x3a6   : > { %v5063_v48 = vpack.c.bf16 %v4013_v51, %v4012_v15  ;;  %v4139_v62 = vmul.f32 %v7969_v53, %v4013_v51  ;;  %v3319_v46 = vpop.f32.mrf.mxu2  ;;  %v3163_v11 = vadd.f32 %v3094_v4, %v7973_v5  ;;  %v7976_v4 = vld [vmem:[#allocation19_spill] sm:$0xff] }
 0x3a7   : > { %v3391_v16 = vadd.f32 %v3319_v46, %v3161_v60 }
 0x3a8   : > { %5144 = vst [vmem:[%s7259_s24 + $0x50] sm:$0xff] %v5063_v48   ;;  %v4180_v52 = vadd.f32 %v4179_v55, %v4139_v62  ;;  %v4228_v50 = vmul.f32 %v4139_v62, %v4013_v51  ;;  %3133 = vmatmul.bf16.gmra.mxu1 %v2959_v43  ;;  %v7975_v51 = vld [vmem:[#allocation62_spill] sm:$0xff] }
 0x3a9   : > { %v3615_v13 = vpop.f32.mrf.mxu3  ;;  %v3680_v25 = vadd.f32 %v7378_v0, %v3391_v16  ;;  %v3186_v0 = vsel %vm2867_vm9, %v7972_v57, %v3185_v18  ;;  %v7980_v57 = vld [vmem:[#allocation28_spill] sm:$0xff] }
 0x3aa   : > { %v4269_v21 = vadd.f32 %v4268_v32, %v4228_v50 }
 0x3ab   : > { %v3942_v45 = vpop.f32.mrf.mxu0 }
 0x3ac   : > { %v4014_v47 = vadd.f32 %v3942_v45, %v3680_v25  ;;  %v7977_v25 = vld [vmem:[#allocation55_spill] sm:$0xff] }
 0x3ad   : > { %v3096_v23 = vpop.f32.mrf.mxu1 }
 0x3ae   : > { %3981 = vmatmul.bf16.gmra.mxu0 %v3812_v33  ;;  %v4140_v9 = vmul.f32 %v7971_v31, %v4014_v47  ;;  %v3321_v12 = vpop.f32.mrf.mxu2  ;;  %v3164_v26 = vadd.f32 %v3096_v23, %v7975_v51  ;;  %v7978_v33 = vld [vmem:[#allocation20_spill] sm:$0xff] }
 0x3af   : > { %v3392_v22 = vadd.f32 %v3321_v12, %v3162_v63  ;;  %v7983_v51 = vld [vmem:[#allocation64_spill] sm:$0xff] }
 0x3b0   : > { %v4181_v39 = vadd.f32 %v4180_v52, %v4140_v9  ;;  %v4229_v15 = vmul.f32 %v4140_v9, %v4014_v47 }
 0x3b1   : > { %v3618_v17 = vpop.f32.mrf.mxu3  ;;  %v3681_v40 = vadd.f32 %v7390_v37, %v3392_v22 }
 0x3b2   : > { %v4270_v54 = vadd.f32 %v4269_v21, %v4229_v15 }
 0x3b3   : > { %v3944_v58 = vpop.f32.mrf.mxu0  ;;  %3363 = vmatmul.bf16.gmra.mxu2 %v3186_v0 }
 0x3b4   : > { %v4015_v38 = vadd.f32 %v3944_v58, %v3681_v40 }
 0x3b5   : > { %v3099_v7 = vpop.f32.mrf.mxu1 }
 0x3b6   : > { %v5068_v55 = vpack.c.bf16 %v4015_v38, %v4014_v47  ;;  %v4141_v30 = vmul.f32 %v7974_v29, %v4015_v38  ;;  %v3324_v42 = vpop.f32.mrf.mxu2  ;;  %v3165_v21 = vadd.f32 %v3099_v7, %v7977_v25  ;;  %v7985_v25 = vld [vmem:[#allocation58_spill] sm:$0xff] }
 0x3b7   : > { %v3393_v49 = vadd.f32 %v3324_v42, %v3163_v11  ;;  %v7982_v42 = vld [vmem:[#allocation29_spill] sm:$0xff] }
 0x3b8   : > { %5145 = vst [vmem:[%s7259_s24 + $0x58] sm:$0xff] %v5068_v55   ;;  %v4182_v34 = vadd.f32 %v4181_v39, %v4141_v30  ;;  %v4230_v6 = vmul.f32 %v4141_v30, %v4015_v38  ;;  %v7981_v55 = vld [vmem:[#allocation59_spill] sm:$0xff] }
 0x3b9   : > { %v3620_v32 = vpop.f32.mrf.mxu3  ;;  %v3682_v37 = vadd.f32 %v3613_v3, %v3393_v49 }
 0x3ba   : > { %v4271_v8 = vadd.f32 %v4270_v54, %v4230_v6 }
 0x3bb   : > { %v3947_v19 = vpop.f32.mrf.mxu0 }
 0x3bc   : > { %v4016_v1 = vadd.f32 %v3947_v19, %v3682_v37 }
 0x3bd   : > { %v3101_v60 = vpop.f32.mrf.mxu1 }
 0x3be   : > { %3986 = vmatmul.bf16.gmra.mxu0 %v3808_v56  ;;  %v4142_v43 = vmul.f32 %v7976_v4, %v4016_v1  ;;  %v3326_v48 = vpop.f32.mrf.mxu2  ;;  %v7984_v4 = vld [vmem:[#allocation40_spill] sm:$0xff] }
 0x3bf   : > { %v3394_v53 = vadd.f32 %v3326_v48, %v3164_v26 }
 0x3c0   : > { %v4183_v62 = vadd.f32 %v4182_v34, %v4142_v43  ;;  %v4231_v46 = vmul.f32 %v4142_v43, %v4016_v1 }
 0x3c1   : > { %v3623_v16 = vpop.f32.mrf.mxu3  ;;  %v3683_v52 = vadd.f32 %v3615_v13, %v3394_v53  ;;  %v7979_v13 = vld [vmem:[#allocation56_spill] sm:$0xff] }
 0x3c2   : > { %v4272_v50 = vadd.f32 %v4271_v8, %v4231_v46  ;;  %v3166_v39 = vadd.f32 %v3101_v60, %v7979_v13 }
 0x3c3   : > { %v3949_v3 = vpop.f32.mrf.mxu0 }
 0x3c4   : > { %v4017_v20 = vadd.f32 %v3949_v3, %v3683_v52 }
 0x3c5   : > { %v3104_v44 = vpop.f32.mrf.mxu1 }
 0x3c6   : > { %v5073_v45 = vpack.c.bf16 %v4017_v20, %v4016_v1  ;;  %v4143_v47 = vmul.f32 %v7978_v33, %v4017_v20  ;;  %v3329_v18 = vpop.f32.mrf.mxu2 }
 0x3c7   : > { %v3395_v10 = vadd.f32 %v3329_v18, %v3165_v21 }
 0x3c8   : > { %5146 = vst [vmem:[%s7259_s24 + $0x60] sm:$0xff] %v5073_v45   ;;  %v4184_v63 = vadd.f32 %v4183_v62, %v4143_v47  ;;  %v4232_v23 = vmul.f32 %v4143_v47, %v4017_v20  ;;  %v7986_v45 = vld [vmem:[#allocation41_spill] sm:$0xff] }
 0x3c9   : > { %v3625_v31 = vpop.f32.mrf.mxu3  ;;  %v3684_v9 = vadd.f32 %v3618_v17, %v3395_v10  ;;  %v3167_v17 = vadd.f32 %v3104_v44, %v7981_v55 }
 0x3ca   : > { %v4273_v12 = vadd.f32 %v4272_v50, %v4232_v23 }
 0x3cb   : > { %v3952_v22 = vpop.f32.mrf.mxu0 }
 0x3cc   : > { %v4018_v24 = vadd.f32 %v3952_v22, %v3684_v9 }
 0x3cd   : > { %v3106_v15 = vpop.f32.mrf.mxu1 }
 0x3ce   : > { %v4144_v0 = vmul.f32 %v7980_v57, %v4018_v24  ;;  %v3331_v40 = vpop.f32.mrf.mxu2  ;;  %v3168_v26 = vadd.f32 %v3106_v15, %v7983_v51  ;;  %v7988_v15 = vld [vmem:[#allocation49_spill] sm:$0xff]  ;;  %v7991_v51 = vld [vmem:[#allocation34_spill] sm:$0xff] }
 0x3cf   : > { %v3396_v54 = vadd.f32 %v3331_v40, %v3166_v39 }
 0x3d0   : > { %v4185_v58 = vadd.f32 %v4184_v63, %v4144_v0  ;;  %v4233_v2 = vmul.f32 %v4144_v0, %v4018_v24 }
 0x3d1   : > { %v3685_v61 = vadd.f32 %v3620_v32, %v3396_v54  ;;  %v3628_v5 = vpop.f32.mrf.mxu3 }
 0x3d2   : > { %v4274_v38 = vadd.f32 %v4273_v12, %v4233_v2 }
 0x3d3   : > { %v3954_v11 = vpop.f32.mrf.mxu0 }
 0x3d4   : > { %v4019_v7 = vadd.f32 %v3954_v11, %v3685_v61 }
 0x3d5   : > { %v3109_v29 = vpop.f32.mrf.mxu1 }
 0x3d6   : > { %v5078_v30 = vpack.c.bf16 %v4019_v7, %v4018_v24  ;;  %v4145_v14 = vmul.f32 %v7982_v42, %v4019_v7  ;;  %v3334_v49 = vpop.f32.mrf.mxu2 }
 0x3d7   : > { %v3397_v34 = vadd.f32 %v3334_v49, %v3167_v17 }
 0x3d8   : > { %5147 = vst [vmem:[%s7259_s24 + $0x68] sm:$0xff] %v5078_v30   ;;  %v4186_v6 = vadd.f32 %v4185_v58, %v4145_v14  ;;  %v4234_v37 = vmul.f32 %v4145_v14, %v4019_v7 }
 0x3d9   : > { %v3686_v8 = vadd.f32 %v3623_v16, %v3397_v34  ;;  %v3630_v32 = vpop.f32.mrf.mxu3  ;;  %v3169_v16 = vadd.f32 %v3109_v29, %v7985_v25  ;;  %v7989_v29 = vld [vmem:[#allocation50_spill] sm:$0xff]  ;;  %v7992_v25 = vld [vmem:[#allocation35_spill] sm:$0xff] }
 0x3da   : > { %v4275_v19 = vadd.f32 %v4274_v38, %v4234_v37 }
 0x3db   : > { %v3957_v56 = vpop.f32.mrf.mxu0 }
 0x3dc   : > { %v4020_v1 = vadd.f32 %v3957_v56, %v3686_v8 }
 0x3dd   : > { %v3111_v60 = vpop.f32.mrf.mxu1 }
 0x3de   : > { %v4146_v43 = vmul.f32 %v7984_v4, %v4020_v1  ;;  %v3336_v48 = vpop.f32.mrf.mxu2 }
 0x3df   : > { %v3398_v53 = vadd.f32 %v3336_v48, %v3168_v26 }
 0x3e0   : > { %v4187_v62 = vadd.f32 %v4186_v6, %v4146_v43  ;;  %v4235_v46 = vmul.f32 %v4146_v43, %v4020_v1 }
 0x3e1   : > { %v3687_v52 = vadd.f32 %v3625_v31, %v3398_v53  ;;  %v3633_v18 = vpop.f32.mrf.mxu3  ;;  %v7987_v31 = vld [vmem:[#allocation66_spill] sm:$0xff] }
 0x3e2   : > { %v4276_v50 = vadd.f32 %v4275_v19, %v4235_v46  ;;  %v3170_v13 = vadd.f32 %v3111_v60, %v7987_v31 }
 0x3e3   : > { %v3959_v3 = vpop.f32.mrf.mxu0 }
 0x3e4   : > { %v4021_v20 = vadd.f32 %v3959_v3, %v3687_v52 }
 0x3e5   : > { %v3114_v21 = vpop.f32.mrf.mxu1 }
 0x3e6   : > { %v5083_v44 = vpack.c.bf16 %v4021_v20, %v4020_v1  ;;  %v4147_v33 = vmul.f32 %v7986_v45, %v4021_v20  ;;  %v3339_v47 = vpop.f32.mrf.mxu2  ;;  %v7990_v1 = vld [vmem:[#allocation6_spill] sm:$0xff] }
 0x3e7   : > { %v3399_v10 = vadd.f32 %v3339_v47, %v3169_v16 }
 0x3e8   : > { %5148 = vst [vmem:[%s7259_s24 + $0x70] sm:$0xff] %v5083_v44   ;;  %v4188_v63 = vadd.f32 %v4187_v62, %v4147_v33  ;;  %v4236_v23 = vmul.f32 %v4147_v33, %v4021_v20 }
 0x3e9   : > { %v3688_v9 = vadd.f32 %v3628_v5, %v3399_v10  ;;  %v3635_v2 = vpop.f32.mrf.mxu3  ;;  %v3171_v5 = vadd.f32 %v3114_v21, %v7179_v59 }
 0x3ea   : > { %v4277_v12 = vadd.f32 %v4276_v50, %v4236_v23 }
 0x3eb   : > { %v3962_v22 = vpop.f32.mrf.mxu0 }
 0x3ec   : > { %v4022_v24 = vadd.f32 %v3962_v22, %v3688_v9  ;;  %v7993_v9 = vld [vmem:[#allocation61_spill] sm:$0xff]  ;;  %v7994_v22 = vld [vmem:[#allocation36_spill] sm:$0xff] }
 0x3ed   : > { %v3116_v39 = vpop.f32.mrf.mxu1 }
 0x3ee   : > { %v4148_v57 = vmul.f32 %v7988_v15, %v4022_v24  ;;  %v3341_v0 = vpop.f32.mrf.mxu2 }
 0x3ef   : > { %v3400_v40 = vadd.f32 %v3341_v0, %v3170_v13 }
 0x3f0   : > { %v4189_v54 = vadd.f32 %v4188_v63, %v4148_v57  ;;  %v4237_v58 = vmul.f32 %v4148_v57, %v4022_v24 }
 0x3f1   : > { %v3689_v61 = vadd.f32 %v3630_v32, %v3400_v40  ;;  %v3638_v8 = vpop.f32.mrf.mxu3  ;;  %v3172_v32 = vadd.f32 %v3116_v39, %v7990_v1 }
 0x3f2   : > { %v4278_v38 = vadd.f32 %v4277_v12, %v4237_v58 }
 0x3f3   : > { %v3964_v11 = vpop.f32.mrf.mxu0 }
 0x3f4   : > { %v4023_v7 = vadd.f32 %v3964_v11, %v3689_v61 }
 0x3f5   : > { %v3119_v55 = vpop.f32.mrf.mxu1 }
 0x3f6   : > { %v5088_v17 = vpack.c.bf16 %v4023_v7, %v4022_v24  ;;  %v4149_v30 = vmul.f32 %v7989_v29, %v4023_v7  ;;  %v3344_v42 = vpop.f32.mrf.mxu2  ;;  %v3173_v3 = vadd.f32 %v3119_v55, %v7193_v41 }
 0x3f7   : > { %v3401_v14 = vadd.f32 %v3344_v42, %v3171_v5 }
 0x3f8   : > { %5149 = vst [vmem:[%s7259_s24 + $0x78] sm:$0xff] %v5088_v17   ;;  %v4190_v49 = vadd.f32 %v4189_v54, %v4149_v30  ;;  %v4238_v34 = vmul.f32 %v4149_v30, %v4023_v7 }
 0x3f9   : > { %v3690_v6 = vadd.f32 %v3633_v18, %v3401_v14  ;;  %v3640_v50 = vpop.f32.mrf.mxu3 }
 0x3fa   : > { %v4279_v37 = vadd.f32 %v4278_v38, %v4238_v34  ;;  %v7995_v38 = vld [vmem:[#allocation37_spill] sm:$0xff] }
 0x3fb   : > { %v3967_v19 = vpop.f32.mrf.mxu0 }
 0x3fc   : > { %v4024_v56 = vadd.f32 %v3967_v19, %v3690_v6  ;;  %v7996_v6 = vld [vmem:[#allocation69_spill] sm:$0xff] }
 0x3fd   : > { %v3121_v60 = vpop.f32.mrf.mxu1 }
 0x3fe   : > { %v4150_v26 = vmul.f32 %v7991_v51, %v4024_v56  ;;  %v3346_v59 = vpop.f32.mrf.mxu2  ;;  %v3174_v12 = vadd.f32 %v3121_v60, %v7993_v9 }
 0x3ff   : > { %v3402_v4 = vadd.f32 %v3346_v59, %v3172_v32 }
 0x400   : > { %v4191_v43 = vadd.f32 %v4190_v49, %v4150_v26  ;;  %v4239_v48 = vmul.f32 %v4150_v26, %v4024_v56 }
 0x401   : > { %v3691_v53 = vadd.f32 %v3635_v2, %v3402_v4  ;;  %v3643_v41 = vpop.f32.mrf.mxu3 }
 0x402   : > { %v4280_v62 = vadd.f32 %v4279_v37, %v4239_v48 }
 0x403   : > { %v3969_v46 = vpop.f32.mrf.mxu0 }
 0x404   : > { %v4025_v52 = vadd.f32 %v3969_v46, %v3691_v53  ;;  %v7998_v53 = vld [vmem:[#allocation46_spill] sm:$0xff] }
 0x405   : > { %v3124_v47 = vpop.f32.mrf.mxu1 }
 0x406   : > { %v5093_v20 = vpack.c.bf16 %v4025_v52, %v4024_v56  ;;  %v4151_v16 = vmul.f32 %v7992_v25, %v4025_v52  ;;  %v3349_v21 = vpop.f32.mrf.mxu2  ;;  %v3175_v2 = vadd.f32 %v3124_v47, %v7207_v27  ;;  %v7999_v47 = vld [vmem:[#allocation12_spill] sm:$0xff] }
 0x407   : > { %v3403_v44 = vadd.f32 %v3349_v21, %v3173_v3 }
 0x408   : > { %5150 = vst [vmem:[%s7259_s24 + $0x80] sm:$0xff] %v5093_v20   ;;  %v4192_v45 = vadd.f32 %v4191_v43, %v4151_v16  ;;  %v4240_v33 = vmul.f32 %v4151_v16, %v4025_v52 }
 0x409   : > { %v3692_v18 = vadd.f32 %v3638_v8, %v3403_v44  ;;  %v3645_v29 = vpop.f32.mrf.mxu3  ;;  %v7997_v8 = vld [vmem:[#allocation45_spill] sm:$0xff] }
 0x40a   : > { %v4281_v10 = vadd.f32 %v4280_v62, %v4240_v33 }
 0x40b   : > { %v3972_v63 = vpop.f32.mrf.mxu0 }
 0x40c   : > { %v4026_v23 = vadd.f32 %v3972_v63, %v3692_v18 }
 0x40d   : > { %v3126_v40 = vpop.f32.mrf.mxu1 }
 0x40e   : > { %v4152_v24 = vmul.f32 %v7994_v22, %v4026_v23  ;;  %v3351_v31 = vpop.f32.mrf.mxu2  ;;  %v3176_v37 = vadd.f32 %v3126_v40, %v7996_v6 }
 0x40f   : > { %v3404_v13 = vadd.f32 %v3351_v31, %v3174_v12 }
 0x410   : > { %v4193_v39 = vadd.f32 %v4192_v45, %v4152_v24  ;;  %v4241_v15 = vmul.f32 %v4152_v24, %v4026_v23 }
 0x411   : > { %v3693_v57 = vadd.f32 %v3640_v50, %v3404_v13  ;;  %v3648_v59 = vpop.f32.mrf.mxu3 }
 0x412   : > { %v4282_v0 = vadd.f32 %v4281_v10, %v4241_v15 }
 0x413   : > { %v3974_v54 = vpop.f32.mrf.mxu0 }
 0x414   : > { %v4027_v58 = vadd.f32 %v3974_v54, %v3693_v57 }
 0x415   : > { %v3129_v34 = vpop.f32.mrf.mxu1 }
 0x416   : > { %v5098_v61 = vpack.c.bf16 %v4027_v58, %v4026_v23  ;;  %v4153_v11 = vmul.f32 %v7995_v38, %v4027_v58  ;;  %v3354_v7 = vpop.f32.mrf.mxu2  ;;  %v3177_v43 = vadd.f32 %v3129_v34, %v7221_v28 }
 0x417   : > { %v3405_v5 = vadd.f32 %v3354_v7, %v3175_v2  ;;  %v8001_v7 = vld [vmem:[#allocation60_spill] sm:$0xff] }
 0x418   : > { %5151 = vst [vmem:[%s7259_s24 + $0x88] sm:$0xff] %v5098_v61   ;;  %v4194_v55 = vadd.f32 %v4193_v39, %v4153_v11  ;;  %v4242_v17 = vmul.f32 %v4153_v11, %v4027_v58  ;;  %v8000_v39 = vld [vmem:[#allocation13_spill] sm:$0xff] }
 0x419   : > { %v3694_v30 = vadd.f32 %v3643_v41, %v3405_v5  ;;  %v3650_v45 = vpop.f32.mrf.mxu3 }
 0x41a   : > { %v4283_v42 = vadd.f32 %v4282_v0, %v4242_v17 }
 0x41b   : > { %v3977_v14 = vpop.f32.mrf.mxu0 }
 0x41c   : > { %v4028_v49 = vadd.f32 %v3977_v14, %v3694_v30 }
 0x41d   : > { %v3131_v52 = vpop.f32.mrf.mxu1 }
 0x41e   : > { %v4154_v19 = vmul.f32 %v7997_v8, %v4028_v49  ;;  %v3356_v27 = vpop.f32.mrf.mxu2  ;;  %v3178_v33 = vadd.f32 %v3131_v52, %v7227_v36 }
 0x41f   : > { %v3406_v56 = vadd.f32 %v3356_v27, %v3176_v37 }
 0x420   : > { %v4195_v1 = vadd.f32 %v4194_v55, %v4154_v19  ;;  %v4243_v32 = vmul.f32 %v4154_v19, %v4028_v49  ;;  %v8002_v55 = vld [vmem:[#allocation14_spill] sm:$0xff]  ;;  %v8003_v19 = vld [vmem:[#allocation15_spill] sm:$0xff] }
 0x421   : > { %v3695_v51 = vadd.f32 %v3645_v29, %v3406_v56  ;;  %v3653_v57 = vpop.f32.mrf.mxu3 }
 0x422   : > { %v4284_v26 = vadd.f32 %v4283_v42, %v4243_v32 }
 0x423   : > { %v3979_v60 = vpop.f32.mrf.mxu0 }
 0x424   : > { %v4029_v4 = vadd.f32 %v3979_v60, %v3695_v51 }
 0x425   : > { %v3134_v9 = vpop.f32.mrf.mxu1 }
 0x426   : > { %v5103_v48 = vpack.c.bf16 %v4029_v4, %v4028_v49  ;;  %v4155_v62 = vmul.f32 %v7998_v53, %v4029_v4  ;;  %v3359_v46 = vpop.f32.mrf.mxu2  ;;  %v3179_v41 = vadd.f32 %v3134_v9, %v7235_v35 }
 0x427   : > { %v3407_v50 = vadd.f32 %v3359_v46, %v3177_v43 }
 0x428   : > { %5152 = vst [vmem:[%s7259_s24 + $0x90] sm:$0xff] %v5103_v48   ;;  %v4196_v3 = vadd.f32 %v4195_v1, %v4155_v62  ;;  %v4244_v20 = vmul.f32 %v4155_v62, %v4029_v4 }
 0x429   : > { %v3696_v25 = vadd.f32 %v3648_v59, %v3407_v50  ;;  %v3655_v14 = vpop.f32.mrf.mxu3 }
 0x42a   : > { %v4285_v16 = vadd.f32 %v4284_v26, %v4244_v20 }
 0x42b   : > { %v3982_v21 = vpop.f32.mrf.mxu0 }
 0x42c   : > { %v4030_v44 = vadd.f32 %v3982_v21, %v3696_v25 }
 0x42d   : > { %v3136_v61 = vpop.f32.mrf.mxu1 }
 0x42e   : > { %v4156_v18 = vmul.f32 %v7999_v47, %v4030_v44  ;;  %v3361_v28 = vpop.f32.mrf.mxu2  ;;  %v3180_v5 = vadd.f32 %v3136_v61, %v8001_v7 }
 0x42f   : > { %v3408_v10 = vadd.f32 %v3361_v28, %v3178_v33 }
 0x430   : > { %v4197_v63 = vadd.f32 %v4196_v3, %v4156_v18  ;;  %v4245_v23 = vmul.f32 %v4156_v18, %v4030_v44 }
 0x431   : > { %v3697_v12 = vadd.f32 %v3650_v45, %v3408_v10 }
 0x432   : > { %v4286_v22 = vadd.f32 %v4285_v16, %v4245_v23 }
 0x433   : > { %v3984_v24 = vpop.f32.mrf.mxu0 }
 0x434   : > { %v4031_v31 = vadd.f32 %v3984_v24, %v3697_v12 }
 0x436   : > { %v5108_v13 = vpack.c.bf16 %v4031_v31, %v4030_v44  ;;  %v4157_v15 = vmul.f32 %v8000_v39, %v4031_v31  ;;  %v3364_v0 = vpop.f32.mrf.mxu2 }
 0x437   : > { %v3409_v36 = vadd.f32 %v3364_v0, %v3179_v41 }
 0x438   : > { %5153 = vst [vmem:[%s7259_s24 + $0x98] sm:$0xff] %v5108_v13   ;;  %v4198_v40 = vadd.f32 %v4197_v63, %v4157_v15  ;;  %v4246_v54 = vmul.f32 %v4157_v15, %v4031_v31 }
 0x439   : > { %v3698_v58 = vadd.f32 %v3653_v57, %v3409_v36 }
 0x43a   : > { %v4287_v2 = vadd.f32 %v4286_v22, %v4246_v54 }
 0x43b   : > { %v3987_v38 = vpop.f32.mrf.mxu0 }
 0x43c   : > { %v4032_v11 = vadd.f32 %v3987_v38, %v3698_v58 }
 0x43e   : > { %v4158_v17 = vmul.f32 %v8002_v55, %v4032_v11  ;;  %v3366_v35 = vpop.f32.mrf.mxu2 }
 0x43f   : > { %v3410_v29 = vadd.f32 %v3366_v35, %v3180_v5 }
 0x440   : > { %v4199_v30 = vadd.f32 %v4198_v40, %v4158_v17  ;;  %v4247_v42 = vmul.f32 %v4158_v17, %v4032_v11 }
 0x441   : > { %v3699_v49 = vadd.f32 %v3655_v14, %v3410_v29 }
 0x442   : > { %v4288_v34 = vadd.f32 %v4287_v2, %v4247_v42 }
 0x443   : > { %v3989_v6 = vpop.f32.mrf.mxu0 }
 0x444   : > { %v4033_v37 = vadd.f32 %v3989_v6, %v3699_v49 }
 0x446   : > { %v5113_v8 = vpack.c.bf16 %v4033_v37, %v4032_v11  ;;  %v4159_v27 = vmul.f32 %v8003_v19, %v4033_v37 }
 0x448   : > { %5154 = vst [vmem:[%s7259_s24 + $0xa0] sm:$0xff] %v5113_v8   ;;  %v4200_v56 = vadd.f32 %v4199_v30, %v4159_v27  ;;  %v4248_v1 = vmul.f32 %v4159_v27, %v4033_v37 }
 0x44a   : > { %v4201_v32 = vrot.slane %v4200_v56, 4  ;;  %v4289_v51 = vadd.f32 %v4288_v34, %v4248_v1 }
 0x44c   : > { %v4202_v26 = vadd.f32 %v4201_v32, %v4200_v56  ;;  %v4290_v59 = vrot.slane %v4289_v51, 4 }
 0x44e   : > { %v4203_v60 = vrot.slane %v4202_v26, 2  ;;  %v4291_v4 = vadd.f32 %v4290_v59, %v4289_v51 }
 0x450   : > { %v4204_v43 = vadd.f32 %v4203_v60, %v4202_v26  ;;  %v4292_v48 = vrot.slane %v4291_v4, 2 }
 0x452   : > { %v4205_v53 = vrot.slane %v4204_v43, 1  ;;  %v4293_v62 = vadd.f32 %v4292_v48, %v4291_v4 }
 0x454   : > { %v4294_v46 = vrot.slane %v4293_v62, 1  ;;  %v4206_v52 = vadd.f32 %v4205_v53, %v4204_v43 }
 0x456   : > { %v4295_v50 = vadd.f32 %v4294_v46, %v4293_v62 }
 0x458   : > { %v4296_v3 = vsel %vm8004_vm6, %v4206_v52, %v4295_v50 }
 0x459   : > { %v4298_v20 = vsel %vm1652_vm7, %v4296_v3, 0.0 }
 0x45a   : > { %4299 = vst [vmem:[%s262_s28] sm:$0xff] %v4298_v20 }
 0x45b PF: > { %s17_s21 = sadd.s32 1, %s5204_s21  }
 0x45c   : > { %p14_p4 = scmp.ge.s32.totalorder %s17_s21, 4  }
 0x45e   :  { %16 = sbr.rel (!%p14_p4) target bundleno = 1 (0x1), region = 90 }

</bundles_post_ra>
